<compile_context>
chip_gen: v5e
topology: v5e:2x2
jax: 0.10.0
libtpu: 0.0.40
codegen_flags: <defaults>
</compile_context>

<pallas_src>
import math
from functools import partial

import jax
import jax.numpy as jnp
from jax.experimental import pallas as pl
from jax.experimental.pallas import tpu as pltpu


# ---------------------------------------------------------------------------
# Fused kernel: LSTM recurrence + self-attention over encoder outputs + fc
# ---------------------------------------------------------------------------
def decoder_kernel(emb_ref, h0_ref, c0_ref, w_ih_ref, w_hh_ref, blstm_ref,
                   enc_ref, wqkv_ref, bqkv_ref,
                   wfc_l_ref, wfc_c_ref, bfc_ref,
                   out_ref, hT_ref, cT_ref,
                   xp_ref, hs_ref):
    T, Bp, H = hs_ref.shape            # Bp = batch padded to the 8-row sublane
    B = out_ref.shape[0] // T          # true batch
    S = T                              # encoder length == decoder length (concat)
    bf16, f32 = jnp.bfloat16, jnp.float32

    # ---- hoisted input projection: ONE MXU matmul over all T*Bp rows,
    #      bias (b_ih + b_hh) folded; only h @ W_hh stays on the serial path --
    xp_ref[...] = (jnp.dot(emb_ref[...], w_ih_ref[...],
                           preferred_element_type=f32)
                   + blstm_ref[...])                          # (T*Bp, 4H) f32

    w_hh = w_hh_ref[...]                                      # (H, 4H) bf16, hoisted

    def step(t, carry):
        h, c = carry                                          # (Bp, H) f32
        row0 = pl.multiple_of(t * Bp, Bp)                     # aligned 8-row slab
        gates = (xp_ref[pl.ds(row0, Bp), :]
                 + jnp.dot(h.astype(bf16), w_hh, preferred_element_type=f32))
        # PyTorch gate order i, f, g, o; H=256 -> lane-aligned slices.
        i_g = jax.nn.sigmoid(gates[:, 0 * H:1 * H])
        f_g = jax.nn.sigmoid(gates[:, 1 * H:2 * H])
        g_g = jnp.tanh(gates[:, 2 * H:3 * H])
        o_g = jax.nn.sigmoid(gates[:, 3 * H:4 * H])
        c_new = f_g * c + i_g * g_g                           # f32 elementwise (v5e-safe)
        h_new = o_g * jnp.tanh(c_new)
        hs_ref[t] = h_new                                     # full unmasked (Bp, H) store
        return (h_new, c_new)

    h_fin, c_fin = jax.lax.fori_loop(0, T, step, (h0_ref[...], c0_ref[...]),
                                     unroll=min(T, 8))
    hT_ref[...] = h_fin                                       # padded; wrapper slices [:B]
    cT_ref[...] = c_fin

    # ---- self-attention over encoder outputs (no softmax -- matches the
    #      reference forward); fused QKV projection over all B*S rows ---------
    enc = enc_ref[...]                                        # (B*S, H) bf16
    qkv = jnp.dot(enc, wqkv_ref[...], preferred_element_type=f32) + bqkv_ref[...]
    q = qkv[:, 0 * H:1 * H]                                   # lane-aligned 256-col slices
    k = qkv[:, 1 * H:2 * H]
    v = qkv[:, 2 * H:3 * H]
    scale = 1.0 / math.sqrt(H)

    hs_all = hs_ref[...]                                      # (T, Bp, H) f32
    wfc_l = wfc_l_ref[...]                                    # (H, Vp) bf16
    wfc_c = wfc_c_ref[...]
    bfc = bfc_ref[...]                                        # (1, Vp) f32

    # Per-batch attention + fused concat-fc written straight to aligned output
    # rows (no ctx_flat / lstm_flat concatenates, no extra VMEM relayouts).
    for b in range(B):                                        # static unroll (B small)
        qb = q[b * S:(b + 1) * S].astype(bf16)                # (S, H) aligned slices
        kb = k[b * S:(b + 1) * S].astype(bf16)
        vb = v[b * S:(b + 1) * S].astype(bf16)
        # contract last dims of q and k -> no explicit k.T relayout
        sb = jax.lax.dot_general(qb, kb, (((1,), (1,)), ((), ())),
                                 preferred_element_type=f32) * scale     # (S, S)
        ctx_b = jnp.dot(sb.astype(bf16), vb, preferred_element_type=f32) # (S, H)
        hs_b = hs_all[:, b, :]                                           # (T, H)
        # [lstm, ctx] @ Wfc == lstm @ Wl + ctx @ Wc ; T=8 rows, Vp lanes dense
        out_ref[pl.ds(b * T, T), :] = (
            jnp.dot(hs_b.astype(bf16), wfc_l, preferred_element_type=f32)
            + jnp.dot(ctx_b.astype(bf16), wfc_c, preferred_element_type=f32)
            + bfc)


# ---------------------------------------------------------------------------
# Parameters
# ---------------------------------------------------------------------------
def init_params(key, vocab_size, embedding_dim, hidden_dim):
    """Master f32 parameters (weights already stored transposed vs. PyTorch)."""
    ks = jax.random.split(key, 12)
    s = 0.1
    H, E, V = hidden_dim, embedding_dim, vocab_size
    return dict(
        embedding=jax.random.normal(ks[0], (V, E), jnp.float32) * s,
        w_ih=jax.random.normal(ks[1], (E, 4 * H), jnp.float32) * s,
        w_hh=jax.random.normal(ks[2], (H, 4 * H), jnp.float32) * s,
        b_lstm=jax.random.normal(ks[3], (1, 4 * H), jnp.float32) * s,  # b_ih + b_hh folded
        wq=jax.random.normal(ks[4], (H, H), jnp.float32) * s,
        bq=jax.random.normal(ks[5], (1, H), jnp.float32) * s,
        wk=jax.random.normal(ks[6], (H, H), jnp.float32) * s,
        bk=jax.random.normal(ks[7], (1, H), jnp.float32) * s,
        wv=jax.random.normal(ks[8], (H, H), jnp.float32) * s,
        bv=jax.random.normal(ks[9], (1, H), jnp.float32) * s,
        wfc=jax.random.normal(ks[10], (2 * H, V), jnp.float32) * s,
        bfc=jax.random.normal(ks[11], (1, V), jnp.float32) * s,
    )


def prepare_params(p, hidden_dim, *, lane=128):
    """Kernel-ready params: bf16 matmul weights + bf16 embedding table, fused
    QKV weight, fc weight pre-split into its lstm/ctx halves, vocab padded to
    a multiple of 128 lanes."""
    H = hidden_dim
    V = p["wfc"].shape[-1]
    Vp = pl.cdiv(V, lane) * lane
    pad = ((0, 0), (0, Vp - V))
    bf16 = jnp.bfloat16
    return dict(
        embedding=p["embedding"].astype(bf16),
        w_ih=p["w_ih"].astype(bf16),
        w_hh=p["w_hh"].astype(bf16),
        b_lstm=p["b_lstm"],
        wqkv=jnp.concatenate([p["wq"], p["wk"], p["wv"]], axis=1).astype(bf16),
        bqkv=jnp.concatenate([p["bq"], p["bk"], p["bv"]], axis=1),
        wfc_l=jnp.pad(p["wfc"][:H], pad).astype(bf16),
        wfc_c=jnp.pad(p["wfc"][H:], pad).astype(bf16),
        bfc=jnp.pad(p["bfc"], pad),
    )


# ---------------------------------------------------------------------------
# Module wrapper
# ---------------------------------------------------------------------------
@partial(jax.jit, static_argnames=("vocab_size",))
def lstm_decoder_forward(kp, x, hidden, cell, encoder_outputs, *, vocab_size):
    """x: (B, T) int32 ids; hidden/cell: (1, B, H); encoder_outputs: (B, T, H)."""
    B, T = x.shape
    H = hidden.shape[-1]
    Vp = kp["wfc_l"].shape[-1]
    assert encoder_outputs.shape == (B, T, H)
    Bp = max(8, pl.cdiv(B, 8) * 8)        # pad batch to the 8-row f32 sublane

    # Time-major embedding gather over the batch-padded id matrix: transpose
    # only the tiny (Bp, T) ids, never activations.  Row t*Bp + b == emb[x[b,t]].
    x_pad = jnp.zeros((Bp, T), x.dtype).at[:B].set(x)
    emb_flat = jnp.take(kp["embedding"], x_pad.T.reshape(-1), axis=0)   # (T*Bp, E) bf16
    # Batch-major encoder activations, flattened + bf16 (halved DMA bytes).
    enc_flat = encoder_outputs.astype(jnp.bfloat16).reshape(B * T, H)   # (B*S, H) bf16
    # Zero-padded initial state for the padded batch rows.
    h0 = jnp.zeros((Bp, H), jnp.float32).at[:B].set(hidden[0])
    c0 = jnp.zeros((Bp, H), jnp.float32).at[:B].set(cell[0])

    vmem = pl.BlockSpec(memory_space=pltpu.MemorySpace.VMEM)
    preds_flat, h_fin, c_fin = pl.pallas_call(
        decoder_kernel,
        out_shape=(
            jax.ShapeDtypeStruct((B * T, Vp), jnp.float32),   # fc output (padded vocab)
            jax.ShapeDtypeStruct((Bp, H), jnp.float32),       # final h (batch-padded)
            jax.ShapeDtypeStruct((Bp, H), jnp.float32),       # final c (batch-padded)
        ),
        in_specs=[vmem] * 12,
        out_specs=(vmem, vmem, vmem),
        scratch_shapes=[
            pltpu.VMEM((T * Bp, 4 * H), jnp.float32),         # hoisted x @ W_ih (+bias)
            pltpu.VMEM((T, Bp, H), jnp.float32),              # hidden states, time-major
        ],
        compiler_params=pltpu.CompilerParams(
            vmem_limit_bytes=32 * 1024 * 1024),
    )(emb_flat, h0, c0, kp["w_ih"], kp["w_hh"], kp["b_lstm"],
      enc_flat, kp["wqkv"], kp["bqkv"],
      kp["wfc_l"], kp["wfc_c"], kp["bfc"])

    preds = preds_flat.reshape(B, T, Vp)[:, :, :vocab_size]
    return preds, h_fin[:B][None], c_fin[:B][None]


# ---------------------------------------------------------------------------
# Pure-JAX reference (mirrors the kernel's bf16-operand / f32-accumulate math)
# ---------------------------------------------------------------------------
def ref_forward(kp, x, hidden, cell, enc, *, vocab_size):
    bf16, f32 = jnp.bfloat16, jnp.float32

    def bdot(a, w, contract=(1, 0)):
        return jax.lax.dot_general(
            a.astype(bf16), w.astype(bf16),
            (((contract[0],), (contract[1],)), ((), ())),
            preferred_element_type=f32)

    B, T = x.shape
    H = hidden.shape[-1]
    wq, wk, wv = (kp["wqkv"][:, i * H:(i + 1) * H] for i in range(3))
    bq, bk, bv = (kp["bqkv"][:, i * H:(i + 1) * H] for i in range(3))

    emb = jnp.take(kp["embedding"], x, axis=0)                # (B, T, E) bf16
    h, c = hidden[0], cell[0]
    outs = []
    for t in range(T):
        gates = bdot(emb[:, t], kp["w_ih"]) + kp["b_lstm"] + bdot(h, kp["w_hh"])
        i_g = jax.nn.sigmoid(gates[:, :H])
        f_g = jax.nn.sigmoid(gates[:, H:2 * H])
        g_g = jnp.tanh(gates[:, 2 * H:3 * H])
        o_g = jax.nn.sigmoid(gates[:, 3 * H:])
        c = f_g * c + i_g * g_g
        h = o_g * jnp.tanh(c)
        outs.append(h)
    out = jnp.stack(outs, axis=1)                             # (B, T, H)

    scale = 1.0 / math.sqrt(H)
    preds = []
    for b in range(B):
        q = bdot(enc[b], wq) + bq
        k = bdot(enc[b], wk) + bk
        v = bdot(enc[b], wv) + bv
        scores = bdot(q, k, contract=(1, 1)) * scale          # (S, S)
        ctx = bdot(scores, v)                                 # (S, H)
        preds.append(bdot(out[b], kp["wfc_l"]) + bdot(ctx, kp["wfc_c"]) + kp["bfc"])
    preds = jnp.stack(preds, axis=0)[:, :, :vocab_size]
    return preds, h[None], c[None]


if __name__ == "__main__":
    # Module constants: embedding_dim=128, hidden_dim=256, vocab_size=100.
    B, T = 2, 8
    embedding_dim, hidden_dim, vocab_size = 128, 256, 100

    key = jax.random.PRNGKey(0)
    k_param, k_x, k_h, k_c, k_enc = jax.random.split(key, 5)

    raw_params = init_params(k_param, vocab_size, embedding_dim, hidden_dim)
    kparams = prepare_params(raw_params, hidden_dim)

    x = jax.random.randint(k_x, (B, T), 0, vocab_size, dtype=jnp.int32)
    hidden = jax.random.normal(k_h, (1, B, hidden_dim), jnp.float32)
    cell = jax.random.normal(k_c, (1, B, hidden_dim), jnp.float32)
    encoder_outputs = jax.random.normal(k_enc, (B, T, hidden_dim), jnp.float32)

    preds, h_out, c_out = jax.block_until_ready(
        lstm_decoder_forward(kparams, x, hidden, cell, encoder_outputs,
                             vocab_size=vocab_size))

    # Sanity check against a pure-JAX reference with matching mixed precision.
    r_preds, r_h, r_c = ref_forward(kparams, x, hidden, cell, encoder_outputs,
                                    vocab_size=vocab_size)
    assert preds.shape == (B, T, vocab_size)
    assert h_out.shape == (1, B, hidden_dim) and c_out.shape == (1, B, hidden_dim)
    assert jnp.allclose(preds, r_preds, atol=5e-2, rtol=2e-2), \
        float(jnp.max(jnp.abs(preds - r_preds)))
    assert jnp.allclose(h_out, r_h, atol=2e-2, rtol=2e-2)
    assert jnp.allclose(c_out, r_c, atol=2e-2, rtol=2e-2)

    print("KERNEL_OK")
</pallas_src>

<mosaic_0001>
module attributes {stable_mosaic.version = 11 : i64} {
  func.func @decoder_kernel(%arg0: memref<64x128xbf16, #tpu.memory_space<vmem>>, %arg1: memref<8x256xf32, #tpu.memory_space<vmem>>, %arg2: memref<8x256xf32, #tpu.memory_space<vmem>>, %arg3: memref<128x1024xbf16, #tpu.memory_space<vmem>>, %arg4: memref<256x1024xbf16, #tpu.memory_space<vmem>>, %arg5: memref<1x1024xf32, #tpu.memory_space<vmem>>, %arg6: memref<16x256xbf16, #tpu.memory_space<vmem>>, %arg7: memref<256x768xbf16, #tpu.memory_space<vmem>>, %arg8: memref<1x768xf32, #tpu.memory_space<vmem>>, %arg9: memref<256x128xbf16, #tpu.memory_space<vmem>>, %arg10: memref<256x128xbf16, #tpu.memory_space<vmem>>, %arg11: memref<1x128xf32, #tpu.memory_space<vmem>>, %arg12: memref<16x128xf32, #tpu.memory_space<vmem>>, %arg13: memref<8x256xf32, #tpu.memory_space<vmem>>, %arg14: memref<8x256xf32, #tpu.memory_space<vmem>>, %arg15: memref<64x1024xf32, #tpu.memory_space<vmem>>, %arg16: memref<8x8x256xf32, #tpu.memory_space<vmem>>) attributes {dimension_semantics = [], scalar_prefetch = 0 : i64, scratch_operands = 2 : i64, tpu.core_type = #tpu.core_type<tc>} {
    %c0 = arith.constant 0 : index
    %c0_0 = arith.constant 0 : index
    %0 = vector.load %arg0[%c0, %c0_0] : memref<64x128xbf16, #tpu.memory_space<vmem>>, vector<64x128xbf16>
    %c0_1 = arith.constant 0 : index
    %c0_2 = arith.constant 0 : index
    %1 = vector.load %arg3[%c0_1, %c0_2] : memref<128x1024xbf16, #tpu.memory_space<vmem>>, vector<128x1024xbf16>
    %cst = arith.constant dense<0.000000e+00> : vector<64x1024xf32>
    %2 = tpu.matmul %0, %1, %cst {dimension_numbers = #tpu.dot_dimension_numbers<[1], [0], [0], [1], [0, 0, 1, 1], [], []>} : vector<64x128xbf16>, vector<128x1024xbf16>, vector<64x1024xf32> -> vector<64x1024xf32>
    %c0_3 = arith.constant 0 : index
    %c0_4 = arith.constant 0 : index
    %3 = vector.load %arg5[%c0_3, %c0_4] : memref<1x1024xf32, #tpu.memory_space<vmem>>, vector<1x1024xf32>
    %4 = vector.broadcast %3 : vector<1x1024xf32> to vector<64x1024xf32>
    %5 = arith.addf %2, %4 : vector<64x1024xf32>
    %c0_5 = arith.constant 0 : index
    %c0_6 = arith.constant 0 : index
    %6 = vector.load %arg15[%c0_5, %c0_6] : memref<64x1024xf32, #tpu.memory_space<vmem>>, vector<64x1024xf32>
    tpu.vector_store %arg15[%c0_5, %c0_6], %5 {strides = array<i32>} : memref<64x1024xf32, #tpu.memory_space<vmem>>, vector<64x1024xf32>,
    %c0_7 = arith.constant 0 : index
    %c0_8 = arith.constant 0 : index
    %7 = vector.load %arg4[%c0_7, %c0_8] : memref<256x1024xbf16, #tpu.memory_space<vmem>>, vector<256x1024xbf16>
    %c0_9 = arith.constant 0 : index
    %c0_10 = arith.constant 0 : index
    %8 = vector.load %arg1[%c0_9, %c0_10] : memref<8x256xf32, #tpu.memory_space<vmem>>, vector<8x256xf32>
    %c0_11 = arith.constant 0 : index
    %c0_12 = arith.constant 0 : index
    %9 = vector.load %arg2[%c0_11, %c0_12] : memref<8x256xf32, #tpu.memory_space<vmem>>, vector<8x256xf32>
    %c0_i32 = arith.constant 0 : i32
    %c8_i32 = arith.constant 8 : i32
    %10 = arith.muli %c0_i32, %c8_i32 : i32
    %11 = tpu.assume_multiple %10, 8 : i32
    %12 = arith.index_cast %11 : i32 to index
    %c0_13 = arith.constant 0 : index
    %13 = vector.load %arg15[%12, %c0_13] : memref<64x1024xf32, #tpu.memory_space<vmem>>, vector<8x1024xf32>
    %14 = arith.truncf %8 : vector<8x256xf32> to vector<8x256xbf16>
    %cst_14 = arith.constant dense<0.000000e+00> : vector<8x1024xf32>
    %15 = tpu.matmul %14, %7, %cst_14 {dimension_numbers = #tpu.dot_dimension_numbers<[1], [0], [0], [1], [0, 0, 1, 1], [], []>} : vector<8x256xbf16>, vector<256x1024xbf16>, vector<8x1024xf32> -> vector<8x1024xf32>
    %16 = arith.addf %13, %15 : vector<8x1024xf32>
    %17 = vector.extract_strided_slice %16 {offsets = [0, 0], sizes = [8, 256], strides = [1, 1]} : vector<8x1024xf32> to vector<8x256xf32>
    %18 = arith.negf %17 : vector<8x256xf32>
    %19 = math.exp %18 : vector<8x256xf32>
    %cst_15 = arith.constant 1.000000e+00 : f32
    %20 = vector.broadcast %cst_15 : f32 to vector<8x256xf32>
    %21 = arith.addf %20, %19 : vector<8x256xf32>
    %22 = arith.divf %20, %21 : vector<8x256xf32>
    %23 = vector.extract_strided_slice %16 {offsets = [0, 256], sizes = [8, 256], strides = [1, 1]} : vector<8x1024xf32> to vector<8x256xf32>
    %24 = arith.negf %23 : vector<8x256xf32>
    %25 = math.exp %24 : vector<8x256xf32>
    %cst_16 = arith.constant 1.000000e+00 : f32
    %26 = vector.broadcast %cst_16 : f32 to vector<8x256xf32>
    %27 = arith.addf %26, %25 : vector<8x256xf32>
    %28 = arith.divf %26, %27 : vector<8x256xf32>
    %29 = vector.extract_strided_slice %16 {offsets = [0, 512], sizes = [8, 256], strides = [1, 1]} : vector<8x1024xf32> to vector<8x256xf32>
    %30 = math.tanh %29 : vector<8x256xf32>
    %31 = vector.extract_strided_slice %16 {offsets = [0, 768], sizes = [8, 256], strides = [1, 1]} : vector<8x1024xf32> to vector<8x256xf32>
    %32 = arith.negf %31 : vector<8x256xf32>
    %33 = math.exp %32 : vector<8x256xf32>
    %cst_17 = arith.constant 1.000000e+00 : f32
    %34 = vector.broadcast %cst_17 : f32 to vector<8x256xf32>
    %35 = arith.addf %34, %33 : vector<8x256xf32>
    %36 = arith.divf %34, %35 : vector<8x256xf32>
    %37 = arith.mulf %28, %9 : vector<8x256xf32>
    %38 = arith.mulf %22, %30 : vector<8x256xf32>
    %39 = arith.addf %37, %38 : vector<8x256xf32>
    %40 = math.tanh %39 : vector<8x256xf32>
    %41 = arith.mulf %36, %40 : vector<8x256xf32>
    %42 = arith.index_cast %c0_i32 : i32 to index
    %c0_18 = arith.constant 0 : index
    %c0_19 = arith.constant 0 : index
    %43 = vector.load %arg16[%42, %c0_18, %c0_19] : memref<8x8x256xf32, #tpu.memory_space<vmem>>, vector<1x8x256xf32>
    %44 = vector.shape_cast %43 : vector<1x8x256xf32> to vector<8x256xf32>
    %45 = vector.shape_cast %41 : vector<8x256xf32> to vector<1x8x256xf32>
    tpu.vector_store %arg16[%42, %c0_18, %c0_19], %45 {strides = array<i32>} : memref<8x8x256xf32, #tpu.memory_space<vmem>>, vector<1x8x256xf32>,
    %c1_i32 = arith.constant 1 : i32
    %c8_i32_20 = arith.constant 8 : i32
    %46 = arith.muli %c1_i32, %c8_i32_20 : i32
    %47 = tpu.assume_multiple %46, 8 : i32
    %48 = arith.index_cast %47 : i32 to index
    %c0_21 = arith.constant 0 : index
    %49 = vector.load %arg15[%48, %c0_21] : memref<64x1024xf32, #tpu.memory_space<vmem>>, vector<8x1024xf32>
    %50 = arith.truncf %41 : vector<8x256xf32> to vector<8x256xbf16>
    %cst_22 = arith.constant dense<0.000000e+00> : vector<8x1024xf32>
    %51 = tpu.matmul %50, %7, %cst_22 {dimension_numbers = #tpu.dot_dimension_numbers<[1], [0], [0], [1], [0, 0, 1, 1], [], []>} : vector<8x256xbf16>, vector<256x1024xbf16>, vector<8x1024xf32> -> vector<8x1024xf32>
    %52 = arith.addf %49, %51 : vector<8x1024xf32>
    %53 = vector.extract_strided_slice %52 {offsets = [0, 0], sizes = [8, 256], strides = [1, 1]} : vector<8x1024xf32> to vector<8x256xf32>
    %54 = arith.negf %53 : vector<8x256xf32>
    %55 = math.exp %54 : vector<8x256xf32>
    %cst_23 = arith.constant 1.000000e+00 : f32
    %56 = vector.broadcast %cst_23 : f32 to vector<8x256xf32>
    %57 = arith.addf %56, %55 : vector<8x256xf32>
    %58 = arith.divf %56, %57 : vector<8x256xf32>
    %59 = vector.extract_strided_slice %52 {offsets = [0, 256], sizes = [8, 256], strides = [1, 1]} : vector<8x1024xf32> to vector<8x256xf32>
    %60 = arith.negf %59 : vector<8x256xf32>
    %61 = math.exp %60 : vector<8x256xf32>
    %cst_24 = arith.constant 1.000000e+00 : f32
    %62 = vector.broadcast %cst_24 : f32 to vector<8x256xf32>
    %63 = arith.addf %62, %61 : vector<8x256xf32>
    %64 = arith.divf %62, %63 : vector<8x256xf32>
    %65 = vector.extract_strided_slice %52 {offsets = [0, 512], sizes = [8, 256], strides = [1, 1]} : vector<8x1024xf32> to vector<8x256xf32>
    %66 = math.tanh %65 : vector<8x256xf32>
    %67 = vector.extract_strided_slice %52 {offsets = [0, 768], sizes = [8, 256], strides = [1, 1]} : vector<8x1024xf32> to vector<8x256xf32>
    %68 = arith.negf %67 : vector<8x256xf32>
    %69 = math.exp %68 : vector<8x256xf32>
    %cst_25 = arith.constant 1.000000e+00 : f32
    %70 = vector.broadcast %cst_25 : f32 to vector<8x256xf32>
    %71 = arith.addf %70, %69 : vector<8x256xf32>
    %72 = arith.divf %70, %71 : vector<8x256xf32>
    %73 = arith.mulf %64, %39 : vector<8x256xf32>
    %74 = arith.mulf %58, %66 : vector<8x256xf32>
    %75 = arith.addf %73, %74 : vector<8x256xf32>
    %76 = math.tanh %75 : vector<8x256xf32>
    %77 = arith.mulf %72, %76 : vector<8x256xf32>
    %78 = arith.index_cast %c1_i32 : i32 to index
    %c0_26 = arith.constant 0 : index
    %c0_27 = arith.constant 0 : index
    %79 = vector.load %arg16[%78, %c0_26, %c0_27] : memref<8x8x256xf32, #tpu.memory_space<vmem>>, vector<1x8x256xf32>
    %80 = vector.shape_cast %79 : vector<1x8x256xf32> to vector<8x256xf32>
    %81 = vector.shape_cast %77 : vector<8x256xf32> to vector<1x8x256xf32>
    tpu.vector_store %arg16[%78, %c0_26, %c0_27], %81 {strides = array<i32>} : memref<8x8x256xf32, #tpu.memory_space<vmem>>, vector<1x8x256xf32>,
    %c2_i32 = arith.constant 2 : i32
    %c8_i32_28 = arith.constant 8 : i32
    %82 = arith.muli %c2_i32, %c8_i32_28 : i32
    %83 = tpu.assume_multiple %82, 8 : i32
    %84 = arith.index_cast %83 : i32 to index
    %c0_29 = arith.constant 0 : index
    %85 = vector.load %arg15[%84, %c0_29] : memref<64x1024xf32, #tpu.memory_space<vmem>>, vector<8x1024xf32>
    %86 = arith.truncf %77 : vector<8x256xf32> to vector<8x256xbf16>
    %cst_30 = arith.constant dense<0.000000e+00> : vector<8x1024xf32>
    %87 = tpu.matmul %86, %7, %cst_30 {dimension_numbers = #tpu.dot_dimension_numbers<[1], [0], [0], [1], [0, 0, 1, 1], [], []>} : vector<8x256xbf16>, vector<256x1024xbf16>, vector<8x1024xf32> -> vector<8x1024xf32>
    %88 = arith.addf %85, %87 : vector<8x1024xf32>
    %89 = vector.extract_strided_slice %88 {offsets = [0, 0], sizes = [8, 256], strides = [1, 1]} : vector<8x1024xf32> to vector<8x256xf32>
    %90 = arith.negf %89 : vector<8x256xf32>
    %91 = math.exp %90 : vector<8x256xf32>
    %cst_31 = arith.constant 1.000000e+00 : f32
    %92 = vector.broadcast %cst_31 : f32 to vector<8x256xf32>
    %93 = arith.addf %92, %91 : vector<8x256xf32>
    %94 = arith.divf %92, %93 : vector<8x256xf32>
    %95 = vector.extract_strided_slice %88 {offsets = [0, 256], sizes = [8, 256], strides = [1, 1]} : vector<8x1024xf32> to vector<8x256xf32>
    %96 = arith.negf %95 : vector<8x256xf32>
    %97 = math.exp %96 : vector<8x256xf32>
    %cst_32 = arith.constant 1.000000e+00 : f32
    %98 = vector.broadcast %cst_32 : f32 to vector<8x256xf32>
    %99 = arith.addf %98, %97 : vector<8x256xf32>
    %100 = arith.divf %98, %99 : vector<8x256xf32>
    %101 = vector.extract_strided_slice %88 {offsets = [0, 512], sizes = [8, 256], strides = [1, 1]} : vector<8x1024xf32> to vector<8x256xf32>
    %102 = math.tanh %101 : vector<8x256xf32>
    %103 = vector.extract_strided_slice %88 {offsets = [0, 768], sizes = [8, 256], strides = [1, 1]} : vector<8x1024xf32> to vector<8x256xf32>
    %104 = arith.negf %103 : vector<8x256xf32>
    %105 = math.exp %104 : vector<8x256xf32>
    %cst_33 = arith.constant 1.000000e+00 : f32
    %106 = vector.broadcast %cst_33 : f32 to vector<8x256xf32>
    %107 = arith.addf %106, %105 : vector<8x256xf32>
    %108 = arith.divf %106, %107 : vector<8x256xf32>
    %109 = arith.mulf %100, %75 : vector<8x256xf32>
    %110 = arith.mulf %94, %102 : vector<8x256xf32>
    %111 = arith.addf %109, %110 : vector<8x256xf32>
    %112 = math.tanh %111 : vector<8x256xf32>
    %113 = arith.mulf %108, %112 : vector<8x256xf32>
    %114 = arith.index_cast %c2_i32 : i32 to index
    %c0_34 = arith.constant 0 : index
    %c0_35 = arith.constant 0 : index
    %115 = vector.load %arg16[%114, %c0_34, %c0_35] : memref<8x8x256xf32, #tpu.memory_space<vmem>>, vector<1x8x256xf32>
    %116 = vector.shape_cast %115 : vector<1x8x256xf32> to vector<8x256xf32>
    %117 = vector.shape_cast %113 : vector<8x256xf32> to vector<1x8x256xf32>
    tpu.vector_store %arg16[%114, %c0_34, %c0_35], %117 {strides = array<i32>} : memref<8x8x256xf32, #tpu.memory_space<vmem>>, vector<1x8x256xf32>,
    %c3_i32 = arith.constant 3 : i32
    %c8_i32_36 = arith.constant 8 : i32
    %118 = arith.muli %c3_i32, %c8_i32_36 : i32
    %119 = tpu.assume_multiple %118, 8 : i32
    %120 = arith.index_cast %119 : i32 to index
    %c0_37 = arith.constant 0 : index
    %121 = vector.load %arg15[%120, %c0_37] : memref<64x1024xf32, #tpu.memory_space<vmem>>, vector<8x1024xf32>
    %122 = arith.truncf %113 : vector<8x256xf32> to vector<8x256xbf16>
    %cst_38 = arith.constant dense<0.000000e+00> : vector<8x1024xf32>
    %123 = tpu.matmul %122, %7, %cst_38 {dimension_numbers = #tpu.dot_dimension_numbers<[1], [0], [0], [1], [0, 0, 1, 1], [], []>} : vector<8x256xbf16>, vector<256x1024xbf16>, vector<8x1024xf32> -> vector<8x1024xf32>
    %124 = arith.addf %121, %123 : vector<8x1024xf32>
    %125 = vector.extract_strided_slice %124 {offsets = [0, 0], sizes = [8, 256], strides = [1, 1]} : vector<8x1024xf32> to vector<8x256xf32>
    %126 = arith.negf %125 : vector<8x256xf32>
    %127 = math.exp %126 : vector<8x256xf32>
    %cst_39 = arith.constant 1.000000e+00 : f32
    %128 = vector.broadcast %cst_39 : f32 to vector<8x256xf32>
    %129 = arith.addf %128, %127 : vector<8x256xf32>
    %130 = arith.divf %128, %129 : vector<8x256xf32>
    %131 = vector.extract_strided_slice %124 {offsets = [0, 256], sizes = [8, 256], strides = [1, 1]} : vector<8x1024xf32> to vector<8x256xf32>
    %132 = arith.negf %131 : vector<8x256xf32>
    %133 = math.exp %132 : vector<8x256xf32>
    %cst_40 = arith.constant 1.000000e+00 : f32
    %134 = vector.broadcast %cst_40 : f32 to vector<8x256xf32>
    %135 = arith.addf %134, %133 : vector<8x256xf32>
    %136 = arith.divf %134, %135 : vector<8x256xf32>
    %137 = vector.extract_strided_slice %124 {offsets = [0, 512], sizes = [8, 256], strides = [1, 1]} : vector<8x1024xf32> to vector<8x256xf32>
    %138 = math.tanh %137 : vector<8x256xf32>
    %139 = vector.extract_strided_slice %124 {offsets = [0, 768], sizes = [8, 256], strides = [1, 1]} : vector<8x1024xf32> to vector<8x256xf32>
    %140 = arith.negf %139 : vector<8x256xf32>
    %141 = math.exp %140 : vector<8x256xf32>
    %cst_41 = arith.constant 1.000000e+00 : f32
    %142 = vector.broadcast %cst_41 : f32 to vector<8x256xf32>
    %143 = arith.addf %142, %141 : vector<8x256xf32>
    %144 = arith.divf %142, %143 : vector<8x256xf32>
    %145 = arith.mulf %136, %111 : vector<8x256xf32>
    %146 = arith.mulf %130, %138 : vector<8x256xf32>
    %147 = arith.addf %145, %146 : vector<8x256xf32>
    %148 = math.tanh %147 : vector<8x256xf32>
    %149 = arith.mulf %144, %148 : vector<8x256xf32>
    %150 = arith.index_cast %c3_i32 : i32 to index
    %c0_42 = arith.constant 0 : index
    %c0_43 = arith.constant 0 : index
    %151 = vector.load %arg16[%150, %c0_42, %c0_43] : memref<8x8x256xf32, #tpu.memory_space<vmem>>, vector<1x8x256xf32>
    %152 = vector.shape_cast %151 : vector<1x8x256xf32> to vector<8x256xf32>
    %153 = vector.shape_cast %149 : vector<8x256xf32> to vector<1x8x256xf32>
    tpu.vector_store %arg16[%150, %c0_42, %c0_43], %153 {strides = array<i32>} : memref<8x8x256xf32, #tpu.memory_space<vmem>>, vector<1x8x256xf32>,
    %c4_i32 = arith.constant 4 : i32
    %c8_i32_44 = arith.constant 8 : i32
    %154 = arith.muli %c4_i32, %c8_i32_44 : i32
    %155 = tpu.assume_multiple %154, 8 : i32
    %156 = arith.index_cast %155 : i32 to index
    %c0_45 = arith.constant 0 : index
    %157 = vector.load %arg15[%156, %c0_45] : memref<64x1024xf32, #tpu.memory_space<vmem>>, vector<8x1024xf32>
    %158 = arith.truncf %149 : vector<8x256xf32> to vector<8x256xbf16>
    %cst_46 = arith.constant dense<0.000000e+00> : vector<8x1024xf32>
    %159 = tpu.matmul %158, %7, %cst_46 {dimension_numbers = #tpu.dot_dimension_numbers<[1], [0], [0], [1], [0, 0, 1, 1], [], []>} : vector<8x256xbf16>, vector<256x1024xbf16>, vector<8x1024xf32> -> vector<8x1024xf32>
    %160 = arith.addf %157, %159 : vector<8x1024xf32>
    %161 = vector.extract_strided_slice %160 {offsets = [0, 0], sizes = [8, 256], strides = [1, 1]} : vector<8x1024xf32> to vector<8x256xf32>
    %162 = arith.negf %161 : vector<8x256xf32>
    %163 = math.exp %162 : vector<8x256xf32>
    %cst_47 = arith.constant 1.000000e+00 : f32
    %164 = vector.broadcast %cst_47 : f32 to vector<8x256xf32>
    %165 = arith.addf %164, %163 : vector<8x256xf32>
    %166 = arith.divf %164, %165 : vector<8x256xf32>
    %167 = vector.extract_strided_slice %160 {offsets = [0, 256], sizes = [8, 256], strides = [1, 1]} : vector<8x1024xf32> to vector<8x256xf32>
    %168 = arith.negf %167 : vector<8x256xf32>
    %169 = math.exp %168 : vector<8x256xf32>
    %cst_48 = arith.constant 1.000000e+00 : f32
    %170 = vector.broadcast %cst_48 : f32 to vector<8x256xf32>
    %171 = arith.addf %170, %169 : vector<8x256xf32>
    %172 = arith.divf %170, %171 : vector<8x256xf32>
    %173 = vector.extract_strided_slice %160 {offsets = [0, 512], sizes = [8, 256], strides = [1, 1]} : vector<8x1024xf32> to vector<8x256xf32>
    %174 = math.tanh %173 : vector<8x256xf32>
    %175 = vector.extract_strided_slice %160 {offsets = [0, 768], sizes = [8, 256], strides = [1, 1]} : vector<8x1024xf32> to vector<8x256xf32>
    %176 = arith.negf %175 : vector<8x256xf32>
    %177 = math.exp %176 : vector<8x256xf32>
    %cst_49 = arith.constant 1.000000e+00 : f32
    %178 = vector.broadcast %cst_49 : f32 to vector<8x256xf32>
    %179 = arith.addf %178, %177 : vector<8x256xf32>
    %180 = arith.divf %178, %179 : vector<8x256xf32>
    %181 = arith.mulf %172, %147 : vector<8x256xf32>
    %182 = arith.mulf %166, %174 : vector<8x256xf32>
    %183 = arith.addf %181, %182 : vector<8x256xf32>
    %184 = math.tanh %183 : vector<8x256xf32>
    %185 = arith.mulf %180, %184 : vector<8x256xf32>
    %186 = arith.index_cast %c4_i32 : i32 to index
    %c0_50 = arith.constant 0 : index
    %c0_51 = arith.constant 0 : index
    %187 = vector.load %arg16[%186, %c0_50, %c0_51] : memref<8x8x256xf32, #tpu.memory_space<vmem>>, vector<1x8x256xf32>
    %188 = vector.shape_cast %187 : vector<1x8x256xf32> to vector<8x256xf32>
    %189 = vector.shape_cast %185 : vector<8x256xf32> to vector<1x8x256xf32>
    tpu.vector_store %arg16[%186, %c0_50, %c0_51], %189 {strides = array<i32>} : memref<8x8x256xf32, #tpu.memory_space<vmem>>, vector<1x8x256xf32>,
    %c5_i32 = arith.constant 5 : i32
    %c8_i32_52 = arith.constant 8 : i32
    %190 = arith.muli %c5_i32, %c8_i32_52 : i32
    %191 = tpu.assume_multiple %190, 8 : i32
    %192 = arith.index_cast %191 : i32 to index
    %c0_53 = arith.constant 0 : index
    %193 = vector.load %arg15[%192, %c0_53] : memref<64x1024xf32, #tpu.memory_space<vmem>>, vector<8x1024xf32>
    %194 = arith.truncf %185 : vector<8x256xf32> to vector<8x256xbf16>
    %cst_54 = arith.constant dense<0.000000e+00> : vector<8x1024xf32>
    %195 = tpu.matmul %194, %7, %cst_54 {dimension_numbers = #tpu.dot_dimension_numbers<[1], [0], [0], [1], [0, 0, 1, 1], [], []>} : vector<8x256xbf16>, vector<256x1024xbf16>, vector<8x1024xf32> -> vector<8x1024xf32>
    %196 = arith.addf %193, %195 : vector<8x1024xf32>
    %197 = vector.extract_strided_slice %196 {offsets = [0, 0], sizes = [8, 256], strides = [1, 1]} : vector<8x1024xf32> to vector<8x256xf32>
    %198 = arith.negf %197 : vector<8x256xf32>
    %199 = math.exp %198 : vector<8x256xf32>
    %cst_55 = arith.constant 1.000000e+00 : f32
    %200 = vector.broadcast %cst_55 : f32 to vector<8x256xf32>
    %201 = arith.addf %200, %199 : vector<8x256xf32>
    %202 = arith.divf %200, %201 : vector<8x256xf32>
    %203 = vector.extract_strided_slice %196 {offsets = [0, 256], sizes = [8, 256], strides = [1, 1]} : vector<8x1024xf32> to vector<8x256xf32>
    %204 = arith.negf %203 : vector<8x256xf32>
    %205 = math.exp %204 : vector<8x256xf32>
    %cst_56 = arith.constant 1.000000e+00 : f32
    %206 = vector.broadcast %cst_56 : f32 to vector<8x256xf32>
    %207 = arith.addf %206, %205 : vector<8x256xf32>
    %208 = arith.divf %206, %207 : vector<8x256xf32>
    %209 = vector.extract_strided_slice %196 {offsets = [0, 512], sizes = [8, 256], strides = [1, 1]} : vector<8x1024xf32> to vector<8x256xf32>
    %210 = math.tanh %209 : vector<8x256xf32>
    %211 = vector.extract_strided_slice %196 {offsets = [0, 768], sizes = [8, 256], strides = [1, 1]} : vector<8x1024xf32> to vector<8x256xf32>
    %212 = arith.negf %211 : vector<8x256xf32>
    %213 = math.exp %212 : vector<8x256xf32>
    %cst_57 = arith.constant 1.000000e+00 : f32
    %214 = vector.broadcast %cst_57 : f32 to vector<8x256xf32>
    %215 = arith.addf %214, %213 : vector<8x256xf32>
    %216 = arith.divf %214, %215 : vector<8x256xf32>
    %217 = arith.mulf %208, %183 : vector<8x256xf32>
    %218 = arith.mulf %202, %210 : vector<8x256xf32>
    %219 = arith.addf %217, %218 : vector<8x256xf32>
    %220 = math.tanh %219 : vector<8x256xf32>
    %221 = arith.mulf %216, %220 : vector<8x256xf32>
    %222 = arith.index_cast %c5_i32 : i32 to index
    %c0_58 = arith.constant 0 : index
    %c0_59 = arith.constant 0 : index
    %223 = vector.load %arg16[%222, %c0_58, %c0_59] : memref<8x8x256xf32, #tpu.memory_space<vmem>>, vector<1x8x256xf32>
    %224 = vector.shape_cast %223 : vector<1x8x256xf32> to vector<8x256xf32>
    %225 = vector.shape_cast %221 : vector<8x256xf32> to vector<1x8x256xf32>
    tpu.vector_store %arg16[%222, %c0_58, %c0_59], %225 {strides = array<i32>} : memref<8x8x256xf32, #tpu.memory_space<vmem>>, vector<1x8x256xf32>,
    %c6_i32 = arith.constant 6 : i32
    %c8_i32_60 = arith.constant 8 : i32
    %226 = arith.muli %c6_i32, %c8_i32_60 : i32
    %227 = tpu.assume_multiple %226, 8 : i32
    %228 = arith.index_cast %227 : i32 to index
    %c0_61 = arith.constant 0 : index
    %229 = vector.load %arg15[%228, %c0_61] : memref<64x1024xf32, #tpu.memory_space<vmem>>, vector<8x1024xf32>
    %230 = arith.truncf %221 : vector<8x256xf32> to vector<8x256xbf16>
    %cst_62 = arith.constant dense<0.000000e+00> : vector<8x1024xf32>
    %231 = tpu.matmul %230, %7, %cst_62 {dimension_numbers = #tpu.dot_dimension_numbers<[1], [0], [0], [1], [0, 0, 1, 1], [], []>} : vector<8x256xbf16>, vector<256x1024xbf16>, vector<8x1024xf32> -> vector<8x1024xf32>
    %232 = arith.addf %229, %231 : vector<8x1024xf32>
    %233 = vector.extract_strided_slice %232 {offsets = [0, 0], sizes = [8, 256], strides = [1, 1]} : vector<8x1024xf32> to vector<8x256xf32>
    %234 = arith.negf %233 : vector<8x256xf32>
    %235 = math.exp %234 : vector<8x256xf32>
    %cst_63 = arith.constant 1.000000e+00 : f32
    %236 = vector.broadcast %cst_63 : f32 to vector<8x256xf32>
    %237 = arith.addf %236, %235 : vector<8x256xf32>
    %238 = arith.divf %236, %237 : vector<8x256xf32>
    %239 = vector.extract_strided_slice %232 {offsets = [0, 256], sizes = [8, 256], strides = [1, 1]} : vector<8x1024xf32> to vector<8x256xf32>
    %240 = arith.negf %239 : vector<8x256xf32>
    %241 = math.exp %240 : vector<8x256xf32>
    %cst_64 = arith.constant 1.000000e+00 : f32
    %242 = vector.broadcast %cst_64 : f32 to vector<8x256xf32>
    %243 = arith.addf %242, %241 : vector<8x256xf32>
    %244 = arith.divf %242, %243 : vector<8x256xf32>
    %245 = vector.extract_strided_slice %232 {offsets = [0, 512], sizes = [8, 256], strides = [1, 1]} : vector<8x1024xf32> to vector<8x256xf32>
    %246 = math.tanh %245 : vector<8x256xf32>
    %247 = vector.extract_strided_slice %232 {offsets = [0, 768], sizes = [8, 256], strides = [1, 1]} : vector<8x1024xf32> to vector<8x256xf32>
    %248 = arith.negf %247 : vector<8x256xf32>
    %249 = math.exp %248 : vector<8x256xf32>
    %cst_65 = arith.constant 1.000000e+00 : f32
    %250 = vector.broadcast %cst_65 : f32 to vector<8x256xf32>
    %251 = arith.addf %250, %249 : vector<8x256xf32>
    %252 = arith.divf %250, %251 : vector<8x256xf32>
    %253 = arith.mulf %244, %219 : vector<8x256xf32>
    %254 = arith.mulf %238, %246 : vector<8x256xf32>
    %255 = arith.addf %253, %254 : vector<8x256xf32>
    %256 = math.tanh %255 : vector<8x256xf32>
    %257 = arith.mulf %252, %256 : vector<8x256xf32>
    %258 = arith.index_cast %c6_i32 : i32 to index
    %c0_66 = arith.constant 0 : index
    %c0_67 = arith.constant 0 : index
    %259 = vector.load %arg16[%258, %c0_66, %c0_67] : memref<8x8x256xf32, #tpu.memory_space<vmem>>, vector<1x8x256xf32>
    %260 = vector.shape_cast %259 : vector<1x8x256xf32> to vector<8x256xf32>
    %261 = vector.shape_cast %257 : vector<8x256xf32> to vector<1x8x256xf32>
    tpu.vector_store %arg16[%258, %c0_66, %c0_67], %261 {strides = array<i32>} : memref<8x8x256xf32, #tpu.memory_space<vmem>>, vector<1x8x256xf32>,
    %c7_i32 = arith.constant 7 : i32
    %c8_i32_68 = arith.constant 8 : i32
    %262 = arith.muli %c7_i32, %c8_i32_68 : i32
    %263 = tpu.assume_multiple %262, 8 : i32
    %264 = arith.index_cast %263 : i32 to index
    %c0_69 = arith.constant 0 : index
    %265 = vector.load %arg15[%264, %c0_69] : memref<64x1024xf32, #tpu.memory_space<vmem>>, vector<8x1024xf32>
    %266 = arith.truncf %257 : vector<8x256xf32> to vector<8x256xbf16>
    %cst_70 = arith.constant dense<0.000000e+00> : vector<8x1024xf32>
    %267 = tpu.matmul %266, %7, %cst_70 {dimension_numbers = #tpu.dot_dimension_numbers<[1], [0], [0], [1], [0, 0, 1, 1], [], []>} : vector<8x256xbf16>, vector<256x1024xbf16>, vector<8x1024xf32> -> vector<8x1024xf32>
    %268 = arith.addf %265, %267 : vector<8x1024xf32>
    %269 = vector.extract_strided_slice %268 {offsets = [0, 0], sizes = [8, 256], strides = [1, 1]} : vector<8x1024xf32> to vector<8x256xf32>
    %270 = arith.negf %269 : vector<8x256xf32>
    %271 = math.exp %270 : vector<8x256xf32>
    %cst_71 = arith.constant 1.000000e+00 : f32
    %272 = vector.broadcast %cst_71 : f32 to vector<8x256xf32>
    %273 = arith.addf %272, %271 : vector<8x256xf32>
    %274 = arith.divf %272, %273 : vector<8x256xf32>
    %275 = vector.extract_strided_slice %268 {offsets = [0, 256], sizes = [8, 256], strides = [1, 1]} : vector<8x1024xf32> to vector<8x256xf32>
    %276 = arith.negf %275 : vector<8x256xf32>
    %277 = math.exp %276 : vector<8x256xf32>
    %cst_72 = arith.constant 1.000000e+00 : f32
    %278 = vector.broadcast %cst_72 : f32 to vector<8x256xf32>
    %279 = arith.addf %278, %277 : vector<8x256xf32>
    %280 = arith.divf %278, %279 : vector<8x256xf32>
    %281 = vector.extract_strided_slice %268 {offsets = [0, 512], sizes = [8, 256], strides = [1, 1]} : vector<8x1024xf32> to vector<8x256xf32>
    %282 = math.tanh %281 : vector<8x256xf32>
    %283 = vector.extract_strided_slice %268 {offsets = [0, 768], sizes = [8, 256], strides = [1, 1]} : vector<8x1024xf32> to vector<8x256xf32>
    %284 = arith.negf %283 : vector<8x256xf32>
    %285 = math.exp %284 : vector<8x256xf32>
    %cst_73 = arith.constant 1.000000e+00 : f32
    %286 = vector.broadcast %cst_73 : f32 to vector<8x256xf32>
    %287 = arith.addf %286, %285 : vector<8x256xf32>
    %288 = arith.divf %286, %287 : vector<8x256xf32>
    %289 = arith.mulf %280, %255 : vector<8x256xf32>
    %290 = arith.mulf %274, %282 : vector<8x256xf32>
    %291 = arith.addf %289, %290 : vector<8x256xf32>
    %292 = math.tanh %291 : vector<8x256xf32>
    %293 = arith.mulf %288, %292 : vector<8x256xf32>
    %294 = arith.index_cast %c7_i32 : i32 to index
    %c0_74 = arith.constant 0 : index
    %c0_75 = arith.constant 0 : index
    %295 = vector.load %arg16[%294, %c0_74, %c0_75] : memref<8x8x256xf32, #tpu.memory_space<vmem>>, vector<1x8x256xf32>
    %296 = vector.shape_cast %295 : vector<1x8x256xf32> to vector<8x256xf32>
    %297 = vector.shape_cast %293 : vector<8x256xf32> to vector<1x8x256xf32>
    tpu.vector_store %arg16[%294, %c0_74, %c0_75], %297 {strides = array<i32>} : memref<8x8x256xf32, #tpu.memory_space<vmem>>, vector<1x8x256xf32>,
    %c8_i32_76 = arith.constant 8 : i32
    %c0_77 = arith.constant 0 : index
    %c0_78 = arith.constant 0 : index
    %298 = vector.load %arg13[%c0_77, %c0_78] : memref<8x256xf32, #tpu.memory_space<vmem>>, vector<8x256xf32>
    tpu.vector_store %arg13[%c0_77, %c0_78], %293 {strides = array<i32>} : memref<8x256xf32, #tpu.memory_space<vmem>>, vector<8x256xf32>,
    %c0_79 = arith.constant 0 : index
    %c0_80 = arith.constant 0 : index
    %299 = vector.load %arg14[%c0_79, %c0_80] : memref<8x256xf32, #tpu.memory_space<vmem>>, vector<8x256xf32>
    tpu.vector_store %arg14[%c0_79, %c0_80], %291 {strides = array<i32>} : memref<8x256xf32, #tpu.memory_space<vmem>>, vector<8x256xf32>,
    %c0_81 = arith.constant 0 : index
    %c0_82 = arith.constant 0 : index
    %300 = vector.load %arg6[%c0_81, %c0_82] : memref<16x256xbf16, #tpu.memory_space<vmem>>, vector<16x256xbf16>
    %c0_83 = arith.constant 0 : index
    %c0_84 = arith.constant 0 : index
    %301 = vector.load %arg7[%c0_83, %c0_84] : memref<256x768xbf16, #tpu.memory_space<vmem>>, vector<256x768xbf16>
    %cst_85 = arith.constant dense<0.000000e+00> : vector<16x768xf32>
    %302 = tpu.matmul %300, %301, %cst_85 {dimension_numbers = #tpu.dot_dimension_numbers<[1], [0], [0], [1], [0, 0, 1, 1], [], []>} : vector<16x256xbf16>, vector<256x768xbf16>, vector<16x768xf32> -> vector<16x768xf32>
    %c0_86 = arith.constant 0 : index
    %c0_87 = arith.constant 0 : index
    %303 = vector.load %arg8[%c0_86, %c0_87] : memref<1x768xf32, #tpu.memory_space<vmem>>, vector<1x768xf32>
    %304 = vector.broadcast %303 : vector<1x768xf32> to vector<16x768xf32>
    %305 = arith.addf %302, %304 : vector<16x768xf32>
    %306 = vector.extract_strided_slice %305 {offsets = [0, 0], sizes = [16, 256], strides = [1, 1]} : vector<16x768xf32> to vector<16x256xf32>
    %307 = vector.extract_strided_slice %305 {offsets = [0, 256], sizes = [16, 256], strides = [1, 1]} : vector<16x768xf32> to vector<16x256xf32>
    %308 = vector.extract_strided_slice %305 {offsets = [0, 512], sizes = [16, 256], strides = [1, 1]} : vector<16x768xf32> to vector<16x256xf32>
    %c0_88 = arith.constant 0 : index
    %c0_89 = arith.constant 0 : index
    %c0_90 = arith.constant 0 : index
    %309 = vector.load %arg16[%c0_88, %c0_89, %c0_90] : memref<8x8x256xf32, #tpu.memory_space<vmem>>, vector<8x8x256xf32>
    %c0_91 = arith.constant 0 : index
    %c0_92 = arith.constant 0 : index
    %310 = vector.load %arg9[%c0_91, %c0_92] : memref<256x128xbf16, #tpu.memory_space<vmem>>, vector<256x128xbf16>
    %c0_93 = arith.constant 0 : index
    %c0_94 = arith.constant 0 : index
    %311 = vector.load %arg10[%c0_93, %c0_94] : memref<256x128xbf16, #tpu.memory_space<vmem>>, vector<256x128xbf16>
    %c0_95 = arith.constant 0 : index
    %c0_96 = arith.constant 0 : index
    %312 = vector.load %arg11[%c0_95, %c0_96] : memref<1x128xf32, #tpu.memory_space<vmem>>, vector<1x128xf32>
    %313 = vector.extract_strided_slice %306 {offsets = [0, 0], sizes = [8, 256], strides = [1, 1]} : vector<16x256xf32> to vector<8x256xf32>
    %314 = arith.truncf %313 : vector<8x256xf32> to vector<8x256xbf16>
    %315 = vector.extract_strided_slice %307 {offsets = [0, 0], sizes = [8, 256], strides = [1, 1]} : vector<16x256xf32> to vector<8x256xf32>
    %316 = arith.truncf %315 : vector<8x256xf32> to vector<8x256xbf16>
    %317 = vector.extract_strided_slice %308 {offsets = [0, 0], sizes = [8, 256], strides = [1, 1]} : vector<16x256xf32> to vector<8x256xf32>
    %318 = arith.truncf %317 : vector<8x256xf32> to vector<8x256xbf16>
    %cst_97 = arith.constant dense<0.000000e+00> : vector<8x8xf32>
    %319 = tpu.matmul %314, %316, %cst_97 {dimension_numbers = #tpu.dot_dimension_numbers<[1], [1], [0], [0], [0, 0, 1, 0], [], []>} : vector<8x256xbf16>, vector<8x256xbf16>, vector<8x8xf32> -> vector<8x8xf32>
    %cst_98 = arith.constant 6.250000e-02 : f32
    %320 = vector.broadcast %cst_98 : f32 to vector<8x8xf32>
    %321 = arith.mulf %319, %320 : vector<8x8xf32>
    %322 = arith.truncf %321 : vector<8x8xf32> to vector<8x8xbf16>
    %cst_99 = arith.constant dense<0.000000e+00> : vector<8x256xf32>
    %323 = tpu.matmul %322, %318, %cst_99 {dimension_numbers = #tpu.dot_dimension_numbers<[1], [0], [0], [1], [0, 0, 1, 1], [], []>} : vector<8x8xbf16>, vector<8x256xbf16>, vector<8x256xf32> -> vector<8x256xf32>
    %324 = vector.extract_strided_slice %309 {offsets = [0, 0, 0], sizes = [8, 1, 256], strides = [1, 1, 1]} : vector<8x8x256xf32> to vector<8x1x256xf32>
    %325 = vector.shape_cast %324 : vector<8x1x256xf32> to vector<8x256xf32>
    %326 = arith.truncf %325 : vector<8x256xf32> to vector<8x256xbf16>
    %cst_100 = arith.constant dense<0.000000e+00> : vector<8x128xf32>
    %327 = tpu.matmul %326, %310, %cst_100 {dimension_numbers = #tpu.dot_dimension_numbers<[1], [0], [0], [1], [0, 0, 1, 1], [], []>} : vector<8x256xbf16>, vector<256x128xbf16>, vector<8x128xf32> -> vector<8x128xf32>
    %328 = arith.truncf %323 : vector<8x256xf32> to vector<8x256xbf16>
    %cst_101 = arith.constant dense<0.000000e+00> : vector<8x128xf32>
    %329 = tpu.matmul %328, %311, %cst_101 {dimension_numbers = #tpu.dot_dimension_numbers<[1], [0], [0], [1], [0, 0, 1, 1], [], []>} : vector<8x256xbf16>, vector<256x128xbf16>, vector<8x128xf32> -> vector<8x128xf32>
    %330 = arith.addf %327, %329 : vector<8x128xf32>
    %331 = vector.broadcast %312 : vector<1x128xf32> to vector<8x128xf32>
    %332 = arith.addf %330, %331 : vector<8x128xf32>
    %c0_102 = arith.constant 0 : index
    %c0_103 = arith.constant 0 : index
    %333 = vector.load %arg12[%c0_102, %c0_103] : memref<16x128xf32, #tpu.memory_space<vmem>>, vector<8x128xf32>
    tpu.vector_store %arg12[%c0_102, %c0_103], %332 {strides = array<i32>} : memref<16x128xf32, #tpu.memory_space<vmem>>, vector<8x128xf32>,
    %334 = vector.extract_strided_slice %306 {offsets = [8, 0], sizes = [8, 256], strides = [1, 1]} : vector<16x256xf32> to vector<8x256xf32>
    %335 = arith.truncf %334 : vector<8x256xf32> to vector<8x256xbf16>
    %336 = vector.extract_strided_slice %307 {offsets = [8, 0], sizes = [8, 256], strides = [1, 1]} : vector<16x256xf32> to vector<8x256xf32>
    %337 = arith.truncf %336 : vector<8x256xf32> to vector<8x256xbf16>
    %338 = vector.extract_strided_slice %308 {offsets = [8, 0], sizes = [8, 256], strides = [1, 1]} : vector<16x256xf32> to vector<8x256xf32>
    %339 = arith.truncf %338 : vector<8x256xf32> to vector<8x256xbf16>
    %cst_104 = arith.constant dense<0.000000e+00> : vector<8x8xf32>
    %340 = tpu.matmul %335, %337, %cst_104 {dimension_numbers = #tpu.dot_dimension_numbers<[1], [1], [0], [0], [0, 0, 1, 0], [], []>} : vector<8x256xbf16>, vector<8x256xbf16>, vector<8x8xf32> -> vector<8x8xf32>
    %cst_105 = arith.constant 6.250000e-02 : f32
    %341 = vector.broadcast %cst_105 : f32 to vector<8x8xf32>
    %342 = arith.mulf %340, %341 : vector<8x8xf32>
    %343 = arith.truncf %342 : vector<8x8xf32> to vector<8x8xbf16>
    %cst_106 = arith.constant dense<0.000000e+00> : vector<8x256xf32>
    %344 = tpu.matmul %343, %339, %cst_106 {dimension_numbers = #tpu.dot_dimension_numbers<[1], [0], [0], [1], [0, 0, 1, 1], [], []>} : vector<8x8xbf16>, vector<8x256xbf16>, vector<8x256xf32> -> vector<8x256xf32>
    %345 = vector.extract_strided_slice %309 {offsets = [0, 1, 0], sizes = [8, 1, 256], strides = [1, 1, 1]} : vector<8x8x256xf32> to vector<8x1x256xf32>
    %346 = vector.shape_cast %345 : vector<8x1x256xf32> to vector<8x256xf32>
    %347 = arith.truncf %346 : vector<8x256xf32> to vector<8x256xbf16>
    %cst_107 = arith.constant dense<0.000000e+00> : vector<8x128xf32>
    %348 = tpu.matmul %347, %310, %cst_107 {dimension_numbers = #tpu.dot_dimension_numbers<[1], [0], [0], [1], [0, 0, 1, 1], [], []>} : vector<8x256xbf16>, vector<256x128xbf16>, vector<8x128xf32> -> vector<8x128xf32>
    %349 = arith.truncf %344 : vector<8x256xf32> to vector<8x256xbf16>
    %cst_108 = arith.constant dense<0.000000e+00> : vector<8x128xf32>
    %350 = tpu.matmul %349, %311, %cst_108 {dimension_numbers = #tpu.dot_dimension_numbers<[1], [0], [0], [1], [0, 0, 1, 1], [], []>} : vector<8x256xbf16>, vector<256x128xbf16>, vector<8x128xf32> -> vector<8x128xf32>
    %351 = arith.addf %348, %350 : vector<8x128xf32>
    %352 = vector.broadcast %312 : vector<1x128xf32> to vector<8x128xf32>
    %353 = arith.addf %351, %352 : vector<8x128xf32>
    %c8 = arith.constant 8 : index
    %c0_109 = arith.constant 0 : index
    %354 = vector.load %arg12[%c8, %c0_109] : memref<16x128xf32, #tpu.memory_space<vmem>>, vector<8x128xf32>
    tpu.vector_store %arg12[%c8, %c0_109], %353 {strides = array<i32>} : memref<16x128xf32, #tpu.memory_space<vmem>>, vector<8x128xf32>,
    return
  }
}

</mosaic_0001>

<bundles_post_ra>
// kernel: lstm_decoder_forward.1
= control target key start
LH: loop header
LB: loop body
LE: loop exit
PB: predicated region body
PF: predicated region fallthrough
CT: control target
= control target key end

     0   :  { %20 = vsyncpa [#allocation5], 0  ;;  %s10703_s0 = inlined_call_operand.vmem [shape: bf16[64,128], index: 0, kind: input, shape index: {}]   ;;  %s10704_s1 = inlined_call_operand.vmem [shape: f32[8,256], index: 1, kind: input, shape index: {}]   ;;  %s10705_s2 = inlined_call_operand.vmem [shape: f32[8,256], index: 2, kind: input, shape index: {}]   ;;  %s10706_s3 = inlined_call_operand.hbm [shape: bf16[128,1024], index: 3, kind: input, shape index: {}]   ;;  %s10707_s4 = inlined_call_operand.hbm [shape: bf16[256,1024], index: 4, kind: input, shape index: {}]   ;;  %s10708_s5 = inlined_call_operand.vmem [shape: f32[1,1024], index: 5, kind: input, shape index: {}]   ;;  %s10709_s6 = inlined_call_operand.vmem [shape: bf16[16,256], index: 6, kind: input, shape index: {}]   ;;  %s10710_s7 = inlined_call_operand.hbm [shape: bf16[256,768], index: 7, kind: input, shape index: {}]   ;;  %s10711_s8 = inlined_call_operand.vmem [shape: f32[1,768], index: 8, kind: input, shape index: {}]   ;;  %s10712_s9 = inlined_call_operand.vmem [shape: bf16[256,128], index: 9, kind: input, shape index: {}]   ;;  %s10713_s10 = inlined_call_operand.vmem [shape: bf16[256,128], index: 10, kind: input, shape index: {}]   ;;  %s10714_s11 = inlined_call_operand.vmem [shape: f32[1,128], index: 11, kind: input, shape index: {}]   ;;  %s10715_s12 = inlined_call_operand.hbm [shape: f32[16,128], index: 12, kind: output, shape index: {0}]   ;;  %s10716_s13 = inlined_call_operand.vmem [shape: f32[8,256], index: 13, kind: output, shape index: {1}]   ;;  %s10717_s14 = inlined_call_operand.vmem [shape: f32[8,256], index: 14, kind: output, shape index: {2}]  }
   0x1   :  { %21 = vsyncpa [#allocation8], 0 }
   0x2   :  { %22 = vsyncpa [#allocation6], 0  ;;  %s46_s15 = sshll.u32 %s10707_s4, 4  ;;  %s7965_s16 = smov [#allocation7]   ;;  %s47_s15 = int_to_ptr.hbm [resolvable:$true] %s46_s15 }
   0x3   :  { %s48_s17 = sshll.u32 %s7965_s16, 4  ;;  %s33_s20 = sshll.u32 %s10706_s3, 4  ;;  %s49_s17 = int_to_ptr.vmem [resolvable:$true] %s48_s17  ;;  %s34_s20 = int_to_ptr.hbm [resolvable:$true] %s33_s20 }
   0x4   :  { %s7966_s21 = smov 512   ;;  %s7967_s22 = smov 32  }
   0x5   :  { %54 = dma.hbm_to_vmem [thread:$0]  %s47_s15, 16384, %s49_s17, [#allocation8], %s7966_s21, %s7966_s21, %s7967_s22  }
   0x6   :  { %s7968_s23 = smov [#allocation4]   ;;  %s63_s27 = sshll.u32 %s10710_s7, 4  ;;  %s64_s27 = int_to_ptr.hbm [resolvable:$true] %s63_s27 }
   0x7   :  { %s35_s24 = sshll.u32 %s7968_s23, 4  ;;  %s7969_s4 = smov [#allocation9]   ;;  %s36_s24 = int_to_ptr.vmem [resolvable:$true] %s35_s24 }
   0x8   :  { %41 = dma.hbm_to_vmem [thread:$0]  %s34_s20, 8192, %s36_s24, [#allocation5], %s7966_s21, %s7966_s21, %s7967_s22  }
   0x9   :  { %s65_s28 = sshll.u32 %s7969_s4, 4  ;;  %s7970_s29 = smov 384   ;;  %s66_s28 = int_to_ptr.vmem [resolvable:$true] %s65_s28 }
   0xa   :  { %s7971_s30 = smov 24  }
   0xb   :  { %71 = dma.hbm_to_vmem [thread:$0]  %s64_s27, 12288, %s66_s28, [#allocation8], %s7970_s29, %s7970_s29, %s7971_s30  }
   0xc   :  { %7959 = dma.done.wait [#allocation5], 8192  }
   0xd   :  { %7960 = vsyncadd [#allocation5], 4294959104 }
   0xe   :  { %7961 = dma.done.wait [#allocation8], 28672  }
   0xf   :  { %7962 = vsyncadd [#allocation8], 4294938624  ;;  %v6156_v0 = vld [vmem:[#allocation4 + $0x1c0] sm:$0xf]  ;;  %v7330_v2 = vld [vmem:[#allocation4 + $0x1c4] sm:$0xf] }
  0x10   :  { %v7334_v1 = vld [vmem:[#allocation4 + $0x1dc] sm:$0xf0]  ;;  %v6158_v4 = vld [vmem:[#allocation4 + $0x1e0] sm:$0xf0]  ;;  %v6164_v5 = vld [vmem:[#allocation4 + $0x1c8] sm:$0xf] }
  0x11   :  { %v6157_v3 = vor.u32 %v7334_v1, %v6156_v0  ;;  %v7335_v6 = vld [vmem:[#allocation4 + $0x1e4] sm:$0xf0]  ;;  %v6161_v7 = vor.u32 %v7330_v2, %v6158_v4  ;;  %v7331_v9 = vld [vmem:[#allocation4 + $0x1cc] sm:$0xf]  ;;  %v6124_v11 = vld [vmem:[#allocation4 + $0x180] sm:$0xf] }
  0x12   :  { %v6165_v8 = vor.u32 %v7335_v6, %v6164_v5  ;;  %v6166_v10 = vld [vmem:[#allocation4 + $0x1e8] sm:$0xf0]  ;;  %v7326_v13 = vld [vmem:[#allocation4 + $0x19c] sm:$0xf0]  ;;  %v7322_v14 = vld [vmem:[#allocation4 + $0x184] sm:$0xf] }
  0x13   :  { %527 = vmatpush.bf16.msra.mxu0 %v6157_v3  ;;  %v6169_v12 = vor.u32 %v7331_v9, %v6166_v10  ;;  %v6126_v15 = vld [vmem:[#allocation4 + $0x1a0] sm:$0xf0]  ;;  %556 = vmatpush.bf16.msra.mxu1 %v6161_v7  ;;  %v6125_v16 = vor.u32 %v7326_v13, %v6124_v11  ;;  %v6132_v18 = vld [vmem:[#allocation4 + $0x188] sm:$0xf]  ;;  %v7323_v20 = vld [vmem:[#allocation4 + $0x18c] sm:$0xf] }
  0x14   :  { %585 = vmatpush.bf16.msra.mxu2 %v6165_v8  ;;  %v6129_v17 = vor.u32 %v7322_v14, %v6126_v15  ;;  %v7327_v19 = vld [vmem:[#allocation4 + $0x1a4] sm:$0xf0]  ;;  %v6134_v22 = vld [vmem:[#allocation4 + $0x1a8] sm:$0xf0]  ;;  %v6092_v23 = vld [vmem:[#allocation4 + $0x140] sm:$0xf] }
  0x15   :  { %614 = vmatpush.bf16.msra.mxu3 %v6169_v12  ;;  %v6133_v21 = vor.u32 %v7327_v19, %v6132_v18  ;;  %v7318_v24 = vld [vmem:[#allocation4 + $0x15c] sm:$0xf0]  ;;  %v6137_v25 = vor.u32 %v7323_v20, %v6134_v22  ;;  %v7314_v26 = vld [vmem:[#allocation4 + $0x144] sm:$0xf]  ;;  %v6100_v28 = vld [vmem:[#allocation4 + $0x148] sm:$0xf] }
  0x16   :  { %v6094_v27 = vld [vmem:[#allocation4 + $0x160] sm:$0xf0]  ;;  %v6093_v29 = vor.u32 %v7318_v24, %v6092_v23  ;;  %v7319_v30 = vld [vmem:[#allocation4 + $0x164] sm:$0xf0]  ;;  %v7315_v31 = vld [vmem:[#allocation4 + $0x14c] sm:$0xf] }
  0x17   :  { %528 = vmatpush.bf16.msra.mxu0 %v6125_v16  ;;  %v6102_v32 = vld [vmem:[#allocation4 + $0x168] sm:$0xf0]  ;;  %557 = vmatpush.bf16.msra.mxu1 %v6129_v17  ;;  %v6097_v33 = vor.u32 %v7314_v26, %v6094_v27  ;;  %v6101_v34 = vor.u32 %v7319_v30, %v6100_v28  ;;  %v6060_v35 = vld [vmem:[#allocation4 + $0x100] sm:$0xf]  ;;  %v7306_v37 = vld [vmem:[#allocation4 + $0x104] sm:$0xf] }
  0x18   :  { %586 = vmatpush.bf16.msra.mxu2 %v6133_v21  ;;  %v7310_v36 = vld [vmem:[#allocation4 + $0x11c] sm:$0xf0]  ;;  %v6105_v38 = vor.u32 %v7315_v31, %v6102_v32  ;;  %v6062_v39 = vld [vmem:[#allocation4 + $0x120] sm:$0xf0]  ;;  %v6068_v40 = vld [vmem:[#allocation4 + $0x108] sm:$0xf] }
  0x19   :  { %615 = vmatpush.bf16.msra.mxu3 %v6137_v25  ;;  %v7311_v41 = vld [vmem:[#allocation4 + $0x124] sm:$0xf0]  ;;  %v7307_v42 = vld [vmem:[#allocation4 + $0x10c] sm:$0xf]  ;;  %v6061_v44 = vor.u32 %v7310_v36, %v6060_v35  ;;  %v6065_v45 = vor.u32 %v7306_v37, %v6062_v39  ;;  %v6028_v47 = vld [vmem:[#allocation4 + $0xc0] sm:$0xf] }
  0x1a   :  { %v6070_v43 = vld [vmem:[#allocation4 + $0x128] sm:$0xf0]  ;;  %v6069_v46 = vor.u32 %v7311_v41, %v6068_v40  ;;  %v7302_v48 = vld [vmem:[#allocation4 + $0xdc] sm:$0xf0]  ;;  %v7298_v49 = vld [vmem:[#allocation4 + $0xc4] sm:$0xf] }
  0x1b   :  { %529 = vmatpush.bf16.msra.mxu0 %v6093_v29  ;;  %558 = vmatpush.bf16.msra.mxu1 %v6097_v33  ;;  %v6073_v50 = vor.u32 %v7307_v42, %v6070_v43  ;;  %v6030_v51 = vld [vmem:[#allocation4 + $0xe0] sm:$0xf0]  ;;  %v6036_v52 = vld [vmem:[#allocation4 + $0xc8] sm:$0xf]  ;;  %v7299_v54 = vld [vmem:[#allocation4 + $0xcc] sm:$0xf]  ;;  %v6029_v56 = vor.u32 %v7302_v48, %v6028_v47 }
  0x1c   :  { %587 = vmatpush.bf16.msra.mxu2 %v6101_v34  ;;  %v7303_v53 = vld [vmem:[#allocation4 + $0xe4] sm:$0xf0]  ;;  %v6038_v55 = vld [vmem:[#allocation4 + $0xe8] sm:$0xf0]  ;;  %v6033_v57 = vor.u32 %v7298_v49, %v6030_v51  ;;  %v5996_v59 = vld [vmem:[#allocation4 + $0x80] sm:$0xf] }
  0x1d   :  { %616 = vmatpush.bf16.msra.mxu3 %v6105_v38  ;;  %v6037_v58 = vor.u32 %v7303_v53, %v6036_v52  ;;  %v7294_v60 = vld [vmem:[#allocation4 + $0x9c] sm:$0xf0]  ;;  %v7290_v61 = vld [vmem:[#allocation4 + $0x84] sm:$0xf]  ;;  %v6041_v62 = vor.u32 %v7299_v54, %v6038_v55  ;;  %v6004_v0 = vld [vmem:[#allocation4 + $0x88] sm:$0xf] }
  0x1e   :  { %v5998_v63 = vld [vmem:[#allocation4 + $0xa0] sm:$0xf0]  ;;  %v7295_v1 = vld [vmem:[#allocation4 + $0xa4] sm:$0xf0]  ;;  %v7291_v2 = vld [vmem:[#allocation4 + $0x8c] sm:$0xf]  ;;  %v5997_v4 = vor.u32 %v7294_v60, %v5996_v59 }
  0x1f   :  { %530 = vmatpush.bf16.msra.mxu0 %v6061_v44  ;;  %559 = vmatpush.bf16.msra.mxu1 %v6065_v45  ;;  %v6006_v3 = vld [vmem:[#allocation4 + $0xa8] sm:$0xf0]  ;;  %v6001_v5 = vor.u32 %v7290_v61, %v5998_v63  ;;  %v6005_v6 = vor.u32 %v7295_v1, %v6004_v0  ;;  %v5964_v7 = vld [vmem:[#allocation4 + $0x40] sm:$0xf]  ;;  %v7282_v9 = vld [vmem:[#allocation4 + $0x44] sm:$0xf] }
  0x20   :  { %588 = vmatpush.bf16.msra.mxu2 %v6069_v46  ;;  %v7286_v8 = vld [vmem:[#allocation4 + $0x5c] sm:$0xf0]  ;;  %v6009_v10 = vor.u32 %v7291_v2, %v6006_v3  ;;  %v5966_v11 = vld [vmem:[#allocation4 + $0x60] sm:$0xf0]  ;;  %v5972_v12 = vld [vmem:[#allocation4 + $0x48] sm:$0xf] }
  0x21   :  { %617 = vmatpush.bf16.msra.mxu3 %v6073_v50  ;;  %v7287_v13 = vld [vmem:[#allocation4 + $0x64] sm:$0xf0]  ;;  %v7283_v14 = vld [vmem:[#allocation4 + $0x4c] sm:$0xf]  ;;  %v5965_v16 = vor.u32 %v7286_v8, %v5964_v7  ;;  %v5969_v17 = vor.u32 %v7282_v9, %v5966_v11  ;;  %v5932_v19 = vld [vmem:[#allocation4] sm:$0xf] }
  0x22   :  { %v5974_v15 = vld [vmem:[#allocation4 + $0x68] sm:$0xf0]  ;;  %v5973_v18 = vor.u32 %v7287_v13, %v5972_v12  ;;  %v7278_v20 = vld [vmem:[#allocation4 + $0x1c] sm:$0xf0]  ;;  %v7274_v21 = vld [vmem:[#allocation4 + $0x4] sm:$0xf] }
  0x23   :  { %531 = vmatpush.bf16.msra.mxu0 %v6029_v56  ;;  %560 = vmatpush.bf16.msra.mxu1 %v6033_v57  ;;  %v5977_v22 = vor.u32 %v7283_v14, %v5974_v15  ;;  %v5934_v23 = vld [vmem:[#allocation4 + $0x20] sm:$0xf0]  ;;  %v5940_v24 = vld [vmem:[#allocation4 + $0x8] sm:$0xf]  ;;  %v7275_v26 = vld [vmem:[#allocation4 + $0xc] sm:$0xf]  ;;  %v5933_v28 = vor.u32 %v7278_v20, %v5932_v19 }
  0x24   :  { %589 = vmatpush.bf16.msra.mxu2 %v6037_v58  ;;  %v7279_v25 = vld [vmem:[#allocation4 + $0x24] sm:$0xf0]  ;;  %v5942_v27 = vld [vmem:[#allocation4 + $0x28] sm:$0xf0]  ;;  %v5937_v29 = vor.u32 %v7274_v21, %v5934_v23  ;;  %v8062_v32 = vld [vmem:[%s10703_s0] sm:$0xff]  ;;  %s5885_s29 = sshll.u32 %s10715_s12, 4  ;;  %s5886_s29 = int_to_ptr.hbm [resolvable:$true] %s5885_s29 }
  0x25   :  { %618 = vmatpush.bf16.msra.mxu3 %v6041_v62  ;;  %v5941_v30 = vor.u32 %v7279_v25, %v5940_v24  ;;  %v5945_v31 = vor.u32 %v7275_v26, %v5942_v27  ;;  %v6172_v33 = vld [vmem:[#allocation4 + $0x1d0] sm:$0xf]  ;;  %v7332_v35 = vld [vmem:[#allocation4 + $0x1d4] sm:$0xf]  ;;  %v6180_v38 = vld [vmem:[#allocation4 + $0x1d8] sm:$0xf] }
  0x26   :  { %v7336_v34 = vld [vmem:[#allocation4 + $0x1ec] sm:$0xf0]  ;;  %v6174_v37 = vld [vmem:[#allocation4 + $0x1f0] sm:$0xf0]  ;;  %v7337_v39 = vld [vmem:[#allocation4 + $0x1f4] sm:$0xf0] }
  0x27   :  { %532 = vmatpush.bf16.msra.mxu0 %v5997_v4  ;;  %561 = vmatpush.bf16.msra.mxu1 %v6001_v5  ;;  %v6173_v36 = vor.u32 %v7336_v34, %v6172_v33  ;;  %v6177_v40 = vor.u32 %v7332_v35, %v6174_v37  ;;  %v6181_v41 = vor.u32 %v7337_v39, %v6180_v38  ;;  %v7333_v42 = vld [vmem:[#allocation4 + $0x1dc] sm:$0xf]  ;;  %v6140_v44 = vld [vmem:[#allocation4 + $0x190] sm:$0xf]  ;;  %v7324_v47 = vld [vmem:[#allocation4 + $0x194] sm:$0xf] }
  0x28   :  { %590 = vmatpush.bf16.msra.mxu2 %v6005_v6  ;;  %v6182_v43 = vld [vmem:[#allocation4 + $0x1f8] sm:$0xf0]  ;;  %v7328_v46 = vld [vmem:[#allocation4 + $0x1ac] sm:$0xf0]  ;;  %v6142_v48 = vld [vmem:[#allocation4 + $0x1b0] sm:$0xf0] }
  0x29   :  { %619 = vmatpush.bf16.msra.mxu3 %v6009_v10  ;;  %v6185_v45 = vor.u32 %v7333_v42, %v6182_v43  ;;  %v6141_v49 = vor.u32 %v7328_v46, %v6140_v44  ;;  %v6145_v50 = vor.u32 %v7324_v47, %v6142_v48  ;;  %v6148_v51 = vld [vmem:[#allocation4 + $0x198] sm:$0xf]  ;;  %v7325_v53 = vld [vmem:[#allocation4 + $0x19c] sm:$0xf]  ;;  %v6108_v56 = vld [vmem:[#allocation4 + $0x150] sm:$0xf] }
  0x2a   :  { %v7329_v52 = vld [vmem:[#allocation4 + $0x1b4] sm:$0xf0]  ;;  %v6150_v55 = vld [vmem:[#allocation4 + $0x1b8] sm:$0xf0]  ;;  %v7320_v57 = vld [vmem:[#allocation4 + $0x16c] sm:$0xf0] }
  0x2b   :  { %533 = vmatpush.bf16.msra.mxu0 %v5965_v16  ;;  %562 = vmatpush.bf16.msra.mxu1 %v5969_v17  ;;  %v6149_v54 = vor.u32 %v7329_v52, %v6148_v51  ;;  %v6153_v58 = vor.u32 %v7325_v53, %v6150_v55  ;;  %v7316_v59 = vld [vmem:[#allocation4 + $0x154] sm:$0xf]  ;;  %v6116_v61 = vld [vmem:[#allocation4 + $0x158] sm:$0xf]  ;;  %v6109_v62 = vor.u32 %v7320_v57, %v6108_v56  ;;  %v7317_v0 = vld [vmem:[#allocation4 + $0x15c] sm:$0xf] }
  0x2c   :  { %591 = vmatpush.bf16.msra.mxu2 %v5973_v18  ;;  %v6110_v60 = vld [vmem:[#allocation4 + $0x170] sm:$0xf0]  ;;  %v7321_v63 = vld [vmem:[#allocation4 + $0x174] sm:$0xf0]  ;;  %v6118_v1 = vld [vmem:[#allocation4 + $0x178] sm:$0xf0] }
  0x2d   :  { %620 = vmatpush.bf16.msra.mxu3 %v5977_v22  ;;  %v6113_v2 = vor.u32 %v7316_v59, %v6110_v60  ;;  %v6117_v3 = vor.u32 %v7321_v63, %v6116_v61  ;;  %v6076_v4 = vld [vmem:[#allocation4 + $0x110] sm:$0xf]  ;;  %v6121_v6 = vor.u32 %v7317_v0, %v6118_v1  ;;  %v7308_v7 = vld [vmem:[#allocation4 + $0x114] sm:$0xf]  ;;  %v6084_v10 = vld [vmem:[#allocation4 + $0x118] sm:$0xf] }
  0x2e   :  { %v7312_v5 = vld [vmem:[#allocation4 + $0x12c] sm:$0xf0]  ;;  %v6078_v8 = vld [vmem:[#allocation4 + $0x130] sm:$0xf0]  ;;  %v7313_v11 = vld [vmem:[#allocation4 + $0x134] sm:$0xf0] }
  0x2f   :  { %534 = vmatpush.bf16.msra.mxu0 %v5933_v28  ;;  %563 = vmatpush.bf16.msra.mxu1 %v5937_v29  ;;  %v6077_v9 = vor.u32 %v7312_v5, %v6076_v4  ;;  %v8071_v12 = vld [vmem:[%s10703_s0 + $0x8] sm:$0xff]  ;;  %v6081_v13 = vor.u32 %v7308_v7, %v6078_v8  ;;  %v7309_v14 = vld [vmem:[#allocation4 + $0x11c] sm:$0xf]  ;;  %v6085_v16 = vor.u32 %v7313_v11, %v6084_v10  ;;  %v6044_v18 = vld [vmem:[#allocation4 + $0xd0] sm:$0xf]  ;;  %s7973_s30 = smov 128  }
  0x30   :  { %592 = vmatpush.bf16.msra.mxu2 %v5941_v30  ;;  %v6086_v15 = vld [vmem:[#allocation4 + $0x138] sm:$0xf0]  ;;  %v7304_v19 = vld [vmem:[#allocation4 + $0xec] sm:$0xf0]  ;;  %v7300_v20 = vld [vmem:[#allocation4 + $0xd4] sm:$0xf] }
  0x31   :  { %621 = vmatpush.bf16.msra.mxu3 %v5945_v31  ;;  %v6089_v17 = vor.u32 %v7309_v14, %v6086_v15  ;;  %v6045_v21 = vor.u32 %v7304_v19, %v6044_v18  ;;  %v6046_v22 = vld [vmem:[#allocation4 + $0xf0] sm:$0xf0]  ;;  %v6052_v23 = vld [vmem:[#allocation4 + $0xd8] sm:$0xf]  ;;  %v7301_v27 = vld [vmem:[#allocation4 + $0xdc] sm:$0xf] }
  0x32   :  { %535 = vmatmul.bf16.vlgmr.msra.gmra.mxu0 %v8062_v32  ;;  %564 = vmatmul.bf16.vlgmr.msra.gmra.mxu1 %v8062_v32  ;;  %v7305_v24 = vld [vmem:[#allocation4 + $0xf4] sm:$0xf0]  ;;  %v6049_v25 = vor.u32 %v7300_v20, %v6046_v22  ;;  %v6054_v28 = vld [vmem:[#allocation4 + $0xf8] sm:$0xf0]  ;;  %v6012_v29 = vld [vmem:[#allocation4 + $0x90] sm:$0xf] }
  0x33   :  { %593 = vmatmul.bf16.vlgmr.msra.gmra.mxu2 %v8062_v32  ;;  %643 = vmatpush.bf16.msrb.mxu0 %v6173_v36  ;;  %v6053_v26 = vor.u32 %v7305_v24, %v6052_v23  ;;  %v6057_v30 = vor.u32 %v7301_v27, %v6054_v28  ;;  %v7296_v31 = vld [vmem:[#allocation4 + $0xac] sm:$0xf0]  ;;  %v7292_v33 = vld [vmem:[#allocation4 + $0x94] sm:$0xf]  ;;  %v6020_v37 = vld [vmem:[#allocation4 + $0x98] sm:$0xf] }
  0x34   :  { %622 = vmatmul.bf16.vlgmr.msra.gmra.mxu3 %v8062_v32  ;;  %672 = vmatpush.bf16.msrb.mxu1 %v6177_v40  ;;  %v6014_v34 = vld [vmem:[#allocation4 + $0xb0] sm:$0xf0]  ;;  %v6013_v35 = vor.u32 %v7296_v31, %v6012_v29  ;;  %v7297_v38 = vld [vmem:[#allocation4 + $0xb4] sm:$0xf0]  ;;  %v7293_v39 = vld [vmem:[#allocation4 + $0x9c] sm:$0xf] }
  0x35   :  { %701 = vmatpush.bf16.msrb.mxu2 %v6181_v41  ;;  %730 = vmatpush.bf16.msrb.mxu3 %v6185_v45  ;;  %v6017_v36 = vor.u32 %v7292_v33, %v6014_v34  ;;  %v6022_v40 = vld [vmem:[#allocation4 + $0xb8] sm:$0xf0]  ;;  %v5980_v41 = vld [vmem:[#allocation4 + $0x50] sm:$0xf]  ;;  %v6021_v43 = vor.u32 %v7297_v38, %v6020_v37  ;;  %v7284_v44 = vld [vmem:[#allocation4 + $0x54] sm:$0xf] }
  0x36   :  { %v7288_v42 = vld [vmem:[#allocation4 + $0x6c] sm:$0xf0]  ;;  %v5982_v45 = vld [vmem:[#allocation4 + $0x70] sm:$0xf0]  ;;  %v6025_v46 = vor.u32 %v7293_v39, %v6022_v40  ;;  %v5988_v48 = vld [vmem:[#allocation4 + $0x58] sm:$0xf] }
  0x37   :  { %644 = vmatpush.bf16.msrb.mxu0 %v6141_v49  ;;  %v5981_v47 = vor.u32 %v7288_v42, %v5980_v41  ;;  %v7289_v49 = vld [vmem:[#allocation4 + $0x74] sm:$0xf0]  ;;  %v5985_v51 = vor.u32 %v7284_v44, %v5982_v45  ;;  %v5990_v52 = vld [vmem:[#allocation4 + $0x78] sm:$0xf0]  ;;  %v5948_v53 = vld [vmem:[#allocation4 + $0x10] sm:$0xf] }
  0x38   :  { %673 = vmatpush.bf16.msrb.mxu1 %v6145_v50  ;;  %v7285_v50 = vld [vmem:[#allocation4 + $0x5c] sm:$0xf]  ;;  %v7276_v55 = vld [vmem:[#allocation4 + $0x14] sm:$0xf]  ;;  %v5989_v57 = vor.u32 %v7289_v49, %v5988_v48  ;;  %v5956_v60 = vld [vmem:[#allocation4 + $0x18] sm:$0xf] }
  0x39   :  { %702 = vmatpush.bf16.msrb.mxu2 %v6149_v54  ;;  %731 = vmatpush.bf16.msrb.mxu3 %v6153_v58  ;;  %v7280_v54 = vld [vmem:[#allocation4 + $0x2c] sm:$0xf0]  ;;  %v5950_v56 = vld [vmem:[#allocation4 + $0x30] sm:$0xf0]  ;;  %v5993_v58 = vor.u32 %v7285_v50, %v5990_v52  ;;  %v7281_v61 = vld [vmem:[#allocation4 + $0x34] sm:$0xf0] }
  0x3a   :  { %v5949_v59 = vor.u32 %v7280_v54, %v5948_v53  ;;  %v5953_v63 = vor.u32 %v7276_v55, %v5950_v56  ;;  %v7277_v0 = vld [vmem:[#allocation4 + $0x1c] sm:$0xf]  ;;  %v6412_v4 = vld [vmem:[#allocation7 + $0x1c0] sm:$0xf]  ;;  %v6414_v10 = vld [vmem:[#allocation7 + $0x1e0] sm:$0xf0] }
  0x3b   :  { %645 = vmatpush.bf16.msrb.mxu0 %v6109_v62  ;;  %v8080_v62 = vld [vmem:[%s10703_s0 + $0x10] sm:$0xff]  ;;  %v5958_v1 = vld [vmem:[#allocation4 + $0x38] sm:$0xf0]  ;;  %v7398_v5 = vld [vmem:[#allocation7 + $0x1dc] sm:$0xf0]  ;;  %s7974_s3 = smov 8  }
  0x3c   :  { %674 = vmatpush.bf16.msrb.mxu1 %v6113_v2  ;;  %v5957_v2 = vor.u32 %v7281_v61, %v5956_v60  ;;  %v8086_v7 = vor.u32 %v7398_v5, %v6412_v4  ;;  %v7462_v8 = vld [vmem:[#allocation7 + $0x3dc] sm:$0xf0]  ;;  %v7458_v14 = vld [vmem:[#allocation7 + $0x3c4] sm:$0xf]  ;;  %v8121_v42 = vld [vmem:[%s10703_s0 + $0x18] sm:$0xff] }
  0x3d   :  { %703 = vmatpush.bf16.msrb.mxu2 %v6117_v3  ;;  %732 = vmatpush.bf16.msrb.mxu3 %v6121_v6  ;;  %v5961_v3 = vor.u32 %v7277_v0, %v5958_v1  ;;  %v6668_v6 = vld [vmem:[#allocation7 + $0x3c0] sm:$0xf]  ;;  %v6670_v15 = vld [vmem:[#allocation7 + $0x3e0] sm:$0xf0] }
  0x3e   :  { %11005 = vst [vmem:[#allocation14_spill] sm:$0xff] %v8086_v7  ;;  %v8088_v11 = vor.u32 %v7462_v8, %v6668_v6  ;;  %v7390_v18 = vld [vmem:[#allocation7 + $0x19c] sm:$0xf0]  ;;  %v7386_v23 = vld [vmem:[#allocation7 + $0x184] sm:$0xf] }
  0x3f   :  { %646 = vmatpush.bf16.msrb.mxu0 %v6077_v9  ;;  %v7394_v9 = vld [vmem:[#allocation7 + $0x1c4] sm:$0xf]  ;;  %v6636_v19 = vld [vmem:[#allocation7 + $0x380] sm:$0xf] }
  0x40   :  { %675 = vmatpush.bf16.msrb.mxu1 %v6081_v13  ;;  %11006 = vst [vmem:[#allocation15_spill] sm:$0xff] %v8088_v11  ;;  %v8090_v13 = vor.u32 %v7394_v9, %v6414_v10  ;;  %v7454_v20 = vld [vmem:[#allocation7 + $0x39c] sm:$0xf0]  ;;  %v6382_v24 = vld [vmem:[#allocation7 + $0x1a0] sm:$0xf0] }
  0x41   :  { %704 = vmatpush.bf16.msrb.mxu2 %v6085_v16  ;;  %733 = vmatpush.bf16.msrb.mxu3 %v6089_v17  ;;  %v6380_v16 = vld [vmem:[#allocation7 + $0x180] sm:$0xf]  ;;  %v8093_v17 = vor.u32 %v7458_v14, %v6670_v15  ;;  %v8099_v22 = vor.u32 %v7454_v20, %v6636_v19  ;;  %v6638_v27 = vld [vmem:[#allocation7 + $0x3a0] sm:$0xf0] }
  0x42   :  { %540 = vmatmul.bf16.gmra.mxu0 %v8071_v12  ;;  %569 = vmatmul.bf16.gmra.mxu1 %v8071_v12  ;;  %11007 = vst [vmem:[#allocation16_spill] sm:$0xff] %v8090_v13  ;;  %v6348_v28 = vld [vmem:[#allocation7 + $0x140] sm:$0xf]  ;;  %v7378_v34 = vld [vmem:[#allocation7 + $0x144] sm:$0xf] }
  0x43   :  { %598 = vmatmul.bf16.gmra.mxu2 %v8071_v12  ;;  %647 = vmatpush.bf16.msrb.mxu0 %v6045_v21  ;;  %11008 = vst [vmem:[#allocation17_spill] sm:$0xff] %v8093_v17  ;;  %v8097_v21 = vor.u32 %v7390_v18, %v6380_v16  ;;  %v7382_v29 = vld [vmem:[#allocation7 + $0x15c] sm:$0xf0]  ;;  %v7442_v37 = vld [vmem:[#allocation7 + $0x344] sm:$0xf] }
  0x44   :  { %627 = vmatmul.bf16.gmra.mxu3 %v8071_v12  ;;  %676 = vmatpush.bf16.msrb.mxu1 %v6049_v25  ;;  %11010 = vst [vmem:[#allocation19_spill] sm:$0xff] %v8099_v22  ;;  %v7450_v25 = vld [vmem:[#allocation7 + $0x384] sm:$0xf]  ;;  %v6604_v31 = vld [vmem:[#allocation7 + $0x340] sm:$0xf] }
  0x45   :  { %705 = vmatpush.bf16.msrb.mxu2 %v6053_v26  ;;  %734 = vmatpush.bf16.msrb.mxu3 %v6057_v30  ;;  %11009 = vst [vmem:[#allocation18_spill] sm:$0xff] %v8097_v21  ;;  %v8102_v26 = vor.u32 %v7386_v23, %v6382_v24  ;;  %v8104_v30 = vor.u32 %v7450_v25, %v6638_v27  ;;  %v7446_v33 = vld [vmem:[#allocation7 + $0x35c] sm:$0xf0]  ;;  %v6606_v38 = vld [vmem:[#allocation7 + $0x360] sm:$0xf0] }
  0x46   :  { %v8111_v39 = vor.u32 %v7446_v33, %v6604_v31  ;;  %v8116_v41 = vor.u32 %v7442_v37, %v6606_v38  ;;  %v7374_v44 = vld [vmem:[#allocation7 + $0x11c] sm:$0xf0]  ;;  %v7370_v48 = vld [vmem:[#allocation7 + $0x104] sm:$0xf] }
  0x47   :  { %648 = vmatpush.bf16.msrb.mxu0 %v6013_v35  ;;  %11011 = vst [vmem:[#allocation20_spill] sm:$0xff] %v8102_v26  ;;  %v8107_v35 = vor.u32 %v7382_v29, %v6348_v28  ;;  %v6572_v45 = vld [vmem:[#allocation7 + $0x300] sm:$0xf]  ;;  %v6318_v49 = vld [vmem:[#allocation7 + $0x120] sm:$0xf0] }
  0x48   :  { %677 = vmatpush.bf16.msrb.mxu1 %v6017_v36  ;;  %11012 = vst [vmem:[#allocation21_spill] sm:$0xff] %v8104_v30  ;;  %v6350_v36 = vld [vmem:[#allocation7 + $0x160] sm:$0xf0]  ;;  %v6284_v54 = vld [vmem:[#allocation7 + $0xc0] sm:$0xf] }
  0x49   :  { %706 = vmatpush.bf16.msrb.mxu2 %v6021_v43  ;;  %735 = vmatpush.bf16.msrb.mxu3 %v6025_v46  ;;  %11013 = vst [vmem:[#allocation22_spill] sm:$0xff] %v8107_v35  ;;  %v8113_v40 = vor.u32 %v7378_v34, %v6350_v36  ;;  %v6316_v43 = vld [vmem:[#allocation7 + $0x100] sm:$0xf]  ;;  %v7434_v52 = vld [vmem:[#allocation7 + $0x304] sm:$0xf] }
  0x4a   :  { %11014 = vst [vmem:[#allocation23_spill] sm:$0xff] %v8111_v39  ;;  %v8131_v46 = vor.u32 %v7374_v44, %v6316_v43  ;;  %v6574_v53 = vld [vmem:[#allocation7 + $0x320] sm:$0xf0]  ;;  %v7366_v56 = vld [vmem:[#allocation7 + $0xdc] sm:$0xf0] }
  0x4b   :  { %649 = vmatpush.bf16.msrb.mxu0 %v5981_v47  ;;  %11015 = vst [vmem:[#allocation24_spill] sm:$0xff] %v8113_v40  ;;  %v7438_v47 = vld [vmem:[#allocation7 + $0x31c] sm:$0xf0]  ;;  %v8138_v55 = vor.u32 %v7434_v52, %v6574_v53  ;;  %v7362_v61 = vld [vmem:[#allocation7 + $0xc4] sm:$0xf] }
  0x4c   :  { %678 = vmatpush.bf16.msrb.mxu1 %v5985_v51  ;;  %11016 = vst [vmem:[#allocation25_spill] sm:$0xff] %v8116_v41  ;;  %v8133_v50 = vor.u32 %v7438_v47, %v6572_v45  ;;  %v8135_v51 = vor.u32 %v7370_v48, %v6318_v49  ;;  %v7426_v0 = vld [vmem:[#allocation7 + $0x2c4] sm:$0xf]  ;;  %v7358_v4 = vld [vmem:[#allocation7 + $0x9c] sm:$0xf0] }
  0x4d   :  { %707 = vmatpush.bf16.msrb.mxu2 %v5989_v57  ;;  %736 = vmatpush.bf16.msrb.mxu3 %v5993_v58  ;;  %11017 = vst [vmem:[#allocation26_spill] sm:$0xff] %v8131_v46  ;;  %v6540_v57 = vld [vmem:[#allocation7 + $0x2c0] sm:$0xf]  ;;  %v7354_v9 = vld [vmem:[#allocation7 + $0x84] sm:$0xf] }
  0x4e   :  { %11018 = vst [vmem:[#allocation27_spill] sm:$0xff] %v8133_v50  ;;  %v7430_v58 = vld [vmem:[#allocation7 + $0x2dc] sm:$0xf0]  ;;  %v6254_v14 = vld [vmem:[#allocation7 + $0xa0] sm:$0xf0] }
  0x4f   :  { %650 = vmatpush.bf16.msrb.mxu0 %v5949_v59  ;;  %11019 = vst [vmem:[#allocation28_spill] sm:$0xff] %v8135_v51  ;;  %v8142_v59 = vor.u32 %v7366_v56, %v6284_v54  ;;  %v8144_v60 = vor.u32 %v7430_v58, %v6540_v57  ;;  %v6508_v6 = vld [vmem:[#allocation7 + $0x280] sm:$0xf]  ;;  %v7418_v15 = vld [vmem:[#allocation7 + $0x284] sm:$0xf]  ;;  %v8158_v19 = vor.u32 %v7354_v9, %v6254_v14 }
  0x50   :  { %679 = vmatpush.bf16.msrb.mxu1 %v5953_v63  ;;  %11020 = vst [vmem:[#allocation29_spill] sm:$0xff] %v8138_v55  ;;  %v6286_v63 = vld [vmem:[#allocation7 + $0xe0] sm:$0xf0]  ;;  %v7422_v8 = vld [vmem:[#allocation7 + $0x29c] sm:$0xf0] }
  0x51   :  { %708 = vmatpush.bf16.msrb.mxu2 %v5957_v2  ;;  %737 = vmatpush.bf16.msrb.mxu3 %v5961_v3  ;;  %11021 = vst [vmem:[#allocation30_spill] sm:$0xff] %v8142_v59  ;;  %v8147_v1 = vor.u32 %v7362_v61, %v6286_v63  ;;  %v6542_v2 = vld [vmem:[#allocation7 + $0x2e0] sm:$0xf0]  ;;  %v6252_v3 = vld [vmem:[#allocation7 + $0x80] sm:$0xf]  ;;  %v8156_v18 = vor.u32 %v7422_v8, %v6508_v6 }
  0x52   :  { %545 = vmatmul.bf16.gmra.mxu0 %v8080_v62  ;;  %574 = vmatmul.bf16.gmra.mxu1 %v8080_v62  ;;  %11022 = vst [vmem:[#allocation31_spill] sm:$0xff] %v8144_v60  ;;  %v8149_v5 = vor.u32 %v7426_v0, %v6542_v2  ;;  %v8152_v10 = vor.u32 %v7358_v4, %v6252_v3  ;;  %v6510_v16 = vld [vmem:[#allocation7 + $0x2a0] sm:$0xf0]  ;;  %v6220_v23 = vld [vmem:[#allocation7 + $0x40] sm:$0xf] }
  0x53   :  { %603 = vmatmul.bf16.gmra.mxu2 %v8080_v62  ;;  %1608 = vmatpush.bf16.msra.mxu0 %v8086_v7  ;;  %11023 = vst [vmem:[#allocation32_spill] sm:$0xff] %v8147_v1  ;;  %v8161_v20 = vor.u32 %v7418_v15, %v6510_v16  ;;  %v7350_v24 = vld [vmem:[#allocation7 + $0x5c] sm:$0xf0]  ;;  %v7346_v28 = vld [vmem:[#allocation7 + $0x44] sm:$0xf] }
  0x54   :  { %632 = vmatmul.bf16.gmra.mxu3 %v8080_v62  ;;  %1621 = vmatpush.bf16.msra.mxu1 %v8088_v11  ;;  %11024 = vst [vmem:[#allocation33_spill] sm:$0xff] %v8149_v5  ;;  %v6476_v25 = vld [vmem:[#allocation7 + $0x240] sm:$0xf]  ;;  %v6222_v29 = vld [vmem:[#allocation7 + $0x60] sm:$0xf0]  ;;  %v8167_v34 = vor.u32 %v7350_v24, %v6220_v23 }
  0x55   :  { %1634 = vmatpush.bf16.msra.mxu2 %v8090_v13  ;;  %1647 = vmatpush.bf16.msra.mxu3 %v8093_v17  ;;  %11025 = vst [vmem:[#allocation34_spill] sm:$0xff] %v8152_v10  ;;  %v7414_v27 = vld [vmem:[#allocation7 + $0x25c] sm:$0xf0]  ;;  %v7410_v31 = vld [vmem:[#allocation7 + $0x244] sm:$0xf]  ;;  %v8171_v37 = vor.u32 %v7346_v28, %v6222_v29 }
  0x56   :  { %11026 = vst [vmem:[#allocation35_spill] sm:$0xff] %v8156_v18  ;;  %v6478_v33 = vld [vmem:[#allocation7 + $0x260] sm:$0xf0]  ;;  %v8169_v36 = vor.u32 %v7414_v27, %v6476_v25  ;;  %v6188_v43 = vld [vmem:[#allocation7] sm:$0xf] }
  0x57   :  { %1609 = vmatpush.bf16.msra.mxu0 %v8097_v21  ;;  %11027 = vst [vmem:[#allocation36_spill] sm:$0xff] %v8158_v19  ;;  %v8174_v38 = vor.u32 %v7410_v31, %v6478_v33  ;;  %v7342_v44 = vld [vmem:[#allocation7 + $0x1c] sm:$0xf0]  ;;  %v7338_v49 = vld [vmem:[#allocation7 + $0x4] sm:$0xf] }
  0x58   :  { %1622 = vmatpush.bf16.msra.mxu1 %v8099_v22  ;;  %11028 = vst [vmem:[#allocation37_spill] sm:$0xff] %v8161_v20  ;;  %v6444_v45 = vld [vmem:[#allocation7 + $0x200] sm:$0xf]  ;;  %v8180_v47 = vor.u32 %v7342_v44, %v6188_v43  ;;  %v6190_v52 = vld [vmem:[#allocation7 + $0x20] sm:$0xf0] }
  0x59   :  { %1635 = vmatpush.bf16.msra.mxu2 %v8102_v26  ;;  %1648 = vmatpush.bf16.msra.mxu3 %v8104_v30  ;;  %11029 = vst [vmem:[#allocation38_spill] sm:$0xff] %v8167_v34  ;;  %v7406_v48 = vld [vmem:[#allocation7 + $0x21c] sm:$0xf0]  ;;  %v8186_v54 = vor.u32 %v7338_v49, %v6190_v52  ;;  %v7402_v56 = vld [vmem:[#allocation7 + $0x204] sm:$0xf] }
  0x5a   :  { %11030 = vst [vmem:[#allocation39_spill] sm:$0xff] %v8169_v36  ;;  %v8184_v53 = vor.u32 %v7406_v48, %v6444_v45  ;;  %v6446_v57 = vld [vmem:[#allocation7 + $0x220] sm:$0xf0]  ;;  %v6420_v58 = vld [vmem:[#allocation7 + $0x1c8] sm:$0xf] }
  0x5b   :  { %1610 = vmatpush.bf16.msra.mxu0 %v8107_v35  ;;  %11031 = vst [vmem:[#allocation40_spill] sm:$0xff] %v8171_v37  ;;  %v7399_v61 = vld [vmem:[#allocation7 + $0x1e4] sm:$0xf0]  ;;  %v7395_v4 = vld [vmem:[#allocation7 + $0x1cc] sm:$0xf] }
  0x5c   :  { %1623 = vmatpush.bf16.msra.mxu1 %v8111_v39  ;;  %11032 = vst [vmem:[#allocation41_spill] sm:$0xff] %v8174_v38  ;;  %v6676_v63 = vld [vmem:[#allocation7 + $0x3c8] sm:$0xf]  ;;  %v8191_v2 = vor.u32 %v7399_v61, %v6420_v58  ;;  %v6422_v6 = vld [vmem:[#allocation7 + $0x1e8] sm:$0xf0] }
  0x5d   :  { %1636 = vmatpush.bf16.msra.mxu2 %v8113_v40  ;;  %1649 = vmatpush.bf16.msra.mxu3 %v8116_v41  ;;  %11033 = vst [vmem:[#allocation42_spill] sm:$0xff] %v8180_v47  ;;  %v7463_v0 = vld [vmem:[#allocation7 + $0x3e4] sm:$0xf0]  ;;  %v7459_v8 = vld [vmem:[#allocation7 + $0x3cc] sm:$0xf]  ;;  %v8196_v9 = vor.u32 %v7395_v4, %v6422_v6 }
  0x5e   :  { %11034 = vst [vmem:[#allocation43_spill] sm:$0xff] %v8184_v53  ;;  %v8193_v3 = vor.u32 %v7463_v0, %v6676_v63  ;;  %v6678_v14 = vld [vmem:[#allocation7 + $0x3e8] sm:$0xf0]  ;;  %v6388_v15 = vld [vmem:[#allocation7 + $0x188] sm:$0xf] }
  0x5f   :  { %1611 = vmatpush.bf16.msra.mxu0 %v8131_v46  ;;  %11035 = vst [vmem:[#allocation44_spill] sm:$0xff] %v8186_v54  ;;  %v7391_v16 = vld [vmem:[#allocation7 + $0x1a4] sm:$0xf0]  ;;  %v8200_v23 = vor.u32 %v7459_v8, %v6678_v14  ;;  %v7387_v27 = vld [vmem:[#allocation7 + $0x18c] sm:$0xf] }
  0x60   :  { %1624 = vmatpush.bf16.msra.mxu1 %v8133_v50  ;;  %11037 = vst [vmem:[#allocation46_spill] sm:$0xff] %v8191_v2  ;;  %v6644_v24 = vld [vmem:[#allocation7 + $0x388] sm:$0xf]  ;;  %v8204_v28 = vor.u32 %v7391_v16, %v6388_v15  ;;  %v6390_v29 = vld [vmem:[#allocation7 + $0x1a8] sm:$0xf0] }
  0x61   :  { %1637 = vmatpush.bf16.msra.mxu2 %v8135_v51  ;;  %1650 = vmatpush.bf16.msra.mxu3 %v8138_v55  ;;  %11038 = vst [vmem:[#allocation47_spill] sm:$0xff] %v8193_v3  ;;  %v7455_v25 = vld [vmem:[#allocation7 + $0x3a4] sm:$0xf0]  ;;  %v7451_v31 = vld [vmem:[#allocation7 + $0x38c] sm:$0xf]  ;;  %v8210_v44 = vor.u32 %v7387_v27, %v6390_v29 }
  0x62   :  { %550 = vmatmul.bf16.gmra.mxu0 %v8121_v42  ;;  %579 = vmatmul.bf16.gmra.mxu1 %v8121_v42  ;;  %11039 = vst [vmem:[#allocation48_spill] sm:$0xff] %v8196_v9  ;;  %v6646_v33 = vld [vmem:[#allocation7 + $0x3a8] sm:$0xf0]  ;;  %v8208_v43 = vor.u32 %v7455_v25, %v6644_v24  ;;  %v6356_v48 = vld [vmem:[#allocation7 + $0x148] sm:$0xf] }
  0x63   :  { %608 = vmatmul.bf16.gmra.mxu2 %v8121_v42  ;;  %1612 = vmatpush.bf16.msra.mxu0 %v8142_v59  ;;  %11040 = vst [vmem:[#allocation49_spill] sm:$0xff] %v8200_v23  ;;  %v8213_v45 = vor.u32 %v7451_v31, %v6646_v33  ;;  %v7383_v49 = vld [vmem:[#allocation7 + $0x164] sm:$0xf0]  ;;  %v6358_v58 = vld [vmem:[#allocation7 + $0x168] sm:$0xf0] }
  0x64   :  { %637 = vmatmul.bf16.gmra.mxu3 %v8121_v42  ;;  %1625 = vmatpush.bf16.msra.mxu1 %v8144_v60  ;;  %11041 = vst [vmem:[#allocation50_spill] sm:$0xff] %v8204_v28  ;;  %v6612_v52 = vld [vmem:[#allocation7 + $0x348] sm:$0xf]  ;;  %v7443_v61 = vld [vmem:[#allocation7 + $0x34c] sm:$0xf]  ;;  %v8219_v0 = vor.u32 %v7383_v49, %v6356_v48 }
  0x65   :  { %1638 = vmatpush.bf16.msra.mxu2 %v8147_v1  ;;  %1651 = vmatpush.bf16.msra.mxu3 %v8149_v5  ;;  %11042 = vst [vmem:[#allocation51_spill] sm:$0xff] %v8208_v43  ;;  %v6614_v63 = vld [vmem:[#allocation7 + $0x368] sm:$0xf0]  ;;  %v6324_v8 = vld [vmem:[#allocation7 + $0x108] sm:$0xf] }
  0x66   :  { %11043 = vst [vmem:[#allocation52_spill] sm:$0xff] %v8210_v44  ;;  %v7375_v14 = vld [vmem:[#allocation7 + $0x124] sm:$0xf0]  ;;  %v8226_v16 = vor.u32 %v7443_v61, %v6614_v63  ;;  %v7371_v25 = vld [vmem:[#allocation7 + $0x10c] sm:$0xf] }
  0x67   :  { %1613 = vmatpush.bf16.msra.mxu0 %v8152_v10  ;;  %11044 = vst [vmem:[#allocation53_spill] sm:$0xff] %v8213_v45  ;;  %v6580_v15 = vld [vmem:[#allocation7 + $0x308] sm:$0xf]  ;;  %v6326_v27 = vld [vmem:[#allocation7 + $0x128] sm:$0xf0]  ;;  %v8232_v33 = vor.u32 %v7375_v14, %v6324_v8 }
  0x68   :  { %1626 = vmatpush.bf16.msra.mxu1 %v8156_v18  ;;  %11045 = vst [vmem:[#allocation54_spill] sm:$0xff] %v8219_v0  ;;  %v7439_v24 = vld [vmem:[#allocation7 + $0x324] sm:$0xf0]  ;;  %v7435_v29 = vld [vmem:[#allocation7 + $0x30c] sm:$0xf]  ;;  %v8238_v49 = vor.u32 %v7371_v25, %v6326_v27 }
  0x69   :  { %1639 = vmatpush.bf16.msra.mxu2 %v8158_v19  ;;  %1652 = vmatpush.bf16.msra.mxu3 %v8161_v20  ;;  %11048 = vst [vmem:[#allocation57_spill] sm:$0xff] %v8226_v16  ;;  %v6582_v31 = vld [vmem:[#allocation7 + $0x328] sm:$0xf0]  ;;  %v8236_v48 = vor.u32 %v7439_v24, %v6580_v15  ;;  %v6260_v25 = vld [vmem:[#allocation7 + $0x88] sm:$0xf] }
  0x6a   :  { %11049 = vst [vmem:[#allocation58_spill] sm:$0xff] %v8232_v33  ;;  %v7363_v61 = vld [vmem:[#allocation7 + $0xcc] sm:$0xf]  ;;  %v7359_v27 = vld [vmem:[#allocation7 + $0xa4] sm:$0xf0] }
  0x6b   :  { %1614 = vmatpush.bf16.msra.mxu0 %v8167_v34  ;;  %11050 = vst [vmem:[#allocation59_spill] sm:$0xff] %v8236_v48  ;;  %v6294_v63 = vld [vmem:[#allocation7 + $0xe8] sm:$0xf0] }
  0x6c   :  { %1627 = vmatpush.bf16.msra.mxu1 %v8169_v36  ;;  %11051 = vst [vmem:[#allocation60_spill] sm:$0xff] %v8238_v49  ;;  %v7427_v8 = vld [vmem:[#allocation7 + $0x2cc] sm:$0xf]  ;;  %v8250_v24 = vor.u32 %v7363_v61, %v6294_v63  ;;  %v6228_v61 = vld [vmem:[#allocation7 + $0x48] sm:$0xf] }
  0x6d   :  { %1640 = vmatpush.bf16.msra.mxu2 %v8171_v37  ;;  %1653 = vmatpush.bf16.msra.mxu3 %v8174_v38  ;;  %v6550_v14 = vld [vmem:[#allocation7 + $0x2e8] sm:$0xf0]  ;;  %v7351_v63 = vld [vmem:[#allocation7 + $0x64] sm:$0xf0] }
  0x6e   :  { %11055 = vst [vmem:[#allocation64_spill] sm:$0xff] %v8250_v24 }
  0x6f   :  { %1615 = vmatpush.bf16.msra.mxu0 %v8180_v47 }
  0x70   :  { %1628 = vmatpush.bf16.msra.mxu1 %v8184_v53 }
  0x71   :  { %1641 = vmatpush.bf16.msra.mxu2 %v8186_v54 }
  0x72   :  { %651 = vmatmul.bf16.vlgmr.msrb.gmra.mxu0 %v8062_v32  ;;  %680 = vmatmul.bf16.vlgmr.msrb.gmra.mxu1 %v8062_v32 }
  0x73   :  { %709 = vmatmul.bf16.vlgmr.msrb.gmra.mxu2 %v8062_v32  ;;  %1660 = vmatpush.bf16.msrb.mxu0 %v8191_v2 }
  0x74   :  { %738 = vmatmul.bf16.vlgmr.msrb.gmra.mxu3 %v8062_v32  ;;  %v8189_v32 = vor.u32 %v7402_v56, %v6446_v57  ;;  %1673 = vmatpush.bf16.msrb.mxu1 %v8193_v3  ;;  %v7447_v56 = vld [vmem:[#allocation7 + $0x364] sm:$0xf0]  ;;  %v7379_v57 = vld [vmem:[#allocation7 + $0x14c] sm:$0xf]  ;;  %v7401_v3 = vld [vmem:[#allocation7 + $0x1f4] sm:$0xf0] }
  0x75   :  { %1686 = vmatpush.bf16.msrb.mxu2 %v8196_v9  ;;  %v8221_v4 = vor.u32 %v7447_v56, %v6612_v52  ;;  %v8223_v6 = vor.u32 %v7379_v57, %v6358_v58  ;;  %v6292_v52 = vld [vmem:[#allocation7 + $0xc8] sm:$0xf]  ;;  %v8241_v58 = vor.u32 %v7435_v29, %v6582_v31  ;;  %v8253_v31 = vor.u32 %v7427_v8, %v6550_v14 }
  0x76   :  { %11036 = vst [vmem:[#allocation45_spill] sm:$0xff] %v8189_v32  ;;  %1654 = vmatpush.bf16.msra.mxu3 %v8189_v32  ;;  %v7367_v56 = vld [vmem:[#allocation7 + $0xe4] sm:$0xf0]  ;;  %v6692_v32 = vld [vmem:[#allocation7 + $0x3d8] sm:$0xf] }
  0x77   :  { %1661 = vmatpush.bf16.msrb.mxu0 %v8204_v28  ;;  %11046 = vst [vmem:[#allocation55_spill] sm:$0xff] %v8221_v4  ;;  %v6548_v57 = vld [vmem:[#allocation7 + $0x2c8] sm:$0xf]  ;;  %v7408_v28 = vld [vmem:[#allocation7 + $0x22c] sm:$0xf0] }
  0x78   :  { %1674 = vmatpush.bf16.msrb.mxu1 %v8208_v43  ;;  %11047 = vst [vmem:[#allocation56_spill] sm:$0xff] %v8223_v6  ;;  %v6516_v29 = vld [vmem:[#allocation7 + $0x288] sm:$0xf]  ;;  %v7360_v43 = vld [vmem:[#allocation7 + $0xac] sm:$0xf0] }
  0x79   :  { %1687 = vmatpush.bf16.msrb.mxu2 %v8210_v44  ;;  %11052 = vst [vmem:[#allocation61_spill] sm:$0xff] %v8241_v58  ;;  %v6484_v8 = vld [vmem:[#allocation7 + $0x248] sm:$0xf] }
  0x7a   :  { %1699 = vmatpush.bf16.msrb.mxu3 %v8200_v23  ;;  %11056 = vst [vmem:[#allocation65_spill] sm:$0xff] %v8253_v31  ;;  %v7416_v23 = vld [vmem:[#allocation7 + $0x26c] sm:$0xf0] }
  0x7b   :  { %1662 = vmatpush.bf16.msrb.mxu0 %v8219_v0  ;;  %v6268_v0 = vld [vmem:[#allocation7 + $0x90] sm:$0xf] }
  0x7c   :  { %1675 = vmatpush.bf16.msrb.mxu1 %v8221_v4  ;;  %v8244_v4 = vor.u32 %v7367_v56, %v6292_v52  ;;  %v7419_v52 = vld [vmem:[#allocation7 + $0x28c] sm:$0xf] }
  0x7d   :  { %1688 = vmatpush.bf16.msrb.mxu2 %v8223_v6  ;;  %v7355_v6 = vld [vmem:[#allocation7 + $0x8c] sm:$0xf] }
  0x7e   :  { %1700 = vmatpush.bf16.msrb.mxu3 %v8213_v45  ;;  %11053 = vst [vmem:[#allocation62_spill] sm:$0xff] %v8244_v4  ;;  %v6518_v56 = vld [vmem:[#allocation7 + $0x2a8] sm:$0xf0]  ;;  %v7372_v45 = vld [vmem:[#allocation7 + $0x114] sm:$0xf] }
  0x7f   :  { %1663 = vmatpush.bf16.msrb.mxu0 %v8232_v33  ;;  %v6262_v33 = vld [vmem:[#allocation7 + $0xa8] sm:$0xf0]  ;;  %v8265_v14 = vor.u32 %v7419_v52, %v6518_v56  ;;  %v6452_v52 = vld [vmem:[#allocation7 + $0x208] sm:$0xf] }
  0x80   :  { %1676 = vmatpush.bf16.msrb.mxu1 %v8236_v48  ;;  %v8256_v48 = vor.u32 %v7359_v27, %v6260_v25  ;;  %v7411_v25 = vld [vmem:[#allocation7 + $0x24c] sm:$0xf] }
  0x81   :  { %1689 = vmatpush.bf16.msrb.mxu2 %v8238_v49  ;;  %11060 = vst [vmem:[#allocation69_spill] sm:$0xff] %v8265_v14  ;;  %v7347_v49 = vld [vmem:[#allocation7 + $0x4c] sm:$0xf] }
  0x82   :  { %656 = vmatmul.bf16.gmra.mxu0 %v8071_v12  ;;  %685 = vmatmul.bf16.gmra.mxu1 %v8071_v12  ;;  %11057 = vst [vmem:[#allocation66_spill] sm:$0xff] %v8256_v48  ;;  %v6486_v27 = vld [vmem:[#allocation7 + $0x268] sm:$0xf0] }
  0x83   :  { %714 = vmatmul.bf16.gmra.mxu2 %v8071_v12  ;;  %1701 = vmatpush.bf16.msrb.mxu3 %v8226_v16  ;;  %v7423_v16 = vld [vmem:[#allocation7 + $0x2a4] sm:$0xf0]  ;;  %v8278_v56 = vor.u32 %v7411_v25, %v6486_v27 }
  0x84   :  { %743 = vmatmul.bf16.gmra.mxu3 %v8071_v12  ;;  %v7431_v12 = vld [vmem:[#allocation7 + $0x2e4] sm:$0xf0]  ;;  %1664 = vmatpush.bf16.msrb.mxu0 %v8244_v4  ;;  %v6230_v4 = vld [vmem:[#allocation7 + $0x68] sm:$0xf0] }
  0x85   :  { %v8248_v15 = vor.u32 %v7431_v12, %v6548_v57  ;;  %1690 = vmatpush.bf16.msrb.mxu2 %v8250_v24  ;;  %v8260_v57 = vor.u32 %v7423_v16, %v6516_v29  ;;  %v8262_v12 = vor.u32 %v7355_v6, %v6262_v33  ;;  %v8274_v16 = vor.u32 %v7347_v49, %v6230_v4  ;;  %v6196_v33 = vld [vmem:[#allocation7 + $0x8] sm:$0xf] }
  0x86   :  { %v7343_v29 = vld [vmem:[#allocation7 + $0x24] sm:$0xf0]  ;;  %11064 = vst [vmem:[#allocation73_spill] sm:$0xff] %v8278_v56 }
  0x87   :  { %11054 = vst [vmem:[#allocation63_spill] sm:$0xff] %v8248_v15  ;;  %1702 = vmatpush.bf16.msrb.mxu3 %v8241_v58  ;;  %1677 = vmatpush.bf16.msrb.mxu1 %v8248_v15  ;;  %v7415_v58 = vld [vmem:[#allocation7 + $0x264] sm:$0xf0]  ;;  %v8268_v15 = vor.u32 %v7351_v63, %v6228_v61  ;;  %v7339_v61 = vld [vmem:[#allocation7 + $0xc] sm:$0xf]  ;;  %v8284_v4 = vor.u32 %v7343_v29, %v6196_v33 }
  0x88   :  { %11058 = vst [vmem:[#allocation67_spill] sm:$0xff] %v8260_v57  ;;  %1665 = vmatpush.bf16.msrb.mxu0 %v8256_v48  ;;  %v8272_v6 = vor.u32 %v7415_v58, %v6484_v8  ;;  %v6198_v63 = vld [vmem:[#allocation7 + $0x28] sm:$0xf0]  ;;  %v6428_v33 = vld [vmem:[#allocation7 + $0x1d0] sm:$0xf] }
  0x89   :  { %11059 = vst [vmem:[#allocation68_spill] sm:$0xff] %v8262_v12  ;;  %1691 = vmatpush.bf16.msrb.mxu2 %v8262_v12  ;;  %v7403_v58 = vld [vmem:[#allocation7 + $0x20c] sm:$0xf]  ;;  %v8290_v25 = vor.u32 %v7339_v61, %v6198_v63  ;;  %v7400_v29 = vld [vmem:[#allocation7 + $0x1ec] sm:$0xf0] }
  0x8a   :  { %11061 = vst [vmem:[#allocation70_spill] sm:$0xff] %v8268_v15  ;;  %v6454_v8 = vld [vmem:[#allocation7 + $0x228] sm:$0xf0]  ;;  %v7464_v63 = vld [vmem:[#allocation7 + $0x3ec] sm:$0xf0] }
  0x8b   :  { %1703 = vmatpush.bf16.msrb.mxu3 %v8253_v31  ;;  %1678 = vmatpush.bf16.msrb.mxu1 %v8260_v57  ;;  %11062 = vst [vmem:[#allocation71_spill] sm:$0xff] %v8272_v6  ;;  %v7407_v31 = vld [vmem:[#allocation7 + $0x224] sm:$0xf0]  ;;  %v8293_v27 = vor.u32 %v7403_v58, %v6454_v8  ;;  %v7396_v58 = vld [vmem:[#allocation7 + $0x1d4] sm:$0xf] }
  0x8c   :  { %11063 = vst [vmem:[#allocation72_spill] sm:$0xff] %v8274_v16  ;;  %1666 = vmatpush.bf16.msrb.mxu0 %v8268_v15  ;;  %v8288_v49 = vor.u32 %v7407_v31, %v6452_v52  ;;  %v952_v31 = vld [vmem:[%s10704_s1 + $0x8] sm:$0xff]  ;;  %v6684_v52 = vld [vmem:[#allocation7 + $0x3d0] sm:$0xf]  ;;  %v6430_v8 = vld [vmem:[#allocation7 + $0x1f0] sm:$0xf0] }
  0x8d   :  { %11065 = vst [vmem:[#allocation74_spill] sm:$0xff] %v8284_v4  ;;  %1692 = vmatpush.bf16.msrb.mxu2 %v8274_v16  ;;  %v8321_v16 = vor.u32 %v7396_v58, %v6430_v8  ;;  %v6652_v15 = vld [vmem:[#allocation7 + $0x390] sm:$0xf]  ;;  %v6398_v12 = vld [vmem:[#allocation7 + $0x1b0] sm:$0xf0] }
  0x8e   :  { %11066 = vst [vmem:[#allocation75_spill] sm:$0xff] %v8288_v49  ;;  %v6364_v58 = vld [vmem:[#allocation7 + $0x150] sm:$0xf] }
  0x8f   :  { %1704 = vmatpush.bf16.msrb.mxu3 %v8265_v14  ;;  %1679 = vmatpush.bf16.msrb.mxu1 %v8272_v6  ;;  %11067 = vst [vmem:[#allocation76_spill] sm:$0xff] %v8290_v25  ;;  %v8319_v6 = vor.u32 %v7464_v63, %v6684_v52  ;;  %v6396_v14 = vld [vmem:[#allocation7 + $0x190] sm:$0xf] }
  0x90   :  { %11068 = vst [vmem:[#allocation77_spill] sm:$0xff] %v8293_v27  ;;  %1667 = vmatpush.bf16.msrb.mxu0 %v8284_v4  ;;  %v8317_v4 = vor.u32 %v7400_v29, %v6428_v33  ;;  %v7452_v33 = vld [vmem:[#allocation7 + $0x394] sm:$0xf]  ;;  %v7384_v8 = vld [vmem:[#allocation7 + $0x16c] sm:$0xf0] }
  0x91   :  { %1693 = vmatpush.bf16.msrb.mxu2 %v8290_v25  ;;  %v6686_v25 = vld [vmem:[#allocation7 + $0x3f0] sm:$0xf0]  ;;  %11072 = vst [vmem:[#allocation81_spill] sm:$0xff] %v8319_v6 }
  0x92   :  { %661 = vmatmul.bf16.gmra.mxu0 %v8080_v62  ;;  %690 = vmatmul.bf16.gmra.mxu1 %v8080_v62  ;;  %11071 = vst [vmem:[#allocation80_spill] sm:$0xff] %v8317_v4  ;;  %v6654_v29 = vld [vmem:[#allocation7 + $0x3b0] sm:$0xf0] }
  0x93   :  { %719 = vmatmul.bf16.gmra.mxu2 %v8080_v62  ;;  %1705 = vmatpush.bf16.msrb.mxu3 %v8278_v56  ;;  %11073 = vst [vmem:[#allocation82_spill] sm:$0xff] %v8321_v16  ;;  %v8341_v48 = vor.u32 %v7452_v33, %v6654_v29  ;;  %v8355_v33 = vor.u32 %v7384_v8, %v6364_v58  ;;  %v7436_v58 = vld [vmem:[#allocation7 + $0x314] sm:$0xf] }
  0x94   :  { %748 = vmatmul.bf16.gmra.mxu3 %v8080_v62  ;;  %1680 = vmatpush.bf16.msrb.mxu1 %v8288_v49  ;;  %v951_v62 = vld [vmem:[%s10704_s1] sm:$0xff]  ;;  %v8313_v49 = vpack.c.bf16 %v952_v31, %v952_v31  ;;  %v7388_v31 = vld [vmem:[#allocation7 + $0x194] sm:$0xf] }
  0x95   :  { %v8309_v61 = vpack.c.bf16 %v951_v62, %v951_v62  ;;  %v7392_v62 = vld [vmem:[#allocation7 + $0x1ac] sm:$0xf0]  ;;  %v8336_v63 = vor.u32 %v7388_v31, %v6398_v12  ;;  %11079 = vst [vmem:[#allocation88_spill] sm:$0xff] %v8341_v48  ;;  %v8350_v12 = vld [vmem:[%s10708_s5] sm:$0xff]  ;;  %v6590_v8 = vld [vmem:[#allocation7 + $0x330] sm:$0xf0] }
  0x96   :  { %v8330_v52 = vor.u32 %v7392_v62, %v6396_v14  ;;  %v7380_v14 = vld [vmem:[#allocation7 + $0x154] sm:$0xf]  ;;  %11083 = vst [vmem:[#allocation92_spill] sm:$0xff] %v8355_v33 }
  0x97   :  { %1706 = vmatpush.bf16.msrb.mxu3 %v8293_v27  ;;  %11077 = vst [vmem:[#allocation86_spill] sm:$0xff] %v8336_v63  ;;  %v6366_v62 = vld [vmem:[#allocation7 + $0x170] sm:$0xf0] }
  0x98   :  { %11075 = vst [vmem:[#allocation84_spill] sm:$0xff] %v8330_v52 }
  0xa2   :  { %666 = vmatmul.bf16.gmra.mxu0 %v8121_v42  ;;  %695 = vmatmul.bf16.gmra.mxu1 %v8121_v42 }
  0xa3   :  { %724 = vmatmul.bf16.gmra.mxu2 %v8121_v42 }
  0xa4   :  { %753 = vmatmul.bf16.gmra.mxu3 %v8121_v42  ;;  %v7460_v42 = vld [vmem:[#allocation7 + $0x3d4] sm:$0xf] }
  0xa5   :  { %v8324_v57 = vor.u32 %v7460_v42, %v6686_v25  ;;  %v6620_v42 = vld [vmem:[#allocation7 + $0x350] sm:$0xf] }
  0xa7   :  { %11074 = vst [vmem:[#allocation83_spill] sm:$0xff] %v8324_v57 }
  0xaf   :  { %v8311_v27 = vpop.f32.mrf.mxu0  ;;  %v8315_v56 = vpop.f32.mrf.mxu1 }
  0xb0   :  { %11069 = vst [vmem:[#allocation78_spill] sm:$0xff] %v8311_v27  ;;  %v7456_v27 = vld [vmem:[#allocation7 + $0x3ac] sm:$0xf0] }
  0xb1   :  { %11070 = vst [vmem:[#allocation79_spill] sm:$0xff] %v8315_v56  ;;  %v8334_v25 = vor.u32 %v7456_v27, %v6652_v15  ;;  %v7444_v15 = vld [vmem:[#allocation7 + $0x354] sm:$0xf] }
  0xb2   :  { %1616 = vmatmul.bf16.vlgmr.msra.gmra.mxu0 %v8309_v61  ;;  %1629 = vmatmul.bf16.vlgmr.msra.gmra.mxu1 %v8313_v49  ;;  %v6622_v27 = vld [vmem:[#allocation7 + $0x370] sm:$0xf0] }
  0xb3   :  { %1642 = vmatmul.bf16.vlgmr.msra.gmra.mxu2 %v8309_v61  ;;  %1712 = vmatpush.bf16.msra.mxu0 %v8317_v4  ;;  %11076 = vst [vmem:[#allocation85_spill] sm:$0xff] %v8334_v25  ;;  %v7448_v4 = vld [vmem:[#allocation7 + $0x36c] sm:$0xf0] }
  0xb4   :  { %1655 = vmatmul.bf16.vlgmr.msra.gmra.mxu3 %v8313_v49  ;;  %1725 = vmatpush.bf16.msra.mxu1 %v8319_v6  ;;  %v8359_v29 = vor.u32 %v7448_v4, %v6620_v42 }
  0xb5   :  { %1738 = vmatpush.bf16.msra.mxu2 %v8321_v16  ;;  %1751 = vmatpush.bf16.msra.mxu3 %v8324_v57  ;;  %v6332_v57 = vld [vmem:[#allocation7 + $0x110] sm:$0xf] }
  0xb6   :  { %v8339_v56 = vpop.f32.mrf.mxu2  ;;  %11084 = vst [vmem:[#allocation93_spill] sm:$0xff] %v8359_v29  ;;  %v7376_v16 = vld [vmem:[#allocation7 + $0x12c] sm:$0xf0] }
  0xb7   :  { %11078 = vst [vmem:[#allocation87_spill] sm:$0xff] %v8339_v56  ;;  %v8343_v24 = vpop.f32.mrf.mxu3  ;;  %v8345_v6 = vpop.f32.mrf.mxu0  ;;  %1713 = vmatpush.bf16.msra.mxu0 %v8330_v52  ;;  %v8364_v56 = vor.u32 %v7444_v15, %v6622_v27  ;;  %v7440_v52 = vld [vmem:[#allocation7 + $0x32c] sm:$0xf0]  ;;  %v8370_v4 = vor.u32 %v7376_v16, %v6332_v57  ;;  %v7364_v57 = vld [vmem:[#allocation7 + $0xd4] sm:$0xf] }
  0xb8   :  { %11080 = vst [vmem:[#allocation89_spill] sm:$0xff] %v8343_v24  ;;  %v8353_v31 = vpop.f32.mrf.mxu1  ;;  %1726 = vmatpush.bf16.msra.mxu1 %v8334_v25  ;;  %v6588_v24 = vld [vmem:[#allocation7 + $0x310] sm:$0xf]  ;;  %v8367_v25 = vperm.slane %v8350_v12, 0  ;;  %v6302_v16 = vld [vmem:[#allocation7 + $0xf0] sm:$0xf0] }
  0xb9   :  { %11081 = vst [vmem:[#allocation90_spill] sm:$0xff] %v8345_v6  ;;  %1739 = vmatpush.bf16.msra.mxu2 %v8336_v63  ;;  %v8361_v6 = vor.u32 %v7380_v14, %v6366_v62  ;;  %1752 = vmatpush.bf16.msra.mxu3 %v8341_v48  ;;  %v8374_v42 = vor.u32 %v7440_v52, %v6588_v24  ;;  %v6300_v62 = vld [vmem:[#allocation7 + $0xd0] sm:$0xf]  ;;  %v6558_v52 = vld [vmem:[#allocation7 + $0x2f0] sm:$0xf0] }
  0xba   :  { %11082 = vst [vmem:[#allocation91_spill] sm:$0xff] %v8353_v31  ;;  %v6334_v31 = vld [vmem:[#allocation7 + $0x130] sm:$0xf0]  ;;  %v7368_v15 = vld [vmem:[#allocation7 + $0xec] sm:$0xf0]  ;;  %v8381_v63 = vor.u32 %v7436_v58, %v6590_v8 }
  0xbb   :  { %11085 = vst [vmem:[#allocation94_spill] sm:$0xff] %v8361_v6  ;;  %1714 = vmatpush.bf16.msra.mxu0 %v8355_v33  ;;  %v8376_v14 = vor.u32 %v7372_v45, %v6334_v31  ;;  %v6556_v27 = vld [vmem:[#allocation7 + $0x2d0] sm:$0xf]  ;;  %v7428_v45 = vld [vmem:[#allocation7 + $0x2d4] sm:$0xf] }
  0xbc   :  { %11086 = vst [vmem:[#allocation95_spill] sm:$0xff] %v8364_v56  ;;  %1727 = vmatpush.bf16.msra.mxu1 %v8359_v29  ;;  %v7432_v33 = vld [vmem:[#allocation7 + $0x2ec] sm:$0xf0]  ;;  %v8384_v29 = vperm.slane %v8350_v12, 1 }
  0xbd   :  { %11087 = vst [vmem:[#allocation96_spill] sm:$0xff] %v8367_v25  ;;  %1740 = vmatpush.bf16.msra.mxu2 %v8361_v6  ;;  %1753 = vmatpush.bf16.msra.mxu3 %v8364_v56  ;;  %v8399_v8 = vor.u32 %v7432_v33, %v6556_v27  ;;  %v6526_v33 = vld [vmem:[#allocation7 + $0x2b0] sm:$0xf0]  ;;  %v8410_v27 = vperm.slane %v8350_v12, 2 }
  0xbe   :  { %11088 = vst [vmem:[#allocation97_spill] sm:$0xff] %v8370_v4  ;;  %v8379_v48 = vpop.f32.mrf.mxu2 }
  0xbf   :  { %11089 = vst [vmem:[#allocation98_spill] sm:$0xff] %v8374_v42  ;;  %v8386_v6 = vpop.f32.mrf.mxu3  ;;  %v541_v24 = vpop.f32.mrf.mxu0  ;;  %1715 = vmatpush.bf16.msra.mxu0 %v8370_v4  ;;  %v6524_v4 = vld [vmem:[#allocation7 + $0x290] sm:$0xf] }
  0xc0   :  { %11090 = vst [vmem:[#allocation99_spill] sm:$0xff] %v8376_v14  ;;  %v8390_v31 = vadd.f32 %v541_v24, %v8367_v25  ;;  %v570_v56 = vpop.f32.mrf.mxu1  ;;  %1728 = vmatpush.bf16.msra.mxu1 %v8374_v42  ;;  %v7356_v24 = vld [vmem:[#allocation7 + $0x94] sm:$0xf]  ;;  %v6492_v42 = vld [vmem:[#allocation7 + $0x250] sm:$0xf] }
  0xc1   :  { %11091 = vst [vmem:[#allocation100_spill] sm:$0xff] %v8379_v48  ;;  %v8392_v48 = vor.u32 %v7368_v15, %v6300_v62  ;;  %1741 = vmatpush.bf16.msra.mxu2 %v8376_v14  ;;  %v8397_v58 = vadd.f32 %v570_v56, %v8384_v29  ;;  %1754 = vmatpush.bf16.msra.mxu3 %v8381_v63  ;;  %v7424_v15 = vld [vmem:[#allocation7 + $0x2ac] sm:$0xf0]  ;;  %v7420_v56 = vld [vmem:[#allocation7 + $0x294] sm:$0xf] }
  0xc2   :  { %11092 = vst [vmem:[#allocation101_spill] sm:$0xff] %v8381_v63  ;;  %1668 = vmatmul.bf16.vlgmr.msrb.gmra.mxu0 %v8309_v61  ;;  %v8405_v62 = vor.u32 %v7428_v45, %v6558_v52  ;;  %1681 = vmatmul.bf16.vlgmr.msrb.gmra.mxu1 %v8313_v49  ;;  %v8421_v45 = vor.u32 %v7424_v15, %v6524_v4  ;;  %v7352_v63 = vld [vmem:[#allocation7 + $0x6c] sm:$0xf0]  ;;  %v7412_v4 = vld [vmem:[#allocation7 + $0x254] sm:$0xf] }
  0xc3   :  { %11093 = vst [vmem:[#allocation102_spill] sm:$0xff] %v8384_v29  ;;  %1694 = vmatmul.bf16.vlgmr.msrb.gmra.mxu2 %v8309_v61  ;;  %1716 = vmatpush.bf16.msra.mxu0 %v8392_v48  ;;  %v8426_v44 = vor.u32 %v7420_v56, %v6526_v33  ;;  %v6204_v33 = vld [vmem:[#allocation7 + $0x10] sm:$0xf] }
  0xc4   :  { %11094 = vst [vmem:[#allocation103_spill] sm:$0xff] %v8386_v6  ;;  %v8401_v6 = vor.u32 %v7364_v57, %v6302_v16  ;;  %v8413_v57 = vperm.slane %v8350_v12, 3  ;;  %1707 = vmatmul.bf16.vlgmr.msrb.gmra.mxu3 %v8313_v49  ;;  %v8417_v16 = vor.u32 %v7360_v43, %v6268_v0  ;;  %1729 = vmatpush.bf16.msra.mxu1 %v8399_v8  ;;  %v6238_v43 = vld [vmem:[#allocation7 + $0x70] sm:$0xf0] }
  0xc5   :  { %11095 = vst [vmem:[#allocation104_spill] sm:$0xff] %v8390_v31  ;;  %v6270_v31 = vld [vmem:[#allocation7 + $0xb0] sm:$0xf0]  ;;  %1755 = vmatpush.bf16.msra.mxu3 %v8405_v62 }
  0xc6   :  { %11096 = vst [vmem:[#allocation105_spill] sm:$0xff] %v8392_v48  ;;  %1742 = vmatpush.bf16.msra.mxu2 %v8401_v6  ;;  %v8423_v52 = vor.u32 %v7356_v24, %v6270_v31  ;;  %v599_v14 = vpop.f32.mrf.mxu2  ;;  %v7348_v48 = vld [vmem:[#allocation7 + $0x54] sm:$0xf] }
  0xc7   :  { %11097 = vst [vmem:[#allocation106_spill] sm:$0xff] %v8397_v58  ;;  %v6236_v58 = vld [vmem:[#allocation7 + $0x50] sm:$0xf]  ;;  %v8429_v0 = vadd.f32 %v599_v14, %v8410_v27  ;;  %v6494_v31 = vld [vmem:[#allocation7 + $0x270] sm:$0xf0]  ;;  %1717 = vmatpush.bf16.msra.mxu0 %v8417_v16  ;;  %v8443_v14 = vor.u32 %v7416_v23, %v6492_v42 }
  0xc8   :  { %11098 = vst [vmem:[#allocation107_spill] sm:$0xff] %v8399_v8  ;;  %v628_v8 = vpop.f32.mrf.mxu3  ;;  %v8437_v24 = vpop.f32.mrf.mxu1  ;;  %v8439_v56 = vor.u32 %v7352_v63, %v6236_v58  ;;  %1730 = vmatpush.bf16.msra.mxu1 %v8421_v45  ;;  %v7404_v63 = vld [vmem:[#allocation7 + $0x214] sm:$0xf]  ;;  %v7465_v23 = vld [vmem:[#allocation7 + $0x3f4] sm:$0xf0] }
  0xc9   :  { %11099 = vst [vmem:[#allocation108_spill] sm:$0xff] %v8401_v6  ;;  %v8431_v6 = vpop.f32.mrf.mxu0  ;;  %v8434_v15 = vadd.f32 %v628_v8, %v8413_v57  ;;  %v7340_v8 = vld [vmem:[#allocation7 + $0x14] sm:$0xf]  ;;  %1756 = vmatpush.bf16.msra.mxu3 %v8426_v44  ;;  %v6438_v42 = vld [vmem:[#allocation7 + $0x1f8] sm:$0xf0] }
  0xca   :  { %11100 = vst [vmem:[#allocation109_spill] sm:$0xff] %v8405_v62  ;;  %v7344_v62 = vld [vmem:[#allocation7 + $0x2c] sm:$0xf0]  ;;  %1743 = vmatpush.bf16.msra.mxu2 %v8423_v52  ;;  %v6462_v58 = vld [vmem:[#allocation7 + $0x230] sm:$0xf0] }
  0xcb   :  { %11101 = vst [vmem:[#allocation110_spill] sm:$0xff] %v8410_v27  ;;  %1718 = vmatpush.bf16.msra.mxu0 %v8439_v56 }
  0xcc   :  { %11102 = vst [vmem:[#allocation111_spill] sm:$0xff] %v8413_v57  ;;  %1731 = vmatpush.bf16.msra.mxu1 %v8443_v14 }
  0xcd   :  { %11103 = vst [vmem:[#allocation112_spill] sm:$0xff] %v8417_v16  ;;  %v6436_v16 = vld [vmem:[#allocation7 + $0x1d8] sm:$0xf] }
  0xce   :  { %11104 = vst [vmem:[#allocation113_spill] sm:$0xff] %v8421_v45  ;;  %v8451_v45 = vor.u32 %v7344_v62, %v6204_v33  ;;  %v8464_v62 = vor.u32 %v7401_v3, %v6436_v16  ;;  %v7457_v3 = vld [vmem:[#allocation7 + $0x3b4] sm:$0xf0]  ;;  %v7389_v16 = vld [vmem:[#allocation7 + $0x19c] sm:$0xf] }
  0xcf   :  { %11105 = vst [vmem:[#allocation114_spill] sm:$0xff] %v8423_v52  ;;  %v8460_v52 = vpop.f32.mrf.mxu2 }
  0xd0   :  { %11106 = vst [vmem:[#allocation115_spill] sm:$0xff] %v8426_v44  ;;  %v6694_v44 = vld [vmem:[#allocation7 + $0x3f8] sm:$0xf0]  ;;  %v8466_v33 = vpop.f32.mrf.mxu3  ;;  %1719 = vmatpush.bf16.msra.mxu0 %v8451_v45 }
  0xd1   :  { %11107 = vst [vmem:[#allocation116_spill] sm:$0xff] %v8429_v0  ;;  %v6460_v0 = vld [vmem:[#allocation7 + $0x210] sm:$0xf]  ;;  %v546_v53 = vpop.f32.mrf.mxu0 }
  0xd2   :  { %11108 = vst [vmem:[#allocation117_spill] sm:$0xff] %v8431_v6  ;;  %v8445_v6 = vor.u32 %v7348_v48, %v6238_v43  ;;  %v7397_v48 = vld [vmem:[#allocation7 + $0x1dc] sm:$0xf]  ;;  %v8455_v43 = vor.u32 %v7408_v28, %v6460_v0  ;;  %v6404_v28 = vld [vmem:[#allocation7 + $0x198] sm:$0xf] }
  0xd3   :  { %11109 = vst [vmem:[#allocation118_spill] sm:$0xff] %v8434_v15  ;;  %v8448_v15 = vor.u32 %v7412_v4, %v6494_v31  ;;  %v7461_v31 = vld [vmem:[#allocation7 + $0x3dc] sm:$0xf]  ;;  %v7393_v0 = vld [vmem:[#allocation7 + $0x1b4] sm:$0xf0]  ;;  %1720 = vmatmul.bf16.vlgmr.msra.gmra.mxu0 %v8309_v61 }
  0xd4   :  { %11110 = vst [vmem:[#allocation119_spill] sm:$0xff] %v8437_v24  ;;  %v6206_v24 = vld [vmem:[#allocation7 + $0x30] sm:$0xf0]  ;;  %1744 = vmatpush.bf16.msra.mxu2 %v8445_v6  ;;  %1732 = vmatpush.bf16.msra.mxu1 %v8455_v43 }
  0xd5   :  { %11111 = vst [vmem:[#allocation120_spill] sm:$0xff] %v8439_v56  ;;  %v8457_v4 = vor.u32 %v7340_v8, %v6206_v24  ;;  %1757 = vmatpush.bf16.msra.mxu3 %v8448_v15  ;;  %v8462_v56 = vor.u32 %v7404_v63, %v6462_v58  ;;  %v6660_v24 = vld [vmem:[#allocation7 + $0x398] sm:$0xf]  ;;  %v8474_v8 = vadd.f32 %v546_v53, %v8367_v25  ;;  %v6406_v58 = vld [vmem:[#allocation7 + $0x1b8] sm:$0xf0] }
  0xd6   :  { %11112 = vst [vmem:[#allocation121_spill] sm:$0xff] %v8443_v14  ;;  %v8468_v14 = vor.u32 %v7465_v23, %v6692_v32  ;;  %v8476_v63 = vor.u32 %v7461_v31, %v6694_v44  ;;  %v7453_v23 = vld [vmem:[#allocation7 + $0x39c] sm:$0xf]  ;;  %1764 = vmatpush.bf16.msrb.mxu0 %v8464_v62  ;;  %v8485_v53 = vor.u32 %v7393_v0, %v6404_v28  ;;  %v6372_v31 = vld [vmem:[#allocation7 + $0x158] sm:$0xf] }
  0xd7   :  { %11113 = vst [vmem:[#allocation122_spill] sm:$0xff] %v8445_v6  ;;  %v8470_v6 = vor.u32 %v7397_v48, %v6438_v42  ;;  %v6662_v48 = vld [vmem:[#allocation7 + $0x3b8] sm:$0xf0]  ;;  %v8489_v44 = vor.u32 %v7457_v3, %v6660_v24  ;;  %v8491_v42 = vor.u32 %v7389_v16, %v6406_v58  ;;  %1733 = vmatmul.bf16.vlgmr.msra.gmra.mxu1 %v8313_v49  ;;  %v604_v16 = vpop.f32.mrf.mxu2 }
  0xd8   :  { %11114 = vst [vmem:[#allocation123_spill] sm:$0xff] %v8448_v15  ;;  %1745 = vmatpush.bf16.msra.mxu2 %v8457_v4  ;;  %1777 = vmatpush.bf16.msrb.mxu1 %v8468_v14  ;;  %v7381_v28 = vld [vmem:[#allocation7 + $0x15c] sm:$0xf]  ;;  %v7377_v15 = vld [vmem:[#allocation7 + $0x134] sm:$0xf0] }
  0xd9   :  { %11115 = vst [vmem:[#allocation124_spill] sm:$0xff] %v8451_v45  ;;  %1758 = vmatpush.bf16.msra.mxu3 %v8462_v56  ;;  %v6374_v0 = vld [vmem:[#allocation7 + $0x178] sm:$0xf0] }
  0xda   :  { %11116 = vst [vmem:[#allocation125_spill] sm:$0xff] %v8455_v43  ;;  %v7445_v24 = vld [vmem:[#allocation7 + $0x35c] sm:$0xf]  ;;  %1765 = vmatpush.bf16.msrb.mxu0 %v8485_v53  ;;  %v6340_v43 = vld [vmem:[#allocation7 + $0x118] sm:$0xf] }
  0xdb   :  { %11117 = vst [vmem:[#allocation126_spill] sm:$0xff] %v8457_v4  ;;  %1746 = vmatmul.bf16.vlgmr.msra.gmra.mxu2 %v8309_v61  ;;  %v6630_v3 = vld [vmem:[#allocation7 + $0x378] sm:$0xf0] }
  0xdc   :  { %11118 = vst [vmem:[#allocation127_spill] sm:$0xff] %v8460_v52  ;;  %v575_v52 = vpop.f32.mrf.mxu1  ;;  %1790 = vmatpush.bf16.msrb.mxu2 %v8470_v6  ;;  %1759 = vmatmul.bf16.vlgmr.msra.gmra.mxu3 %v8313_v49 }
  0xdd   :  { %11119 = vst [vmem:[#allocation128_spill] sm:$0xff] %v8462_v56  ;;  %v8481_v32 = vadd.f32 %v575_v52, %v8384_v29  ;;  %v6628_v52 = vld [vmem:[#allocation7 + $0x358] sm:$0xf]  ;;  %1803 = vmatpush.bf16.msrb.mxu3 %v8476_v63  ;;  %1778 = vmatpush.bf16.msrb.mxu1 %v8489_v44  ;;  %v8512_v56 = vor.u32 %v7381_v28, %v6374_v0 }
  0xde   :  { %11120 = vst [vmem:[#allocation129_spill] sm:$0xff] %v8464_v62 }
  0xdf   :  { %11121 = vst [vmem:[#allocation130_spill] sm:$0xff] %v8466_v33  ;;  %v7449_v33 = vld [vmem:[#allocation7 + $0x374] sm:$0xf0] }
  0xe0   :  { %11122 = vst [vmem:[#allocation131_spill] sm:$0xff] %v8468_v14  ;;  %1791 = vmatpush.bf16.msrb.mxu2 %v8491_v42  ;;  %v8510_v14 = vor.u32 %v7449_v33, %v6628_v52  ;;  %v6598_v33 = vld [vmem:[#allocation7 + $0x338] sm:$0xf0]  ;;  %v8523_v52 = vor.u32 %v7377_v15, %v6340_v43 }
  0xe1   :  { %11123 = vst [vmem:[#allocation132_spill] sm:$0xff] %v8470_v6  ;;  %v7429_v15 = vld [vmem:[#allocation7 + $0x2dc] sm:$0xf] }
  0xe2   :  { %11124 = vst [vmem:[#allocation133_spill] sm:$0xff] %v8474_v8  ;;  %v7385_v8 = vld [vmem:[#allocation7 + $0x174] sm:$0xf0]  ;;  %1779 = vmatpush.bf16.msrb.mxu1 %v8510_v14  ;;  %v6566_v43 = vld [vmem:[#allocation7 + $0x2f8] sm:$0xf0] }
  0xe3   :  { %11125 = vst [vmem:[#allocation134_spill] sm:$0xff] %v8476_v63  ;;  %v8501_v58 = vor.u32 %v7385_v8, %v6372_v31  ;;  %v8508_v63 = vpop.f32.mrf.mxu0 }
  0xe4   :  { %11126 = vst [vmem:[#allocation135_spill] sm:$0xff] %v8481_v32  ;;  %v8495_v32 = vor.u32 %v7453_v23, %v6662_v48  ;;  %v8506_v23 = vadd.f32 %v604_v16, %v8410_v27  ;;  %v633_v48 = vpop.f32.mrf.mxu3  ;;  %v8518_v31 = vpop.f32.mrf.mxu1  ;;  %v7441_v16 = vld [vmem:[#allocation7 + $0x334] sm:$0xf0]  ;;  %1792 = vmatpush.bf16.msrb.mxu2 %v8512_v56 }
  0xe5   :  { %11127 = vst [vmem:[#allocation136_spill] sm:$0xff] %v8485_v53  ;;  %v6596_v53 = vld [vmem:[#allocation7 + $0x318] sm:$0xf]  ;;  %v8516_v8 = vadd.f32 %v633_v48, %v8413_v57  ;;  %1766 = vmatpush.bf16.msrb.mxu0 %v8501_v58 }
  0xe6   :  { %11128 = vst [vmem:[#allocation137_spill] sm:$0xff] %v8489_v44  ;;  %1804 = vmatpush.bf16.msrb.mxu3 %v8495_v32  ;;  %v8520_v44 = vor.u32 %v7445_v24, %v6630_v3  ;;  %v8527_v28 = vor.u32 %v7441_v16, %v6596_v53  ;;  %v6308_v48 = vld [vmem:[#allocation7 + $0xd8] sm:$0xf] }
  0xe7   :  { %11129 = vst [vmem:[#allocation138_spill] sm:$0xff] %v8491_v42  ;;  %v6342_v42 = vld [vmem:[#allocation7 + $0x138] sm:$0xf0]  ;;  %v7369_v24 = vld [vmem:[#allocation7 + $0xf4] sm:$0xf0] }
  0xe8   :  { %11130 = vst [vmem:[#allocation139_spill] sm:$0xff] %v8495_v32  ;;  %v6564_v3 = vld [vmem:[#allocation7 + $0x2d8] sm:$0xf]  ;;  %v7365_v32 = vld [vmem:[#allocation7 + $0xdc] sm:$0xf]  ;;  %v8537_v53 = vor.u32 %v7369_v24, %v6308_v48  ;;  %1780 = vmatpush.bf16.msrb.mxu1 %v8527_v28  ;;  %v8551_v24 = vor.u32 %v7429_v15, %v6566_v43 }
  0xe9   :  { %11131 = vst [vmem:[#allocation140_spill] sm:$0xff] %v8501_v58  ;;  %v6310_v58 = vld [vmem:[#allocation7 + $0xf8] sm:$0xf0]  ;;  %1767 = vmatpush.bf16.msrb.mxu0 %v8523_v52  ;;  %v6244_v43 = vld [vmem:[#allocation7 + $0x58] sm:$0xf] }
  0xea   :  { %11132 = vst [vmem:[#allocation141_spill] sm:$0xff] %v8506_v23  ;;  %v7373_v23 = vld [vmem:[#allocation7 + $0x11c] sm:$0xf]  ;;  %1805 = vmatpush.bf16.msrb.mxu3 %v8520_v44  ;;  %v8545_v16 = vor.u32 %v7365_v32, %v6310_v58 }
  0xeb   :  { %11133 = vst [vmem:[#allocation142_spill] sm:$0xff] %v8508_v63  ;;  %v7437_v63 = vld [vmem:[#allocation7 + $0x31c] sm:$0xf]  ;;  %v8529_v0 = vor.u32 %v7373_v23, %v6342_v42  ;;  %v551_v23 = vpop.f32.mrf.mxu0 }
  0xec   :  { %11134 = vst [vmem:[#allocation143_spill] sm:$0xff] %v8510_v14  ;;  %v8535_v14 = vpop.f32.mrf.mxu2  ;;  %v8541_v42 = vpop.f32.mrf.mxu3  ;;  %v6534_v32 = vld [vmem:[#allocation7 + $0x2b8] sm:$0xf0] }
  0xed   :  { %11135 = vst [vmem:[#allocation144_spill] sm:$0xff] %v8512_v56  ;;  %1793 = vmatpush.bf16.msrb.mxu2 %v8529_v0  ;;  %v6532_v56 = vld [vmem:[#allocation7 + $0x298] sm:$0xf]  ;;  %v580_v48 = vpop.f32.mrf.mxu1  ;;  %1768 = vmatpush.bf16.msrb.mxu0 %v8537_v53 }
  0xee   :  { %11136 = vst [vmem:[#allocation145_spill] sm:$0xff] %v8516_v8  ;;  %v7433_v8 = vld [vmem:[#allocation7 + $0x2f4] sm:$0xf0] }
  0xef   :  { %11137 = vst [vmem:[#allocation146_spill] sm:$0xff] %v8518_v31  ;;  %v8532_v31 = vor.u32 %v7437_v63, %v6598_v33  ;;  %v8543_v63 = vor.u32 %v7433_v8, %v6564_v3  ;;  %v6276_v33 = vld [vmem:[#allocation7 + $0x98] sm:$0xf]  ;;  %v7421_v8 = vld [vmem:[#allocation7 + $0x29c] sm:$0xf] }
  0xf0   :  { %11138 = vst [vmem:[#allocation147_spill] sm:$0xff] %v8520_v44  ;;  %v7361_v44 = vld [vmem:[#allocation7 + $0xb4] sm:$0xf0] }
  0xf1   :  { %11139 = vst [vmem:[#allocation148_spill] sm:$0xff] %v8523_v52  ;;  %1806 = vmatpush.bf16.msrb.mxu3 %v8532_v31  ;;  %v6278_v52 = vld [vmem:[#allocation7 + $0xb8] sm:$0xf0]  ;;  %v8557_v58 = vor.u32 %v7361_v44, %v6276_v33  ;;  %1781 = vmatpush.bf16.msrb.mxu1 %v8543_v63 }
  0xf2   :  { %11140 = vst [vmem:[#allocation149_spill] sm:$0xff] %v8527_v28  ;;  %v7425_v28 = vld [vmem:[#allocation7 + $0x2b4] sm:$0xf0]  ;;  %1794 = vmatpush.bf16.msrb.mxu2 %v8545_v16  ;;  %v7413_v44 = vld [vmem:[#allocation7 + $0x25c] sm:$0xf] }
  0xf3   :  { %11141 = vst [vmem:[#allocation150_spill] sm:$0xff] %v8529_v0  ;;  %v7357_v0 = vld [vmem:[#allocation7 + $0x9c] sm:$0xf]  ;;  %v8561_v3 = vor.u32 %v7425_v28, %v6532_v56  ;;  %1769 = vmatpush.bf16.msrb.mxu0 %v8557_v58  ;;  %v8576_v28 = vpop.f32.mrf.mxu0 }
  0xf4   :  { %11142 = vst [vmem:[#allocation151_spill] sm:$0xff] %v8532_v31  ;;  %v8563_v15 = vor.u32 %v7357_v0, %v6278_v52  ;;  %v7349_v31 = vld [vmem:[#allocation7 + $0x5c] sm:$0xf]  ;;  %v638_v52 = vpop.f32.mrf.mxu3 }
  0xf5   :  { %11143 = vst [vmem:[#allocation152_spill] sm:$0xff] %v8535_v14  ;;  %v8549_v14 = vadd.f32 %v551_v23, %v8367_v25  ;;  %v7353_v23 = vld [vmem:[#allocation7 + $0x74] sm:$0xf0]  ;;  %1807 = vmatpush.bf16.msrb.mxu3 %v8551_v24  ;;  %v6502_v33 = vld [vmem:[#allocation7 + $0x278] sm:$0xf0]  ;;  %1782 = vmatpush.bf16.msrb.mxu1 %v8561_v3 }
  0xf6   :  { %11144 = vst [vmem:[#allocation153_spill] sm:$0xff] %v8537_v53  ;;  %v6246_v53 = vld [vmem:[#allocation7 + $0x78] sm:$0xf0]  ;;  %1795 = vmatpush.bf16.msrb.mxu2 %v8563_v15 }
  0xf7   :  { %11145 = vst [vmem:[#allocation154_spill] sm:$0xff] %v8541_v42  ;;  %v8554_v42 = vadd.f32 %v580_v48, %v8384_v29  ;;  %v8566_v48 = vor.u32 %v7421_v8, %v6534_v32  ;;  %v8580_v8 = vor.u32 %v7349_v31, %v6246_v53  ;;  %v6212_v32 = vld [vmem:[#allocation7 + $0x18] sm:$0xf] }
  0xf8   :  { %11146 = vst [vmem:[#allocation155_spill] sm:$0xff] %v8543_v63  ;;  %v609_v63 = vpop.f32.mrf.mxu2 }
  0xf9   :  { %11147 = vst [vmem:[#allocation156_spill] sm:$0xff] %v8545_v16  ;;  %v8569_v16 = vor.u32 %v7353_v23, %v6244_v43  ;;  %v8574_v56 = vadd.f32 %v609_v63, %v8410_v27  ;;  %1808 = vmatpush.bf16.msrb.mxu3 %v8566_v48  ;;  %v8584_v43 = vadd.f32 %v638_v52, %v8413_v57  ;;  %v8586_v23 = vpop.f32.mrf.mxu1  ;;  %v7409_v63 = vld [vmem:[#allocation7 + $0x234] sm:$0xf0] }
  0xfa   :  { %11148 = vst [vmem:[#allocation157_spill] sm:$0xff] %v8549_v14  ;;  %v6500_v14 = vld [vmem:[#allocation7 + $0x258] sm:$0xf]  ;;  %1796 = vmatpush.bf16.msrb.mxu2 %v8580_v8 }
  0xfb   :  { %11149 = vst [vmem:[#allocation158_spill] sm:$0xff] %v8551_v24  ;;  %v7345_v24 = vld [vmem:[#allocation7 + $0x34] sm:$0xf0]  ;;  %1770 = vmatpush.bf16.msrb.mxu0 %v8569_v16  ;;  %v8609_v52 = vpop.f32.mrf.mxu0 }
  0xfc   :  { %11150 = vst [vmem:[#allocation159_spill] sm:$0xff] %v8554_v42  ;;  %v7417_v42 = vld [vmem:[#allocation7 + $0x274] sm:$0xf0]  ;;  %v8591_v31 = vor.u32 %v7345_v24, %v6212_v32  ;;  %v8607_v24 = vpop.f32.mrf.mxu3 }
  0xfd   :  { %11151 = vst [vmem:[#allocation160_spill] sm:$0xff] %v8557_v58  ;;  %v8578_v0 = vor.u32 %v7417_v42, %v6500_v14  ;;  %v6468_v58 = vld [vmem:[#allocation7 + $0x218] sm:$0xf]  ;;  %v6470_v14 = vld [vmem:[#allocation7 + $0x238] sm:$0xf0] }
  0xfe   :  { %11152 = vst [vmem:[#allocation161_spill] sm:$0xff] %v8561_v3  ;;  %v8588_v3 = vor.u32 %v7413_v44, %v6502_v33  ;;  %v8595_v53 = vor.u32 %v7409_v63, %v6468_v58  ;;  %v8646_v63 = vperm.slane %v8350_v12, 5 }
  0xff   :  { %11153 = vst [vmem:[#allocation162_spill] sm:$0xff] %v8563_v15  ;;  %v6214_v15 = vld [vmem:[#allocation7 + $0x38] sm:$0xf0]  ;;  %1783 = vmatpush.bf16.msrb.mxu1 %v8578_v0  ;;  %1771 = vmatpush.bf16.msrb.mxu0 %v8591_v31 }
 0x100   :  { %11154 = vst [vmem:[#allocation163_spill] sm:$0xff] %v8566_v48  ;;  %1809 = vmatpush.bf16.msrb.mxu3 %v8588_v3  ;;  %v8603_v33 = vpop.f32.mrf.mxu2 }
 0x101   :  { %11155 = vst [vmem:[#allocation164_spill] sm:$0xff] %v8569_v16  ;;  %v8612_v58 = vpop.f32.mrf.mxu1 }
 0x102   :  { %11156 = vst [vmem:[#allocation165_spill] sm:$0xff] %v8574_v56  ;;  %v7341_v56 = vld [vmem:[#allocation7 + $0x1c] sm:$0xf]  ;;  %1772 = vmatmul.bf16.vlgmr.msrb.gmra.mxu0 %v8309_v61 }
 0x103   :  { %11157 = vst [vmem:[#allocation166_spill] sm:$0xff] %v8576_v28  ;;  %v7405_v28 = vld [vmem:[#allocation7 + $0x21c] sm:$0xf]  ;;  %v8597_v42 = vor.u32 %v7341_v56, %v6214_v15  ;;  %1784 = vmatpush.bf16.msrb.mxu1 %v8595_v53  ;;  %1965 = vmatpush.bf16.msra.mxu0 %v8086_v7 }
 0x104   :  { %11158 = vst [vmem:[#allocation167_spill] sm:$0xff] %v8578_v0  ;;  %v8600_v44 = vor.u32 %v7405_v28, %v6470_v14  ;;  %v8626_v56 = vpop.f32.mrf.mxu3  ;;  %v8628_v28 = vpop.f32.mrf.mxu0 }
 0x105   :  { %11159 = vst [vmem:[#allocation168_spill] sm:$0xff] %v8580_v8  ;;  %1797 = vmatpush.bf16.msrb.mxu2 %v8597_v42 }
 0x106   :  { %11160 = vst [vmem:[#allocation169_spill] sm:$0xff] %v8584_v43  ;;  %1810 = vmatpush.bf16.msrb.mxu3 %v8600_v44  ;;  %1785 = vmatmul.bf16.vlgmr.msrb.gmra.mxu1 %v8313_v49 }
 0x107   :  { %11161 = vst [vmem:[#allocation170_spill] sm:$0xff] %v8586_v23  ;;  %1978 = vmatpush.bf16.msra.mxu1 %v8088_v11  ;;  %1966 = vmatpush.bf16.msra.mxu0 %v8097_v21 }
 0x108   :  { %11162 = vst [vmem:[#allocation171_spill] sm:$0xff] %v8588_v3  ;;  %1798 = vmatmul.bf16.vlgmr.msrb.gmra.mxu2 %v8309_v61  ;;  %v8624_v15 = vpop.f32.mrf.mxu2 }
 0x109   :  { %11163 = vst [vmem:[#allocation172_spill] sm:$0xff] %v8591_v31  ;;  %1991 = vmatpush.bf16.msra.mxu2 %v8090_v13  ;;  %1811 = vmatmul.bf16.vlgmr.msrb.gmra.mxu3 %v8313_v49  ;;  %v8631_v32 = vpop.f32.mrf.mxu1  ;;  %v8641_v49 = vperm.slane %v8350_v12, 4 }
 0x10a   :  { %11164 = vst [vmem:[#allocation173_spill] sm:$0xff] %v8595_v53  ;;  %2004 = vmatpush.bf16.msra.mxu3 %v8093_v17 }
 0x10b   :  { %11165 = vst [vmem:[#allocation174_spill] sm:$0xff] %v8597_v42  ;;  %1979 = vmatpush.bf16.msra.mxu1 %v8099_v22  ;;  %1967 = vmatpush.bf16.msra.mxu0 %v8107_v35 }
 0x10c   :  { %11166 = vst [vmem:[#allocation175_spill] sm:$0xff] %v8600_v44  ;;  %v8648_v14 = vpop.f32.mrf.mxu3 }
 0x10d   :  { %11167 = vst [vmem:[#allocation176_spill] sm:$0xff] %v8603_v33  ;;  %1992 = vmatpush.bf16.msra.mxu2 %v8102_v26 }
 0x10e   :  { %11168 = vst [vmem:[#allocation177_spill] sm:$0xff] %v8607_v24  ;;  %2005 = vmatpush.bf16.msra.mxu3 %v8104_v30  ;;  %v657_v24 = vpop.f32.mrf.mxu0 }
 0x10f   :  { %11169 = vst [vmem:[#allocation178_spill] sm:$0xff] %v8628_v28  ;;  %1980 = vmatpush.bf16.msra.mxu1 %v8111_v39  ;;  %1968 = vmatpush.bf16.msra.mxu0 %v8131_v46  ;;  %v8652_v33 = vadd.f32 %v657_v24, %v8641_v49  ;;  %v8668_v24 = vperm.slane %v8350_v12, 7 }
 0x110   :  { %11170 = vst [vmem:[#allocation179_spill] sm:$0xff] %v8631_v32  ;;  %v8643_v61 = vpop.f32.mrf.mxu2 }
 0x111   :  { %1993 = vmatpush.bf16.msra.mxu2 %v8113_v40  ;;  %11171 = vst [vmem:[#allocation180_spill] sm:$0xff] %v8641_v49  ;;  %v686_v23 = vpop.f32.mrf.mxu1 }
 0x112   :  { %2006 = vmatpush.bf16.msra.mxu3 %v8116_v41  ;;  %11172 = vst [vmem:[#allocation181_spill] sm:$0xff] %v8643_v61  ;;  %v8657_v43 = vadd.f32 %v686_v23, %v8646_v63 }
 0x113   :  { %11173 = vst [vmem:[#allocation182_spill] sm:$0xff] %v8646_v63  ;;  %1981 = vmatpush.bf16.msra.mxu1 %v8133_v50  ;;  %1969 = vmatpush.bf16.msra.mxu0 %v8142_v59 }
 0x114   :  { %11174 = vst [vmem:[#allocation183_spill] sm:$0xff] %v8648_v14  ;;  %v8664_v14 = vperm.slane %v8350_v12, 6 }
 0x115   :  { %1994 = vmatpush.bf16.msra.mxu2 %v8135_v51  ;;  %11175 = vst [vmem:[#allocation184_spill] sm:$0xff] %v8652_v33 }
 0x116   :  { %2007 = vmatpush.bf16.msra.mxu3 %v8138_v55  ;;  %11176 = vst [vmem:[#allocation185_spill] sm:$0xff] %v8657_v43  ;;  %v744_v43 = vpop.f32.mrf.mxu3  ;;  %v8673_v61 = vpop.f32.mrf.mxu0 }
 0x117   :  { %1982 = vmatpush.bf16.msra.mxu1 %v8144_v60  ;;  %1970 = vmatpush.bf16.msra.mxu0 %v8152_v10  ;;  %11177 = vst [vmem:[#allocation186_spill] sm:$0xff] %v8664_v14  ;;  %v8677_v32 = vadd.f32 %v744_v43, %v8668_v24 }
 0x118   :  { %11178 = vst [vmem:[#allocation187_spill] sm:$0xff] %v8668_v24  ;;  %v715_v33 = vpop.f32.mrf.mxu2 }
 0x119   :  { %1995 = vmatpush.bf16.msra.mxu2 %v8147_v1  ;;  %v8671_v23 = vadd.f32 %v715_v33, %v8664_v14  ;;  %11180 = vst [vmem:[#allocation189_spill] sm:$0xff] %v8673_v61  ;;  %v8679_v28 = vpop.f32.mrf.mxu1 }
 0x11a   :  { %2008 = vmatpush.bf16.msra.mxu3 %v8149_v5  ;;  %11181 = vst [vmem:[#allocation190_spill] sm:$0xff] %v8677_v32 }
 0x11b   :  { %11179 = vst [vmem:[#allocation188_spill] sm:$0xff] %v8671_v23  ;;  %1983 = vmatpush.bf16.msra.mxu1 %v8156_v18  ;;  %1971 = vmatpush.bf16.msra.mxu0 %v8167_v34  ;;  %v11187_v23 = vld [vmem:[#allocation45_spill] sm:$0xff] }
 0x11c   :  { %11182 = vst [vmem:[#allocation191_spill] sm:$0xff] %v8679_v28  ;;  %v11185_v28 = vld [vmem:[#allocation43_spill] sm:$0xff] }
 0x11d   :  { %1996 = vmatpush.bf16.msra.mxu2 %v8158_v19 }
 0x11e   :  { %2009 = vmatpush.bf16.msra.mxu3 %v8161_v20  ;;  %v8692_v43 = vpop.f32.mrf.mxu3  ;;  %v662_v33 = vpop.f32.mrf.mxu0 }
 0x11f   :  { %1984 = vmatpush.bf16.msra.mxu1 %v8169_v36  ;;  %1972 = vmatpush.bf16.msra.mxu0 %v8180_v47  ;;  %11184 = vst [vmem:[#allocation193_spill] sm:$0xff] %v8692_v43  ;;  %v8696_v61 = vadd.f32 %v662_v33, %v8641_v49  ;;  %v11193_v43 = vld [vmem:[#allocation51_spill] sm:$0xff]  ;;  %v11195_v33 = vld [vmem:[#allocation53_spill] sm:$0xff] }
 0x120   :  { %v8689_v12 = vpop.f32.mrf.mxu2 }
 0x121   :  { %1997 = vmatpush.bf16.msra.mxu2 %v8171_v37  ;;  %11183 = vst [vmem:[#allocation192_spill] sm:$0xff] %v8689_v12  ;;  %v691_v32 = vpop.f32.mrf.mxu1  ;;  %v11191_v12 = vld [vmem:[#allocation49_spill] sm:$0xff] }
 0x122   :  { %2010 = vmatpush.bf16.msra.mxu3 %v8174_v38  ;;  %11186 = vst [vmem:[#allocation194_spill] sm:$0xff] %v8696_v61  ;;  %v11188_v38 = vld [vmem:[#allocation47_spill] sm:$0xff]  ;;  %v8701_v36 = vadd.f32 %v691_v32, %v8646_v63 }
 0x123   :  { %2017 = vmatpush.bf16.msrb.mxu0 %v8191_v2  ;;  %1985 = vmatpush.bf16.msra.mxu1 %v11185_v28  ;;  %v11190_v2 = vld [vmem:[#allocation50_spill] sm:$0xff] }
 0x124   :  { %11189 = vst [vmem:[#allocation195_spill] sm:$0xff] %v8701_v36  ;;  %v11194_v28 = vld [vmem:[#allocation54_spill] sm:$0xff] }
 0x125   :  { %1998 = vmatpush.bf16.msra.mxu2 %v8186_v54  ;;  %v11196_v54 = vld [vmem:[#allocation56_spill] sm:$0xff] }
 0x126   :  { %2011 = vmatpush.bf16.msra.mxu3 %v11187_v23  ;;  %v749_v32 = vpop.f32.mrf.mxu3  ;;  %v8713_v36 = vpop.f32.mrf.mxu0 }
 0x127   :  { %2030 = vmatpush.bf16.msrb.mxu1 %v11188_v38  ;;  %2018 = vmatpush.bf16.msrb.mxu0 %v11190_v2  ;;  %11198 = vst [vmem:[#allocation197_spill] sm:$0xff] %v8713_v36  ;;  %v8716_v23 = vadd.f32 %v749_v32, %v8668_v24  ;;  %v11209_v32 = vld [vmem:[#allocation64_spill] sm:$0xff] }
 0x128   :  { %v720_v61 = vpop.f32.mrf.mxu2 }
 0x129   :  { %2043 = vmatpush.bf16.msrb.mxu2 %v8196_v9  ;;  %v11192_v9 = vld [vmem:[#allocation52_spill] sm:$0xff]  ;;  %v8711_v38 = vadd.f32 %v720_v61, %v8664_v14  ;;  %11199 = vst [vmem:[#allocation198_spill] sm:$0xff] %v8716_v23  ;;  %v11206_v61 = vld [vmem:[#allocation62_spill] sm:$0xff] }
 0x12a   :  { %2056 = vmatpush.bf16.msrb.mxu3 %v11191_v12  ;;  %v8718_v12 = vpop.f32.mrf.mxu1 }
 0x12b   :  { %2031 = vmatpush.bf16.msrb.mxu1 %v11193_v43  ;;  %2019 = vmatpush.bf16.msrb.mxu0 %v11194_v28  ;;  %11197 = vst [vmem:[#allocation196_spill] sm:$0xff] %v8711_v38  ;;  %v11202_v43 = vld [vmem:[#allocation58_spill] sm:$0xff]  ;;  %v11203_v28 = vld [vmem:[#allocation57_spill] sm:$0xff] }
 0x12c   :  { %11200 = vst [vmem:[#allocation199_spill] sm:$0xff] %v8718_v12  ;;  %v11207_v38 = vld [vmem:[#allocation61_spill] sm:$0xff] }
 0x12d   :  { %2044 = vmatpush.bf16.msrb.mxu2 %v11192_v9  ;;  %v11201_v9 = vld [vmem:[#allocation55_spill] sm:$0xff] }
 0x12e   :  { %2057 = vmatpush.bf16.msrb.mxu3 %v11195_v33  ;;  %v11204_v33 = vld [vmem:[#allocation60_spill] sm:$0xff]  ;;  %v8730_v23 = vpop.f32.mrf.mxu3  ;;  %v667_v12 = vpop.f32.mrf.mxu0 }
 0x12f   :  { %2032 = vmatpush.bf16.msrb.mxu1 %v11201_v9  ;;  %2020 = vmatpush.bf16.msrb.mxu0 %v11202_v43  ;;  %11210 = vst [vmem:[#allocation201_spill] sm:$0xff] %v8730_v23  ;;  %v8733_v9 = vadd.f32 %v667_v12, %v8641_v49  ;;  %v11219_v23 = vld [vmem:[#allocation69_spill] sm:$0xff] }
 0x130   :  { %v8727_v36 = vpop.f32.mrf.mxu2 }
 0x131   :  { %2045 = vmatpush.bf16.msrb.mxu2 %v11196_v54  ;;  %v11205_v54 = vld [vmem:[#allocation59_spill] sm:$0xff]  ;;  %11208 = vst [vmem:[#allocation200_spill] sm:$0xff] %v8727_v36 }
 0x132   :  { %2058 = vmatpush.bf16.msrb.mxu3 %v11203_v28  ;;  %11211 = vst [vmem:[#allocation202_spill] sm:$0xff] %v8733_v9  ;;  %v696_v43 = vpop.f32.mrf.mxu1  ;;  %v11212_v28 = vld [vmem:[#allocation63_spill] sm:$0xff]  ;;  %v11220_v9 = vld [vmem:[#allocation72_spill] sm:$0xff] }
 0x133   :  { %2033 = vmatpush.bf16.msrb.mxu1 %v11205_v54  ;;  %2021 = vmatpush.bf16.msrb.mxu0 %v11206_v61  ;;  %v11214_v54 = vld [vmem:[#allocation66_spill] sm:$0xff]  ;;  %v11215_v61 = vld [vmem:[#allocation65_spill] sm:$0xff]  ;;  %v11217_v36 = vld [vmem:[#allocation67_spill] sm:$0xff] }
 0x135   :  { %2046 = vmatpush.bf16.msrb.mxu2 %v11204_v33  ;;  %v8737_v33 = vadd.f32 %v696_v43, %v8646_v63 }
 0x136   :  { %2059 = vmatpush.bf16.msrb.mxu3 %v11207_v38  ;;  %v11216_v38 = vld [vmem:[#allocation68_spill] sm:$0xff]  ;;  %v754_v43 = vpop.f32.mrf.mxu3 }
 0x137   :  { %2034 = vmatpush.bf16.msrb.mxu1 %v11212_v28  ;;  %11213 = vst [vmem:[#allocation203_spill] sm:$0xff] %v8737_v33  ;;  %2022 = vmatpush.bf16.msrb.mxu0 %v11214_v54  ;;  %v8749_v33 = vpop.f32.mrf.mxu0  ;;  %v8752_v54 = vadd.f32 %v754_v43, %v8668_v24 }
 0x138   :  { %v725_v12 = vpop.f32.mrf.mxu2  ;;  %11222 = vst [vmem:[#allocation205_spill] sm:$0xff] %v8749_v33 }
 0x139   :  { %2047 = vmatpush.bf16.msrb.mxu2 %v11209_v32  ;;  %v11218_v32 = vld [vmem:[#allocation70_spill] sm:$0xff]  ;;  %v8747_v28 = vadd.f32 %v725_v12, %v8664_v14  ;;  %11223 = vst [vmem:[#allocation206_spill] sm:$0xff] %v8752_v54  ;;  %v11230_v12 = vld [vmem:[#allocation77_spill] sm:$0xff] }
 0x13a   :  { %2060 = vmatpush.bf16.msrb.mxu3 %v11215_v61  ;;  %v8754_v61 = vpop.f32.mrf.mxu1 }
 0x13b   :  { %2035 = vmatpush.bf16.msrb.mxu1 %v11217_v36  ;;  %2023 = vmatpush.bf16.msrb.mxu0 %v11218_v32  ;;  %11221 = vst [vmem:[#allocation204_spill] sm:$0xff] %v8747_v28  ;;  %v11226_v36 = vld [vmem:[#allocation74_spill] sm:$0xff]  ;;  %v11227_v32 = vld [vmem:[#allocation73_spill] sm:$0xff] }
 0x13c   :  { %11224 = vst [vmem:[#allocation207_spill] sm:$0xff] %v8754_v61  ;;  %v11233_v61 = vld [vmem:[#allocation78_spill] sm:$0xff] }
 0x13d   :  { %2048 = vmatpush.bf16.msrb.mxu2 %v11216_v38  ;;  %v11225_v38 = vld [vmem:[#allocation71_spill] sm:$0xff]  ;;  %v537_v2 = vadd.f32 %v11233_v61, %v8367_v25 }
 0x13e   :  { %2061 = vmatpush.bf16.msrb.mxu3 %v11219_v23  ;;  %v11228_v23 = vld [vmem:[#allocation76_spill] sm:$0xff]  ;;  %v8764_v33 = vpop.f32.mrf.mxu3 }
 0x13f   :  { %2036 = vmatpush.bf16.msrb.mxu1 %v11225_v38  ;;  %2024 = vmatpush.bf16.msrb.mxu0 %v11226_v36  ;;  %11232 = vst [vmem:[#allocation209_spill] sm:$0xff] %v8764_v33  ;;  %v1617_v43 = vpop.f32.mrf.mxu0 }
 0x140   :  { %v8762_v28 = vpop.f32.mrf.mxu2 }
 0x141   :  { %2049 = vmatpush.bf16.msrb.mxu2 %v11220_v9  ;;  %v11229_v9 = vld [vmem:[#allocation75_spill] sm:$0xff]  ;;  %11231 = vst [vmem:[#allocation208_spill] sm:$0xff] %v8762_v28 }
 0x142   :  { %2062 = vmatpush.bf16.msrb.mxu3 %v11227_v32  ;;  %v1630_v54 = vpop.f32.mrf.mxu1 }
 0x143   :  { %2037 = vmatpush.bf16.msrb.mxu1 %v11229_v9  ;;  %v1631_v38 = vadd.f32 %v1630_v54, %v1617_v43  ;;  %v11234_v9 = vld [vmem:[#allocation79_spill] sm:$0xff] }
 0x144   :  { %v566_v18 = vadd.f32 %v11234_v9, %v8384_v29 }
 0x145   :  { %2050 = vmatpush.bf16.msrb.mxu2 %v11228_v23  ;;  %v1816_v47 = vadd.f32 %v1631_v38, %v537_v2 }
 0x146   :  { %2063 = vmatpush.bf16.msrb.mxu3 %v11230_v12  ;;  %v1656_v32 = vpop.f32.mrf.mxu3 }
 0x147   :  { %v6698_v36 = vmul.f32 -1.442695, %v1816_v47  ;;  %v1619_v23 = vpop.f32.mrf.mxu0  ;;  %v11235_v47 = vld [vmem:[#allocation87_spill] sm:$0xff] }
 0x148   :  { %v1643_v20 = vpop.f32.mrf.mxu2 }
 0x149   :  { %7607 = vpow2.f32 %v6698_v36  ;;  %v1657_v12 = vadd.f32 %v1656_v32, %v1643_v20  ;;  %v595_v36 = vadd.f32 %v11235_v47, %v8410_v27 }
 0x14a   :  { %v1632_v37 = vpop.f32.mrf.mxu1 }
 0x14b   :  { %v1817_v28 = vadd.f32 %v1657_v12, %v566_v18 }
 0x14d   :  { %v6699_v34 = vmul.f32 -1.442695, %v1817_v28 }
 0x14e   :  { %v1658_v61 = vpop.f32.mrf.mxu3 }
 0x14f   :  { %v7608_v33 = vpop.eup %7607  ;;  %7609 = vpow2.f32 %v6699_v34  ;;  %v1669_v54 = vpop.f32.mrf.mxu0 }
 0x150   :  { %v8770_v5 = vadd.f32 1.0, %v7608_v33  ;;  %v1645_v60 = vpop.f32.mrf.mxu2  ;;  %v11236_v33 = vld [vmem:[#allocation89_spill] sm:$0xff] }
 0x151   :  { %v624_v32 = vadd.f32 %v11236_v33, %v8413_v57 }
 0x152   :  { %v1682_v38 = vpop.f32.mrf.mxu1  ;;  %7611 = vrcp.f32 %v8770_v5  ;;  %vm1837_vm1 = vweird.f32 %v8770_v5 }
 0x153   :  { %v1683_v2 = vadd.f32 %v1682_v38, %v1669_v54 }
 0x155   :  { %v1818_v23 = vadd.f32 %v1683_v2, %v595_v36  ;;  %v7610_v9 = vpop.eup %7609 }
 0x156   :  { %v8775_v20 = vadd.f32 1.0, %v7610_v9  ;;  %v1708_v34 = vpop.f32.mrf.mxu3 }
 0x157   :  { %v6700_v18 = vmul.f32 -1.442695, %v1818_v23  ;;  %v1671_v60 = vpop.f32.mrf.mxu0 }
 0x158   :  { %v1695_v37 = vpop.f32.mrf.mxu2  ;;  %v7612_v28 = vpop.eup %7611  ;;  %7613 = vrcp.f32 %v8775_v20  ;;  %vm1852_vm8 = vweird.f32 %v8775_v20 }
 0x159   :  { %7615 = vpow2.f32 %v6700_v18  ;;  %v1709_v12 = vadd.f32 %v1708_v34, %v1695_v37  ;;  %v1833_v61 = vmul.f32 %v7612_v28, %v8770_v5  ;;  %v653_v34 = vadd.f32 %v8609_v52, %v8641_v49 }
 0x15a   :  { %v1684_v43 = vpop.f32.mrf.mxu1  ;;  %vm1838_vm0 = vweird.f32 %v7612_v28 }
 0x15b   :  { %v1819_v54 = vadd.f32 %v1709_v12, %v624_v32  ;;  %v1834_v2 = vsub.f32 1.0, %v1833_v61  ;;  %vm8793_vm2 = vmor %vm1837_vm1, %vm1838_vm0 }
 0x15d   :  { %v6701_v38 = vmul.f32 -1.442695, %v1819_v54  ;;  %v1835_v37 = vmul.f32 %v7612_v28, %v1834_v2 }
 0x15e   :  { %v8781_v47 = vpop.eup %7613  ;;  %v1710_v27 = vpop.f32.mrf.mxu3 }
 0x15f   :  { %v7616_v36 = vpop.eup %7615  ;;  %7617 = vpow2.f32 %v6701_v38  ;;  %v1848_v60 = vmul.f32 %v8781_v47, %v8775_v20  ;;  %v1721_v33 = vpop.f32.mrf.mxu0  ;;  %v1836_v38 = vadd.f32 %v7612_v28, %v1835_v37  ;;  %v1841_v27 = vand.u32 2147483647, %v8770_v5 }
 0x160   :  { %v1697_v23 = vpop.f32.mrf.mxu2  ;;  %v1868_v9 = vadd.f32 1.0, %v7616_v36  ;;  %v682_v37 = vadd.f32 %v8612_v58, %v8646_v63  ;;  %vm1853_vm5 = vweird.f32 %v8781_v47 }
 0x161   :  { %v1849_v43 = vsub.f32 1.0, %v1848_v60  ;;  %v1843_v23 = vand.u32 2147483648, %v8770_v5  ;;  %vm1842_vm3 = vcmp.eq.f32.partialorder %v1841_v27, 8.507059e+37  ;;  %v953_v27 = vld [vmem:[%s10705_s2] sm:$0xff]  ;;  %vm8813_vm10 = vmor %vm1852_vm8, %vm1853_vm5 }
 0x162   :  { %7619 = vrcp.f32 %v1868_v9  ;;  %v1734_v18 = vpop.f32.mrf.mxu1  ;;  %v1881_v5 = vand.u32 2147483648, %v1868_v9  ;;  %v1879_v25 = vand.u32 2147483647, %v1868_v9  ;;  %vm1875_vm6 = vweird.f32 %v1868_v9 }
 0x163   :  { %v1735_v32 = vadd.f32 %v1734_v18, %v1721_v33  ;;  %v1850_v33 = vmul.f32 %v8781_v47, %v1849_v43 }
 0x164   :  { %vm1880_vm9 = vcmp.eq.f32.partialorder %v1879_v25, 8.507059e+37 }
 0x165   :  { %v7618_v12 = vpop.eup %7617  ;;  %v1820_v61 = vadd.f32 %v1735_v32, %v653_v34  ;;  %v1840_v32 = vsel %vm8793_vm2, %v7612_v28, %v1836_v38  ;;  %v1851_v43 = vadd.f32 %v8781_v47, %v1850_v33  ;;  %v1882_v38 = vor.u32 1.1754944e-38, %v1881_v5 }
 0x166   :  { %v8787_v54 = vadd.f32 1.0, %v7618_v12  ;;  %v1760_v60 = vpop.f32.mrf.mxu3 }
 0x167   :  { %v1723_v18 = vpop.f32.mrf.mxu0 }
 0x168   :  { %v7620_v36 = vpop.eup %7619  ;;  %7621 = vrcp.f32 %v8787_v54  ;;  %v1747_v52 = vpop.f32.mrf.mxu2  ;;  %v1894_v25 = vand.u32 2147483647, %v8787_v54  ;;  %vm1890_vm13 = vweird.f32 %v8787_v54 }
 0x169   :  { %v1871_v57 = vmul.f32 %v7620_v36, %v1868_v9  ;;  %7623 = vtanh.f32 %v1820_v61  ;;  %v1761_v12 = vadd.f32 %v1760_v60, %v1747_v52  ;;  %v1844_v61 = vor.u32 1.1754944e-38, %v1843_v23 }
 0x16a   :  { %v1736_v49 = vpop.f32.mrf.mxu1  ;;  %vm1876_vm4 = vweird.f32 %v7620_v36  ;;  %v1856_v52 = vand.u32 2147483647, %v8775_v20  ;;  %vm1895_vm15 = vcmp.eq.f32.partialorder %v1894_v25, 8.507059e+37 }
 0x16b   :  { %v1872_v34 = vsub.f32 1.0, %v1871_v57  ;;  %v1821_v19 = vadd.f32 %v1761_v12, %v682_v37  ;;  %v1845_v55 = vsel %vm1842_vm3, %v1844_v61, %v1840_v32  ;;  %v1858_v57 = vand.u32 2147483648, %v8775_v20  ;;  %vm1877_vm7 = vmor %vm1875_vm6, %vm1876_vm4 }
 0x16c   :  { %vm1857_vm12 = vcmp.eq.f32.partialorder %v1856_v52, 8.507059e+37 }
 0x16d   :  { %v1873_v29 = vmul.f32 %v7620_v36, %v1872_v34  ;;  %7625 = vtanh.f32 %v1821_v19  ;;  %v1859_v18 = vor.u32 1.1754944e-38, %v1858_v57 }
 0x16e   :  { %v7622_v10 = vpop.eup %7621  ;;  %v1762_v37 = vpop.f32.mrf.mxu3 }
 0x16f   :  { %v7624_v58 = vpop.eup %7623  ;;  %v1886_v28 = vmul.f32 %v7622_v10, %v8787_v54  ;;  %v1874_v49 = vadd.f32 %v7620_v36, %v1873_v29  ;;  %v1896_v29 = vand.u32 2147483648, %v8787_v54  ;;  %vm1891_vm11 = vweird.f32 %v7622_v10 }
 0x170   :  { %v1942_v23 = vmul.f32 %v7624_v58, %v1845_v55  ;;  %v1749_v19 = vpop.f32.mrf.mxu2  ;;  %v1855_v55 = vsel %vm8813_vm10, %v8781_v47, %v1851_v43  ;;  %vm1892_vm14 = vmor %vm1890_vm13, %vm1891_vm11  ;;  %v954_v47 = vld [vmem:[%s10705_s2 + $0x8] sm:$0xff]  ;;  %v711_v54 = vadd.f32 %v8624_v15, %v8664_v14 }
 0x171   :  { %v1887_v2 = vsub.f32 1.0, %v1886_v28  ;;  %v1878_v60 = vsel %vm1877_vm7, %v7620_v36, %v1874_v49  ;;  %v1860_v12 = vsel %vm1857_vm12, %v1859_v18, %v1855_v55  ;;  %v1897_v61 = vor.u32 1.1754944e-38, %v1896_v29 }
 0x172   :  { %v1883_v33 = vsel %vm1880_vm9, %v1882_v38, %v1878_v60 }
 0x173   :  { %v1888_v20 = vmul.f32 %v7622_v10, %v1887_v2  ;;  %v1940_v36 = vmul.f32 %v1883_v33, %v953_v27  ;;  %v7626_v34 = vpop.eup %7625 }
 0x174   :  { %v1943_v43 = vmul.f32 %v7626_v34, %v1860_v12 }
 0x175   :  { %v8823_v32 = vadd.f32 %v1942_v23, %v1940_v36  ;;  %v1889_v5 = vadd.f32 %v7622_v10, %v1888_v20 }
 0x177   :  { %v1893_v57 = vsel %vm1892_vm14, %v7622_v10, %v1889_v5  ;;  %v740_v10 = vadd.f32 %v8626_v56, %v8668_v24 }
 0x178   :  { %v1898_v58 = vsel %vm1895_vm15, %v1897_v61, %v1893_v57 }
 0x179   :  { %v1941_v28 = vmul.f32 %v1898_v58, %v954_v47 }
 0x17b   :  { %v8828_v49 = vadd.f32 %v1943_v43, %v1941_v28 }
 0x17f   :  { %v1773_v38 = vpop.f32.mrf.mxu0 }
 0x183   :  { %v1786_v27 = vpop.f32.mrf.mxu1 }
 0x184   :  { %v1787_v23 = vadd.f32 %v1786_v27, %v1773_v38 }
 0x186   :  { %v1822_v52 = vadd.f32 %v1787_v23, %v711_v54 }
 0x187   :  { %v1775_v19 = vpop.f32.mrf.mxu0 }
 0x188   :  { %v6702_v2 = vmul.f32 -1.442695, %v1822_v52 }
 0x18a   :  { %7627 = vpow2.f32 %v6702_v2 }
 0x18b   :  { %v1799_v60 = vpop.f32.mrf.mxu2  ;;  %v1788_v33 = vpop.f32.mrf.mxu1 }
 0x18c   :  { %v1812_v9 = vpop.f32.mrf.mxu3 }
 0x18d   :  { %v1813_v29 = vadd.f32 %v1812_v9, %v1799_v60 }
 0x18f   :  { %v1823_v55 = vadd.f32 %v1813_v29, %v740_v10 }
 0x190   :  { %v7628_v37 = vpop.eup %7627 }
 0x191   :  { %v6703_v18 = vmul.f32 -1.442695, %v1823_v55  ;;  %v1908_v20 = vadd.f32 1.0, %v7628_v37  ;;  %v11242_v37 = vld [vmem:[#allocation82_spill] sm:$0xff] }
 0x193   :  { %7629 = vpow2.f32 %v6703_v18  ;;  %v1801_v36 = vpop.f32.mrf.mxu2  ;;  %v1921_v47 = vand.u32 2147483648, %v1908_v20  ;;  %v1919_v43 = vand.u32 2147483647, %v1908_v20  ;;  %vm1915_vm1 = vweird.f32 %v1908_v20  ;;  %v11241_v18 = vld [vmem:[#allocation80_spill] sm:$0xff] }
 0x194   :  { %v1814_v25 = vpop.f32.mrf.mxu3  ;;  %7631 = vrcp.f32 %v1908_v20 }
 0x195   :  { %v1922_v28 = vor.u32 1.1754944e-38, %v1921_v47  ;;  %vm1920_vm3 = vcmp.eq.f32.partialorder %v1919_v43, 8.507059e+37  ;;  %v11247_v47 = vld [vmem:[#allocation92_spill] sm:$0xff]  ;;  %v11249_v43 = vld [vmem:[#allocation85_spill] sm:$0xff] }
 0x199   :  { %v7630_v15 = vpop.eup %7629 }
 0x19a   :  { %v1909_v34 = vadd.f32 1.0, %v7630_v15  ;;  %v7632_v12 = vpop.eup %7631 }
 0x19b   :  { %v1911_v5 = vmul.f32 %v7632_v12, %v1908_v20  ;;  %vm1916_vm0 = vweird.f32 %v7632_v12 }
 0x19c   :  { %7633 = vrcp.f32 %v1909_v34  ;;  %vm1917_vm2 = vmor %vm1915_vm1, %vm1916_vm0  ;;  %v1936_v60 = vand.u32 2147483648, %v1909_v34  ;;  %v1934_v19 = vand.u32 2147483647, %v1909_v34  ;;  %vm1930_vm5 = vweird.f32 %v1909_v34 }
 0x19d   :  { %v1912_v61 = vsub.f32 1.0, %v1911_v5  ;;  %7635 = vtanh.f32 %v8823_v32  ;;  %v11245_v5 = vld [vmem:[#allocation81_spill] sm:$0xff] }
 0x19e   :  { %7637 = vtanh.f32 %v8828_v49  ;;  %v1937_v33 = vor.u32 1.1754944e-38, %v1936_v60  ;;  %vm1935_vm7 = vcmp.eq.f32.partialorder %v1934_v19, 8.507059e+37  ;;  %v11259_v60 = vld [vmem:[#allocation112_spill] sm:$0xff]  ;;  %v11261_v19 = vld [vmem:[#allocation107_spill] sm:$0xff] }
 0x19f   :  { %v1913_v56 = vmul.f32 %v7632_v12, %v1912_v61  ;;  %v11246_v61 = vld [vmem:[#allocation83_spill] sm:$0xff] }
 0x1a1   :  { %v1914_v58 = vadd.f32 %v7632_v12, %v1913_v56  ;;  %v11248_v56 = vld [vmem:[#allocation94_spill] sm:$0xff] }
 0x1a2   :  { %v7634_v57 = vpop.eup %7633 }
 0x1a3   :  { %v1926_v38 = vmul.f32 %v7634_v57, %v1909_v34  ;;  %v1918_v27 = vsel %vm1917_vm2, %v7632_v12, %v1914_v58  ;;  %v7636_v54 = vpop.eup %7635  ;;  %vm1931_vm4 = vweird.f32 %v7634_v57  ;;  %v11243_v12 = vld [vmem:[#allocation84_spill] sm:$0xff]  ;;  %v11244_v34 = vld [vmem:[#allocation86_spill] sm:$0xff]  ;;  %v11251_v58 = vld [vmem:[#allocation97_spill] sm:$0xff] }
 0x1a4   :  { %v1923_v23 = vsel %vm1920_vm3, %v1922_v28, %v1918_v27  ;;  %vm1932_vm6 = vmor %vm1930_vm5, %vm1931_vm4  ;;  %v7638_v20 = vpop.eup %7637  ;;  %v11252_v28 = vld [vmem:[#allocation99_spill] sm:$0xff] }
 0x1a5   :  { %v1927_v52 = vsub.f32 1.0, %v1926_v38  ;;  %v1948_v2 = vmul.f32 %v7636_v54, %v1923_v23  ;;  %v11253_v38 = vld [vmem:[#allocation93_spill] sm:$0xff]  ;;  %v11254_v27 = vld [vmem:[#allocation95_spill] sm:$0xff]  ;;  %v11256_v23 = vld [vmem:[#allocation108_spill] sm:$0xff] }
 0x1a6   :  { %v11255_v54 = vld [vmem:[#allocation105_spill] sm:$0xff] }
 0x1a7   :  { %v1928_v9 = vmul.f32 %v7634_v57, %v1927_v52  ;;  %v8836_v10 = vpack.c.bf16 %v1948_v2, %v1948_v2  ;;  %v11257_v52 = vld [vmem:[#allocation98_spill] sm:$0xff]  ;;  %v11258_v2 = vld [vmem:[#allocation101_spill] sm:$0xff] }
 0x1a9   :  { %v1929_v29 = vadd.f32 %v7634_v57, %v1928_v9  ;;  %1973 = vmatmul.bf16.vlgmr.msra.gmra.mxu0 %v8836_v10  ;;  %1999 = vmatmul.bf16.vlgmr.msra.gmra.mxu2 %v8836_v10  ;;  %v11260_v9 = vld [vmem:[#allocation114_spill] sm:$0xff] }
 0x1aa   :  { %2069 = vmatpush.bf16.msra.mxu0 %v11241_v18  ;;  %2095 = vmatpush.bf16.msra.mxu2 %v11242_v37 }
 0x1ab   :  { %v1933_v55 = vsel %vm1932_vm6, %v7634_v57, %v1929_v29  ;;  %v11250_v57 = vld [vmem:[#allocation88_spill] sm:$0xff]  ;;  %v11262_v29 = vld [vmem:[#allocation109_spill] sm:$0xff] }
 0x1ac   :  { %v1938_v36 = vsel %vm1935_vm7, %v1937_v33, %v1933_v55  ;;  %v11263_v33 = vld [vmem:[#allocation120_spill] sm:$0xff]  ;;  %v11264_v55 = vld [vmem:[#allocation122_spill] sm:$0xff] }
 0x1ad   :  { %v1949_v25 = vmul.f32 %v7638_v20, %v1938_v36  ;;  %v11265_v20 = vld [vmem:[#allocation113_spill] sm:$0xff]  ;;  %v11266_v36 = vld [vmem:[#allocation115_spill] sm:$0xff] }
 0x1ae   :  { %2070 = vmatpush.bf16.msra.mxu0 %v11243_v12  ;;  %2096 = vmatpush.bf16.msra.mxu2 %v11244_v34 }
 0x1af   :  { %v8842_v15 = vpack.c.bf16 %v1949_v25, %v1949_v25  ;;  %v11267_v25 = vld [vmem:[#allocation121_spill] sm:$0xff] }
 0x1b1   :  { %1986 = vmatmul.bf16.vlgmr.msra.gmra.mxu1 %v8842_v15  ;;  %2012 = vmatmul.bf16.vlgmr.msra.gmra.mxu3 %v8842_v15 }
 0x1b2   :  { %2082 = vmatpush.bf16.msra.mxu1 %v11245_v5  ;;  %2108 = vmatpush.bf16.msra.mxu3 %v11246_v61 }
 0x1b3   :  { %2071 = vmatpush.bf16.msra.mxu0 %v11247_v47  ;;  %2097 = vmatpush.bf16.msra.mxu2 %v11248_v56 }
 0x1b6   :  { %2083 = vmatpush.bf16.msra.mxu1 %v11249_v43  ;;  %2109 = vmatpush.bf16.msra.mxu3 %v11250_v57 }
 0x1b7   :  { %2072 = vmatpush.bf16.msra.mxu0 %v11251_v58  ;;  %2098 = vmatpush.bf16.msra.mxu2 %v11252_v28 }
 0x1b9   :  { %2025 = vmatmul.bf16.vlgmr.msrb.gmra.mxu0 %v8836_v10  ;;  %2051 = vmatmul.bf16.vlgmr.msrb.gmra.mxu2 %v8836_v10 }
 0x1ba   :  { %2084 = vmatpush.bf16.msra.mxu1 %v11253_v38  ;;  %2110 = vmatpush.bf16.msra.mxu3 %v11254_v27 }
 0x1bb   :  { %2073 = vmatpush.bf16.msra.mxu0 %v11255_v54  ;;  %2099 = vmatpush.bf16.msra.mxu2 %v11256_v23 }
 0x1be   :  { %2085 = vmatpush.bf16.msra.mxu1 %v11257_v52  ;;  %2111 = vmatpush.bf16.msra.mxu3 %v11258_v2 }
 0x1bf   :  { %2074 = vmatpush.bf16.msra.mxu0 %v11259_v60  ;;  %2100 = vmatpush.bf16.msra.mxu2 %v11260_v9 }
 0x1c1   :  { %2038 = vmatmul.bf16.vlgmr.msrb.gmra.mxu1 %v8842_v15  ;;  %2064 = vmatmul.bf16.vlgmr.msrb.gmra.mxu3 %v8842_v15 }
 0x1c2   :  { %2086 = vmatpush.bf16.msra.mxu1 %v11261_v19  ;;  %2112 = vmatpush.bf16.msra.mxu3 %v11262_v29  ;;  %v11268_v19 = vld [vmem:[#allocation123_spill] sm:$0xff]  ;;  %v11287_v29 = vld [vmem:[#allocation160_spill] sm:$0xff] }
 0x1c3   :  { %2075 = vmatpush.bf16.msra.mxu0 %v11263_v33  ;;  %2101 = vmatpush.bf16.msra.mxu2 %v11264_v55  ;;  %v11269_v55 = vld [vmem:[#allocation136_spill] sm:$0xff]  ;;  %v11286_v33 = vld [vmem:[#allocation151_spill] sm:$0xff] }
 0x1c6   :  { %2087 = vmatpush.bf16.msra.mxu1 %v11265_v20  ;;  %2113 = vmatpush.bf16.msra.mxu3 %v11266_v36  ;;  %v11270_v20 = vld [vmem:[#allocation138_spill] sm:$0xff]  ;;  %v11271_v36 = vld [vmem:[#allocation125_spill] sm:$0xff] }
 0x1c7   :  { %2076 = vmatpush.bf16.msra.mxu0 %v8451_v45  ;;  %2102 = vmatpush.bf16.msra.mxu2 %v8457_v4  ;;  %v11272_v45 = vld [vmem:[#allocation128_spill] sm:$0xff]  ;;  %v11273_v4 = vld [vmem:[#allocation131_spill] sm:$0xff] }
 0x1ca   :  { %2088 = vmatpush.bf16.msra.mxu1 %v11267_v25  ;;  %2114 = vmatpush.bf16.msra.mxu3 %v11268_v19  ;;  %v11276_v25 = vld [vmem:[#allocation144_spill] sm:$0xff]  ;;  %v11277_v19 = vld [vmem:[#allocation137_spill] sm:$0xff] }
 0x1cb   :  { %2121 = vmatpush.bf16.msrb.mxu0 %v8464_v62  ;;  %2147 = vmatpush.bf16.msrb.mxu2 %v8470_v6  ;;  %v11274_v62 = vld [vmem:[#allocation134_spill] sm:$0xff]  ;;  %v11275_v6 = vld [vmem:[#allocation140_spill] sm:$0xff] }
 0x1cc   :  { %2077 = vmatmul.bf16.vlgmr.msra.gmra.mxu0 %v8836_v10  ;;  %2103 = vmatmul.bf16.vlgmr.msra.gmra.mxu2 %v8836_v10 }
 0x1ce   :  { %2089 = vmatpush.bf16.msra.mxu1 %v11271_v36  ;;  %2115 = vmatpush.bf16.msra.mxu3 %v11272_v45  ;;  %v11280_v36 = vld [vmem:[#allocation150_spill] sm:$0xff]  ;;  %v11281_v45 = vld [vmem:[#allocation143_spill] sm:$0xff] }
 0x1cf   :  { %2122 = vmatpush.bf16.msrb.mxu0 %v11269_v55  ;;  %2148 = vmatpush.bf16.msrb.mxu2 %v11270_v20  ;;  %v11278_v55 = vld [vmem:[#allocation139_spill] sm:$0xff]  ;;  %v11279_v20 = vld [vmem:[#allocation148_spill] sm:$0xff] }
 0x1d1   :  { %2090 = vmatmul.bf16.vlgmr.msra.gmra.mxu1 %v8842_v15  ;;  %2116 = vmatmul.bf16.vlgmr.msra.gmra.mxu3 %v8842_v15 }
 0x1d2   :  { %2134 = vmatpush.bf16.msrb.mxu1 %v11273_v4  ;;  %2160 = vmatpush.bf16.msrb.mxu3 %v11274_v62  ;;  %v11282_v4 = vld [vmem:[#allocation147_spill] sm:$0xff]  ;;  %v11283_v62 = vld [vmem:[#allocation153_spill] sm:$0xff] }
 0x1d3   :  { %2123 = vmatpush.bf16.msrb.mxu0 %v11275_v6  ;;  %2149 = vmatpush.bf16.msrb.mxu2 %v11276_v25  ;;  %v11284_v6 = vld [vmem:[#allocation156_spill] sm:$0xff]  ;;  %v11285_v25 = vld [vmem:[#allocation149_spill] sm:$0xff] }
 0x1d6   :  { %2135 = vmatpush.bf16.msrb.mxu1 %v11277_v19  ;;  %2161 = vmatpush.bf16.msrb.mxu3 %v11278_v55  ;;  %v11288_v19 = vld [vmem:[#allocation162_spill] sm:$0xff]  ;;  %v11289_v55 = vld [vmem:[#allocation155_spill] sm:$0xff] }
 0x1d7   :  { %2124 = vmatpush.bf16.msrb.mxu0 %v11279_v20  ;;  %2150 = vmatpush.bf16.msrb.mxu2 %v11280_v36  ;;  %v11290_v20 = vld [vmem:[#allocation158_spill] sm:$0xff] }
 0x1da   :  { %2136 = vmatpush.bf16.msrb.mxu1 %v11281_v45  ;;  %2162 = vmatpush.bf16.msrb.mxu3 %v11282_v4  ;;  %v11291_v4 = vld [vmem:[#allocation161_spill] sm:$0xff] }
 0x1db   :  { %2125 = vmatpush.bf16.msrb.mxu0 %v11283_v62  ;;  %2151 = vmatpush.bf16.msrb.mxu2 %v11284_v6 }
 0x1de   :  { %2137 = vmatpush.bf16.msrb.mxu1 %v11285_v25  ;;  %2163 = vmatpush.bf16.msrb.mxu3 %v11286_v33 }
 0x1df   :  { %2126 = vmatpush.bf16.msrb.mxu0 %v11287_v29  ;;  %2152 = vmatpush.bf16.msrb.mxu2 %v11288_v19 }
 0x1e2   :  { %2138 = vmatpush.bf16.msrb.mxu1 %v11289_v55  ;;  %2164 = vmatpush.bf16.msrb.mxu3 %v11290_v20 }
 0x1e3   :  { %2127 = vmatpush.bf16.msrb.mxu0 %v8569_v16  ;;  %2153 = vmatpush.bf16.msrb.mxu2 %v8580_v8 }
 0x1e6   :  { %2139 = vmatpush.bf16.msrb.mxu1 %v11291_v4  ;;  %2165 = vmatpush.bf16.msrb.mxu3 %v8566_v48 }
 0x1e7   :  { %2128 = vmatpush.bf16.msrb.mxu0 %v8591_v31  ;;  %2154 = vmatpush.bf16.msrb.mxu2 %v8597_v42 }
 0x1ea   :  { %2140 = vmatpush.bf16.msrb.mxu1 %v8578_v0  ;;  %2166 = vmatpush.bf16.msrb.mxu3 %v8588_v3 }
 0x1eb   :  { %2323 = vmatpush.bf16.msra.mxu0 %v8086_v7  ;;  %2349 = vmatpush.bf16.msra.mxu2 %v8090_v13 }
 0x1ec   :  { %2129 = vmatmul.bf16.vlgmr.msrb.gmra.mxu0 %v8836_v10  ;;  %2155 = vmatmul.bf16.vlgmr.msrb.gmra.mxu2 %v8836_v10 }
 0x1ee   :  { %2141 = vmatpush.bf16.msrb.mxu1 %v8595_v53  ;;  %2167 = vmatpush.bf16.msrb.mxu3 %v8600_v44 }
 0x1ef   :  { %2324 = vmatpush.bf16.msra.mxu0 %v8097_v21  ;;  %2350 = vmatpush.bf16.msra.mxu2 %v8102_v26  ;;  %v11342_v21 = vld [vmem:[#allocation91_spill] sm:$0xff] }
 0x1f1   :  { %2142 = vmatmul.bf16.vlgmr.msrb.gmra.mxu1 %v8842_v15  ;;  %2168 = vmatmul.bf16.vlgmr.msrb.gmra.mxu3 %v8842_v15 }
 0x1f2   :  { %2336 = vmatpush.bf16.msra.mxu1 %v8088_v11  ;;  %2362 = vmatpush.bf16.msra.mxu3 %v8093_v17  ;;  %v11340_v11 = vld [vmem:[#allocation90_spill] sm:$0xff] }
 0x1f3   :  { %2325 = vmatpush.bf16.msra.mxu0 %v8107_v35  ;;  %2351 = vmatpush.bf16.msra.mxu2 %v8113_v40  ;;  %v11292_v35 = vld [vmem:[#allocation29_spill] sm:$0xff]  ;;  %v11293_v40 = vld [vmem:[#allocation34_spill] sm:$0xff] }
 0x1f6   :  { %2337 = vmatpush.bf16.msra.mxu1 %v8099_v22  ;;  %2363 = vmatpush.bf16.msra.mxu3 %v8104_v30  ;;  %v11294_v22 = vld [vmem:[#allocation36_spill] sm:$0xff]  ;;  %v11295_v30 = vld [vmem:[#allocation31_spill] sm:$0xff] }
 0x1f7   :  { %2326 = vmatpush.bf16.msra.mxu0 %v8131_v46  ;;  %2352 = vmatpush.bf16.msra.mxu2 %v8135_v51  ;;  %v11296_v46 = vld [vmem:[#allocation33_spill] sm:$0xff]  ;;  %v11297_v51 = vld [vmem:[#allocation38_spill] sm:$0xff] }
 0x1fa   :  { %2338 = vmatpush.bf16.msra.mxu1 %v8111_v39  ;;  %2364 = vmatpush.bf16.msra.mxu3 %v8116_v41  ;;  %v11298_v39 = vld [vmem:[#allocation40_spill] sm:$0xff]  ;;  %v11299_v41 = vld [vmem:[#allocation35_spill] sm:$0xff] }
 0x1fb   :  { %2327 = vmatpush.bf16.msra.mxu0 %v8142_v59  ;;  %2353 = vmatpush.bf16.msra.mxu2 %v8147_v1  ;;  %v11300_v59 = vld [vmem:[#allocation37_spill] sm:$0xff]  ;;  %v11301_v1 = vld [vmem:[#allocation42_spill] sm:$0xff] }
 0x1fe   :  { %2339 = vmatpush.bf16.msra.mxu1 %v8133_v50  ;;  %2365 = vmatpush.bf16.msra.mxu3 %v11292_v35  ;;  %v11302_v50 = vld [vmem:[#allocation44_spill] sm:$0xff]  ;;  %v11303_v35 = vld [vmem:[#allocation46_spill] sm:$0xff] }
 0x1ff   :  { %2328 = vmatpush.bf16.msra.mxu0 %v11293_v40  ;;  %2354 = vmatpush.bf16.msra.mxu2 %v11294_v22  ;;  %v11304_v40 = vld [vmem:[#allocation48_spill] sm:$0xff]  ;;  %v11305_v22 = vld [vmem:[#allocation39_spill] sm:$0xff] }
 0x202   :  { %2340 = vmatpush.bf16.msra.mxu1 %v11295_v30  ;;  %2366 = vmatpush.bf16.msra.mxu3 %v11296_v46  ;;  %v11306_v30 = vld [vmem:[#allocation41_spill] sm:$0xff]  ;;  %v11307_v46 = vld [vmem:[#allocation50_spill] sm:$0xff] }
 0x203   :  { %2329 = vmatpush.bf16.msra.mxu0 %v11297_v51  ;;  %2355 = vmatpush.bf16.msra.mxu2 %v11298_v39  ;;  %v11308_v51 = vld [vmem:[#allocation52_spill] sm:$0xff]  ;;  %v11309_v39 = vld [vmem:[#allocation43_spill] sm:$0xff] }
 0x206   :  { %2341 = vmatpush.bf16.msra.mxu1 %v11299_v41  ;;  %2367 = vmatpush.bf16.msra.mxu3 %v11300_v59  ;;  %v11310_v41 = vld [vmem:[#allocation45_spill] sm:$0xff]  ;;  %v11311_v59 = vld [vmem:[#allocation47_spill] sm:$0xff] }
 0x207   :  { %2330 = vmatpush.bf16.msra.mxu0 %v11301_v1  ;;  %2356 = vmatpush.bf16.msra.mxu2 %v11302_v50  ;;  %v11312_v1 = vld [vmem:[#allocation49_spill] sm:$0xff]  ;;  %v11313_v50 = vld [vmem:[#allocation54_spill] sm:$0xff] }
 0x20a   :  { %2342 = vmatpush.bf16.msra.mxu1 %v11305_v22  ;;  %2368 = vmatpush.bf16.msra.mxu3 %v11306_v30  ;;  %v11316_v22 = vld [vmem:[#allocation53_spill] sm:$0xff]  ;;  %v11317_v30 = vld [vmem:[#allocation58_spill] sm:$0xff] }
 0x20b   :  { %2375 = vmatpush.bf16.msrb.mxu0 %v11303_v35  ;;  %2401 = vmatpush.bf16.msrb.mxu2 %v11304_v40  ;;  %v11314_v35 = vld [vmem:[#allocation56_spill] sm:$0xff]  ;;  %v11315_v40 = vld [vmem:[#allocation51_spill] sm:$0xff] }
 0x20e   :  { %2343 = vmatpush.bf16.msra.mxu1 %v11309_v39  ;;  %2369 = vmatpush.bf16.msra.mxu3 %v11310_v41  ;;  %v11320_v39 = vld [vmem:[#allocation57_spill] sm:$0xff]  ;;  %v11321_v41 = vld [vmem:[#allocation62_spill] sm:$0xff] }
 0x20f   :  { %2376 = vmatpush.bf16.msrb.mxu0 %v11307_v46  ;;  %2402 = vmatpush.bf16.msrb.mxu2 %v11308_v51  ;;  %v11318_v46 = vld [vmem:[#allocation60_spill] sm:$0xff]  ;;  %v11319_v51 = vld [vmem:[#allocation55_spill] sm:$0xff] }
 0x212   :  { %2388 = vmatpush.bf16.msrb.mxu1 %v11311_v59  ;;  %2414 = vmatpush.bf16.msrb.mxu3 %v11312_v1  ;;  %v11322_v59 = vld [vmem:[#allocation64_spill] sm:$0xff]  ;;  %v11323_v1 = vld [vmem:[#allocation59_spill] sm:$0xff] }
 0x213   :  { %2377 = vmatpush.bf16.msrb.mxu0 %v11313_v50  ;;  %2403 = vmatpush.bf16.msrb.mxu2 %v11314_v35  ;;  %v11324_v50 = vld [vmem:[#allocation61_spill] sm:$0xff]  ;;  %v11325_v35 = vld [vmem:[#allocation66_spill] sm:$0xff] }
 0x216   :  { %2389 = vmatpush.bf16.msrb.mxu1 %v11315_v40  ;;  %2415 = vmatpush.bf16.msrb.mxu3 %v11316_v22  ;;  %v11326_v40 = vld [vmem:[#allocation68_spill] sm:$0xff]  ;;  %v11327_v22 = vld [vmem:[#allocation63_spill] sm:$0xff] }
 0x217   :  { %2378 = vmatpush.bf16.msrb.mxu0 %v11317_v30  ;;  %2404 = vmatpush.bf16.msrb.mxu2 %v11318_v46  ;;  %v11328_v30 = vld [vmem:[#allocation65_spill] sm:$0xff]  ;;  %v11329_v46 = vld [vmem:[#allocation70_spill] sm:$0xff] }
 0x21a   :  { %2390 = vmatpush.bf16.msrb.mxu1 %v11319_v51  ;;  %2416 = vmatpush.bf16.msrb.mxu3 %v11320_v39  ;;  %v11330_v51 = vld [vmem:[#allocation72_spill] sm:$0xff]  ;;  %v11331_v39 = vld [vmem:[#allocation67_spill] sm:$0xff] }
 0x21b   :  { %2379 = vmatpush.bf16.msrb.mxu0 %v11321_v41  ;;  %2405 = vmatpush.bf16.msrb.mxu2 %v11322_v59  ;;  %v11332_v41 = vld [vmem:[#allocation69_spill] sm:$0xff]  ;;  %v11333_v59 = vld [vmem:[#allocation74_spill] sm:$0xff] }
 0x21e   :  { %2391 = vmatpush.bf16.msrb.mxu1 %v11323_v1  ;;  %2417 = vmatpush.bf16.msrb.mxu3 %v11324_v50  ;;  %v11334_v1 = vld [vmem:[#allocation76_spill] sm:$0xff]  ;;  %v11335_v50 = vld [vmem:[#allocation71_spill] sm:$0xff] }
 0x21f   :  { %2380 = vmatpush.bf16.msrb.mxu0 %v11325_v35  ;;  %2406 = vmatpush.bf16.msrb.mxu2 %v11326_v40  ;;  %v11336_v35 = vld [vmem:[#allocation73_spill] sm:$0xff]  ;;  %v11337_v40 = vld [vmem:[#allocation75_spill] sm:$0xff] }
 0x222   :  { %2392 = vmatpush.bf16.msrb.mxu1 %v11327_v22  ;;  %2418 = vmatpush.bf16.msrb.mxu3 %v11328_v30  ;;  %v11338_v22 = vld [vmem:[#allocation77_spill] sm:$0xff] }
 0x223   :  { %2381 = vmatpush.bf16.msrb.mxu0 %v11329_v46  ;;  %2407 = vmatpush.bf16.msrb.mxu2 %v11330_v51  ;;  %v11339_v51 = vld [vmem:[#allocation96_spill] sm:$0xff] }
 0x226   :  { %2393 = vmatpush.bf16.msrb.mxu1 %v11331_v39  ;;  %2419 = vmatpush.bf16.msrb.mxu3 %v11332_v41  ;;  %v1974_v30 = vpop.f32.mrf.mxu0  ;;  %v539_v39 = vadd.f32 %v11340_v11, %v11339_v51 }
 0x227   :  { %2382 = vmatpush.bf16.msrb.mxu0 %v11333_v59  ;;  %2408 = vmatpush.bf16.msrb.mxu2 %v11334_v1  ;;  %v11341_v1 = vld [vmem:[#allocation102_spill] sm:$0xff] }
 0x22a   :  { %2394 = vmatpush.bf16.msrb.mxu1 %v11335_v50  ;;  %2420 = vmatpush.bf16.msrb.mxu3 %v11336_v35  ;;  %v568_v50 = vadd.f32 %v11342_v21, %v11341_v1 }
 0x22c   :  { %v2000_v46 = vpop.f32.mrf.mxu2 }
 0x22e   :  { %2395 = vmatpush.bf16.msrb.mxu1 %v11337_v40  ;;  %2421 = vmatpush.bf16.msrb.mxu3 %v11338_v22  ;;  %v1987_v17 = vpop.f32.mrf.mxu1  ;;  %v1976_v41 = vpop.f32.mrf.mxu0 }
 0x22f   :  { %v1988_v44 = vadd.f32 %v1987_v17, %v1974_v30  ;;  %v11343_v30 = vld [vmem:[#allocation110_spill] sm:$0xff] }
 0x231   :  { %v2173_v53 = vadd.f32 %v1988_v44, %v539_v39  ;;  %v11344_v39 = vld [vmem:[#allocation100_spill] sm:$0xff] }
 0x232   :  { %v597_v41 = vadd.f32 %v11344_v39, %v11343_v30 }
 0x233   :  { %v6704_v59 = vmul.f32 -1.442695, %v2173_v53 }
 0x234   :  { %v2013_v26 = vpop.f32.mrf.mxu3  ;;  %v2002_v3 = vpop.f32.mrf.mxu2 }
 0x235   :  { %7639 = vpow2.f32 %v6704_v59  ;;  %v2014_v35 = vadd.f32 %v2013_v26, %v2000_v46 }
 0x236   :  { %v1989_v40 = vpop.f32.mrf.mxu1  ;;  %v2026_v22 = vpop.f32.mrf.mxu0 }
 0x237   :  { %v2174_v0 = vadd.f32 %v2014_v35, %v568_v50 }
 0x239   :  { %v6705_v13 = vmul.f32 -1.442695, %v2174_v0 }
 0x23b   :  { %v7640_v7 = vpop.eup %7639  ;;  %7641 = vpow2.f32 %v6705_v13  ;;  %v11346_v13 = vld [vmem:[#allocation103_spill] sm:$0xff] }
 0x23c   :  { %v2187_v42 = vadd.f32 1.0, %v7640_v7  ;;  %v2015_v31 = vpop.f32.mrf.mxu3  ;;  %v2052_v17 = vpop.f32.mrf.mxu2  ;;  %v11345_v7 = vld [vmem:[#allocation111_spill] sm:$0xff] }
 0x23d   :  { %v626_v50 = vadd.f32 %v11346_v13, %v11345_v7  ;;  %v11348_v13 = vld [vmem:[#allocation178_spill] sm:$0xff] }
 0x23e   :  { %v2039_v11 = vpop.f32.mrf.mxu1  ;;  %7643 = vrcp.f32 %v2187_v42  ;;  %v2028_v44 = vpop.f32.mrf.mxu0  ;;  %vm2194_vm9 = vweird.f32 %v2187_v42 }
 0x23f   :  { %v2040_v53 = vadd.f32 %v2039_v11, %v2026_v22 }
 0x241   :  { %v7642_v21 = vpop.eup %7641  ;;  %v2175_v59 = vadd.f32 %v2040_v53, %v597_v41 }
 0x242   :  { %v8990_v26 = vadd.f32 1.0, %v7642_v21 }
 0x243   :  { %v6706_v40 = vmul.f32 -1.442695, %v2175_v59 }
 0x244   :  { %7645 = vrcp.f32 %v8990_v26  ;;  %v2065_v35 = vpop.f32.mrf.mxu3  ;;  %v8993_v46 = vpop.eup %7643  ;;  %vm2209_vm14 = vweird.f32 %v8990_v26 }
 0x245   :  { %7647 = vpow2.f32 %v6706_v40  ;;  %v2066_v3 = vadd.f32 %v2065_v35, %v2052_v17  ;;  %v2054_v31 = vpop.f32.mrf.mxu2  ;;  %v2190_v22 = vmul.f32 %v8993_v46, %v2187_v42  ;;  %v11347_v35 = vld [vmem:[#allocation180_spill] sm:$0xff]  ;;  %vm2195_vm8 = vweird.f32 %v8993_v46 }
 0x246   :  { %v2041_v0 = vpop.f32.mrf.mxu1  ;;  %vm9013_vm10 = vmor %vm2194_vm9, %vm2195_vm8 }
 0x247   :  { %v2176_v39 = vadd.f32 %v2066_v3, %v626_v50  ;;  %v2191_v21 = vsub.f32 1.0, %v2190_v22  ;;  %v655_v50 = vadd.f32 %v11348_v13, %v11347_v35 }
 0x249   :  { %v2078_v11 = vpop.f32.mrf.mxu0  ;;  %v6707_v41 = vmul.f32 -1.442695, %v2176_v39  ;;  %v2192_v0 = vmul.f32 %v8993_v46, %v2191_v21 }
 0x24a   :  { %v8998_v53 = vpop.eup %7645 }
 0x24b   :  { %v7648_v44 = vpop.eup %7647  ;;  %7649 = vpow2.f32 %v6707_v41  ;;  %v2205_v1 = vmul.f32 %v8998_v53, %v8990_v26  ;;  %v2198_v41 = vand.u32 2147483647, %v2187_v42  ;;  %v2193_v48 = vadd.f32 %v8993_v46, %v2192_v0 }
 0x24c   :  { %v2225_v59 = vadd.f32 1.0, %v7648_v44  ;;  %v2067_v30 = vpop.f32.mrf.mxu3  ;;  %vm2210_vm12 = vweird.f32 %v8998_v53 }
 0x24d   :  { %v2206_v7 = vsub.f32 1.0, %v2205_v1  ;;  %v2200_v30 = vand.u32 2147483648, %v2187_v42  ;;  %vm9017_vm11 = vcmp.eq.f32.partialorder %v2198_v41, 8.507059e+37  ;;  %v2213_v41 = vand.u32 2147483647, %v8990_v26  ;;  %vm9034_vm0 = vmor %vm2209_vm14, %vm2210_vm12 }
 0x24e   :  { %7651 = vrcp.f32 %v2225_v59  ;;  %v2091_v17 = vpop.f32.mrf.mxu1  ;;  %v2238_v35 = vand.u32 2147483648, %v2225_v59  ;;  %vm2232_vm15 = vweird.f32 %v2225_v59 }
 0x24f   :  { %v2104_v40 = vpop.f32.mrf.mxu2  ;;  %v2092_v3 = vadd.f32 %v2091_v17, %v2078_v11  ;;  %v2207_v21 = vmul.f32 %v8998_v53, %v2206_v7  ;;  %v11349_v17 = vld [vmem:[#allocation179_spill] sm:$0xff]  ;;  %v2197_v7 = vsel %vm9013_vm10, %v8993_v46, %v2193_v48  ;;  %vm2214_vm3 = vcmp.eq.f32.partialorder %v2213_v41, 8.507059e+37 }
 0x250   :  { %v684_v1 = vadd.f32 %v11349_v17, %v8646_v63  ;;  %v11381_v63 = vld [vmem:[#allocation147_spill] sm:$0xff] }
 0x251   :  { %v2080_v31 = vpop.f32.mrf.mxu0  ;;  %v7650_v39 = vpop.eup %7649  ;;  %v2177_v22 = vadd.f32 %v2092_v3, %v655_v50 }
 0x252   :  { %v9005_v51 = vadd.f32 1.0, %v7650_v39  ;;  %v2201_v39 = vor.u32 1.1754944e-38, %v2200_v30  ;;  %v2215_v30 = vand.u32 2147483648, %v8990_v26 }
 0x254   :  { %v7652_v44 = vpop.eup %7651  ;;  %7653 = vrcp.f32 %v9005_v51  ;;  %v2117_v11 = vpop.f32.mrf.mxu3  ;;  %v2202_v46 = vsel %vm9017_vm11, %v2201_v39, %v2197_v7  ;;  %v2253_v0 = vand.u32 2147483648, %v9005_v51  ;;  %v2216_v7 = vor.u32 1.1754944e-38, %v2215_v30 }
 0x255   :  { %v2228_v4 = vmul.f32 %v7652_v44, %v2225_v59  ;;  %7655 = vtanh.f32 %v2177_v22  ;;  %v2118_v13 = vadd.f32 %v2117_v11, %v2104_v40  ;;  %vm2233_vm13 = vweird.f32 %v7652_v44 }
 0x256   :  { %v2093_v22 = vpop.f32.mrf.mxu1  ;;  %v2208_v40 = vadd.f32 %v8998_v53, %v2207_v21  ;;  %vm2234_vm1 = vmor %vm2232_vm15, %vm2233_vm13  ;;  %vm2247_vm5 = vweird.f32 %v9005_v51  ;;  %vm5557_vm15 = vcmask 1041409  }
 0x257   :  { %v2106_v50 = vpop.f32.mrf.mxu2  ;;  %v2229_v3 = vsub.f32 1.0, %v2228_v4  ;;  %v2178_v17 = vadd.f32 %v2118_v13, %v684_v1  ;;  %v2236_v4 = vand.u32 2147483647, %v2225_v59  ;;  %v2239_v13 = vor.u32 1.1754944e-38, %v2238_v35 }
 0x258   :  { %v2212_v59 = vsel %vm9034_vm0, %v8998_v53, %v2208_v40  ;;  %v2251_v35 = vand.u32 2147483647, %v9005_v51  ;;  %v2254_v40 = vor.u32 1.1754944e-38, %v2253_v0  ;;  %v11357_v0 = vld [vmem:[#allocation183_spill] sm:$0xff] }
 0x259   :  { %v2230_v42 = vmul.f32 %v7652_v44, %v2229_v3  ;;  %7657 = vtanh.f32 %v2178_v17  ;;  %vm2237_vm2 = vcmp.eq.f32.partialorder %v2236_v4, 8.507059e+37 }
 0x25a   :  { %v7654_v11 = vpop.eup %7653  ;;  %vm2252_vm7 = vcmp.eq.f32.partialorder %v2251_v35, 8.507059e+37 }
 0x25b   :  { %v7656_v50 = vpop.eup %7655  ;;  %v2243_v48 = vmul.f32 %v7654_v11, %v9005_v51  ;;  %v2231_v1 = vadd.f32 %v7652_v44, %v2230_v42  ;;  %vm2248_vm4 = vweird.f32 %v7654_v11 }
 0x25c   :  { %v2299_v3 = vmul.f32 %v7656_v50, %v2202_v46  ;;  %v2119_v22 = vpop.f32.mrf.mxu3  ;;  %vm2249_vm6 = vmor %vm2247_vm5, %vm2248_vm4 }
 0x25d   :  { %v2244_v31 = vsub.f32 1.0, %v2243_v48  ;;  %v2235_v26 = vsel %vm2234_vm1, %v7652_v44, %v2231_v1  ;;  %v2217_v48 = vsel %vm2214_vm3, %v2216_v7, %v2212_v59 }
 0x25e   :  { %v2240_v39 = vsel %vm2237_vm2, %v2239_v13, %v2235_v26 }
 0x25f   :  { %v2245_v17 = vmul.f32 %v7654_v11, %v2244_v31  ;;  %v2297_v42 = vmul.f32 %v2240_v39, %v8823_v32  ;;  %v7658_v50 = vpop.eup %7657  ;;  %v11356_v31 = vld [vmem:[#allocation181_spill] sm:$0xff] }
 0x260   :  { %v2300_v53 = vmul.f32 %v7658_v50, %v2217_v48  ;;  %v713_v26 = vadd.f32 %v11356_v31, %v8664_v14  ;;  %v11380_v14 = vld [vmem:[#allocation148_spill] sm:$0xff] }
 0x261   :  { %v9045_v44 = vadd.f32 %v2299_v3, %v2297_v42  ;;  %v2246_v4 = vadd.f32 %v7654_v11, %v2245_v17 }
 0x263   :  { %v2250_v46 = vsel %vm2249_vm6, %v7654_v11, %v2246_v4  ;;  %v742_v11 = vadd.f32 %v11357_v0, %v8668_v24  ;;  %v11379_v24 = vld [vmem:[#allocation139_spill] sm:$0xff] }
 0x264   :  { %v2255_v41 = vsel %vm2252_vm7, %v2254_v40, %v2250_v46 }
 0x265   :  { %v2298_v30 = vmul.f32 %v2255_v41, %v8828_v49 }
 0x267   :  { %v9048_v21 = vadd.f32 %v2300_v53, %v2298_v30 }
 0x269   :  { %v2130_v1 = vpop.f32.mrf.mxu0 }
 0x26e   :  { %v2143_v32 = vpop.f32.mrf.mxu1 }
 0x26f   :  { %v2156_v13 = vpop.f32.mrf.mxu2  ;;  %v2144_v51 = vadd.f32 %v2143_v32, %v2130_v1 }
 0x271   :  { %v2132_v3 = vpop.f32.mrf.mxu0  ;;  %v2179_v59 = vadd.f32 %v2144_v51, %v713_v26 }
 0x273   :  { %v6708_v22 = vmul.f32 -1.442695, %v2179_v59 }
 0x274   :  { %v2169_v39 = vpop.f32.mrf.mxu3 }
 0x275   :  { %7659 = vpow2.f32 %v6708_v22  ;;  %v2170_v7 = vadd.f32 %v2169_v39, %v2156_v13 }
 0x276   :  { %v2145_v17 = vpop.f32.mrf.mxu1 }
 0x277   :  { %v2158_v49 = vpop.f32.mrf.mxu2  ;;  %v2180_v42 = vadd.f32 %v2170_v7, %v742_v11  ;;  %v10982_v7 = vunpack.c.l.b16 %v8836_v10 }
 0x279   :  { %v6709_v35 = vmul.f32 -1.442695, %v2180_v42 }
 0x27b   :  { %v7660_v50 = vpop.eup %7659  ;;  %7661 = vpow2.f32 %v6709_v35 }
 0x27c   :  { %v2265_v48 = vadd.f32 1.0, %v7660_v50  ;;  %v2171_v4 = vpop.f32.mrf.mxu3 }
 0x27e   :  { %7663 = vrcp.f32 %v2265_v48  ;;  %v2278_v1 = vand.u32 2147483648, %v2265_v48  ;;  %v2276_v13 = vand.u32 2147483647, %v2265_v48  ;;  %vm2272_vm9 = vweird.f32 %v2265_v48 }
 0x280   :  { %v2279_v3 = vor.u32 1.1754944e-38, %v2278_v1  ;;  %vm2277_vm11 = vcmp.eq.f32.partialorder %v2276_v13, 8.507059e+37  ;;  %v10980_v1 = vunpack.c.l.b16 %v8842_v15 }
 0x281   :  { %v7662_v53 = vpop.eup %7661 }
 0x282   :  { %v2266_v40 = vadd.f32 1.0, %v7662_v53 }
 0x284   :  { %v7664_v46 = vpop.eup %7663  ;;  %7665 = vrcp.f32 %v2266_v40  ;;  %v2293_v11 = vand.u32 2147483648, %v2266_v40  ;;  %v2291_v42 = vand.u32 2147483647, %v2266_v40  ;;  %vm2287_vm13 = vweird.f32 %v2266_v40 }
 0x285   :  { %v2268_v41 = vmul.f32 %v7664_v46, %v2265_v48  ;;  %7667 = vtanh.f32 %v9045_v44  ;;  %vm2273_vm8 = vweird.f32 %v7664_v46 }
 0x286   :  { %vm2274_vm10 = vmor %vm2272_vm9, %vm2273_vm8  ;;  %7669 = vtanh.f32 %v9048_v21  ;;  %v2294_v48 = vor.u32 1.1754944e-38, %v2293_v11  ;;  %vm2292_vm0 = vcmp.eq.f32.partialorder %v2291_v42, 8.507059e+37  ;;  %v11363_v11 = vld [vmem:[#allocation115_spill] sm:$0xff]  ;;  %v11366_v42 = vld [vmem:[#allocation129_spill] sm:$0xff] }
 0x287   :  { %v2269_v30 = vsub.f32 1.0, %v2268_v41 }
 0x289   :  { %v2270_v32 = vmul.f32 %v7664_v46, %v2269_v30 }
 0x28a   :  { %v7666_v31 = vpop.eup %7665 }
 0x28b   :  { %v2271_v26 = vadd.f32 %v7664_v46, %v2270_v32  ;;  %v2283_v51 = vmul.f32 %v7666_v31, %v2266_v40  ;;  %v7668_v39 = vpop.eup %7667  ;;  %vm2288_vm12 = vweird.f32 %v7666_v31 }
 0x28c   :  { %vm2289_vm14 = vmor %vm2287_vm13, %vm2288_vm12  ;;  %v7670_v41 = vpop.eup %7669 }
 0x28d   :  { %v2275_v59 = vsel %vm2274_vm10, %v7664_v46, %v2271_v26  ;;  %v2284_v22 = vsub.f32 1.0, %v2283_v51  ;;  %v5819_v46 = vrot.slane %v10982_v7, 1  ;;  %v5833_v26 = vrot.slane %v10980_v1, 1  ;;  %v11375_v1 = vld [vmem:[#allocation134_spill] sm:$0xff]  ;;  %v11377_v7 = vld [vmem:[#allocation144_spill] sm:$0xff] }
 0x28e   :  { %v2280_v0 = vsel %vm2277_vm11, %v2279_v3, %v2275_v59  ;;  %v11358_v3 = vld [vmem:[#allocation107_spill] sm:$0xff]  ;;  %v11359_v59 = vld [vmem:[#allocation109_spill] sm:$0xff] }
 0x28f   :  { %v2305_v17 = vmul.f32 %v7668_v39, %v2280_v0  ;;  %v2285_v49 = vmul.f32 %v7666_v31, %v2284_v22  ;;  %v11360_v22 = vld [vmem:[#allocation120_spill] sm:$0xff]  ;;  %v11361_v39 = vld [vmem:[#allocation122_spill] sm:$0xff]  ;;  %v11362_v0 = vld [vmem:[#allocation113_spill] sm:$0xff] }
 0x291   :  { %v9057_v35 = vpack.c.bf16 %v2305_v17, %v2305_v17  ;;  %v2286_v50 = vadd.f32 %v7666_v31, %v2285_v49  ;;  %v11364_v17 = vld [vmem:[#allocation124_spill] sm:$0xff]  ;;  %v11365_v49 = vld [vmem:[#allocation126_spill] sm:$0xff] }
 0x293   :  { %v2290_v4 = vsel %vm2289_vm14, %v7666_v31, %v2286_v50  ;;  %2331 = vmatmul.bf16.vlgmr.msra.gmra.mxu0 %v9057_v35  ;;  %2357 = vmatmul.bf16.vlgmr.msra.gmra.mxu2 %v9057_v35  ;;  %v10983_v53 = vunpack.c.l.b16 %v9057_v35  ;;  %v11367_v50 = vld [vmem:[#allocation132_spill] sm:$0xff] }
 0x294   :  { %v2295_v30 = vsel %vm2292_vm0, %v2294_v48, %v2290_v4  ;;  %2427 = vmatpush.bf16.msra.mxu0 %v11241_v18  ;;  %2453 = vmatpush.bf16.msra.mxu2 %v11242_v37  ;;  %v11368_v48 = vld [vmem:[#allocation121_spill] sm:$0xff]  ;;  %v11369_v4 = vld [vmem:[#allocation123_spill] sm:$0xff] }
 0x295   :  { %v2306_v40 = vmul.f32 %v7670_v41, %v2295_v30  ;;  %v9070_v32 = vsel %vm5557_vm15, %v10983_v53, %v5819_v46  ;;  %v11370_v46 = vld [vmem:[#allocation136_spill] sm:$0xff]  ;;  %v11371_v41 = vld [vmem:[#allocation138_spill] sm:$0xff]  ;;  %v11372_v30 = vld [vmem:[#allocation125_spill] sm:$0xff] }
 0x296   :  { %v11378_v53 = vld [vmem:[#allocation137_spill] sm:$0xff] }
 0x297   :  { %v9072_v13 = vpack.c.bf16 %v2306_v40, %v2306_v40  ;;  %v11373_v40 = vld [vmem:[#allocation128_spill] sm:$0xff] }
 0x298   :  { %2428 = vmatpush.bf16.msra.mxu0 %v11243_v12  ;;  %2454 = vmatpush.bf16.msra.mxu2 %v11244_v34 }
 0x299   :  { %2344 = vmatmul.bf16.vlgmr.msra.gmra.mxu1 %v9072_v13  ;;  %2370 = vmatmul.bf16.vlgmr.msra.gmra.mxu3 %v9072_v13  ;;  %v10981_v31 = vunpack.c.l.b16 %v9072_v13 }
 0x29a   :  { %2440 = vmatpush.bf16.msra.mxu1 %v11245_v5  ;;  %2466 = vmatpush.bf16.msra.mxu3 %v11246_v61 }
 0x29b   :  { %v9086_v51 = vsel %vm5557_vm15, %v10981_v31, %v5833_v26  ;;  %v11374_v26 = vld [vmem:[#allocation131_spill] sm:$0xff]  ;;  %v11376_v31 = vld [vmem:[#allocation140_spill] sm:$0xff] }
 0x29c   :  { %2429 = vmatpush.bf16.msra.mxu0 %v11247_v47  ;;  %2455 = vmatpush.bf16.msra.mxu2 %v11248_v56 }
 0x29e   :  { %2441 = vmatpush.bf16.msra.mxu1 %v11249_v43  ;;  %2467 = vmatpush.bf16.msra.mxu3 %v11250_v57 }
 0x2a0   :  { %2430 = vmatpush.bf16.msra.mxu0 %v11251_v58  ;;  %2456 = vmatpush.bf16.msra.mxu2 %v11252_v28 }
 0x2a2   :  { %2442 = vmatpush.bf16.msra.mxu1 %v11253_v38  ;;  %2468 = vmatpush.bf16.msra.mxu3 %v11254_v27 }
 0x2a3   :  { %2383 = vmatmul.bf16.vlgmr.msrb.gmra.mxu0 %v9057_v35  ;;  %2409 = vmatmul.bf16.vlgmr.msrb.gmra.mxu2 %v9057_v35 }
 0x2a4   :  { %2431 = vmatpush.bf16.msra.mxu0 %v11255_v54  ;;  %2457 = vmatpush.bf16.msra.mxu2 %v11256_v23 }
 0x2a6   :  { %2443 = vmatpush.bf16.msra.mxu1 %v11257_v52  ;;  %2469 = vmatpush.bf16.msra.mxu3 %v11258_v2 }
 0x2a8   :  { %2432 = vmatpush.bf16.msra.mxu0 %v11259_v60  ;;  %2458 = vmatpush.bf16.msra.mxu2 %v11260_v9 }
 0x2a9   :  { %2396 = vmatmul.bf16.vlgmr.msrb.gmra.mxu1 %v9072_v13  ;;  %2422 = vmatmul.bf16.vlgmr.msrb.gmra.mxu3 %v9072_v13 }
 0x2aa   :  { %2444 = vmatpush.bf16.msra.mxu1 %v11358_v3  ;;  %2470 = vmatpush.bf16.msra.mxu3 %v11359_v59 }
 0x2ac   :  { %2433 = vmatpush.bf16.msra.mxu0 %v11360_v22  ;;  %2459 = vmatpush.bf16.msra.mxu2 %v11361_v39 }
 0x2ae   :  { %2445 = vmatpush.bf16.msra.mxu1 %v11362_v0  ;;  %2471 = vmatpush.bf16.msra.mxu3 %v11363_v11 }
 0x2b0   :  { %2434 = vmatpush.bf16.msra.mxu0 %v11364_v17  ;;  %2460 = vmatpush.bf16.msra.mxu2 %v11365_v49 }
 0x2b2   :  { %2446 = vmatpush.bf16.msra.mxu1 %v11368_v48  ;;  %2472 = vmatpush.bf16.msra.mxu3 %v11369_v4  ;;  %v11463_v4 = vld [vmem:[#allocation185_spill] sm:$0xff] }
 0x2b3   :  { %2435 = vmatmul.bf16.vlgmr.msra.gmra.mxu0 %v9057_v35  ;;  %2461 = vmatmul.bf16.vlgmr.msra.gmra.mxu2 %v9057_v35 }
 0x2b4   :  { %2479 = vmatpush.bf16.msrb.mxu0 %v11366_v42  ;;  %2505 = vmatpush.bf16.msrb.mxu2 %v11367_v50 }
 0x2b6   :  { %2447 = vmatpush.bf16.msra.mxu1 %v11372_v30  ;;  %2473 = vmatpush.bf16.msra.mxu3 %v11373_v40 }
 0x2b8   :  { %2480 = vmatpush.bf16.msrb.mxu0 %v11370_v46  ;;  %2506 = vmatpush.bf16.msrb.mxu2 %v11371_v41 }
 0x2b9   :  { %2448 = vmatmul.bf16.vlgmr.msra.gmra.mxu1 %v9072_v13  ;;  %2474 = vmatmul.bf16.vlgmr.msra.gmra.mxu3 %v9072_v13 }
 0x2ba   :  { %2492 = vmatpush.bf16.msrb.mxu1 %v11374_v26  ;;  %2518 = vmatpush.bf16.msrb.mxu3 %v11375_v1 }
 0x2bc   :  { %2481 = vmatpush.bf16.msrb.mxu0 %v11376_v31  ;;  %2507 = vmatpush.bf16.msrb.mxu2 %v11377_v7 }
 0x2be   :  { %2493 = vmatpush.bf16.msrb.mxu1 %v11378_v53  ;;  %2519 = vmatpush.bf16.msrb.mxu3 %v11379_v24 }
 0x2c0   :  { %2482 = vmatpush.bf16.msrb.mxu0 %v11380_v14  ;;  %2508 = vmatpush.bf16.msrb.mxu2 %v11280_v36 }
 0x2c2   :  { %2494 = vmatpush.bf16.msrb.mxu1 %v11281_v45  ;;  %2520 = vmatpush.bf16.msrb.mxu3 %v11381_v63  ;;  %v11382_v63 = vld [vmem:[#allocation161_spill] sm:$0xff] }
 0x2c4   :  { %2483 = vmatpush.bf16.msrb.mxu0 %v11283_v62  ;;  %2509 = vmatpush.bf16.msrb.mxu2 %v11284_v6  ;;  %v11383_v62 = vld [vmem:[#allocation163_spill] sm:$0xff]  ;;  %v11384_v6 = vld [vmem:[#allocation172_spill] sm:$0xff] }
 0x2c6   :  { %2495 = vmatpush.bf16.msrb.mxu1 %v11285_v25  ;;  %2521 = vmatpush.bf16.msrb.mxu3 %v11286_v33  ;;  %v11385_v25 = vld [vmem:[#allocation174_spill] sm:$0xff] }
 0x2c7   :  { %v11386_v33 = vld [vmem:[#allocation14_spill] sm:$0xff] }
 0x2c8   :  { %2484 = vmatpush.bf16.msrb.mxu0 %v11287_v29  ;;  %2510 = vmatpush.bf16.msrb.mxu2 %v11288_v19  ;;  %v11387_v29 = vld [vmem:[#allocation16_spill] sm:$0xff]  ;;  %v11388_v19 = vld [vmem:[#allocation167_spill] sm:$0xff] }
 0x2ca   :  { %2496 = vmatpush.bf16.msrb.mxu1 %v11289_v55  ;;  %2522 = vmatpush.bf16.msrb.mxu3 %v11290_v20  ;;  %v11389_v55 = vld [vmem:[#allocation171_spill] sm:$0xff] }
 0x2cb   :  { %v11406_v20 = vld [vmem:[#allocation27_spill] sm:$0xff] }
 0x2cc   :  { %2485 = vmatpush.bf16.msrb.mxu0 %v8569_v16  ;;  %2511 = vmatpush.bf16.msrb.mxu2 %v8580_v8  ;;  %v11390_v8 = vld [vmem:[#allocation18_spill] sm:$0xff]  ;;  %v11405_v16 = vld [vmem:[#allocation32_spill] sm:$0xff] }
 0x2ce   :  { %2497 = vmatpush.bf16.msrb.mxu1 %v11382_v63  ;;  %2523 = vmatpush.bf16.msrb.mxu3 %v11383_v62  ;;  %v11391_v63 = vld [vmem:[#allocation20_spill] sm:$0xff]  ;;  %v11392_v62 = vld [vmem:[#allocation173_spill] sm:$0xff] }
 0x2d0   :  { %2486 = vmatpush.bf16.msrb.mxu0 %v11384_v6  ;;  %2512 = vmatpush.bf16.msrb.mxu2 %v11385_v25  ;;  %v11393_v6 = vld [vmem:[#allocation175_spill] sm:$0xff] }
 0x2d1   :  { %v11394_v25 = vld [vmem:[#allocation15_spill] sm:$0xff] }
 0x2d2   :  { %2498 = vmatpush.bf16.msrb.mxu1 %v11388_v19  ;;  %2524 = vmatpush.bf16.msrb.mxu3 %v11389_v55  ;;  %v11396_v55 = vld [vmem:[#allocation22_spill] sm:$0xff]  ;;  %v11397_v19 = vld [vmem:[#allocation24_spill] sm:$0xff] }
 0x2d3   :  { %2487 = vmatmul.bf16.vlgmr.msrb.gmra.mxu0 %v9057_v35  ;;  %2513 = vmatmul.bf16.vlgmr.msrb.gmra.mxu2 %v9057_v35 }
 0x2d4   :  { %2681 = vmatpush.bf16.msra.mxu0 %v11386_v33  ;;  %2707 = vmatpush.bf16.msra.mxu2 %v11387_v29  ;;  %v11395_v33 = vld [vmem:[#allocation17_spill] sm:$0xff]  ;;  %v11398_v29 = vld [vmem:[#allocation19_spill] sm:$0xff] }
 0x2d6   :  { %2499 = vmatpush.bf16.msrb.mxu1 %v11392_v62  ;;  %2525 = vmatpush.bf16.msrb.mxu3 %v11393_v6  ;;  %v11401_v62 = vld [vmem:[#allocation28_spill] sm:$0xff]  ;;  %v11402_v6 = vld [vmem:[#allocation23_spill] sm:$0xff] }
 0x2d8   :  { %2682 = vmatpush.bf16.msra.mxu0 %v11390_v8  ;;  %2708 = vmatpush.bf16.msra.mxu2 %v11391_v63  ;;  %v11399_v8 = vld [vmem:[#allocation21_spill] sm:$0xff]  ;;  %v11400_v63 = vld [vmem:[#allocation26_spill] sm:$0xff] }
 0x2d9   :  { %2500 = vmatmul.bf16.vlgmr.msrb.gmra.mxu1 %v9072_v13  ;;  %2526 = vmatmul.bf16.vlgmr.msrb.gmra.mxu3 %v9072_v13 }
 0x2da   :  { %2694 = vmatpush.bf16.msra.mxu1 %v11394_v25  ;;  %2720 = vmatpush.bf16.msra.mxu3 %v11395_v33  ;;  %v11403_v25 = vld [vmem:[#allocation25_spill] sm:$0xff]  ;;  %v11404_v33 = vld [vmem:[#allocation30_spill] sm:$0xff] }
 0x2dc   :  { %2683 = vmatpush.bf16.msra.mxu0 %v11396_v55  ;;  %2709 = vmatpush.bf16.msra.mxu2 %v11397_v19  ;;  %v11407_v55 = vld [vmem:[#allocation29_spill] sm:$0xff]  ;;  %v11408_v19 = vld [vmem:[#allocation34_spill] sm:$0xff] }
 0x2de   :  { %2695 = vmatpush.bf16.msra.mxu1 %v11398_v29  ;;  %2721 = vmatpush.bf16.msra.mxu3 %v11399_v8  ;;  %v11409_v29 = vld [vmem:[#allocation36_spill] sm:$0xff]  ;;  %v11410_v8 = vld [vmem:[#allocation31_spill] sm:$0xff] }
 0x2e0   :  { %2684 = vmatpush.bf16.msra.mxu0 %v11400_v63  ;;  %2710 = vmatpush.bf16.msra.mxu2 %v11401_v62  ;;  %v11411_v63 = vld [vmem:[#allocation33_spill] sm:$0xff]  ;;  %v11412_v62 = vld [vmem:[#allocation38_spill] sm:$0xff] }
 0x2e2   :  { %2696 = vmatpush.bf16.msra.mxu1 %v11402_v6  ;;  %2722 = vmatpush.bf16.msra.mxu3 %v11403_v25  ;;  %v11413_v6 = vld [vmem:[#allocation40_spill] sm:$0xff]  ;;  %v11414_v25 = vld [vmem:[#allocation35_spill] sm:$0xff] }
 0x2e4   :  { %2685 = vmatpush.bf16.msra.mxu0 %v11404_v33  ;;  %2711 = vmatpush.bf16.msra.mxu2 %v11405_v16  ;;  %v11415_v33 = vld [vmem:[#allocation37_spill] sm:$0xff]  ;;  %v11416_v16 = vld [vmem:[#allocation42_spill] sm:$0xff] }
 0x2e6   :  { %2697 = vmatpush.bf16.msra.mxu1 %v11406_v20  ;;  %2723 = vmatpush.bf16.msra.mxu3 %v11407_v55  ;;  %v11417_v20 = vld [vmem:[#allocation44_spill] sm:$0xff]  ;;  %v11418_v55 = vld [vmem:[#allocation46_spill] sm:$0xff] }
 0x2e8   :  { %2686 = vmatpush.bf16.msra.mxu0 %v11408_v19  ;;  %2712 = vmatpush.bf16.msra.mxu2 %v11409_v29  ;;  %v11419_v19 = vld [vmem:[#allocation48_spill] sm:$0xff]  ;;  %v11420_v29 = vld [vmem:[#allocation39_spill] sm:$0xff] }
 0x2ea   :  { %2698 = vmatpush.bf16.msra.mxu1 %v11410_v8  ;;  %2724 = vmatpush.bf16.msra.mxu3 %v11411_v63  ;;  %v11421_v8 = vld [vmem:[#allocation41_spill] sm:$0xff]  ;;  %v11422_v63 = vld [vmem:[#allocation50_spill] sm:$0xff] }
 0x2ec   :  { %2687 = vmatpush.bf16.msra.mxu0 %v11412_v62  ;;  %2713 = vmatpush.bf16.msra.mxu2 %v11413_v6  ;;  %v11423_v62 = vld [vmem:[#allocation52_spill] sm:$0xff]  ;;  %v11424_v6 = vld [vmem:[#allocation43_spill] sm:$0xff] }
 0x2ee   :  { %2699 = vmatpush.bf16.msra.mxu1 %v11414_v25  ;;  %2725 = vmatpush.bf16.msra.mxu3 %v11415_v33  ;;  %v11425_v25 = vld [vmem:[#allocation45_spill] sm:$0xff]  ;;  %v11426_v33 = vld [vmem:[#allocation47_spill] sm:$0xff] }
 0x2f0   :  { %2688 = vmatpush.bf16.msra.mxu0 %v11416_v16  ;;  %2714 = vmatpush.bf16.msra.mxu2 %v11417_v20  ;;  %v11427_v16 = vld [vmem:[#allocation49_spill] sm:$0xff]  ;;  %v11428_v20 = vld [vmem:[#allocation54_spill] sm:$0xff] }
 0x2f2   :  { %2700 = vmatpush.bf16.msra.mxu1 %v11420_v29  ;;  %2726 = vmatpush.bf16.msra.mxu3 %v11421_v8  ;;  %v11431_v29 = vld [vmem:[#allocation53_spill] sm:$0xff]  ;;  %v11432_v8 = vld [vmem:[#allocation58_spill] sm:$0xff] }
 0x2f4   :  { %2733 = vmatpush.bf16.msrb.mxu0 %v11418_v55  ;;  %2759 = vmatpush.bf16.msrb.mxu2 %v11419_v19  ;;  %v11429_v55 = vld [vmem:[#allocation56_spill] sm:$0xff]  ;;  %v11430_v19 = vld [vmem:[#allocation51_spill] sm:$0xff] }
 0x2f6   :  { %2701 = vmatpush.bf16.msra.mxu1 %v11424_v6  ;;  %2727 = vmatpush.bf16.msra.mxu3 %v11425_v25  ;;  %v11435_v6 = vld [vmem:[#allocation57_spill] sm:$0xff]  ;;  %v11436_v25 = vld [vmem:[#allocation62_spill] sm:$0xff] }
 0x2f8   :  { %2734 = vmatpush.bf16.msrb.mxu0 %v11422_v63  ;;  %2760 = vmatpush.bf16.msrb.mxu2 %v11423_v62  ;;  %v11433_v63 = vld [vmem:[#allocation60_spill] sm:$0xff]  ;;  %v11434_v62 = vld [vmem:[#allocation55_spill] sm:$0xff] }
 0x2fa   :  { %2746 = vmatpush.bf16.msrb.mxu1 %v11426_v33  ;;  %2772 = vmatpush.bf16.msrb.mxu3 %v11427_v16  ;;  %v11437_v33 = vld [vmem:[#allocation64_spill] sm:$0xff]  ;;  %v11438_v16 = vld [vmem:[#allocation59_spill] sm:$0xff] }
 0x2fc   :  { %2735 = vmatpush.bf16.msrb.mxu0 %v11428_v20  ;;  %2761 = vmatpush.bf16.msrb.mxu2 %v11429_v55  ;;  %v11439_v20 = vld [vmem:[#allocation61_spill] sm:$0xff]  ;;  %v11440_v55 = vld [vmem:[#allocation66_spill] sm:$0xff] }
 0x2fe   :  { %2747 = vmatpush.bf16.msrb.mxu1 %v11430_v19  ;;  %2773 = vmatpush.bf16.msrb.mxu3 %v11431_v29  ;;  %v11441_v19 = vld [vmem:[#allocation68_spill] sm:$0xff]  ;;  %v11442_v29 = vld [vmem:[#allocation63_spill] sm:$0xff] }
 0x300   :  { %2736 = vmatpush.bf16.msrb.mxu0 %v11432_v8  ;;  %2762 = vmatpush.bf16.msrb.mxu2 %v11433_v63  ;;  %v11443_v8 = vld [vmem:[#allocation65_spill] sm:$0xff]  ;;  %v11444_v63 = vld [vmem:[#allocation70_spill] sm:$0xff] }
 0x302   :  { %2748 = vmatpush.bf16.msrb.mxu1 %v11434_v62  ;;  %2774 = vmatpush.bf16.msrb.mxu3 %v11435_v6  ;;  %v11445_v62 = vld [vmem:[#allocation72_spill] sm:$0xff]  ;;  %v11446_v6 = vld [vmem:[#allocation67_spill] sm:$0xff] }
 0x304   :  { %2737 = vmatpush.bf16.msrb.mxu0 %v11436_v25  ;;  %2763 = vmatpush.bf16.msrb.mxu2 %v11437_v33  ;;  %v11447_v25 = vld [vmem:[#allocation69_spill] sm:$0xff]  ;;  %v11448_v33 = vld [vmem:[#allocation74_spill] sm:$0xff] }
 0x306   :  { %2749 = vmatpush.bf16.msrb.mxu1 %v11438_v16  ;;  %2775 = vmatpush.bf16.msrb.mxu3 %v11439_v20  ;;  %v11449_v16 = vld [vmem:[#allocation76_spill] sm:$0xff]  ;;  %v11450_v20 = vld [vmem:[#allocation71_spill] sm:$0xff] }
 0x308   :  { %2738 = vmatpush.bf16.msrb.mxu0 %v11440_v55  ;;  %2764 = vmatpush.bf16.msrb.mxu2 %v11441_v19  ;;  %v11451_v55 = vld [vmem:[#allocation73_spill] sm:$0xff]  ;;  %v11452_v19 = vld [vmem:[#allocation75_spill] sm:$0xff] }
 0x30a   :  { %2750 = vmatpush.bf16.msrb.mxu1 %v11442_v29  ;;  %2776 = vmatpush.bf16.msrb.mxu3 %v11443_v8  ;;  %v11453_v29 = vld [vmem:[#allocation77_spill] sm:$0xff] }
 0x30c   :  { %2739 = vmatpush.bf16.msrb.mxu0 %v11444_v63  ;;  %2765 = vmatpush.bf16.msrb.mxu2 %v11445_v62 }
 0x30e   :  { %2751 = vmatpush.bf16.msrb.mxu1 %v11446_v6  ;;  %2777 = vmatpush.bf16.msrb.mxu3 %v11447_v25  ;;  %v11454_v6 = vld [vmem:[#allocation104_spill] sm:$0xff] }
 0x310   :  { %2740 = vmatpush.bf16.msrb.mxu0 %v11448_v33  ;;  %2766 = vmatpush.bf16.msrb.mxu2 %v11449_v16  ;;  %v2332_v8 = vpop.f32.mrf.mxu0 }
 0x312   :  { %2752 = vmatpush.bf16.msrb.mxu1 %v11450_v20  ;;  %2778 = vmatpush.bf16.msrb.mxu3 %v11451_v55  ;;  %v11455_v20 = vld [vmem:[#allocation106_spill] sm:$0xff] }
 0x316   :  { %2753 = vmatpush.bf16.msrb.mxu1 %v11452_v19  ;;  %2779 = vmatpush.bf16.msrb.mxu3 %v11453_v29  ;;  %v2345_v63 = vpop.f32.mrf.mxu1  ;;  %v2358_v45 = vpop.f32.mrf.mxu2 }
 0x317   :  { %v2346_v62 = vadd.f32 %v2345_v63, %v2332_v8 }
 0x318   :  { %v2334_v36 = vpop.f32.mrf.mxu0 }
 0x319   :  { %v2531_v14 = vadd.f32 %v2346_v62, %v11454_v6  ;;  %v11456_v62 = vld [vmem:[#allocation116_spill] sm:$0xff] }
 0x31b   :  { %v6710_v25 = vmul.f32 -1.442695, %v2531_v14 }
 0x31c   :  { %v2371_v24 = vpop.f32.mrf.mxu3 }
 0x31d   :  { %7671 = vpow2.f32 %v6710_v25  ;;  %v2372_v33 = vadd.f32 %v2371_v24, %v2358_v45  ;;  %v11457_v25 = vld [vmem:[#allocation118_spill] sm:$0xff] }
 0x31e   :  { %v2347_v16 = vpop.f32.mrf.mxu1  ;;  %v2360_v53 = vpop.f32.mrf.mxu2 }
 0x31f   :  { %v2532_v7 = vadd.f32 %v2372_v33, %v11455_v20 }
 0x320   :  { %v2384_v55 = vpop.f32.mrf.mxu0 }
 0x321   :  { %v6711_v31 = vmul.f32 -1.442695, %v2532_v7 }
 0x323   :  { %v7672_v19 = vpop.eup %7671  ;;  %7673 = vpow2.f32 %v6711_v31 }
 0x324   :  { %v2545_v29 = vadd.f32 1.0, %v7672_v19  ;;  %v2373_v1 = vpop.f32.mrf.mxu3 }
 0x326   :  { %v2397_v26 = vpop.f32.mrf.mxu1  ;;  %v2410_v40 = vpop.f32.mrf.mxu2  ;;  %7675 = vrcp.f32 %v2545_v29  ;;  %v2556_v41 = vand.u32 2147483647, %v2545_v29  ;;  %vm2552_vm2 = vweird.f32 %v2545_v29 }
 0x327   :  { %v2398_v8 = vadd.f32 %v2397_v26, %v2384_v55 }
 0x328   :  { %v2386_v63 = vpop.f32.mrf.mxu0  ;;  %vm9242_vm4 = vcmp.eq.f32.partialorder %v2556_v41, 8.507059e+37 }
 0x329   :  { %v7674_v6 = vpop.eup %7673  ;;  %v2533_v14 = vadd.f32 %v2398_v8, %v11456_v62 }
 0x32a   :  { %v9225_v36 = vadd.f32 1.0, %v7674_v6 }
 0x32b   :  { %v6712_v45 = vmul.f32 -1.442695, %v2533_v14 }
 0x32c   :  { %7677 = vrcp.f32 %v9225_v36  ;;  %v2423_v16 = vpop.f32.mrf.mxu3  ;;  %v7676_v24 = vpop.eup %7675  ;;  %vm2567_vm7 = vweird.f32 %v9225_v36  ;;  %v2571_v41 = vand.u32 2147483647, %v9225_v36 }
 0x32d   :  { %7679 = vpow2.f32 %v6712_v45  ;;  %v2424_v33 = vadd.f32 %v2423_v16, %v2410_v40  ;;  %v2548_v53 = vmul.f32 %v7676_v24, %v2545_v29  ;;  %vm2553_vm1 = vweird.f32 %v7676_v24 }
 0x32e   :  { %v2399_v20 = vpop.f32.mrf.mxu1  ;;  %v2412_v19 = vpop.f32.mrf.mxu2  ;;  %vm9238_vm3 = vmor %vm2552_vm2, %vm2553_vm1  ;;  %vm2572_vm12 = vcmp.eq.f32.partialorder %v2571_v41, 8.507059e+37 }
 0x32f   :  { %v2534_v7 = vadd.f32 %v2424_v33, %v11457_v25  ;;  %v2549_v8 = vsub.f32 1.0, %v2548_v53 }
 0x330   :  { %v2436_v1 = vpop.f32.mrf.mxu0 }
 0x331   :  { %v6713_v55 = vmul.f32 -1.442695, %v2534_v7  ;;  %v2550_v16 = vmul.f32 %v7676_v24, %v2549_v8  ;;  %v11458_v7 = vld [vmem:[#allocation184_spill] sm:$0xff] }
 0x332   :  { %v9229_v31 = vpop.eup %7677 }
 0x333   :  { %v7680_v26 = vpop.eup %7679  ;;  %7681 = vpow2.f32 %v6713_v55  ;;  %v2563_v62 = vmul.f32 %v9229_v31, %v9225_v36  ;;  %v2558_v55 = vand.u32 2147483648, %v2545_v29  ;;  %vm2568_vm5 = vweird.f32 %v9229_v31 }
 0x334   :  { %v2583_v63 = vadd.f32 1.0, %v7680_v26  ;;  %v2425_v6 = vpop.f32.mrf.mxu3  ;;  %v2551_v26 = vadd.f32 %v7676_v24, %v2550_v16  ;;  %vm9259_vm9 = vmor %vm2567_vm7, %vm2568_vm5 }
 0x335   :  { %v2564_v19 = vsub.f32 1.0, %v2563_v62 }
 0x336   :  { %7683 = vrcp.f32 %v2583_v63  ;;  %v2462_v14 = vpop.f32.mrf.mxu2  ;;  %v2449_v40 = vpop.f32.mrf.mxu1  ;;  %vm2590_vm8 = vweird.f32 %v2583_v63 }
 0x337   :  { %v2450_v45 = vadd.f32 %v2449_v40, %v2436_v1  ;;  %v2565_v1 = vmul.f32 %v9229_v31, %v2564_v19 }
 0x338   :  { %v2438_v20 = vpop.f32.mrf.mxu0 }
 0x339   :  { %v7682_v33 = vpop.eup %7681  ;;  %v2535_v30 = vadd.f32 %v2450_v45, %v11458_v7  ;;  %v2596_v7 = vand.u32 2147483648, %v2583_v63 }
 0x33a   :  { %v9233_v25 = vadd.f32 1.0, %v7682_v33  ;;  %v2559_v33 = vor.u32 1.1754944e-38, %v2558_v55  ;;  %v2573_v55 = vand.u32 2147483648, %v9225_v36 }
 0x33c   :  { %v7684_v53 = vpop.eup %7683  ;;  %7685 = vrcp.f32 %v9233_v25  ;;  %v2475_v46 = vpop.f32.mrf.mxu3  ;;  %v2611_v45 = vand.u32 2147483648, %v9233_v25  ;;  %vm2605_vm14 = vweird.f32 %v9233_v25 }
 0x33d   :  { %v2586_v6 = vmul.f32 %v7684_v53, %v2583_v63  ;;  %7687 = vtanh.f32 %v2535_v30  ;;  %v2476_v8 = vadd.f32 %v2475_v46, %v2462_v14  ;;  %v2555_v30 = vsel %vm9238_vm3, %v7676_v24, %v2551_v26 }
 0x33e   :  { %v2464_v40 = vpop.f32.mrf.mxu2  ;;  %v2451_v16 = vpop.f32.mrf.mxu1  ;;  %vm2591_vm6 = vweird.f32 %v7684_v53  ;;  %v2594_v46 = vand.u32 2147483647, %v2583_v63  ;;  %v2566_v14 = vadd.f32 %v9229_v31, %v2565_v1 }
 0x33f   :  { %v2587_v62 = vsub.f32 1.0, %v2586_v6  ;;  %v2536_v19 = vadd.f32 %v2476_v8, %v11463_v4  ;;  %v2560_v4 = vsel %vm9242_vm4, %v2559_v33, %v2555_v30  ;;  %vm2592_vm10 = vmor %vm2590_vm8, %vm2591_vm6  ;;  %v2597_v8 = vor.u32 1.1754944e-38, %v2596_v7 }
 0x340   :  { %vm2595_vm11 = vcmp.eq.f32.partialorder %v2594_v46, 8.507059e+37  ;;  %v2570_v63 = vsel %vm9259_vm9, %v9229_v31, %v2566_v14  ;;  %v2574_v30 = vor.u32 1.1754944e-38, %v2573_v55  ;;  %v2609_v7 = vand.u32 2147483647, %v9233_v25 }
 0x341   :  { %v2588_v29 = vmul.f32 %v7684_v53, %v2587_v62  ;;  %7689 = vtanh.f32 %v2536_v19  ;;  %v2612_v14 = vor.u32 1.1754944e-38, %v2611_v45 }
 0x342   :  { %v7686_v6 = vpop.eup %7685  ;;  %vm2610_vm1 = vcmp.eq.f32.partialorder %v2609_v7, 8.507059e+37 }
 0x343   :  { %v7688_v40 = vpop.eup %7687  ;;  %v2601_v24 = vmul.f32 %v7686_v6, %v9233_v25  ;;  %v2589_v26 = vadd.f32 %v7684_v53, %v2588_v29  ;;  %vm2606_vm13 = vweird.f32 %v7686_v6 }
 0x344   :  { %v2657_v62 = vmul.f32 %v7688_v40, %v2560_v4  ;;  %v2477_v16 = vpop.f32.mrf.mxu3  ;;  %vm2607_vm0 = vmor %vm2605_vm14, %vm2606_vm13 }
 0x345   :  { %v2602_v20 = vsub.f32 1.0, %v2601_v24  ;;  %v2593_v36 = vsel %vm2592_vm10, %v7684_v53, %v2589_v26  ;;  %v2575_v24 = vsel %vm2572_vm12, %v2574_v30, %v2570_v63  ;;  %v11466_v63 = vld [vmem:[#allocation188_spill] sm:$0xff]  ;;  %vm5560_vm10 = vcmask 1042434  }
 0x346   :  { %v2598_v33 = vsel %vm2595_vm11, %v2597_v8, %v2593_v36 }
 0x347   :  { %v2603_v19 = vmul.f32 %v7686_v6, %v2602_v20  ;;  %v2655_v29 = vmul.f32 %v2598_v33, %v9045_v44  ;;  %v7690_v40 = vpop.eup %7689 }
 0x348   :  { %v2658_v31 = vmul.f32 %v7690_v40, %v2575_v24 }
 0x349   :  { %v9270_v53 = vadd.f32 %v2657_v62, %v2655_v29  ;;  %v2604_v46 = vadd.f32 %v7686_v6, %v2603_v19 }
 0x34b   :  { %v2608_v4 = vsel %vm2607_vm0, %v7686_v6, %v2604_v46  ;;  %v11467_v6 = vld [vmem:[#allocation190_spill] sm:$0xff] }
 0x34c   :  { %v2613_v41 = vsel %vm2610_vm1, %v2612_v14, %v2608_v4 }
 0x34d   :  { %v2656_v55 = vmul.f32 %v2613_v41, %v9048_v21 }
 0x34f   :  { %v9273_v1 = vadd.f32 %v2658_v31, %v2656_v55 }
 0x350   :  { %v2488_v26 = vpop.f32.mrf.mxu0 }
 0x356   :  { %v2501_v44 = vpop.f32.mrf.mxu1  ;;  %v2514_v8 = vpop.f32.mrf.mxu2 }
 0x357   :  { %v2502_v20 = vadd.f32 %v2501_v44, %v2488_v26 }
 0x358   :  { %v2490_v36 = vpop.f32.mrf.mxu0 }
 0x359   :  { %v2537_v25 = vadd.f32 %v2502_v20, %v11466_v63 }
 0x35b   :  { %v6714_v62 = vmul.f32 -1.442695, %v2537_v25 }
 0x35c   :  { %v2527_v16 = vpop.f32.mrf.mxu3 }
 0x35d   :  { %7691 = vpow2.f32 %v6714_v62  ;;  %v2528_v33 = vadd.f32 %v2527_v16, %v2514_v8 }
 0x35e   :  { %v2503_v30 = vpop.f32.mrf.mxu1  ;;  %v2516_v45 = vpop.f32.mrf.mxu2 }
 0x35f   :  { %v2538_v19 = vadd.f32 %v2528_v33, %v11467_v6 }
 0x361   :  { %v6715_v29 = vmul.f32 -1.442695, %v2538_v19 }
 0x363   :  { %v7692_v7 = vpop.eup %7691  ;;  %7693 = vpow2.f32 %v6715_v29 }
 0x364   :  { %v2623_v21 = vadd.f32 1.0, %v7692_v7  ;;  %v2529_v40 = vpop.f32.mrf.mxu3 }
 0x366   :  { %7695 = vrcp.f32 %v2623_v21  ;;  %v2636_v41 = vand.u32 2147483648, %v2623_v21  ;;  %v2634_v26 = vand.u32 2147483647, %v2623_v21  ;;  %vm2630_vm3 = vweird.f32 %v2623_v21 }
 0x368   :  { %v2637_v36 = vor.u32 1.1754944e-38, %v2636_v41  ;;  %vm2635_vm5 = vcmp.eq.f32.partialorder %v2634_v26, 8.507059e+37 }
 0x369   :  { %v7694_v24 = vpop.eup %7693 }
 0x36a   :  { %v2624_v46 = vadd.f32 1.0, %v7694_v24 }
 0x36c   :  { %v7696_v31 = vpop.eup %7695  ;;  %7697 = vrcp.f32 %v2624_v46  ;;  %v2651_v33 = vand.u32 2147483648, %v2624_v46  ;;  %v2649_v6 = vand.u32 2147483647, %v2624_v46  ;;  %vm2645_vm7 = vweird.f32 %v2624_v46 }
 0x36d   :  { %v2626_v14 = vmul.f32 %v7696_v31, %v2623_v21  ;;  %7699 = vtanh.f32 %v9270_v53  ;;  %vm2631_vm2 = vweird.f32 %v7696_v31  ;;  %v11468_v21 = vunpack.c.l.b16 %v9057_v35 }
 0x36e   :  { %vm2632_vm4 = vmor %vm2630_vm3, %vm2631_vm2  ;;  %7701 = vtanh.f32 %v9273_v1  ;;  %v2652_v7 = vor.u32 1.1754944e-38, %v2651_v33  ;;  %vm2650_vm9 = vcmp.eq.f32.partialorder %v2649_v6, 8.507059e+37  ;;  %v11469_v35 = vunpack.c.l.b16 %v8836_v10  ;;  %v11476_v6 = vld [vmem:[#allocation128_spill] sm:$0xff] }
 0x36f   :  { %v2627_v4 = vsub.f32 1.0, %v2626_v14  ;;  %v5556_v40 = vrot.slane %v11468_v21, 7  ;;  %v11479_v21 = vld [vmem:[#allocation140_spill] sm:$0xff] }
 0x371   :  { %v2628_v55 = vmul.f32 %v7696_v31, %v2627_v4  ;;  %v5558_v26 = vsel %vm5557_vm15, %v5556_v40, %v11469_v35  ;;  %v11480_v40 = vld [vmem:[#allocation144_spill] sm:$0xff] }
 0x372   :  { %v7698_v44 = vpop.eup %7697  ;;  %v11488_v35 = vld [vmem:[#allocation156_spill] sm:$0xff] }
 0x373   :  { %v2629_v8 = vadd.f32 %v7696_v31, %v2628_v55  ;;  %v2641_v20 = vmul.f32 %v7698_v44, %v2624_v46  ;;  %v7700_v62 = vpop.eup %7699  ;;  %vm2646_vm6 = vweird.f32 %v7698_v44 }
 0x374   :  { %vm2647_vm8 = vmor %vm2645_vm7, %vm2646_vm6  ;;  %v7702_v14 = vpop.eup %7701 }
 0x375   :  { %v2633_v63 = vsel %vm2632_vm4, %v7696_v31, %v2629_v8  ;;  %v2642_v25 = vsub.f32 1.0, %v2641_v20 }
 0x376   :  { %v2638_v16 = vsel %vm2635_vm5, %v2637_v36, %v2633_v63  ;;  %v11470_v36 = vunpack.c.l.b16 %v9072_v13 }
 0x377   :  { %v2663_v30 = vmul.f32 %v7700_v62, %v2638_v16  ;;  %v2643_v45 = vmul.f32 %v7698_v44, %v2642_v25  ;;  %v11471_v62 = vunpack.c.l.b16 %v8842_v15  ;;  %v11472_v15 = vld [vmem:[#allocation123_spill] sm:$0xff] }
 0x378   :  { %v5577_v63 = vrot.slane %v11470_v36, 7  ;;  %v11490_v36 = vld [vmem:[#allocation151_spill] sm:$0xff] }
 0x379   :  { %v9279_v19 = vpack.c.bf16 %v2663_v30, %v2663_v30  ;;  %v2644_v29 = vadd.f32 %v7698_v44, %v2643_v45  ;;  %v11474_v30 = vld [vmem:[#allocation138_spill] sm:$0xff]  ;;  %v11475_v45 = vld [vmem:[#allocation125_spill] sm:$0xff] }
 0x37a   :  { %v5578_v13 = vsel %vm5557_vm15, %v5577_v63, %v11471_v62  ;;  %v11491_v63 = vld [vmem:[#allocation160_spill] sm:$0xff] }
 0x37b   :  { %v2648_v24 = vsel %vm2647_vm8, %v7698_v44, %v2644_v29  ;;  %2689 = vmatmul.bf16.vlgmr.msra.gmra.mxu0 %v9279_v19  ;;  %2715 = vmatmul.bf16.vlgmr.msra.gmra.mxu2 %v9279_v19  ;;  %v5544_v31 = vunpack.c.l.b16 %v9279_v19  ;;  %v11477_v29 = vld [vmem:[#allocation131_spill] sm:$0xff]  ;;  %v11495_v62 = vld [vmem:[#allocation164_spill] sm:$0xff] }
 0x37c   :  { %v2653_v4 = vsel %vm2650_vm9, %v2652_v7, %v2648_v24  ;;  %2785 = vmatpush.bf16.msra.mxu0 %v11241_v18  ;;  %2811 = vmatpush.bf16.msra.mxu2 %v11242_v37  ;;  %v11478_v7 = vld [vmem:[#allocation134_spill] sm:$0xff]  ;;  %v11481_v24 = vld [vmem:[#allocation137_spill] sm:$0xff] }
 0x37d   :  { %v2664_v46 = vmul.f32 %v7702_v14, %v2653_v4  ;;  %v5559_v41 = vrot.slane %v5544_v31, 6  ;;  %v5821_v55 = vrot.slane %v5544_v31, 7  ;;  %v11482_v31 = vld [vmem:[#allocation139_spill] sm:$0xff]  ;;  %v11483_v14 = vld [vmem:[#allocation148_spill] sm:$0xff]  ;;  %v11484_v4 = vld [vmem:[#allocation150_spill] sm:$0xff] }
 0x37f   :  { %v9291_v44 = vpack.c.bf16 %v2664_v46, %v2664_v46  ;;  %v9294_v8 = vsel %vm5560_vm10, %v5559_v41, %v5558_v26  ;;  %v9298_v20 = vsel %vm5560_vm10, %v5821_v55, %v9070_v32  ;;  %v11485_v46 = vld [vmem:[#allocation143_spill] sm:$0xff]  ;;  %v11487_v55 = vld [vmem:[#allocation153_spill] sm:$0xff] }
 0x380   :  { %2786 = vmatpush.bf16.msra.mxu0 %v11243_v12  ;;  %2812 = vmatpush.bf16.msra.mxu2 %v11244_v34  ;;  %v11486_v41 = vld [vmem:[#allocation147_spill] sm:$0xff]  ;;  %v11489_v26 = vld [vmem:[#allocation149_spill] sm:$0xff] }
 0x381   :  { %2702 = vmatmul.bf16.vlgmr.msra.gmra.mxu1 %v9291_v44  ;;  %2728 = vmatmul.bf16.vlgmr.msra.gmra.mxu3 %v9291_v44  ;;  %v5545_v10 = vunpack.c.l.b16 %v9291_v44 }
 0x382   :  { %2798 = vmatpush.bf16.msra.mxu1 %v11245_v5  ;;  %2824 = vmatpush.bf16.msra.mxu3 %v11246_v61 }
 0x383   :  { %v5579_v25 = vrot.slane %v5545_v10, 6  ;;  %v5835_v32 = vrot.slane %v5545_v10, 7  ;;  %v11492_v10 = vld [vmem:[#allocation162_spill] sm:$0xff] }
 0x384   :  { %2787 = vmatpush.bf16.msra.mxu0 %v11247_v47  ;;  %2813 = vmatpush.bf16.msra.mxu2 %v11248_v56 }
 0x385   :  { %v9315_v16 = vsel %vm5560_vm10, %v5579_v25, %v5578_v13  ;;  %v9319_v33 = vsel %vm5560_vm10, %v5835_v32, %v9086_v51  ;;  %v11473_v51 = vld [vmem:[#allocation136_spill] sm:$0xff]  ;;  %v11493_v25 = vld [vmem:[#allocation155_spill] sm:$0xff]  ;;  %v11494_v32 = vld [vmem:[#allocation158_spill] sm:$0xff] }
 0x386   :  { %2799 = vmatpush.bf16.msra.mxu1 %v11249_v43  ;;  %2825 = vmatpush.bf16.msra.mxu3 %v11250_v57  ;;  %v11496_v13 = vld [vmem:[#allocation168_spill] sm:$0xff] }
 0x388   :  { %2788 = vmatpush.bf16.msra.mxu0 %v11251_v58  ;;  %2814 = vmatpush.bf16.msra.mxu2 %v11252_v28 }
 0x38a   :  { %2800 = vmatpush.bf16.msra.mxu1 %v11253_v38  ;;  %2826 = vmatpush.bf16.msra.mxu3 %v11254_v27 }
 0x38b   :  { %2741 = vmatmul.bf16.vlgmr.msrb.gmra.mxu0 %v9279_v19  ;;  %2767 = vmatmul.bf16.vlgmr.msrb.gmra.mxu2 %v9279_v19 }
 0x38c   :  { %2789 = vmatpush.bf16.msra.mxu0 %v11255_v54  ;;  %2815 = vmatpush.bf16.msra.mxu2 %v11256_v23 }
 0x38e   :  { %2801 = vmatpush.bf16.msra.mxu1 %v11257_v52  ;;  %2827 = vmatpush.bf16.msra.mxu3 %v11258_v2 }
 0x390   :  { %2790 = vmatpush.bf16.msra.mxu0 %v11259_v60  ;;  %2816 = vmatpush.bf16.msra.mxu2 %v11260_v9 }
 0x391   :  { %2754 = vmatmul.bf16.vlgmr.msrb.gmra.mxu1 %v9291_v44  ;;  %2780 = vmatmul.bf16.vlgmr.msrb.gmra.mxu3 %v9291_v44 }
 0x392   :  { %2802 = vmatpush.bf16.msra.mxu1 %v11358_v3  ;;  %2828 = vmatpush.bf16.msra.mxu3 %v11359_v59 }
 0x394   :  { %2791 = vmatpush.bf16.msra.mxu0 %v11360_v22  ;;  %2817 = vmatpush.bf16.msra.mxu2 %v11361_v39 }
 0x396   :  { %2803 = vmatpush.bf16.msra.mxu1 %v11362_v0  ;;  %2829 = vmatpush.bf16.msra.mxu3 %v11363_v11 }
 0x398   :  { %2792 = vmatpush.bf16.msra.mxu0 %v11364_v17  ;;  %2818 = vmatpush.bf16.msra.mxu2 %v11365_v49 }
 0x39a   :  { %2804 = vmatpush.bf16.msra.mxu1 %v11368_v48  ;;  %2830 = vmatpush.bf16.msra.mxu3 %v11472_v15 }
 0x39b   :  { %2793 = vmatmul.bf16.vlgmr.msra.gmra.mxu0 %v9279_v19  ;;  %2819 = vmatmul.bf16.vlgmr.msra.gmra.mxu2 %v9279_v19 }
 0x39c   :  { %2837 = vmatpush.bf16.msrb.mxu0 %v11366_v42  ;;  %2863 = vmatpush.bf16.msrb.mxu2 %v11367_v50 }
 0x39e   :  { %2805 = vmatpush.bf16.msra.mxu1 %v11475_v45  ;;  %2831 = vmatpush.bf16.msra.mxu3 %v11476_v6 }
 0x3a0   :  { %2838 = vmatpush.bf16.msrb.mxu0 %v11473_v51  ;;  %2864 = vmatpush.bf16.msrb.mxu2 %v11474_v30 }
 0x3a1   :  { %2806 = vmatmul.bf16.vlgmr.msra.gmra.mxu1 %v9291_v44  ;;  %2832 = vmatmul.bf16.vlgmr.msra.gmra.mxu3 %v9291_v44 }
 0x3a2   :  { %2850 = vmatpush.bf16.msrb.mxu1 %v11477_v29  ;;  %2876 = vmatpush.bf16.msrb.mxu3 %v11478_v7 }
 0x3a4   :  { %2839 = vmatpush.bf16.msrb.mxu0 %v11479_v21  ;;  %2865 = vmatpush.bf16.msrb.mxu2 %v11480_v40 }
 0x3a6   :  { %2851 = vmatpush.bf16.msrb.mxu1 %v11481_v24  ;;  %2877 = vmatpush.bf16.msrb.mxu3 %v11482_v31  ;;  %v11572_v31 = vld [vmem:[#allocation119_spill] sm:$0xff] }
 0x3a8   :  { %2840 = vmatpush.bf16.msrb.mxu0 %v11483_v14  ;;  %2866 = vmatpush.bf16.msrb.mxu2 %v11484_v4 }
 0x3aa   :  { %2852 = vmatpush.bf16.msrb.mxu1 %v11485_v46  ;;  %2878 = vmatpush.bf16.msrb.mxu3 %v11486_v41  ;;  %v11497_v41 = vld [vmem:[#allocation161_spill] sm:$0xff] }
 0x3ac   :  { %2841 = vmatpush.bf16.msrb.mxu0 %v11487_v55  ;;  %2867 = vmatpush.bf16.msrb.mxu2 %v11488_v35  ;;  %v11498_v55 = vld [vmem:[#allocation163_spill] sm:$0xff]  ;;  %v11499_v35 = vld [vmem:[#allocation172_spill] sm:$0xff] }
 0x3ae   :  { %2853 = vmatpush.bf16.msrb.mxu1 %v11489_v26  ;;  %2879 = vmatpush.bf16.msrb.mxu3 %v11490_v36  ;;  %v11500_v26 = vld [vmem:[#allocation174_spill] sm:$0xff] }
 0x3af   :  { %v11501_v36 = vld [vmem:[#allocation14_spill] sm:$0xff] }
 0x3b0   :  { %2842 = vmatpush.bf16.msrb.mxu0 %v11491_v63  ;;  %2868 = vmatpush.bf16.msrb.mxu2 %v11492_v10  ;;  %v11502_v63 = vld [vmem:[#allocation16_spill] sm:$0xff]  ;;  %v11503_v10 = vld [vmem:[#allocation167_spill] sm:$0xff] }
 0x3b2   :  { %2854 = vmatpush.bf16.msrb.mxu1 %v11493_v25  ;;  %2880 = vmatpush.bf16.msrb.mxu3 %v11494_v32  ;;  %v11504_v25 = vld [vmem:[#allocation171_spill] sm:$0xff]  ;;  %v11570_v32 = vld [vmem:[#allocation117_spill] sm:$0xff] }
 0x3b4   :  { %2843 = vmatpush.bf16.msrb.mxu0 %v11495_v62  ;;  %2869 = vmatpush.bf16.msrb.mxu2 %v11496_v13  ;;  %v11505_v13 = vld [vmem:[#allocation18_spill] sm:$0xff] }
 0x3b6   :  { %2855 = vmatpush.bf16.msrb.mxu1 %v11497_v41  ;;  %2881 = vmatpush.bf16.msrb.mxu3 %v11498_v55  ;;  %v11506_v41 = vld [vmem:[#allocation20_spill] sm:$0xff]  ;;  %v11507_v55 = vld [vmem:[#allocation173_spill] sm:$0xff] }
 0x3b8   :  { %2844 = vmatpush.bf16.msrb.mxu0 %v11499_v35  ;;  %2870 = vmatpush.bf16.msrb.mxu2 %v11500_v26  ;;  %v11508_v35 = vld [vmem:[#allocation175_spill] sm:$0xff] }
 0x3b9   :  { %v11509_v26 = vld [vmem:[#allocation15_spill] sm:$0xff] }
 0x3ba   :  { %2856 = vmatpush.bf16.msrb.mxu1 %v11503_v10  ;;  %2882 = vmatpush.bf16.msrb.mxu3 %v11504_v25  ;;  %v11511_v25 = vld [vmem:[#allocation22_spill] sm:$0xff]  ;;  %v11512_v10 = vld [vmem:[#allocation24_spill] sm:$0xff] }
 0x3bb   :  { %2845 = vmatmul.bf16.vlgmr.msrb.gmra.mxu0 %v9279_v19  ;;  %2871 = vmatmul.bf16.vlgmr.msrb.gmra.mxu2 %v9279_v19  ;;  %v11513_v19 = vld [vmem:[#allocation19_spill] sm:$0xff] }
 0x3bc   :  { %3039 = vmatpush.bf16.msra.mxu0 %v11501_v36  ;;  %3065 = vmatpush.bf16.msra.mxu2 %v11502_v63  ;;  %v11510_v36 = vld [vmem:[#allocation17_spill] sm:$0xff]  ;;  %v11520_v63 = vld [vmem:[#allocation32_spill] sm:$0xff] }
 0x3be   :  { %2857 = vmatpush.bf16.msrb.mxu1 %v11507_v55  ;;  %2883 = vmatpush.bf16.msrb.mxu3 %v11508_v35  ;;  %v11516_v55 = vld [vmem:[#allocation28_spill] sm:$0xff]  ;;  %v11517_v35 = vld [vmem:[#allocation23_spill] sm:$0xff] }
 0x3c0   :  { %3040 = vmatpush.bf16.msra.mxu0 %v11505_v13  ;;  %3066 = vmatpush.bf16.msra.mxu2 %v11506_v41  ;;  %v11514_v13 = vld [vmem:[#allocation21_spill] sm:$0xff]  ;;  %v11515_v41 = vld [vmem:[#allocation26_spill] sm:$0xff] }
 0x3c1   :  { %2858 = vmatmul.bf16.vlgmr.msrb.gmra.mxu1 %v9291_v44  ;;  %2884 = vmatmul.bf16.vlgmr.msrb.gmra.mxu3 %v9291_v44  ;;  %v11521_v44 = vld [vmem:[#allocation27_spill] sm:$0xff] }
 0x3c2   :  { %3052 = vmatpush.bf16.msra.mxu1 %v11509_v26  ;;  %3078 = vmatpush.bf16.msra.mxu3 %v11510_v36  ;;  %v11518_v26 = vld [vmem:[#allocation25_spill] sm:$0xff]  ;;  %v11519_v36 = vld [vmem:[#allocation30_spill] sm:$0xff] }
 0x3c4   :  { %3041 = vmatpush.bf16.msra.mxu0 %v11511_v25  ;;  %3067 = vmatpush.bf16.msra.mxu2 %v11512_v10  ;;  %v11522_v25 = vld [vmem:[#allocation29_spill] sm:$0xff]  ;;  %v11523_v10 = vld [vmem:[#allocation34_spill] sm:$0xff] }
 0x3c6   :  { %3053 = vmatpush.bf16.msra.mxu1 %v11513_v19  ;;  %3079 = vmatpush.bf16.msra.mxu3 %v11514_v13  ;;  %v11524_v19 = vld [vmem:[#allocation36_spill] sm:$0xff]  ;;  %v11525_v13 = vld [vmem:[#allocation31_spill] sm:$0xff] }
 0x3c8   :  { %3042 = vmatpush.bf16.msra.mxu0 %v11515_v41  ;;  %3068 = vmatpush.bf16.msra.mxu2 %v11516_v55  ;;  %v11526_v41 = vld [vmem:[#allocation33_spill] sm:$0xff]  ;;  %v11527_v55 = vld [vmem:[#allocation38_spill] sm:$0xff] }
 0x3ca   :  { %3054 = vmatpush.bf16.msra.mxu1 %v11517_v35  ;;  %3080 = vmatpush.bf16.msra.mxu3 %v11518_v26  ;;  %v11528_v35 = vld [vmem:[#allocation40_spill] sm:$0xff]  ;;  %v11529_v26 = vld [vmem:[#allocation35_spill] sm:$0xff] }
 0x3cc   :  { %3043 = vmatpush.bf16.msra.mxu0 %v11519_v36  ;;  %3069 = vmatpush.bf16.msra.mxu2 %v11520_v63  ;;  %v11530_v36 = vld [vmem:[#allocation37_spill] sm:$0xff]  ;;  %v11531_v63 = vld [vmem:[#allocation42_spill] sm:$0xff] }
 0x3ce   :  { %3055 = vmatpush.bf16.msra.mxu1 %v11521_v44  ;;  %3081 = vmatpush.bf16.msra.mxu3 %v11522_v25  ;;  %v11532_v44 = vld [vmem:[#allocation44_spill] sm:$0xff]  ;;  %v11533_v25 = vld [vmem:[#allocation46_spill] sm:$0xff] }
 0x3d0   :  { %3044 = vmatpush.bf16.msra.mxu0 %v11523_v10  ;;  %3070 = vmatpush.bf16.msra.mxu2 %v11524_v19  ;;  %v11534_v10 = vld [vmem:[#allocation48_spill] sm:$0xff]  ;;  %v11535_v19 = vld [vmem:[#allocation39_spill] sm:$0xff] }
 0x3d2   :  { %3056 = vmatpush.bf16.msra.mxu1 %v11525_v13  ;;  %3082 = vmatpush.bf16.msra.mxu3 %v11526_v41  ;;  %v11536_v13 = vld [vmem:[#allocation41_spill] sm:$0xff]  ;;  %v11537_v41 = vld [vmem:[#allocation50_spill] sm:$0xff] }
 0x3d4   :  { %3045 = vmatpush.bf16.msra.mxu0 %v11527_v55  ;;  %3071 = vmatpush.bf16.msra.mxu2 %v11528_v35  ;;  %v11538_v55 = vld [vmem:[#allocation52_spill] sm:$0xff]  ;;  %v11539_v35 = vld [vmem:[#allocation43_spill] sm:$0xff] }
 0x3d6   :  { %3057 = vmatpush.bf16.msra.mxu1 %v11529_v26  ;;  %3083 = vmatpush.bf16.msra.mxu3 %v11530_v36  ;;  %v11540_v26 = vld [vmem:[#allocation45_spill] sm:$0xff]  ;;  %v11541_v36 = vld [vmem:[#allocation47_spill] sm:$0xff] }
 0x3d8   :  { %3046 = vmatpush.bf16.msra.mxu0 %v11531_v63  ;;  %3072 = vmatpush.bf16.msra.mxu2 %v11532_v44  ;;  %v11542_v63 = vld [vmem:[#allocation49_spill] sm:$0xff]  ;;  %v11543_v44 = vld [vmem:[#allocation54_spill] sm:$0xff] }
 0x3da   :  { %3058 = vmatpush.bf16.msra.mxu1 %v11535_v19  ;;  %3084 = vmatpush.bf16.msra.mxu3 %v11536_v13  ;;  %v11546_v19 = vld [vmem:[#allocation53_spill] sm:$0xff]  ;;  %v11547_v13 = vld [vmem:[#allocation58_spill] sm:$0xff] }
 0x3dc   :  { %3091 = vmatpush.bf16.msrb.mxu0 %v11533_v25  ;;  %3117 = vmatpush.bf16.msrb.mxu2 %v11534_v10  ;;  %v11544_v25 = vld [vmem:[#allocation56_spill] sm:$0xff]  ;;  %v11545_v10 = vld [vmem:[#allocation51_spill] sm:$0xff] }
 0x3de   :  { %3059 = vmatpush.bf16.msra.mxu1 %v11539_v35  ;;  %3085 = vmatpush.bf16.msra.mxu3 %v11540_v26  ;;  %v11550_v35 = vld [vmem:[#allocation57_spill] sm:$0xff]  ;;  %v11551_v26 = vld [vmem:[#allocation62_spill] sm:$0xff] }
 0x3e0   :  { %3092 = vmatpush.bf16.msrb.mxu0 %v11537_v41  ;;  %3118 = vmatpush.bf16.msrb.mxu2 %v11538_v55  ;;  %v11548_v41 = vld [vmem:[#allocation60_spill] sm:$0xff]  ;;  %v11549_v55 = vld [vmem:[#allocation55_spill] sm:$0xff] }
 0x3e2   :  { %3104 = vmatpush.bf16.msrb.mxu1 %v11541_v36  ;;  %3130 = vmatpush.bf16.msrb.mxu3 %v11542_v63  ;;  %v11552_v36 = vld [vmem:[#allocation64_spill] sm:$0xff]  ;;  %v11553_v63 = vld [vmem:[#allocation59_spill] sm:$0xff] }
 0x3e4   :  { %3093 = vmatpush.bf16.msrb.mxu0 %v11543_v44  ;;  %3119 = vmatpush.bf16.msrb.mxu2 %v11544_v25  ;;  %v11554_v44 = vld [vmem:[#allocation61_spill] sm:$0xff]  ;;  %v11555_v25 = vld [vmem:[#allocation66_spill] sm:$0xff] }
 0x3e6   :  { %3105 = vmatpush.bf16.msrb.mxu1 %v11545_v10  ;;  %3131 = vmatpush.bf16.msrb.mxu3 %v11546_v19  ;;  %v11556_v10 = vld [vmem:[#allocation68_spill] sm:$0xff]  ;;  %v11557_v19 = vld [vmem:[#allocation63_spill] sm:$0xff] }
 0x3e8   :  { %3094 = vmatpush.bf16.msrb.mxu0 %v11547_v13  ;;  %3120 = vmatpush.bf16.msrb.mxu2 %v11548_v41  ;;  %v11558_v13 = vld [vmem:[#allocation65_spill] sm:$0xff]  ;;  %v11559_v41 = vld [vmem:[#allocation70_spill] sm:$0xff] }
 0x3ea   :  { %3106 = vmatpush.bf16.msrb.mxu1 %v11549_v55  ;;  %3132 = vmatpush.bf16.msrb.mxu3 %v11550_v35  ;;  %v11560_v55 = vld [vmem:[#allocation72_spill] sm:$0xff]  ;;  %v11561_v35 = vld [vmem:[#allocation67_spill] sm:$0xff] }
 0x3ec   :  { %3095 = vmatpush.bf16.msrb.mxu0 %v11551_v26  ;;  %3121 = vmatpush.bf16.msrb.mxu2 %v11552_v36  ;;  %v11562_v26 = vld [vmem:[#allocation69_spill] sm:$0xff]  ;;  %v11563_v36 = vld [vmem:[#allocation74_spill] sm:$0xff] }
 0x3ee   :  { %3107 = vmatpush.bf16.msrb.mxu1 %v11553_v63  ;;  %3133 = vmatpush.bf16.msrb.mxu3 %v11554_v44  ;;  %v11564_v63 = vld [vmem:[#allocation76_spill] sm:$0xff]  ;;  %v11565_v44 = vld [vmem:[#allocation71_spill] sm:$0xff] }
 0x3f0   :  { %3096 = vmatpush.bf16.msrb.mxu0 %v11555_v25  ;;  %3122 = vmatpush.bf16.msrb.mxu2 %v11556_v10  ;;  %v11566_v25 = vld [vmem:[#allocation73_spill] sm:$0xff]  ;;  %v11567_v10 = vld [vmem:[#allocation75_spill] sm:$0xff] }
 0x3f2   :  { %3108 = vmatpush.bf16.msrb.mxu1 %v11557_v19  ;;  %3134 = vmatpush.bf16.msrb.mxu3 %v11558_v13  ;;  %v11568_v19 = vld [vmem:[#allocation77_spill] sm:$0xff] }
 0x3f4   :  { %3097 = vmatpush.bf16.msrb.mxu0 %v11559_v41  ;;  %3123 = vmatpush.bf16.msrb.mxu2 %v11560_v55  ;;  %v11569_v55 = vld [vmem:[#allocation96_spill] sm:$0xff] }
 0x3f6   :  { %3109 = vmatpush.bf16.msrb.mxu1 %v11561_v35  ;;  %3135 = vmatpush.bf16.msrb.mxu3 %v11562_v26  ;;  %v544_v35 = vadd.f32 %v11570_v32, %v11569_v55 }
 0x3f8   :  { %3098 = vmatpush.bf16.msrb.mxu0 %v11563_v36  ;;  %3124 = vmatpush.bf16.msrb.mxu2 %v11564_v63  ;;  %v2690_v13 = vpop.f32.mrf.mxu0  ;;  %v11571_v63 = vld [vmem:[#allocation102_spill] sm:$0xff] }
 0x3fa   :  { %3110 = vmatpush.bf16.msrb.mxu1 %v11565_v44  ;;  %3136 = vmatpush.bf16.msrb.mxu3 %v11566_v25  ;;  %v573_v44 = vadd.f32 %v11572_v31, %v11571_v63 }
 0x3fe   :  { %3111 = vmatpush.bf16.msrb.mxu1 %v11567_v10  ;;  %3137 = vmatpush.bf16.msrb.mxu3 %v11568_v19  ;;  %v2703_v41 = vpop.f32.mrf.mxu1  ;;  %v2716_v62 = vpop.f32.mrf.mxu2 }
 0x3ff   :  { %v2704_v46 = vadd.f32 %v2703_v41, %v2690_v13 }
 0x400   :  { %v2692_v26 = vpop.f32.mrf.mxu0 }
 0x401   :  { %v2889_v4 = vadd.f32 %v2704_v46, %v544_v35  ;;  %v11573_v26 = vld [vmem:[#allocation110_spill] sm:$0xff]  ;;  %v11574_v46 = vld [vmem:[#allocation127_spill] sm:$0xff] }
 0x403   :  { %v6716_v36 = vmul.f32 -1.442695, %v2889_v4  ;;  %v602_v4 = vadd.f32 %v11574_v46, %v11573_v26 }
 0x404   :  { %v2729_v14 = vpop.f32.mrf.mxu3 }
 0x405   :  { %7703 = vpow2.f32 %v6716_v36  ;;  %v2730_v25 = vadd.f32 %v2729_v14, %v2716_v62 }
 0x406   :  { %v2705_v24 = vpop.f32.mrf.mxu1  ;;  %v2718_v10 = vpop.f32.mrf.mxu2 }
 0x407   :  { %v2890_v40 = vadd.f32 %v2730_v25, %v573_v44 }
 0x408   :  { %v2742_v19 = vpop.f32.mrf.mxu0 }
 0x409   :  { %v6717_v21 = vmul.f32 -1.442695, %v2890_v40 }
 0x40b   :  { %v7704_v7 = vpop.eup %7703  ;;  %7705 = vpow2.f32 %v6717_v21 }
 0x40c   :  { %v2903_v29 = vadd.f32 1.0, %v7704_v7  ;;  %v2731_v6 = vpop.f32.mrf.mxu3  ;;  %v11575_v7 = vld [vmem:[#allocation111_spill] sm:$0xff] }
 0x40d   :  { %v11576_v6 = vld [vmem:[#allocation130_spill] sm:$0xff] }
 0x40e   :  { %v2755_v32 = vpop.f32.mrf.mxu1  ;;  %v2768_v41 = vpop.f32.mrf.mxu2  ;;  %7707 = vrcp.f32 %v2903_v29  ;;  %v631_v21 = vadd.f32 %v11576_v6, %v11575_v7  ;;  %v11578_v6 = vld [vmem:[#allocation189_spill] sm:$0xff]  ;;  %vm2910_vm11 = vweird.f32 %v2903_v29 }
 0x40f   :  { %v2756_v35 = vadd.f32 %v2755_v32, %v2742_v19 }
 0x410   :  { %v2744_v13 = vpop.f32.mrf.mxu0 }
 0x411   :  { %v7706_v31 = vpop.eup %7705  ;;  %v2891_v36 = vadd.f32 %v2756_v35, %v602_v4 }
 0x412   :  { %v9459_v14 = vadd.f32 1.0, %v7706_v31 }
 0x413   :  { %v6718_v24 = vmul.f32 -1.442695, %v2891_v36 }
 0x414   :  { %7709 = vrcp.f32 %v9459_v14  ;;  %v2781_v40 = vpop.f32.mrf.mxu3  ;;  %v9462_v10 = vpop.eup %7707  ;;  %vm2925_vm1 = vweird.f32 %v9459_v14 }
 0x415   :  { %7711 = vpow2.f32 %v6718_v24  ;;  %v2782_v25 = vadd.f32 %v2781_v40, %v2768_v41  ;;  %v2906_v19 = vmul.f32 %v9462_v10, %v2903_v29  ;;  %v11577_v40 = vld [vmem:[#allocation180_spill] sm:$0xff]  ;;  %vm2911_vm15 = vweird.f32 %v9462_v10 }
 0x416   :  { %v2757_v62 = vpop.f32.mrf.mxu1  ;;  %v2770_v44 = vpop.f32.mrf.mxu2  ;;  %vm9482_vm12 = vmor %vm2910_vm11, %vm2911_vm15 }
 0x417   :  { %v2892_v46 = vadd.f32 %v2782_v25, %v631_v21  ;;  %v2907_v31 = vsub.f32 1.0, %v2906_v19  ;;  %v660_v21 = vadd.f32 %v11578_v6, %v11577_v40  ;;  %v11580_v6 = vld [vmem:[#allocation191_spill] sm:$0xff] }
 0x418   :  { %v2794_v32 = vpop.f32.mrf.mxu0 }
 0x419   :  { %v6719_v4 = vmul.f32 -1.442695, %v2892_v46  ;;  %v2908_v62 = vmul.f32 %v9462_v10, %v2907_v31 }
 0x41a   :  { %v9467_v35 = vpop.eup %7709 }
 0x41b   :  { %v7712_v13 = vpop.eup %7711  ;;  %7713 = vpow2.f32 %v6719_v4  ;;  %v2921_v63 = vmul.f32 %v9467_v35, %v9459_v14  ;;  %v2914_v4 = vand.u32 2147483647, %v2903_v29  ;;  %v2909_v45 = vadd.f32 %v9462_v10, %v2908_v62 }
 0x41c   :  { %v2941_v36 = vadd.f32 1.0, %v7712_v13  ;;  %v2783_v26 = vpop.f32.mrf.mxu3  ;;  %vm2926_vm14 = vweird.f32 %v9467_v35 }
 0x41d   :  { %v2922_v7 = vsub.f32 1.0, %v2921_v63  ;;  %v2916_v26 = vand.u32 2147483648, %v2903_v29  ;;  %vm9486_vm13 = vcmp.eq.f32.partialorder %v2914_v4, 8.507059e+37  ;;  %v2929_v4 = vand.u32 2147483647, %v9459_v14  ;;  %vm9503_vm3 = vmor %vm2925_vm1, %vm2926_vm14 }
 0x41e   :  { %7715 = vrcp.f32 %v2941_v36  ;;  %v2820_v24 = vpop.f32.mrf.mxu2  ;;  %v2807_v41 = vpop.f32.mrf.mxu1  ;;  %v2954_v51 = vand.u32 2147483648, %v2941_v36  ;;  %vm2948_vm2 = vweird.f32 %v2941_v36 }
 0x41f   :  { %v2808_v25 = vadd.f32 %v2807_v41, %v2794_v32  ;;  %v2923_v31 = vmul.f32 %v9467_v35, %v2922_v7  ;;  %v11579_v41 = vld [vmem:[#allocation182_spill] sm:$0xff]  ;;  %v2917_v40 = vor.u32 1.1754944e-38, %v2916_v26  ;;  %v2913_v7 = vsel %vm9482_vm12, %v9462_v10, %v2909_v45 }
 0x420   :  { %v2796_v44 = vpop.f32.mrf.mxu0  ;;  %v689_v63 = vadd.f32 %v11580_v6, %v11579_v41  ;;  %v2931_v26 = vand.u32 2147483648, %v9459_v14  ;;  %vm2930_vm6 = vcmp.eq.f32.partialorder %v2929_v4, 8.507059e+37  ;;  %v11614_v41 = vld [vmem:[#allocation168_spill] sm:$0xff] }
 0x421   :  { %v7714_v46 = vpop.eup %7713  ;;  %v2893_v19 = vadd.f32 %v2808_v25, %v660_v21  ;;  %v2918_v10 = vsel %vm9486_vm13, %v2917_v40, %v2913_v7 }
 0x422   :  { %v9474_v55 = vadd.f32 1.0, %v7714_v46  ;;  %v2932_v7 = vor.u32 1.1754944e-38, %v2931_v26 }
 0x424   :  { %v7716_v13 = vpop.eup %7715  ;;  %7717 = vrcp.f32 %v9474_v55  ;;  %v2833_v32 = vpop.f32.mrf.mxu3  ;;  %v2969_v40 = vand.u32 2147483648, %v9474_v55  ;;  %vm2963_vm8 = vweird.f32 %v9474_v55 }
 0x425   :  { %v2944_v30 = vmul.f32 %v7716_v13, %v2941_v36  ;;  %7719 = vtanh.f32 %v2893_v19  ;;  %v2834_v44 = vadd.f32 %v2833_v32, %v2820_v24  ;;  %vm2949_vm0 = vweird.f32 %v7716_v13 }
 0x426   :  { %v2822_v21 = vpop.f32.mrf.mxu2  ;;  %v2809_v19 = vpop.f32.mrf.mxu1  ;;  %v2924_v24 = vadd.f32 %v9467_v35, %v2923_v31  ;;  %vm2950_vm4 = vmor %vm2948_vm2, %vm2949_vm0 }
 0x427   :  { %v2945_v25 = vsub.f32 1.0, %v2944_v30  ;;  %v2894_v6 = vadd.f32 %v2834_v44, %v689_v63  ;;  %v2952_v30 = vand.u32 2147483647, %v2941_v36  ;;  %v2955_v44 = vor.u32 1.1754944e-38, %v2954_v51 }
 0x428   :  { %v2928_v36 = vsel %vm9503_vm3, %v9467_v35, %v2924_v24  ;;  %v2967_v51 = vand.u32 2147483647, %v9474_v55  ;;  %v2970_v24 = vor.u32 1.1754944e-38, %v2969_v40  ;;  %v11590_v40 = vld [vmem:[#allocation193_spill] sm:$0xff]  ;;  %vm5563_vm3 = vcmask 1043459  }
 0x429   :  { %v2946_v29 = vmul.f32 %v7716_v13, %v2945_v25  ;;  %7721 = vtanh.f32 %v2894_v6  ;;  %vm2953_vm5 = vcmp.eq.f32.partialorder %v2952_v30, 8.507059e+37 }
 0x42a   :  { %v7718_v32 = vpop.eup %7717  ;;  %vm2968_vm10 = vcmp.eq.f32.partialorder %v2967_v51, 8.507059e+37 }
 0x42b   :  { %v7720_v21 = vpop.eup %7719  ;;  %v2959_v45 = vmul.f32 %v7718_v32, %v9474_v55  ;;  %v2947_v63 = vadd.f32 %v7716_v13, %v2946_v29  ;;  %vm2964_vm7 = vweird.f32 %v7718_v32 }
 0x42c   :  { %v3015_v25 = vmul.f32 %v7720_v21, %v2918_v10  ;;  %v2835_v19 = vpop.f32.mrf.mxu3  ;;  %vm2965_vm9 = vmor %vm2963_vm8, %vm2964_vm7 }
 0x42d   :  { %v2960_v46 = vsub.f32 1.0, %v2959_v45  ;;  %v2951_v14 = vsel %vm2950_vm4, %v7716_v13, %v2947_v63  ;;  %v2933_v45 = vsel %vm2930_vm6, %v2932_v7, %v2928_v36 }
 0x42e   :  { %v2956_v62 = vsel %vm2953_vm5, %v2955_v44, %v2951_v14  ;;  %v11588_v14 = vld [vmem:[#allocation192_spill] sm:$0xff] }
 0x42f   :  { %v2961_v6 = vmul.f32 %v7718_v32, %v2960_v46  ;;  %v3013_v29 = vmul.f32 %v2956_v62, %v9270_v53  ;;  %v7722_v21 = vpop.eup %7721  ;;  %v11587_v46 = vld [vmem:[#allocation186_spill] sm:$0xff] }
 0x430   :  { %v3016_v35 = vmul.f32 %v7722_v21, %v2933_v45  ;;  %v718_v36 = vadd.f32 %v11588_v14, %v11587_v46  ;;  %v11613_v46 = vld [vmem:[#allocation164_spill] sm:$0xff] }
 0x431   :  { %v9514_v13 = vadd.f32 %v3015_v25, %v3013_v29  ;;  %v2962_v30 = vadd.f32 %v7718_v32, %v2961_v6  ;;  %v11589_v6 = vld [vmem:[#allocation187_spill] sm:$0xff] }
 0x433   :  { %v2966_v10 = vsel %vm2965_vm9, %v7718_v32, %v2962_v30  ;;  %v747_v32 = vadd.f32 %v11590_v40, %v11589_v6  ;;  %v11612_v6 = vld [vmem:[#allocation158_spill] sm:$0xff] }
 0x434   :  { %v2971_v4 = vsel %vm2968_vm10, %v2970_v24, %v2966_v10 }
 0x435   :  { %v3014_v26 = vmul.f32 %v2971_v4, %v9273_v1 }
 0x437   :  { %v9517_v31 = vadd.f32 %v3016_v35, %v3014_v26 }
 0x438   :  { %v2846_v63 = vpop.f32.mrf.mxu0 }
 0x43e   :  { %v2859_v53 = vpop.f32.mrf.mxu1  ;;  %v2872_v44 = vpop.f32.mrf.mxu2 }
 0x43f   :  { %v2860_v55 = vadd.f32 %v2859_v53, %v2846_v63 }
 0x440   :  { %v2848_v25 = vpop.f32.mrf.mxu0 }
 0x441   :  { %v2895_v19 = vadd.f32 %v2860_v55, %v718_v36 }
 0x443   :  { %v6720_v62 = vmul.f32 -1.442695, %v2895_v19 }
 0x444   :  { %v2885_v7 = vpop.f32.mrf.mxu3 }
 0x445   :  { %7723 = vpow2.f32 %v6720_v62  ;;  %v2886_v29 = vadd.f32 %v2885_v7, %v2872_v44 }
 0x446   :  { %v2861_v51 = vpop.f32.mrf.mxu1  ;;  %v2874_v1 = vpop.f32.mrf.mxu2 }
 0x447   :  { %v2896_v21 = vadd.f32 %v2886_v29, %v747_v32 }
 0x449   :  { %v6721_v45 = vmul.f32 -1.442695, %v2896_v21 }
 0x44b   :  { %v7724_v30 = vpop.eup %7723  ;;  %7725 = vpow2.f32 %v6721_v45 }
 0x44c   :  { %v2981_v35 = vadd.f32 1.0, %v7724_v30  ;;  %v2887_v24 = vpop.f32.mrf.mxu3 }
 0x44e   :  { %7727 = vrcp.f32 %v2981_v35  ;;  %v2994_v14 = vand.u32 2147483648, %v2981_v35  ;;  %v2992_v44 = vand.u32 2147483647, %v2981_v35  ;;  %vm2988_vm11 = vweird.f32 %v2981_v35 }
 0x450   :  { %v2995_v62 = vor.u32 1.1754944e-38, %v2994_v14  ;;  %vm2993_vm13 = vcmp.eq.f32.partialorder %v2992_v44, 8.507059e+37 }
 0x451   :  { %v7726_v10 = vpop.eup %7725 }
 0x452   :  { %v2982_v4 = vadd.f32 1.0, %v7726_v10 }
 0x454   :  { %v7728_v26 = vpop.eup %7727  ;;  %7729 = vrcp.f32 %v2982_v4  ;;  %v3009_v51 = vand.u32 2147483648, %v2982_v4  ;;  %v3007_v45 = vand.u32 2147483647, %v2982_v4  ;;  %vm3003_vm0 = vweird.f32 %v2982_v4 }
 0x455   :  { %v2984_v63 = vmul.f32 %v7728_v26, %v2981_v35  ;;  %7731 = vtanh.f32 %v9514_v13  ;;  %vm2989_vm15 = vweird.f32 %v7728_v26 }
 0x456   :  { %vm2990_vm12 = vmor %vm2988_vm11, %vm2989_vm15  ;;  %7733 = vtanh.f32 %v9517_v31  ;;  %v3010_v35 = vor.u32 1.1754944e-38, %v3009_v51  ;;  %vm3008_vm2 = vcmp.eq.f32.partialorder %v3007_v45, 8.507059e+37  ;;  %v11596_v51 = vld [vmem:[#allocation134_spill] sm:$0xff]  ;;  %v11599_v45 = vld [vmem:[#allocation137_spill] sm:$0xff] }
 0x457   :  { %v2985_v53 = vsub.f32 1.0, %v2984_v63 }
 0x459   :  { %v2986_v36 = vmul.f32 %v7728_v26, %v2985_v53 }
 0x45a   :  { %v7730_v55 = vpop.eup %7729 }
 0x45b   :  { %v2987_v25 = vadd.f32 %v7728_v26, %v2986_v36  ;;  %v2999_v19 = vmul.f32 %v7730_v55, %v2982_v4  ;;  %v7732_v32 = vpop.eup %7731  ;;  %vm3004_vm14 = vweird.f32 %v7730_v55 }
 0x45c   :  { %vm3005_vm1 = vmor %vm3003_vm0, %vm3004_vm14  ;;  %v7734_v63 = vpop.eup %7733 }
 0x45d   :  { %v2991_v7 = vsel %vm2990_vm12, %v7728_v26, %v2987_v25  ;;  %v3000_v40 = vsub.f32 1.0, %v2999_v19 }
 0x45e   :  { %v2996_v29 = vsel %vm2993_vm13, %v2995_v62, %v2991_v7 }
 0x45f   :  { %v3021_v1 = vmul.f32 %v7732_v32, %v2996_v29  ;;  %v3001_v21 = vmul.f32 %v7730_v55, %v3000_v40  ;;  %v11593_v40 = vld [vmem:[#allocation125_spill] sm:$0xff]  ;;  %v11594_v32 = vld [vmem:[#allocation128_spill] sm:$0xff]  ;;  %v11595_v29 = vld [vmem:[#allocation131_spill] sm:$0xff] }
 0x461   :  { %v9525_v30 = vpack.c.bf16 %v3021_v1, %v3021_v1  ;;  %v3002_v24 = vadd.f32 %v7730_v55, %v3001_v21  ;;  %v11597_v1 = vld [vmem:[#allocation140_spill] sm:$0xff] }
 0x462   :  { %v11598_v21 = vld [vmem:[#allocation144_spill] sm:$0xff] }
 0x463   :  { %v3006_v10 = vsel %vm3005_vm1, %v7730_v55, %v3002_v24  ;;  %3047 = vmatmul.bf16.vlgmr.msra.gmra.mxu0 %v9525_v30  ;;  %3073 = vmatmul.bf16.vlgmr.msra.gmra.mxu2 %v9525_v30  ;;  %v5546_v26 = vunpack.c.l.b16 %v9525_v30  ;;  %v11600_v24 = vld [vmem:[#allocation139_spill] sm:$0xff] }
 0x464   :  { %v3011_v53 = vsel %vm3008_vm2, %v3010_v35, %v3006_v10  ;;  %3143 = vmatpush.bf16.msra.mxu0 %v11241_v18  ;;  %3169 = vmatpush.bf16.msra.mxu2 %v11242_v37  ;;  %v11601_v35 = vld [vmem:[#allocation148_spill] sm:$0xff]  ;;  %v11602_v10 = vld [vmem:[#allocation150_spill] sm:$0xff] }
 0x465   :  { %v3022_v14 = vmul.f32 %v7734_v63, %v3011_v53  ;;  %v5562_v36 = vrot.slane %v5546_v26, 5  ;;  %v5823_v4 = vrot.slane %v5546_v26, 6  ;;  %v11603_v26 = vld [vmem:[#allocation143_spill] sm:$0xff]  ;;  %v11605_v53 = vld [vmem:[#allocation153_spill] sm:$0xff] }
 0x466   :  { %v11604_v63 = vld [vmem:[#allocation147_spill] sm:$0xff] }
 0x467   :  { %v9532_v44 = vpack.c.bf16 %v3022_v14, %v3022_v14  ;;  %v9536_v55 = vsel %vm5563_vm3, %v5562_v36, %v9294_v8  ;;  %v9540_v25 = vsel %vm5563_vm3, %v5823_v4, %v9298_v20  ;;  %v11606_v14 = vld [vmem:[#allocation156_spill] sm:$0xff]  ;;  %v11607_v36 = vld [vmem:[#allocation149_spill] sm:$0xff]  ;;  %v11608_v4 = vld [vmem:[#allocation151_spill] sm:$0xff] }
 0x468   :  { %3144 = vmatpush.bf16.msra.mxu0 %v11243_v12  ;;  %3170 = vmatpush.bf16.msra.mxu2 %v11244_v34 }
 0x469   :  { %3060 = vmatmul.bf16.vlgmr.msra.gmra.mxu1 %v9532_v44  ;;  %3086 = vmatmul.bf16.vlgmr.msra.gmra.mxu3 %v9532_v44  ;;  %v5547_v19 = vunpack.c.l.b16 %v9532_v44 }
 0x46a   :  { %3156 = vmatpush.bf16.msra.mxu1 %v11245_v5  ;;  %3182 = vmatpush.bf16.msra.mxu3 %v11246_v61 }
 0x46b   :  { %v5581_v8 = vrot.slane %v5547_v19, 5  ;;  %v5837_v62 = vrot.slane %v5547_v19, 6  ;;  %v11609_v19 = vld [vmem:[#allocation160_spill] sm:$0xff] }
 0x46c   :  { %3145 = vmatpush.bf16.msra.mxu0 %v11247_v47  ;;  %3171 = vmatpush.bf16.msra.mxu2 %v11248_v56 }
 0x46d   :  { %v9553_v20 = vsel %vm5563_vm3, %v5581_v8, %v9315_v16  ;;  %v9557_v7 = vsel %vm5563_vm3, %v5837_v62, %v9319_v33  ;;  %v11591_v16 = vld [vmem:[#allocation136_spill] sm:$0xff]  ;;  %v11592_v33 = vld [vmem:[#allocation138_spill] sm:$0xff]  ;;  %v11611_v62 = vld [vmem:[#allocation155_spill] sm:$0xff] }
 0x46e   :  { %3157 = vmatpush.bf16.msra.mxu1 %v11249_v43  ;;  %3183 = vmatpush.bf16.msra.mxu3 %v11250_v57  ;;  %v11610_v8 = vld [vmem:[#allocation162_spill] sm:$0xff] }
 0x470   :  { %3146 = vmatpush.bf16.msra.mxu0 %v11251_v58  ;;  %3172 = vmatpush.bf16.msra.mxu2 %v11252_v28 }
 0x472   :  { %3158 = vmatpush.bf16.msra.mxu1 %v11253_v38  ;;  %3184 = vmatpush.bf16.msra.mxu3 %v11254_v27 }
 0x473   :  { %3099 = vmatmul.bf16.vlgmr.msrb.gmra.mxu0 %v9525_v30  ;;  %3125 = vmatmul.bf16.vlgmr.msrb.gmra.mxu2 %v9525_v30 }
 0x474   :  { %3147 = vmatpush.bf16.msra.mxu0 %v11255_v54  ;;  %3173 = vmatpush.bf16.msra.mxu2 %v11256_v23 }
 0x476   :  { %3159 = vmatpush.bf16.msra.mxu1 %v11257_v52  ;;  %3185 = vmatpush.bf16.msra.mxu3 %v11258_v2 }
 0x478   :  { %3148 = vmatpush.bf16.msra.mxu0 %v11259_v60  ;;  %3174 = vmatpush.bf16.msra.mxu2 %v11260_v9 }
 0x479   :  { %3112 = vmatmul.bf16.vlgmr.msrb.gmra.mxu1 %v9532_v44  ;;  %3138 = vmatmul.bf16.vlgmr.msrb.gmra.mxu3 %v9532_v44 }
 0x47a   :  { %3160 = vmatpush.bf16.msra.mxu1 %v11358_v3  ;;  %3186 = vmatpush.bf16.msra.mxu3 %v11359_v59 }
 0x47c   :  { %3149 = vmatpush.bf16.msra.mxu0 %v11360_v22  ;;  %3175 = vmatpush.bf16.msra.mxu2 %v11361_v39 }
 0x47e   :  { %3161 = vmatpush.bf16.msra.mxu1 %v11362_v0  ;;  %3187 = vmatpush.bf16.msra.mxu3 %v11363_v11 }
 0x480   :  { %3150 = vmatpush.bf16.msra.mxu0 %v11364_v17  ;;  %3176 = vmatpush.bf16.msra.mxu2 %v11365_v49 }
 0x482   :  { %3162 = vmatpush.bf16.msra.mxu1 %v11368_v48  ;;  %3188 = vmatpush.bf16.msra.mxu3 %v11472_v15 }
 0x483   :  { %3151 = vmatmul.bf16.vlgmr.msra.gmra.mxu0 %v9525_v30  ;;  %3177 = vmatmul.bf16.vlgmr.msra.gmra.mxu2 %v9525_v30 }
 0x484   :  { %3195 = vmatpush.bf16.msrb.mxu0 %v11366_v42  ;;  %3221 = vmatpush.bf16.msrb.mxu2 %v11367_v50 }
 0x486   :  { %3163 = vmatpush.bf16.msra.mxu1 %v11593_v40  ;;  %3189 = vmatpush.bf16.msra.mxu3 %v11594_v32 }
 0x488   :  { %3196 = vmatpush.bf16.msrb.mxu0 %v11591_v16  ;;  %3222 = vmatpush.bf16.msrb.mxu2 %v11592_v33  ;;  %v11696_v33 = vld [vmem:[#allocation195_spill] sm:$0xff] }
 0x489   :  { %3164 = vmatmul.bf16.vlgmr.msra.gmra.mxu1 %v9532_v44  ;;  %3190 = vmatmul.bf16.vlgmr.msra.gmra.mxu3 %v9532_v44 }
 0x48a   :  { %3208 = vmatpush.bf16.msrb.mxu1 %v11595_v29  ;;  %3234 = vmatpush.bf16.msrb.mxu3 %v11596_v51 }
 0x48c   :  { %3197 = vmatpush.bf16.msrb.mxu0 %v11597_v1  ;;  %3223 = vmatpush.bf16.msrb.mxu2 %v11598_v21 }
 0x48e   :  { %3209 = vmatpush.bf16.msrb.mxu1 %v11599_v45  ;;  %3235 = vmatpush.bf16.msrb.mxu3 %v11600_v24 }
 0x490   :  { %3198 = vmatpush.bf16.msrb.mxu0 %v11601_v35  ;;  %3224 = vmatpush.bf16.msrb.mxu2 %v11602_v10 }
 0x492   :  { %3210 = vmatpush.bf16.msrb.mxu1 %v11603_v26  ;;  %3236 = vmatpush.bf16.msrb.mxu3 %v11604_v63  ;;  %v11615_v63 = vld [vmem:[#allocation161_spill] sm:$0xff] }
 0x494   :  { %3199 = vmatpush.bf16.msrb.mxu0 %v11605_v53  ;;  %3225 = vmatpush.bf16.msrb.mxu2 %v11606_v14  ;;  %v11616_v53 = vld [vmem:[#allocation163_spill] sm:$0xff]  ;;  %v11617_v14 = vld [vmem:[#allocation172_spill] sm:$0xff] }
 0x496   :  { %3211 = vmatpush.bf16.msrb.mxu1 %v11607_v36  ;;  %3237 = vmatpush.bf16.msrb.mxu3 %v11608_v4  ;;  %v11618_v36 = vld [vmem:[#allocation174_spill] sm:$0xff] }
 0x497   :  { %v11619_v4 = vld [vmem:[#allocation14_spill] sm:$0xff] }
 0x498   :  { %3200 = vmatpush.bf16.msrb.mxu0 %v11609_v19  ;;  %3226 = vmatpush.bf16.msrb.mxu2 %v11610_v8  ;;  %v11620_v19 = vld [vmem:[#allocation16_spill] sm:$0xff]  ;;  %v11621_v8 = vld [vmem:[#allocation167_spill] sm:$0xff] }
 0x49a   :  { %3212 = vmatpush.bf16.msrb.mxu1 %v11611_v62  ;;  %3238 = vmatpush.bf16.msrb.mxu3 %v11612_v6  ;;  %v11622_v62 = vld [vmem:[#allocation171_spill] sm:$0xff] }
 0x49c   :  { %3201 = vmatpush.bf16.msrb.mxu0 %v11613_v46  ;;  %3227 = vmatpush.bf16.msrb.mxu2 %v11614_v41  ;;  %v11623_v41 = vld [vmem:[#allocation18_spill] sm:$0xff] }
 0x49e   :  { %3213 = vmatpush.bf16.msrb.mxu1 %v11615_v63  ;;  %3239 = vmatpush.bf16.msrb.mxu3 %v11616_v53  ;;  %v11624_v63 = vld [vmem:[#allocation20_spill] sm:$0xff]  ;;  %v11625_v53 = vld [vmem:[#allocation173_spill] sm:$0xff] }
 0x4a0   :  { %3202 = vmatpush.bf16.msrb.mxu0 %v11617_v14  ;;  %3228 = vmatpush.bf16.msrb.mxu2 %v11618_v36  ;;  %v11626_v14 = vld [vmem:[#allocation175_spill] sm:$0xff] }
 0x4a1   :  { %v11627_v36 = vld [vmem:[#allocation15_spill] sm:$0xff] }
 0x4a2   :  { %3214 = vmatpush.bf16.msrb.mxu1 %v11621_v8  ;;  %3240 = vmatpush.bf16.msrb.mxu3 %v11622_v62  ;;  %v11629_v62 = vld [vmem:[#allocation22_spill] sm:$0xff]  ;;  %v11630_v8 = vld [vmem:[#allocation24_spill] sm:$0xff] }
 0x4a3   :  { %3203 = vmatmul.bf16.vlgmr.msrb.gmra.mxu0 %v9525_v30  ;;  %3229 = vmatmul.bf16.vlgmr.msrb.gmra.mxu2 %v9525_v30  ;;  %v11631_v30 = vld [vmem:[#allocation19_spill] sm:$0xff] }
 0x4a4   :  { %3397 = vmatpush.bf16.msra.mxu0 %v11619_v4  ;;  %3423 = vmatpush.bf16.msra.mxu2 %v11620_v19  ;;  %v11628_v4 = vld [vmem:[#allocation17_spill] sm:$0xff]  ;;  %v11638_v19 = vld [vmem:[#allocation32_spill] sm:$0xff] }
 0x4a6   :  { %3215 = vmatpush.bf16.msrb.mxu1 %v11625_v53  ;;  %3241 = vmatpush.bf16.msrb.mxu3 %v11626_v14  ;;  %v11634_v53 = vld [vmem:[#allocation28_spill] sm:$0xff]  ;;  %v11635_v14 = vld [vmem:[#allocation23_spill] sm:$0xff] }
 0x4a8   :  { %3398 = vmatpush.bf16.msra.mxu0 %v11623_v41  ;;  %3424 = vmatpush.bf16.msra.mxu2 %v11624_v63  ;;  %v11632_v41 = vld [vmem:[#allocation21_spill] sm:$0xff]  ;;  %v11633_v63 = vld [vmem:[#allocation26_spill] sm:$0xff] }
 0x4a9   :  { %3216 = vmatmul.bf16.vlgmr.msrb.gmra.mxu1 %v9532_v44  ;;  %3242 = vmatmul.bf16.vlgmr.msrb.gmra.mxu3 %v9532_v44  ;;  %v11639_v44 = vld [vmem:[#allocation27_spill] sm:$0xff] }
 0x4aa   :  { %3410 = vmatpush.bf16.msra.mxu1 %v11627_v36  ;;  %3436 = vmatpush.bf16.msra.mxu3 %v11628_v4  ;;  %v11636_v36 = vld [vmem:[#allocation25_spill] sm:$0xff]  ;;  %v11637_v4 = vld [vmem:[#allocation30_spill] sm:$0xff] }
 0x4ac   :  { %3399 = vmatpush.bf16.msra.mxu0 %v11629_v62  ;;  %3425 = vmatpush.bf16.msra.mxu2 %v11630_v8  ;;  %v11640_v62 = vld [vmem:[#allocation29_spill] sm:$0xff]  ;;  %v11641_v8 = vld [vmem:[#allocation34_spill] sm:$0xff] }
 0x4ae   :  { %3411 = vmatpush.bf16.msra.mxu1 %v11631_v30  ;;  %3437 = vmatpush.bf16.msra.mxu3 %v11632_v41  ;;  %v11642_v30 = vld [vmem:[#allocation36_spill] sm:$0xff]  ;;  %v11643_v41 = vld [vmem:[#allocation31_spill] sm:$0xff] }
 0x4b0   :  { %3400 = vmatpush.bf16.msra.mxu0 %v11633_v63  ;;  %3426 = vmatpush.bf16.msra.mxu2 %v11634_v53  ;;  %v11644_v63 = vld [vmem:[#allocation33_spill] sm:$0xff]  ;;  %v11645_v53 = vld [vmem:[#allocation38_spill] sm:$0xff] }
 0x4b2   :  { %3412 = vmatpush.bf16.msra.mxu1 %v11635_v14  ;;  %3438 = vmatpush.bf16.msra.mxu3 %v11636_v36  ;;  %v11646_v14 = vld [vmem:[#allocation40_spill] sm:$0xff]  ;;  %v11647_v36 = vld [vmem:[#allocation35_spill] sm:$0xff] }
 0x4b4   :  { %3401 = vmatpush.bf16.msra.mxu0 %v11637_v4  ;;  %3427 = vmatpush.bf16.msra.mxu2 %v11638_v19  ;;  %v11648_v4 = vld [vmem:[#allocation37_spill] sm:$0xff]  ;;  %v11649_v19 = vld [vmem:[#allocation42_spill] sm:$0xff] }
 0x4b6   :  { %3413 = vmatpush.bf16.msra.mxu1 %v11639_v44  ;;  %3439 = vmatpush.bf16.msra.mxu3 %v11640_v62  ;;  %v11650_v44 = vld [vmem:[#allocation44_spill] sm:$0xff]  ;;  %v11651_v62 = vld [vmem:[#allocation46_spill] sm:$0xff] }
 0x4b8   :  { %3402 = vmatpush.bf16.msra.mxu0 %v11641_v8  ;;  %3428 = vmatpush.bf16.msra.mxu2 %v11642_v30  ;;  %v11652_v8 = vld [vmem:[#allocation48_spill] sm:$0xff]  ;;  %v11653_v30 = vld [vmem:[#allocation39_spill] sm:$0xff] }
 0x4ba   :  { %3414 = vmatpush.bf16.msra.mxu1 %v11643_v41  ;;  %3440 = vmatpush.bf16.msra.mxu3 %v11644_v63  ;;  %v11654_v41 = vld [vmem:[#allocation41_spill] sm:$0xff]  ;;  %v11655_v63 = vld [vmem:[#allocation50_spill] sm:$0xff] }
 0x4bc   :  { %3403 = vmatpush.bf16.msra.mxu0 %v11645_v53  ;;  %3429 = vmatpush.bf16.msra.mxu2 %v11646_v14  ;;  %v11656_v53 = vld [vmem:[#allocation52_spill] sm:$0xff]  ;;  %v11657_v14 = vld [vmem:[#allocation43_spill] sm:$0xff] }
 0x4be   :  { %3415 = vmatpush.bf16.msra.mxu1 %v11647_v36  ;;  %3441 = vmatpush.bf16.msra.mxu3 %v11648_v4  ;;  %v11658_v36 = vld [vmem:[#allocation45_spill] sm:$0xff]  ;;  %v11659_v4 = vld [vmem:[#allocation47_spill] sm:$0xff] }
 0x4c0   :  { %3404 = vmatpush.bf16.msra.mxu0 %v11649_v19  ;;  %3430 = vmatpush.bf16.msra.mxu2 %v11650_v44  ;;  %v11660_v19 = vld [vmem:[#allocation49_spill] sm:$0xff]  ;;  %v11661_v44 = vld [vmem:[#allocation54_spill] sm:$0xff] }
 0x4c2   :  { %3416 = vmatpush.bf16.msra.mxu1 %v11653_v30  ;;  %3442 = vmatpush.bf16.msra.mxu3 %v11654_v41  ;;  %v11664_v30 = vld [vmem:[#allocation53_spill] sm:$0xff]  ;;  %v11665_v41 = vld [vmem:[#allocation58_spill] sm:$0xff] }
 0x4c4   :  { %3449 = vmatpush.bf16.msrb.mxu0 %v11651_v62  ;;  %3475 = vmatpush.bf16.msrb.mxu2 %v11652_v8  ;;  %v11662_v62 = vld [vmem:[#allocation56_spill] sm:$0xff]  ;;  %v11663_v8 = vld [vmem:[#allocation51_spill] sm:$0xff] }
 0x4c6   :  { %3417 = vmatpush.bf16.msra.mxu1 %v11657_v14  ;;  %3443 = vmatpush.bf16.msra.mxu3 %v11658_v36  ;;  %v11668_v14 = vld [vmem:[#allocation57_spill] sm:$0xff]  ;;  %v11669_v36 = vld [vmem:[#allocation62_spill] sm:$0xff] }
 0x4c8   :  { %3450 = vmatpush.bf16.msrb.mxu0 %v11655_v63  ;;  %3476 = vmatpush.bf16.msrb.mxu2 %v11656_v53  ;;  %v11666_v63 = vld [vmem:[#allocation60_spill] sm:$0xff]  ;;  %v11667_v53 = vld [vmem:[#allocation55_spill] sm:$0xff] }
 0x4ca   :  { %3462 = vmatpush.bf16.msrb.mxu1 %v11659_v4  ;;  %3488 = vmatpush.bf16.msrb.mxu3 %v11660_v19  ;;  %v11670_v4 = vld [vmem:[#allocation64_spill] sm:$0xff]  ;;  %v11671_v19 = vld [vmem:[#allocation59_spill] sm:$0xff] }
 0x4cc   :  { %3451 = vmatpush.bf16.msrb.mxu0 %v11661_v44  ;;  %3477 = vmatpush.bf16.msrb.mxu2 %v11662_v62  ;;  %v11672_v44 = vld [vmem:[#allocation61_spill] sm:$0xff]  ;;  %v11673_v62 = vld [vmem:[#allocation66_spill] sm:$0xff] }
 0x4ce   :  { %3463 = vmatpush.bf16.msrb.mxu1 %v11663_v8  ;;  %3489 = vmatpush.bf16.msrb.mxu3 %v11664_v30  ;;  %v11674_v8 = vld [vmem:[#allocation68_spill] sm:$0xff]  ;;  %v11675_v30 = vld [vmem:[#allocation63_spill] sm:$0xff] }
 0x4d0   :  { %3452 = vmatpush.bf16.msrb.mxu0 %v11665_v41  ;;  %3478 = vmatpush.bf16.msrb.mxu2 %v11666_v63  ;;  %v11676_v41 = vld [vmem:[#allocation65_spill] sm:$0xff]  ;;  %v11677_v63 = vld [vmem:[#allocation70_spill] sm:$0xff] }
 0x4d2   :  { %3464 = vmatpush.bf16.msrb.mxu1 %v11667_v53  ;;  %3490 = vmatpush.bf16.msrb.mxu3 %v11668_v14  ;;  %v11678_v53 = vld [vmem:[#allocation72_spill] sm:$0xff]  ;;  %v11679_v14 = vld [vmem:[#allocation67_spill] sm:$0xff] }
 0x4d4   :  { %3453 = vmatpush.bf16.msrb.mxu0 %v11669_v36  ;;  %3479 = vmatpush.bf16.msrb.mxu2 %v11670_v4  ;;  %v11680_v36 = vld [vmem:[#allocation69_spill] sm:$0xff]  ;;  %v11681_v4 = vld [vmem:[#allocation74_spill] sm:$0xff] }
 0x4d6   :  { %3465 = vmatpush.bf16.msrb.mxu1 %v11671_v19  ;;  %3491 = vmatpush.bf16.msrb.mxu3 %v11672_v44  ;;  %v11682_v19 = vld [vmem:[#allocation76_spill] sm:$0xff]  ;;  %v11683_v44 = vld [vmem:[#allocation71_spill] sm:$0xff] }
 0x4d8   :  { %3454 = vmatpush.bf16.msrb.mxu0 %v11673_v62  ;;  %3480 = vmatpush.bf16.msrb.mxu2 %v11674_v8  ;;  %v11684_v62 = vld [vmem:[#allocation73_spill] sm:$0xff]  ;;  %v11685_v8 = vld [vmem:[#allocation75_spill] sm:$0xff] }
 0x4da   :  { %3466 = vmatpush.bf16.msrb.mxu1 %v11675_v30  ;;  %3492 = vmatpush.bf16.msrb.mxu3 %v11676_v41  ;;  %v11686_v30 = vld [vmem:[#allocation77_spill] sm:$0xff] }
 0x4dc   :  { %3455 = vmatpush.bf16.msrb.mxu0 %v11677_v63  ;;  %3481 = vmatpush.bf16.msrb.mxu2 %v11678_v53 }
 0x4de   :  { %3467 = vmatpush.bf16.msrb.mxu1 %v11679_v14  ;;  %3493 = vmatpush.bf16.msrb.mxu3 %v11680_v36  ;;  %v11687_v14 = vld [vmem:[#allocation133_spill] sm:$0xff] }
 0x4e0   :  { %3456 = vmatpush.bf16.msrb.mxu0 %v11681_v4  ;;  %3482 = vmatpush.bf16.msrb.mxu2 %v11682_v19  ;;  %v3048_v41 = vpop.f32.mrf.mxu0 }
 0x4e2   :  { %3468 = vmatpush.bf16.msrb.mxu1 %v11683_v44  ;;  %3494 = vmatpush.bf16.msrb.mxu3 %v11684_v62  ;;  %v11688_v44 = vld [vmem:[#allocation135_spill] sm:$0xff] }
 0x4e6   :  { %3469 = vmatpush.bf16.msrb.mxu1 %v11685_v8  ;;  %3495 = vmatpush.bf16.msrb.mxu3 %v11686_v30  ;;  %v3061_v63 = vpop.f32.mrf.mxu1  ;;  %v3074_v46 = vpop.f32.mrf.mxu2 }
 0x4e7   :  { %v3062_v53 = vadd.f32 %v3061_v63, %v3048_v41 }
 0x4e8   :  { %v3050_v6 = vpop.f32.mrf.mxu0 }
 0x4e9   :  { %v3247_v26 = vadd.f32 %v3062_v53, %v11687_v14 }
 0x4eb   :  { %v6722_v36 = vmul.f32 -1.442695, %v3247_v26  ;;  %v11689_v26 = vld [vmem:[#allocation141_spill] sm:$0xff] }
 0x4ec   :  { %v3087_v10 = vpop.f32.mrf.mxu3 }
 0x4ed   :  { %7735 = vpow2.f32 %v6722_v36  ;;  %v3088_v4 = vadd.f32 %v3087_v10, %v3074_v46 }
 0x4ee   :  { %v3063_v19 = vpop.f32.mrf.mxu1  ;;  %v3076_v35 = vpop.f32.mrf.mxu2 }
 0x4ef   :  { %v3248_v24 = vadd.f32 %v3088_v4, %v11688_v44 }
 0x4f0   :  { %v3100_v62 = vpop.f32.mrf.mxu0 }
 0x4f1   :  { %v6723_v45 = vmul.f32 -1.442695, %v3248_v24 }
 0x4f3   :  { %v7736_v8 = vpop.eup %7735  ;;  %7737 = vpow2.f32 %v6723_v45 }
 0x4f4   :  { %v3261_v30 = vadd.f32 1.0, %v7736_v8  ;;  %v3089_v21 = vpop.f32.mrf.mxu3 }
 0x4f5   :  { %v11690_v21 = vld [vmem:[#allocation145_spill] sm:$0xff] }
 0x4f6   :  { %v3113_v1 = vpop.f32.mrf.mxu1  ;;  %v3126_v51 = vpop.f32.mrf.mxu2  ;;  %7739 = vrcp.f32 %v3261_v30  ;;  %v3272_v32 = vand.u32 2147483647, %v3261_v30  ;;  %vm3268_vm5 = vweird.f32 %v3261_v30 }
 0x4f7   :  { %v3114_v41 = vadd.f32 %v3113_v1, %v3100_v62 }
 0x4f8   :  { %v3102_v6 = vpop.f32.mrf.mxu0  ;;  %vm9711_vm7 = vcmp.eq.f32.partialorder %v3272_v32, 8.507059e+37 }
 0x4f9   :  { %v7738_v63 = vpop.eup %7737  ;;  %v3249_v53 = vadd.f32 %v3114_v41, %v11689_v26 }
 0x4fa   :  { %v9694_v14 = vadd.f32 1.0, %v7738_v63 }
 0x4fb   :  { %v6724_v46 = vmul.f32 -1.442695, %v3249_v53 }
 0x4fc   :  { %7741 = vrcp.f32 %v9694_v14  ;;  %v3139_v35 = vpop.f32.mrf.mxu3  ;;  %v7740_v10 = vpop.eup %7739  ;;  %vm3283_vm10 = vweird.f32 %v9694_v14  ;;  %v3287_v32 = vand.u32 2147483647, %v9694_v14 }
 0x4fd   :  { %7743 = vpow2.f32 %v6724_v46  ;;  %v3140_v24 = vadd.f32 %v3139_v35, %v3126_v51  ;;  %v3264_v19 = vmul.f32 %v7740_v10, %v3261_v30  ;;  %vm3269_vm4 = vweird.f32 %v7740_v10 }
 0x4fe   :  { %v3115_v45 = vpop.f32.mrf.mxu1  ;;  %v3128_v36 = vpop.f32.mrf.mxu2  ;;  %vm9707_vm6 = vmor %vm3268_vm5, %vm3269_vm4  ;;  %vm3288_vm14 = vcmp.eq.f32.partialorder %v3287_v32, 8.507059e+37 }
 0x4ff   :  { %v3250_v4 = vadd.f32 %v3140_v24, %v11690_v21  ;;  %v3265_v41 = vsub.f32 1.0, %v3264_v19 }
 0x500   :  { %v3152_v8 = vpop.f32.mrf.mxu0 }
 0x501   :  { %v6725_v1 = vmul.f32 -1.442695, %v3250_v4  ;;  %v3266_v35 = vmul.f32 %v7740_v10, %v3265_v41  ;;  %v11691_v4 = vld [vmem:[#allocation194_spill] sm:$0xff] }
 0x502   :  { %v9698_v62 = vpop.eup %7741 }
 0x503   :  { %v7744_v44 = vpop.eup %7743  ;;  %7745 = vpow2.f32 %v6725_v1  ;;  %v3279_v26 = vmul.f32 %v9698_v62, %v9694_v14  ;;  %v3274_v1 = vand.u32 2147483648, %v3261_v30  ;;  %vm3284_vm8 = vweird.f32 %v9698_v62 }
 0x504   :  { %v3299_v6 = vadd.f32 1.0, %v7744_v44  ;;  %v3141_v63 = vpop.f32.mrf.mxu3  ;;  %v3267_v44 = vadd.f32 %v7740_v10, %v3266_v35  ;;  %vm9728_vm11 = vmor %vm3283_vm10, %vm3284_vm8 }
 0x505   :  { %v3280_v36 = vsub.f32 1.0, %v3279_v26 }
 0x506   :  { %7747 = vrcp.f32 %v3299_v6  ;;  %v3178_v53 = vpop.f32.mrf.mxu2  ;;  %v3165_v51 = vpop.f32.mrf.mxu1  ;;  %v3310_v30 = vand.u32 2147483647, %v3299_v6  ;;  %vm3306_vm15 = vweird.f32 %v3299_v6 }
 0x507   :  { %v3166_v46 = vadd.f32 %v3165_v51, %v3152_v8  ;;  %v3281_v8 = vmul.f32 %v9698_v62, %v3280_v36 }
 0x508   :  { %v3154_v45 = vpop.f32.mrf.mxu0  ;;  %vm3311_vm13 = vcmp.eq.f32.partialorder %v3310_v30, 8.507059e+37 }
 0x509   :  { %v7746_v24 = vpop.eup %7745  ;;  %v3251_v29 = vadd.f32 %v3166_v46, %v11691_v4  ;;  %v3312_v4 = vand.u32 2147483648, %v3299_v6 }
 0x50a   :  { %v9702_v21 = vadd.f32 1.0, %v7746_v24  ;;  %v3275_v24 = vor.u32 1.1754944e-38, %v3274_v1  ;;  %v3289_v1 = vand.u32 2147483648, %v9694_v14 }
 0x50c   :  { %v7748_v19 = vpop.eup %7747  ;;  %7749 = vrcp.f32 %v9702_v21  ;;  %v3191_v40 = vpop.f32.mrf.mxu3  ;;  %v3327_v46 = vand.u32 2147483648, %v9702_v21  ;;  %vm3321_vm1 = vweird.f32 %v9702_v21 }
 0x50d   :  { %v3302_v63 = vmul.f32 %v7748_v19, %v3299_v6  ;;  %7751 = vtanh.f32 %v3251_v29  ;;  %v3192_v41 = vadd.f32 %v3191_v40, %v3178_v53  ;;  %v3271_v29 = vsel %vm9707_vm6, %v7740_v10, %v3267_v44 }
 0x50e   :  { %v3180_v51 = vpop.f32.mrf.mxu2  ;;  %v3167_v35 = vpop.f32.mrf.mxu1  ;;  %vm3307_vm9 = vweird.f32 %v7748_v19  ;;  %v3282_v53 = vadd.f32 %v9698_v62, %v3281_v8 }
 0x50f   :  { %v3303_v26 = vsub.f32 1.0, %v3302_v63  ;;  %v3252_v36 = vadd.f32 %v3192_v41, %v11696_v33  ;;  %v3276_v33 = vsel %vm9711_vm7, %v3275_v24, %v3271_v29  ;;  %vm3308_vm12 = vmor %vm3306_vm15, %vm3307_vm9  ;;  %v3313_v41 = vor.u32 1.1754944e-38, %v3312_v4 }
 0x510   :  { %v3286_v6 = vsel %vm9728_vm11, %v9698_v62, %v3282_v53  ;;  %v3290_v29 = vor.u32 1.1754944e-38, %v3289_v1  ;;  %v3325_v4 = vand.u32 2147483647, %v9702_v21  ;;  %v3328_v53 = vor.u32 1.1754944e-38, %v3327_v46 }
 0x511   :  { %v3304_v40 = vmul.f32 %v7748_v19, %v3303_v26  ;;  %7753 = vtanh.f32 %v3252_v36  ;;  %vm5566_vm11 = vcmask 1044484  }
 0x512   :  { %v7750_v63 = vpop.eup %7749  ;;  %vm3326_vm3 = vcmp.eq.f32.partialorder %v3325_v4, 8.507059e+37 }
 0x513   :  { %v7752_v51 = vpop.eup %7751  ;;  %v3317_v10 = vmul.f32 %v7750_v63, %v9702_v21  ;;  %v3305_v44 = vadd.f32 %v7748_v19, %v3304_v40  ;;  %vm3322_vm0 = vweird.f32 %v7750_v63 }
 0x514   :  { %v3373_v26 = vmul.f32 %v7752_v51, %v3276_v33  ;;  %v3193_v35 = vpop.f32.mrf.mxu3  ;;  %vm3323_vm2 = vmor %vm3321_vm1, %vm3322_vm0 }
 0x515   :  { %v3318_v45 = vsub.f32 1.0, %v3317_v10  ;;  %v3309_v14 = vsel %vm3308_vm12, %v7748_v19, %v3305_v44  ;;  %v3291_v10 = vsel %vm3288_vm14, %v3290_v29, %v3286_v6  ;;  %v11699_v6 = vld [vmem:[#allocation196_spill] sm:$0xff] }
 0x516   :  { %v3314_v24 = vsel %vm3311_vm13, %v3313_v41, %v3309_v14 }
 0x517   :  { %v3319_v36 = vmul.f32 %v7750_v63, %v3318_v45  ;;  %v3371_v40 = vmul.f32 %v3314_v24, %v9514_v13  ;;  %v7754_v51 = vpop.eup %7753 }
 0x518   :  { %v3374_v62 = vmul.f32 %v7754_v51, %v3291_v10 }
 0x519   :  { %v9739_v19 = vadd.f32 %v3373_v26, %v3371_v40  ;;  %v3320_v30 = vadd.f32 %v7750_v63, %v3319_v36 }
 0x51b   :  { %v3324_v33 = vsel %vm3323_vm2, %v7750_v63, %v3320_v30  ;;  %v11700_v63 = vld [vmem:[#allocation198_spill] sm:$0xff] }
 0x51c   :  { %v3329_v32 = vsel %vm3326_vm3, %v3328_v53, %v3324_v33 }
 0x51d   :  { %v3372_v1 = vmul.f32 %v3329_v32, %v9517_v31 }
 0x51f   :  { %v9742_v8 = vadd.f32 %v3374_v62, %v3372_v1 }
 0x520   :  { %v3204_v44 = vpop.f32.mrf.mxu0 }
 0x526   :  { %v3217_v13 = vpop.f32.mrf.mxu1  ;;  %v3230_v41 = vpop.f32.mrf.mxu2 }
 0x527   :  { %v3218_v45 = vadd.f32 %v3217_v13, %v3204_v44 }
 0x528   :  { %v3206_v14 = vpop.f32.mrf.mxu0 }
 0x529   :  { %v3253_v21 = vadd.f32 %v3218_v45, %v11699_v6 }
 0x52b   :  { %v6726_v26 = vmul.f32 -1.442695, %v3253_v21 }
 0x52c   :  { %v3243_v35 = vpop.f32.mrf.mxu3 }
 0x52d   :  { %7755 = vpow2.f32 %v6726_v26  ;;  %v3244_v24 = vadd.f32 %v3243_v35, %v3230_v41 }
 0x52e   :  { %v3219_v29 = vpop.f32.mrf.mxu1  ;;  %v3232_v46 = vpop.f32.mrf.mxu2 }
 0x52f   :  { %v3254_v36 = vadd.f32 %v3244_v24, %v11700_v63 }
 0x531   :  { %v6727_v40 = vmul.f32 -1.442695, %v3254_v36 }
 0x533   :  { %v7756_v4 = vpop.eup %7755  ;;  %7757 = vpow2.f32 %v6727_v40 }
 0x534   :  { %v3339_v31 = vadd.f32 1.0, %v7756_v4  ;;  %v3245_v51 = vpop.f32.mrf.mxu3 }
 0x536   :  { %7759 = vrcp.f32 %v3339_v31  ;;  %v3352_v32 = vand.u32 2147483648, %v3339_v31  ;;  %v3350_v44 = vand.u32 2147483647, %v3339_v31  ;;  %vm3346_vm5 = vweird.f32 %v3339_v31 }
 0x538   :  { %v3353_v14 = vor.u32 1.1754944e-38, %v3352_v32  ;;  %vm3351_vm7 = vcmp.eq.f32.partialorder %v3350_v44, 8.507059e+37 }
 0x539   :  { %v7758_v10 = vpop.eup %7757 }
 0x53a   :  { %v3340_v30 = vadd.f32 1.0, %v7758_v10 }
 0x53c   :  { %v7760_v62 = vpop.eup %7759  ;;  %7761 = vrcp.f32 %v3340_v30  ;;  %v3367_v24 = vand.u32 2147483648, %v3340_v30  ;;  %v3365_v63 = vand.u32 2147483647, %v3340_v30  ;;  %vm3361_vm9 = vweird.f32 %v3340_v30 }
 0x53d   :  { %v3342_v53 = vmul.f32 %v7760_v62, %v3339_v31  ;;  %7763 = vtanh.f32 %v9739_v19  ;;  %vm3347_vm4 = vweird.f32 %v7760_v62 }
 0x53e   :  { %vm3348_vm6 = vmor %vm3346_vm5, %vm3347_vm4  ;;  %7765 = vtanh.f32 %v9742_v8  ;;  %v3368_v4 = vor.u32 1.1754944e-38, %v3367_v24  ;;  %vm3366_vm15 = vcmp.eq.f32.partialorder %v3365_v63, 8.507059e+37  ;;  %v11708_v24 = vld [vmem:[#allocation137_spill] sm:$0xff]  ;;  %v11711_v63 = vld [vmem:[#allocation150_spill] sm:$0xff] }
 0x53f   :  { %v3343_v33 = vsub.f32 1.0, %v3342_v53 }
 0x541   :  { %v3344_v1 = vmul.f32 %v7760_v62, %v3343_v33 }
 0x542   :  { %v7762_v13 = vpop.eup %7761 }
 0x543   :  { %v3345_v41 = vadd.f32 %v7760_v62, %v3344_v1  ;;  %v3357_v45 = vmul.f32 %v7762_v13, %v3340_v30  ;;  %v7764_v26 = vpop.eup %7763  ;;  %vm3362_vm8 = vweird.f32 %v7762_v13 }
 0x544   :  { %vm3363_vm10 = vmor %vm3361_vm9, %vm3362_vm8  ;;  %v7766_v10 = vpop.eup %7765 }
 0x545   :  { %v3349_v6 = vsel %vm3348_vm6, %v7760_v62, %v3345_v41  ;;  %v3358_v21 = vsub.f32 1.0, %v3357_v45 }
 0x546   :  { %v3354_v35 = vsel %vm3351_vm7, %v3353_v14, %v3349_v6  ;;  %v11703_v14 = vld [vmem:[#allocation128_spill] sm:$0xff]  ;;  %v11704_v6 = vld [vmem:[#allocation131_spill] sm:$0xff] }
 0x547   :  { %v3379_v29 = vmul.f32 %v7764_v26, %v3354_v35  ;;  %v3359_v46 = vmul.f32 %v7762_v13, %v3358_v21  ;;  %v11705_v21 = vld [vmem:[#allocation134_spill] sm:$0xff]  ;;  %v11706_v26 = vld [vmem:[#allocation140_spill] sm:$0xff] }
 0x548   :  { %v11707_v35 = vld [vmem:[#allocation144_spill] sm:$0xff] }
 0x549   :  { %v9748_v36 = vpack.c.bf16 %v3379_v29, %v3379_v29  ;;  %v3360_v40 = vadd.f32 %v7762_v13, %v3359_v46  ;;  %v11709_v29 = vld [vmem:[#allocation139_spill] sm:$0xff]  ;;  %v11710_v46 = vld [vmem:[#allocation148_spill] sm:$0xff] }
 0x54b   :  { %v3364_v31 = vsel %vm3363_vm10, %v7762_v13, %v3360_v40  ;;  %3405 = vmatmul.bf16.vlgmr.msra.gmra.mxu0 %v9748_v36  ;;  %3431 = vmatmul.bf16.vlgmr.msra.gmra.mxu2 %v9748_v36  ;;  %v5548_v51 = vunpack.c.l.b16 %v9748_v36  ;;  %v11712_v40 = vld [vmem:[#allocation143_spill] sm:$0xff] }
 0x54c   :  { %v3369_v62 = vsel %vm3366_vm15, %v3368_v4, %v3364_v31  ;;  %3501 = vmatpush.bf16.msra.mxu0 %v11241_v18  ;;  %3527 = vmatpush.bf16.msra.mxu2 %v11242_v37  ;;  %v11713_v4 = vld [vmem:[#allocation147_spill] sm:$0xff]  ;;  %v11714_v31 = vld [vmem:[#allocation153_spill] sm:$0xff] }
 0x54d   :  { %v3380_v53 = vmul.f32 %v7766_v10, %v3369_v62  ;;  %v5565_v33 = vrot.slane %v5548_v51, 4  ;;  %v5825_v30 = vrot.slane %v5548_v51, 5  ;;  %v11715_v51 = vld [vmem:[#allocation156_spill] sm:$0xff]  ;;  %v11716_v10 = vld [vmem:[#allocation149_spill] sm:$0xff]  ;;  %v11717_v62 = vld [vmem:[#allocation151_spill] sm:$0xff] }
 0x54f   :  { %v9755_v32 = vpack.c.bf16 %v3380_v53, %v3380_v53  ;;  %v9759_v1 = vsel %vm5566_vm11, %v5565_v33, %v9536_v55  ;;  %v9763_v44 = vsel %vm5566_vm11, %v5825_v30, %v9540_v25  ;;  %v11718_v53 = vld [vmem:[#allocation160_spill] sm:$0xff]  ;;  %v11719_v33 = vld [vmem:[#allocation162_spill] sm:$0xff]  ;;  %v11720_v30 = vld [vmem:[#allocation155_spill] sm:$0xff] }
 0x550   :  { %3502 = vmatpush.bf16.msra.mxu0 %v11243_v12  ;;  %3528 = vmatpush.bf16.msra.mxu2 %v11244_v34 }
 0x551   :  { %3418 = vmatmul.bf16.vlgmr.msra.gmra.mxu1 %v9755_v32  ;;  %3444 = vmatmul.bf16.vlgmr.msra.gmra.mxu3 %v9755_v32  ;;  %v5549_v13 = vunpack.c.l.b16 %v9755_v32 }
 0x552   :  { %3514 = vmatpush.bf16.msra.mxu1 %v11245_v5  ;;  %3540 = vmatpush.bf16.msra.mxu3 %v11246_v61 }
 0x553   :  { %v5583_v55 = vrot.slane %v5549_v13, 4  ;;  %v5839_v41 = vrot.slane %v5549_v13, 5  ;;  %v11721_v13 = vld [vmem:[#allocation158_spill] sm:$0xff] }
 0x554   :  { %3503 = vmatpush.bf16.msra.mxu0 %v11247_v47  ;;  %3529 = vmatpush.bf16.msra.mxu2 %v11248_v56 }
 0x555   :  { %v9776_v25 = vsel %vm5566_vm11, %v5583_v55, %v9553_v20  ;;  %v9780_v45 = vsel %vm5566_vm11, %v5839_v41, %v9557_v7  ;;  %v11701_v20 = vld [vmem:[#allocation138_spill] sm:$0xff]  ;;  %v11702_v7 = vld [vmem:[#allocation125_spill] sm:$0xff]  ;;  %v11722_v55 = vld [vmem:[#allocation164_spill] sm:$0xff] }
 0x556   :  { %3515 = vmatpush.bf16.msra.mxu1 %v11249_v43  ;;  %3541 = vmatpush.bf16.msra.mxu3 %v11250_v57  ;;  %v11723_v41 = vld [vmem:[#allocation168_spill] sm:$0xff] }
 0x558   :  { %3504 = vmatpush.bf16.msra.mxu0 %v11251_v58  ;;  %3530 = vmatpush.bf16.msra.mxu2 %v11252_v28 }
 0x55a   :  { %3516 = vmatpush.bf16.msra.mxu1 %v11253_v38  ;;  %3542 = vmatpush.bf16.msra.mxu3 %v11254_v27 }
 0x55b   :  { %3457 = vmatmul.bf16.vlgmr.msrb.gmra.mxu0 %v9748_v36  ;;  %3483 = vmatmul.bf16.vlgmr.msrb.gmra.mxu2 %v9748_v36 }
 0x55c   :  { %3505 = vmatpush.bf16.msra.mxu0 %v11255_v54  ;;  %3531 = vmatpush.bf16.msra.mxu2 %v11256_v23 }
 0x55e   :  { %3517 = vmatpush.bf16.msra.mxu1 %v11257_v52  ;;  %3543 = vmatpush.bf16.msra.mxu3 %v11258_v2 }
 0x560   :  { %3506 = vmatpush.bf16.msra.mxu0 %v11259_v60  ;;  %3532 = vmatpush.bf16.msra.mxu2 %v11260_v9 }
 0x561   :  { %3470 = vmatmul.bf16.vlgmr.msrb.gmra.mxu1 %v9755_v32  ;;  %3496 = vmatmul.bf16.vlgmr.msrb.gmra.mxu3 %v9755_v32 }
 0x562   :  { %3518 = vmatpush.bf16.msra.mxu1 %v11358_v3  ;;  %3544 = vmatpush.bf16.msra.mxu3 %v11359_v59 }
 0x564   :  { %3507 = vmatpush.bf16.msra.mxu0 %v11360_v22  ;;  %3533 = vmatpush.bf16.msra.mxu2 %v11361_v39 }
 0x566   :  { %3519 = vmatpush.bf16.msra.mxu1 %v11362_v0  ;;  %3545 = vmatpush.bf16.msra.mxu3 %v11363_v11 }
 0x568   :  { %3508 = vmatpush.bf16.msra.mxu0 %v11364_v17  ;;  %3534 = vmatpush.bf16.msra.mxu2 %v11365_v49 }
 0x56a   :  { %3520 = vmatpush.bf16.msra.mxu1 %v11368_v48  ;;  %3546 = vmatpush.bf16.msra.mxu3 %v11472_v15 }
 0x56b   :  { %3509 = vmatmul.bf16.vlgmr.msra.gmra.mxu0 %v9748_v36  ;;  %3535 = vmatmul.bf16.vlgmr.msra.gmra.mxu2 %v9748_v36 }
 0x56c   :  { %3553 = vmatpush.bf16.msrb.mxu0 %v11366_v42  ;;  %3579 = vmatpush.bf16.msrb.mxu2 %v11367_v50 }
 0x56e   :  { %3521 = vmatpush.bf16.msra.mxu1 %v11702_v7  ;;  %3547 = vmatpush.bf16.msra.mxu3 %v11703_v14 }
 0x570   :  { %3554 = vmatpush.bf16.msrb.mxu0 %v11591_v16  ;;  %3580 = vmatpush.bf16.msrb.mxu2 %v11701_v20 }
 0x571   :  { %3522 = vmatmul.bf16.vlgmr.msra.gmra.mxu1 %v9755_v32  ;;  %3548 = vmatmul.bf16.vlgmr.msra.gmra.mxu3 %v9755_v32 }
 0x572   :  { %3566 = vmatpush.bf16.msrb.mxu1 %v11704_v6  ;;  %3592 = vmatpush.bf16.msrb.mxu3 %v11705_v21 }
 0x574   :  { %3555 = vmatpush.bf16.msrb.mxu0 %v11706_v26  ;;  %3581 = vmatpush.bf16.msrb.mxu2 %v11707_v35 }
 0x576   :  { %3567 = vmatpush.bf16.msrb.mxu1 %v11708_v24  ;;  %3593 = vmatpush.bf16.msrb.mxu3 %v11709_v29  ;;  %v11799_v29 = vld [vmem:[#allocation146_spill] sm:$0xff] }
 0x578   :  { %3556 = vmatpush.bf16.msrb.mxu0 %v11710_v46  ;;  %3582 = vmatpush.bf16.msrb.mxu2 %v11711_v63 }
 0x57a   :  { %3568 = vmatpush.bf16.msrb.mxu1 %v11712_v40  ;;  %3594 = vmatpush.bf16.msrb.mxu3 %v11713_v4  ;;  %v11724_v4 = vld [vmem:[#allocation161_spill] sm:$0xff] }
 0x57c   :  { %3557 = vmatpush.bf16.msrb.mxu0 %v11714_v31  ;;  %3583 = vmatpush.bf16.msrb.mxu2 %v11715_v51  ;;  %v11725_v31 = vld [vmem:[#allocation163_spill] sm:$0xff]  ;;  %v11726_v51 = vld [vmem:[#allocation172_spill] sm:$0xff] }
 0x57e   :  { %3569 = vmatpush.bf16.msrb.mxu1 %v11716_v10  ;;  %3595 = vmatpush.bf16.msrb.mxu3 %v11717_v62  ;;  %v11727_v10 = vld [vmem:[#allocation174_spill] sm:$0xff] }
 0x57f   :  { %v11728_v62 = vld [vmem:[#allocation14_spill] sm:$0xff] }
 0x580   :  { %3558 = vmatpush.bf16.msrb.mxu0 %v11718_v53  ;;  %3584 = vmatpush.bf16.msrb.mxu2 %v11719_v33  ;;  %v11729_v53 = vld [vmem:[#allocation16_spill] sm:$0xff]  ;;  %v11730_v33 = vld [vmem:[#allocation167_spill] sm:$0xff] }
 0x582   :  { %3570 = vmatpush.bf16.msrb.mxu1 %v11720_v30  ;;  %3596 = vmatpush.bf16.msrb.mxu3 %v11721_v13  ;;  %v11731_v30 = vld [vmem:[#allocation171_spill] sm:$0xff]  ;;  %v11797_v13 = vld [vmem:[#allocation142_spill] sm:$0xff] }
 0x584   :  { %3559 = vmatpush.bf16.msrb.mxu0 %v11722_v55  ;;  %3585 = vmatpush.bf16.msrb.mxu2 %v11723_v41  ;;  %v11732_v41 = vld [vmem:[#allocation18_spill] sm:$0xff] }
 0x586   :  { %3571 = vmatpush.bf16.msrb.mxu1 %v11724_v4  ;;  %3597 = vmatpush.bf16.msrb.mxu3 %v11725_v31  ;;  %v11733_v4 = vld [vmem:[#allocation20_spill] sm:$0xff]  ;;  %v11734_v31 = vld [vmem:[#allocation173_spill] sm:$0xff] }
 0x588   :  { %3560 = vmatpush.bf16.msrb.mxu0 %v11726_v51  ;;  %3586 = vmatpush.bf16.msrb.mxu2 %v11727_v10  ;;  %v11735_v51 = vld [vmem:[#allocation175_spill] sm:$0xff] }
 0x589   :  { %v11736_v10 = vld [vmem:[#allocation15_spill] sm:$0xff] }
 0x58a   :  { %3572 = vmatpush.bf16.msrb.mxu1 %v11730_v33  ;;  %3598 = vmatpush.bf16.msrb.mxu3 %v11731_v30  ;;  %v11738_v30 = vld [vmem:[#allocation22_spill] sm:$0xff]  ;;  %v11739_v33 = vld [vmem:[#allocation24_spill] sm:$0xff] }
 0x58b   :  { %3561 = vmatmul.bf16.vlgmr.msrb.gmra.mxu0 %v9748_v36  ;;  %3587 = vmatmul.bf16.vlgmr.msrb.gmra.mxu2 %v9748_v36  ;;  %v11740_v36 = vld [vmem:[#allocation19_spill] sm:$0xff] }
 0x58c   :  { %3755 = vmatpush.bf16.msra.mxu0 %v11728_v62  ;;  %3781 = vmatpush.bf16.msra.mxu2 %v11729_v53  ;;  %v11737_v62 = vld [vmem:[#allocation17_spill] sm:$0xff]  ;;  %v11747_v53 = vld [vmem:[#allocation32_spill] sm:$0xff] }
 0x58e   :  { %3573 = vmatpush.bf16.msrb.mxu1 %v11734_v31  ;;  %3599 = vmatpush.bf16.msrb.mxu3 %v11735_v51  ;;  %v11743_v31 = vld [vmem:[#allocation28_spill] sm:$0xff]  ;;  %v11744_v51 = vld [vmem:[#allocation23_spill] sm:$0xff] }
 0x590   :  { %3756 = vmatpush.bf16.msra.mxu0 %v11732_v41  ;;  %3782 = vmatpush.bf16.msra.mxu2 %v11733_v4  ;;  %v11741_v41 = vld [vmem:[#allocation21_spill] sm:$0xff]  ;;  %v11742_v4 = vld [vmem:[#allocation26_spill] sm:$0xff] }
 0x591   :  { %3574 = vmatmul.bf16.vlgmr.msrb.gmra.mxu1 %v9755_v32  ;;  %3600 = vmatmul.bf16.vlgmr.msrb.gmra.mxu3 %v9755_v32  ;;  %v11748_v32 = vld [vmem:[#allocation27_spill] sm:$0xff] }
 0x592   :  { %3768 = vmatpush.bf16.msra.mxu1 %v11736_v10  ;;  %3794 = vmatpush.bf16.msra.mxu3 %v11737_v62  ;;  %v11745_v10 = vld [vmem:[#allocation25_spill] sm:$0xff]  ;;  %v11746_v62 = vld [vmem:[#allocation30_spill] sm:$0xff] }
 0x594   :  { %3757 = vmatpush.bf16.msra.mxu0 %v11738_v30  ;;  %3783 = vmatpush.bf16.msra.mxu2 %v11739_v33  ;;  %v11749_v30 = vld [vmem:[#allocation29_spill] sm:$0xff]  ;;  %v11750_v33 = vld [vmem:[#allocation34_spill] sm:$0xff] }
 0x596   :  { %3769 = vmatpush.bf16.msra.mxu1 %v11740_v36  ;;  %3795 = vmatpush.bf16.msra.mxu3 %v11741_v41  ;;  %v11751_v36 = vld [vmem:[#allocation36_spill] sm:$0xff]  ;;  %v11752_v41 = vld [vmem:[#allocation31_spill] sm:$0xff] }
 0x598   :  { %3758 = vmatpush.bf16.msra.mxu0 %v11742_v4  ;;  %3784 = vmatpush.bf16.msra.mxu2 %v11743_v31  ;;  %v11753_v4 = vld [vmem:[#allocation33_spill] sm:$0xff]  ;;  %v11754_v31 = vld [vmem:[#allocation38_spill] sm:$0xff] }
 0x59a   :  { %3770 = vmatpush.bf16.msra.mxu1 %v11744_v51  ;;  %3796 = vmatpush.bf16.msra.mxu3 %v11745_v10  ;;  %v11755_v51 = vld [vmem:[#allocation40_spill] sm:$0xff]  ;;  %v11756_v10 = vld [vmem:[#allocation35_spill] sm:$0xff] }
 0x59c   :  { %3759 = vmatpush.bf16.msra.mxu0 %v11746_v62  ;;  %3785 = vmatpush.bf16.msra.mxu2 %v11747_v53  ;;  %v11757_v62 = vld [vmem:[#allocation37_spill] sm:$0xff]  ;;  %v11758_v53 = vld [vmem:[#allocation42_spill] sm:$0xff] }
 0x59e   :  { %3771 = vmatpush.bf16.msra.mxu1 %v11748_v32  ;;  %3797 = vmatpush.bf16.msra.mxu3 %v11749_v30  ;;  %v11759_v32 = vld [vmem:[#allocation44_spill] sm:$0xff]  ;;  %v11760_v30 = vld [vmem:[#allocation46_spill] sm:$0xff] }
 0x5a0   :  { %3760 = vmatpush.bf16.msra.mxu0 %v11750_v33  ;;  %3786 = vmatpush.bf16.msra.mxu2 %v11751_v36  ;;  %v11761_v33 = vld [vmem:[#allocation48_spill] sm:$0xff]  ;;  %v11762_v36 = vld [vmem:[#allocation39_spill] sm:$0xff] }
 0x5a2   :  { %3772 = vmatpush.bf16.msra.mxu1 %v11752_v41  ;;  %3798 = vmatpush.bf16.msra.mxu3 %v11753_v4  ;;  %v11763_v41 = vld [vmem:[#allocation41_spill] sm:$0xff]  ;;  %v11764_v4 = vld [vmem:[#allocation50_spill] sm:$0xff] }
 0x5a4   :  { %3761 = vmatpush.bf16.msra.mxu0 %v11754_v31  ;;  %3787 = vmatpush.bf16.msra.mxu2 %v11755_v51  ;;  %v11765_v31 = vld [vmem:[#allocation52_spill] sm:$0xff]  ;;  %v11766_v51 = vld [vmem:[#allocation43_spill] sm:$0xff] }
 0x5a6   :  { %3773 = vmatpush.bf16.msra.mxu1 %v11756_v10  ;;  %3799 = vmatpush.bf16.msra.mxu3 %v11757_v62  ;;  %v11767_v10 = vld [vmem:[#allocation45_spill] sm:$0xff]  ;;  %v11768_v62 = vld [vmem:[#allocation47_spill] sm:$0xff] }
 0x5a8   :  { %3762 = vmatpush.bf16.msra.mxu0 %v11758_v53  ;;  %3788 = vmatpush.bf16.msra.mxu2 %v11759_v32  ;;  %v11769_v53 = vld [vmem:[#allocation49_spill] sm:$0xff]  ;;  %v11770_v32 = vld [vmem:[#allocation54_spill] sm:$0xff] }
 0x5aa   :  { %3774 = vmatpush.bf16.msra.mxu1 %v11762_v36  ;;  %3800 = vmatpush.bf16.msra.mxu3 %v11763_v41  ;;  %v11773_v36 = vld [vmem:[#allocation53_spill] sm:$0xff]  ;;  %v11774_v41 = vld [vmem:[#allocation58_spill] sm:$0xff] }
 0x5ac   :  { %3807 = vmatpush.bf16.msrb.mxu0 %v11760_v30  ;;  %3833 = vmatpush.bf16.msrb.mxu2 %v11761_v33  ;;  %v11771_v30 = vld [vmem:[#allocation56_spill] sm:$0xff]  ;;  %v11772_v33 = vld [vmem:[#allocation51_spill] sm:$0xff] }
 0x5ae   :  { %3775 = vmatpush.bf16.msra.mxu1 %v11766_v51  ;;  %3801 = vmatpush.bf16.msra.mxu3 %v11767_v10  ;;  %v11777_v51 = vld [vmem:[#allocation57_spill] sm:$0xff]  ;;  %v11778_v10 = vld [vmem:[#allocation62_spill] sm:$0xff] }
 0x5b0   :  { %3808 = vmatpush.bf16.msrb.mxu0 %v11764_v4  ;;  %3834 = vmatpush.bf16.msrb.mxu2 %v11765_v31  ;;  %v11775_v4 = vld [vmem:[#allocation60_spill] sm:$0xff]  ;;  %v11776_v31 = vld [vmem:[#allocation55_spill] sm:$0xff] }
 0x5b2   :  { %3820 = vmatpush.bf16.msrb.mxu1 %v11768_v62  ;;  %3846 = vmatpush.bf16.msrb.mxu3 %v11769_v53  ;;  %v11779_v62 = vld [vmem:[#allocation64_spill] sm:$0xff]  ;;  %v11780_v53 = vld [vmem:[#allocation59_spill] sm:$0xff] }
 0x5b4   :  { %3809 = vmatpush.bf16.msrb.mxu0 %v11770_v32  ;;  %3835 = vmatpush.bf16.msrb.mxu2 %v11771_v30  ;;  %v11781_v32 = vld [vmem:[#allocation61_spill] sm:$0xff]  ;;  %v11782_v30 = vld [vmem:[#allocation66_spill] sm:$0xff] }
 0x5b6   :  { %3821 = vmatpush.bf16.msrb.mxu1 %v11772_v33  ;;  %3847 = vmatpush.bf16.msrb.mxu3 %v11773_v36  ;;  %v11783_v33 = vld [vmem:[#allocation68_spill] sm:$0xff]  ;;  %v11784_v36 = vld [vmem:[#allocation63_spill] sm:$0xff] }
 0x5b8   :  { %3810 = vmatpush.bf16.msrb.mxu0 %v11774_v41  ;;  %3836 = vmatpush.bf16.msrb.mxu2 %v11775_v4  ;;  %v11785_v41 = vld [vmem:[#allocation65_spill] sm:$0xff]  ;;  %v11786_v4 = vld [vmem:[#allocation70_spill] sm:$0xff] }
 0x5ba   :  { %3822 = vmatpush.bf16.msrb.mxu1 %v11776_v31  ;;  %3848 = vmatpush.bf16.msrb.mxu3 %v11777_v51  ;;  %v11787_v31 = vld [vmem:[#allocation72_spill] sm:$0xff]  ;;  %v11788_v51 = vld [vmem:[#allocation67_spill] sm:$0xff] }
 0x5bc   :  { %3811 = vmatpush.bf16.msrb.mxu0 %v11778_v10  ;;  %3837 = vmatpush.bf16.msrb.mxu2 %v11779_v62  ;;  %v11789_v10 = vld [vmem:[#allocation69_spill] sm:$0xff]  ;;  %v11790_v62 = vld [vmem:[#allocation74_spill] sm:$0xff] }
 0x5be   :  { %3823 = vmatpush.bf16.msrb.mxu1 %v11780_v53  ;;  %3849 = vmatpush.bf16.msrb.mxu3 %v11781_v32  ;;  %v11791_v53 = vld [vmem:[#allocation76_spill] sm:$0xff]  ;;  %v11792_v32 = vld [vmem:[#allocation71_spill] sm:$0xff] }
 0x5c0   :  { %3812 = vmatpush.bf16.msrb.mxu0 %v11782_v30  ;;  %3838 = vmatpush.bf16.msrb.mxu2 %v11783_v33  ;;  %v11793_v30 = vld [vmem:[#allocation73_spill] sm:$0xff]  ;;  %v11794_v33 = vld [vmem:[#allocation75_spill] sm:$0xff] }
 0x5c2   :  { %3824 = vmatpush.bf16.msrb.mxu1 %v11784_v36  ;;  %3850 = vmatpush.bf16.msrb.mxu3 %v11785_v41  ;;  %v11795_v36 = vld [vmem:[#allocation77_spill] sm:$0xff] }
 0x5c4   :  { %3813 = vmatpush.bf16.msrb.mxu0 %v11786_v4  ;;  %3839 = vmatpush.bf16.msrb.mxu2 %v11787_v31  ;;  %v11796_v31 = vld [vmem:[#allocation96_spill] sm:$0xff] }
 0x5c6   :  { %3825 = vmatpush.bf16.msrb.mxu1 %v11788_v51  ;;  %3851 = vmatpush.bf16.msrb.mxu3 %v11789_v10  ;;  %v549_v51 = vadd.f32 %v11797_v13, %v11796_v31 }
 0x5c8   :  { %3814 = vmatpush.bf16.msrb.mxu0 %v11790_v62  ;;  %3840 = vmatpush.bf16.msrb.mxu2 %v11791_v53  ;;  %v3406_v41 = vpop.f32.mrf.mxu0  ;;  %v11798_v53 = vld [vmem:[#allocation102_spill] sm:$0xff] }
 0x5ca   :  { %3826 = vmatpush.bf16.msrb.mxu1 %v11792_v32  ;;  %3852 = vmatpush.bf16.msrb.mxu3 %v11793_v30  ;;  %v578_v32 = vadd.f32 %v11799_v29, %v11798_v53 }
 0x5ce   :  { %3827 = vmatpush.bf16.msrb.mxu1 %v11794_v33  ;;  %3853 = vmatpush.bf16.msrb.mxu3 %v11795_v36  ;;  %v3419_v4 = vpop.f32.mrf.mxu1  ;;  %v3432_v55 = vpop.f32.mrf.mxu2 }
 0x5cf   :  { %v3420_v40 = vadd.f32 %v3419_v4, %v3406_v41 }
 0x5d0   :  { %v3408_v10 = vpop.f32.mrf.mxu0 }
 0x5d1   :  { %v3605_v63 = vadd.f32 %v3420_v40, %v549_v51  ;;  %v11800_v10 = vld [vmem:[#allocation110_spill] sm:$0xff]  ;;  %v11801_v40 = vld [vmem:[#allocation152_spill] sm:$0xff] }
 0x5d3   :  { %v6728_v62 = vmul.f32 -1.442695, %v3605_v63  ;;  %v607_v63 = vadd.f32 %v11801_v40, %v11800_v10 }
 0x5d4   :  { %v3445_v46 = vpop.f32.mrf.mxu3 }
 0x5d5   :  { %7767 = vpow2.f32 %v6728_v62  ;;  %v3446_v30 = vadd.f32 %v3445_v46, %v3432_v55 }
 0x5d6   :  { %v3421_v24 = vpop.f32.mrf.mxu1  ;;  %v3434_v33 = vpop.f32.mrf.mxu2 }
 0x5d7   :  { %v3606_v35 = vadd.f32 %v3446_v30, %v578_v32 }
 0x5d8   :  { %v3458_v36 = vpop.f32.mrf.mxu0 }
 0x5d9   :  { %v6729_v26 = vmul.f32 -1.442695, %v3606_v35 }
 0x5db   :  { %v7768_v21 = vpop.eup %7767  ;;  %7769 = vpow2.f32 %v6729_v26 }
 0x5dc   :  { %v3619_v6 = vadd.f32 1.0, %v7768_v21  ;;  %v3447_v14 = vpop.f32.mrf.mxu3  ;;  %v11802_v21 = vld [vmem:[#allocation111_spill] sm:$0xff] }
 0x5dd   :  { %v11803_v14 = vld [vmem:[#allocation154_spill] sm:$0xff] }
 0x5de   :  { %v3471_v13 = vpop.f32.mrf.mxu1  ;;  %v3484_v4 = vpop.f32.mrf.mxu2  ;;  %7771 = vrcp.f32 %v3619_v6  ;;  %v636_v26 = vadd.f32 %v11803_v14, %v11802_v21  ;;  %v11805_v14 = vld [vmem:[#allocation197_spill] sm:$0xff]  ;;  %vm3626_vm13 = vweird.f32 %v3619_v6 }
 0x5df   :  { %v3472_v51 = vadd.f32 %v3471_v13, %v3458_v36 }
 0x5e0   :  { %v3460_v41 = vpop.f32.mrf.mxu0 }
 0x5e1   :  { %v7770_v29 = vpop.eup %7769  ;;  %v3607_v62 = vadd.f32 %v3472_v51, %v607_v63 }
 0x5e2   :  { %v9920_v46 = vadd.f32 1.0, %v7770_v29 }
 0x5e3   :  { %v6730_v24 = vmul.f32 -1.442695, %v3607_v62 }
 0x5e4   :  { %7773 = vrcp.f32 %v9920_v46  ;;  %v3497_v35 = vpop.f32.mrf.mxu3  ;;  %v9923_v33 = vpop.eup %7771  ;;  %vm3641_vm3 = vweird.f32 %v9920_v46 }
 0x5e5   :  { %7775 = vpow2.f32 %v6730_v24  ;;  %v3498_v30 = vadd.f32 %v3497_v35, %v3484_v4  ;;  %v3622_v36 = vmul.f32 %v9923_v33, %v3619_v6  ;;  %v11804_v35 = vld [vmem:[#allocation180_spill] sm:$0xff]  ;;  %vm3627_vm12 = vweird.f32 %v9923_v33 }
 0x5e6   :  { %v3473_v55 = vpop.f32.mrf.mxu1  ;;  %v3486_v32 = vpop.f32.mrf.mxu2  ;;  %vm9943_vm14 = vmor %vm3626_vm13, %vm3627_vm12 }
 0x5e7   :  { %v3608_v40 = vadd.f32 %v3498_v30, %v636_v26  ;;  %v3623_v29 = vsub.f32 1.0, %v3622_v36  ;;  %v665_v26 = vadd.f32 %v11805_v14, %v11804_v35  ;;  %v11807_v14 = vld [vmem:[#allocation199_spill] sm:$0xff] }
 0x5e8   :  { %v3510_v13 = vpop.f32.mrf.mxu0 }
 0x5e9   :  { %v6731_v63 = vmul.f32 -1.442695, %v3608_v40  ;;  %v3624_v55 = vmul.f32 %v9923_v33, %v3623_v29 }
 0x5ea   :  { %v9928_v51 = vpop.eup %7773 }
 0x5eb   :  { %v7776_v41 = vpop.eup %7775  ;;  %7777 = vpow2.f32 %v6731_v63  ;;  %v3637_v53 = vmul.f32 %v9928_v51, %v9920_v46  ;;  %v3630_v63 = vand.u32 2147483647, %v3619_v6  ;;  %v3625_v7 = vadd.f32 %v9923_v33, %v3624_v55 }
 0x5ec   :  { %v3657_v62 = vadd.f32 1.0, %v7776_v41  ;;  %v3499_v10 = vpop.f32.mrf.mxu3  ;;  %vm3642_vm1 = vweird.f32 %v9928_v51 }
 0x5ed   :  { %v3638_v21 = vsub.f32 1.0, %v3637_v53  ;;  %v3632_v10 = vand.u32 2147483648, %v3619_v6  ;;  %vm9947_vm0 = vcmp.eq.f32.partialorder %v3630_v63, 8.507059e+37  ;;  %v3645_v63 = vand.u32 2147483647, %v9920_v46  ;;  %vm9964_vm5 = vmor %vm3641_vm3, %vm3642_vm1 }
 0x5ee   :  { %7779 = vrcp.f32 %v3657_v62  ;;  %v3536_v24 = vpop.f32.mrf.mxu2  ;;  %v3523_v4 = vpop.f32.mrf.mxu1  ;;  %v3670_v16 = vand.u32 2147483648, %v3657_v62  ;;  %vm3664_vm4 = vweird.f32 %v3657_v62 }
 0x5ef   :  { %v3524_v30 = vadd.f32 %v3523_v4, %v3510_v13  ;;  %v3639_v29 = vmul.f32 %v9928_v51, %v3638_v21  ;;  %v11806_v4 = vld [vmem:[#allocation182_spill] sm:$0xff]  ;;  %v3633_v35 = vor.u32 1.1754944e-38, %v3632_v10  ;;  %v3629_v21 = vsel %vm9943_vm14, %v9923_v33, %v3625_v7 }
 0x5f0   :  { %v3512_v32 = vpop.f32.mrf.mxu0  ;;  %v694_v53 = vadd.f32 %v11807_v14, %v11806_v4  ;;  %v3647_v10 = vand.u32 2147483648, %v9920_v46  ;;  %vm3646_vm8 = vcmp.eq.f32.partialorder %v3645_v63, 8.507059e+37  ;;  %v11841_v4 = vld [vmem:[#allocation168_spill] sm:$0xff] }
 0x5f1   :  { %v7778_v40 = vpop.eup %7777  ;;  %v3609_v36 = vadd.f32 %v3524_v30, %v665_v26  ;;  %v3634_v33 = vsel %vm9947_vm0, %v3633_v35, %v3629_v21 }
 0x5f2   :  { %v9935_v31 = vadd.f32 1.0, %v7778_v40  ;;  %v3648_v21 = vor.u32 1.1754944e-38, %v3647_v10 }
 0x5f4   :  { %v7780_v41 = vpop.eup %7779  ;;  %7781 = vrcp.f32 %v9935_v31  ;;  %v3549_v13 = vpop.f32.mrf.mxu3  ;;  %v3685_v35 = vand.u32 2147483648, %v9935_v31  ;;  %vm3679_vm10 = vweird.f32 %v9935_v31 }
 0x5f5   :  { %v3660_v20 = vmul.f32 %v7780_v41, %v3657_v62  ;;  %7783 = vtanh.f32 %v3609_v36  ;;  %v3550_v32 = vadd.f32 %v3549_v13, %v3536_v24  ;;  %vm3665_vm2 = vweird.f32 %v7780_v41 }
 0x5f6   :  { %v3538_v26 = vpop.f32.mrf.mxu2  ;;  %v3525_v36 = vpop.f32.mrf.mxu1  ;;  %v3640_v24 = vadd.f32 %v9928_v51, %v3639_v29  ;;  %vm3666_vm6 = vmor %vm3664_vm4, %vm3665_vm2 }
 0x5f7   :  { %v3661_v30 = vsub.f32 1.0, %v3660_v20  ;;  %v3610_v14 = vadd.f32 %v3550_v32, %v694_v53  ;;  %v3668_v20 = vand.u32 2147483647, %v3657_v62  ;;  %v3671_v32 = vor.u32 1.1754944e-38, %v3670_v16 }
 0x5f8   :  { %v3644_v62 = vsel %vm9964_vm5, %v9928_v51, %v3640_v24  ;;  %v3683_v16 = vand.u32 2147483647, %v9935_v31  ;;  %v3686_v24 = vor.u32 1.1754944e-38, %v3685_v35  ;;  %v11817_v35 = vld [vmem:[#allocation201_spill] sm:$0xff]  ;;  %vm5569_vm5 = vcmask 1045509  }
 0x5f9   :  { %v3662_v6 = vmul.f32 %v7780_v41, %v3661_v30  ;;  %7785 = vtanh.f32 %v3610_v14  ;;  %vm3669_vm7 = vcmp.eq.f32.partialorder %v3668_v20, 8.507059e+37 }
 0x5fa   :  { %v7782_v13 = vpop.eup %7781  ;;  %vm3684_vm11 = vcmp.eq.f32.partialorder %v3683_v16, 8.507059e+37 }
 0x5fb   :  { %v7784_v26 = vpop.eup %7783  ;;  %v3675_v7 = vmul.f32 %v7782_v13, %v9935_v31  ;;  %v3663_v53 = vadd.f32 %v7780_v41, %v3662_v6  ;;  %vm3680_vm9 = vweird.f32 %v7782_v13 }
 0x5fc   :  { %v3731_v30 = vmul.f32 %v7784_v26, %v3634_v33  ;;  %v3551_v36 = vpop.f32.mrf.mxu3  ;;  %vm3681_vm15 = vmor %vm3679_vm10, %vm3680_vm9 }
 0x5fd   :  { %v3676_v40 = vsub.f32 1.0, %v3675_v7  ;;  %v3667_v46 = vsel %vm3666_vm6, %v7780_v41, %v3663_v53  ;;  %v3649_v7 = vsel %vm3646_vm8, %v3648_v21, %v3644_v62 }
 0x5fe   :  { %v3672_v55 = vsel %vm3669_vm7, %v3671_v32, %v3667_v46  ;;  %v11815_v46 = vld [vmem:[#allocation200_spill] sm:$0xff] }
 0x5ff   :  { %v3677_v14 = vmul.f32 %v7782_v13, %v3676_v40  ;;  %v3729_v6 = vmul.f32 %v3672_v55, %v9739_v19  ;;  %v7786_v26 = vpop.eup %7785  ;;  %v11814_v40 = vld [vmem:[#allocation186_spill] sm:$0xff] }
 0x600   :  { %v3732_v51 = vmul.f32 %v7786_v26, %v3649_v7  ;;  %v723_v62 = vadd.f32 %v11815_v46, %v11814_v40  ;;  %v11840_v40 = vld [vmem:[#allocation164_spill] sm:$0xff] }
 0x601   :  { %v9975_v41 = vadd.f32 %v3731_v30, %v3729_v6  ;;  %v3678_v20 = vadd.f32 %v7782_v13, %v3677_v14  ;;  %v11816_v14 = vld [vmem:[#allocation187_spill] sm:$0xff] }
 0x603   :  { %v3682_v33 = vsel %vm3681_vm15, %v7782_v13, %v3678_v20  ;;  %v752_v13 = vadd.f32 %v11817_v35, %v11816_v14  ;;  %v11839_v14 = vld [vmem:[#allocation158_spill] sm:$0xff] }
 0x604   :  { %v3687_v63 = vsel %vm3684_vm11, %v3686_v24, %v3682_v33 }
 0x605   :  { %v3730_v10 = vmul.f32 %v3687_v63, %v9742_v8 }
 0x607   :  { %v9978_v29 = vadd.f32 %v3732_v51, %v3730_v10 }
 0x608   :  { %v3562_v53 = vpop.f32.mrf.mxu0 }
 0x60e   :  { %v3575_v19 = vpop.f32.mrf.mxu1  ;;  %v3588_v32 = vpop.f32.mrf.mxu2 }
 0x60f   :  { %v3576_v31 = vadd.f32 %v3575_v19, %v3562_v53 }
 0x610   :  { %v3564_v30 = vpop.f32.mrf.mxu0 }
 0x611   :  { %v3611_v36 = vadd.f32 %v3576_v31, %v723_v62 }
 0x613   :  { %v6732_v55 = vmul.f32 -1.442695, %v3611_v36 }
 0x614   :  { %v3601_v21 = vpop.f32.mrf.mxu3 }
 0x615   :  { %7787 = vpow2.f32 %v6732_v55  ;;  %v3602_v6 = vadd.f32 %v3601_v21, %v3588_v32 }
 0x616   :  { %v3577_v16 = vpop.f32.mrf.mxu1  ;;  %v3590_v8 = vpop.f32.mrf.mxu2 }
 0x617   :  { %v3612_v26 = vadd.f32 %v3602_v6, %v752_v13 }
 0x619   :  { %v6733_v7 = vmul.f32 -1.442695, %v3612_v26 }
 0x61b   :  { %v7788_v20 = vpop.eup %7787  ;;  %7789 = vpow2.f32 %v6733_v7 }
 0x61c   :  { %v3697_v51 = vadd.f32 1.0, %v7788_v20  ;;  %v3603_v24 = vpop.f32.mrf.mxu3 }
 0x61e   :  { %7791 = vrcp.f32 %v3697_v51  ;;  %v3710_v46 = vand.u32 2147483648, %v3697_v51  ;;  %v3708_v32 = vand.u32 2147483647, %v3697_v51  ;;  %vm3704_vm13 = vweird.f32 %v3697_v51 }
 0x620   :  { %v3711_v55 = vor.u32 1.1754944e-38, %v3710_v46  ;;  %vm3709_vm0 = vcmp.eq.f32.partialorder %v3708_v32, 8.507059e+37 }
 0x621   :  { %v7790_v33 = vpop.eup %7789 }
 0x622   :  { %v3698_v63 = vadd.f32 1.0, %v7790_v33 }
 0x624   :  { %v7792_v10 = vpop.eup %7791  ;;  %7793 = vrcp.f32 %v3698_v63  ;;  %v3725_v16 = vand.u32 2147483648, %v3698_v63  ;;  %v3723_v7 = vand.u32 2147483647, %v3698_v63  ;;  %vm3719_vm2 = vweird.f32 %v3698_v63 }
 0x625   :  { %v3700_v53 = vmul.f32 %v7792_v10, %v3697_v51  ;;  %7795 = vtanh.f32 %v9975_v41  ;;  %vm3705_vm12 = vweird.f32 %v7792_v10 }
 0x626   :  { %vm3706_vm14 = vmor %vm3704_vm13, %vm3705_vm12  ;;  %7797 = vtanh.f32 %v9978_v29  ;;  %v3726_v51 = vor.u32 1.1754944e-38, %v3725_v16  ;;  %vm3724_vm4 = vcmp.eq.f32.partialorder %v3723_v7, 8.507059e+37  ;;  %v11823_v16 = vld [vmem:[#allocation134_spill] sm:$0xff]  ;;  %v11826_v7 = vld [vmem:[#allocation137_spill] sm:$0xff] }
 0x627   :  { %v3701_v19 = vsub.f32 1.0, %v3700_v53 }
 0x629   :  { %v3702_v62 = vmul.f32 %v7792_v10, %v3701_v19 }
 0x62a   :  { %v7794_v31 = vpop.eup %7793 }
 0x62b   :  { %v3703_v30 = vadd.f32 %v7792_v10, %v3702_v62  ;;  %v3715_v36 = vmul.f32 %v7794_v31, %v3698_v63  ;;  %v7796_v13 = vpop.eup %7795  ;;  %vm3720_vm1 = vweird.f32 %v7794_v31 }
 0x62c   :  { %vm3721_vm3 = vmor %vm3719_vm2, %vm3720_vm1  ;;  %v7798_v53 = vpop.eup %7797 }
 0x62d   :  { %v3707_v21 = vsel %vm3706_vm14, %v7792_v10, %v3703_v30  ;;  %v3716_v35 = vsub.f32 1.0, %v3715_v36 }
 0x62e   :  { %v3712_v6 = vsel %vm3709_vm0, %v3711_v55, %v3707_v21 }
 0x62f   :  { %v3737_v8 = vmul.f32 %v7796_v13, %v3712_v6  ;;  %v3717_v26 = vmul.f32 %v7794_v31, %v3716_v35  ;;  %v11820_v35 = vld [vmem:[#allocation125_spill] sm:$0xff]  ;;  %v11821_v13 = vld [vmem:[#allocation128_spill] sm:$0xff]  ;;  %v11822_v6 = vld [vmem:[#allocation131_spill] sm:$0xff] }
 0x631   :  { %v9986_v20 = vpack.c.bf16 %v3737_v8, %v3737_v8  ;;  %v3718_v24 = vadd.f32 %v7794_v31, %v3717_v26  ;;  %v11824_v8 = vld [vmem:[#allocation140_spill] sm:$0xff] }
 0x632   :  { %v11825_v26 = vld [vmem:[#allocation144_spill] sm:$0xff] }
 0x633   :  { %v3722_v33 = vsel %vm3721_vm3, %v7794_v31, %v3718_v24  ;;  %3763 = vmatmul.bf16.vlgmr.msra.gmra.mxu0 %v9986_v20  ;;  %3789 = vmatmul.bf16.vlgmr.msra.gmra.mxu2 %v9986_v20  ;;  %v5550_v10 = vunpack.c.l.b16 %v9986_v20  ;;  %v11827_v24 = vld [vmem:[#allocation139_spill] sm:$0xff] }
 0x634   :  { %v3727_v19 = vsel %vm3724_vm4, %v3726_v51, %v3722_v33  ;;  %3859 = vmatpush.bf16.msra.mxu0 %v11241_v18  ;;  %3885 = vmatpush.bf16.msra.mxu2 %v11242_v37  ;;  %v11828_v51 = vld [vmem:[#allocation148_spill] sm:$0xff]  ;;  %v11829_v33 = vld [vmem:[#allocation150_spill] sm:$0xff] }
 0x635   :  { %v3738_v46 = vmul.f32 %v7798_v53, %v3727_v19  ;;  %v5568_v62 = vrot.slane %v5550_v10, 3  ;;  %v5827_v63 = vrot.slane %v5550_v10, 4  ;;  %v11830_v10 = vld [vmem:[#allocation143_spill] sm:$0xff]  ;;  %v11832_v19 = vld [vmem:[#allocation153_spill] sm:$0xff] }
 0x636   :  { %v11831_v53 = vld [vmem:[#allocation147_spill] sm:$0xff] }
 0x637   :  { %v9993_v32 = vpack.c.bf16 %v3738_v46, %v3738_v46  ;;  %v9997_v31 = vsel %vm5569_vm5, %v5568_v62, %v9759_v1  ;;  %v10001_v30 = vsel %vm5569_vm5, %v5827_v63, %v9763_v44  ;;  %v11833_v46 = vld [vmem:[#allocation156_spill] sm:$0xff]  ;;  %v11834_v62 = vld [vmem:[#allocation149_spill] sm:$0xff]  ;;  %v11835_v63 = vld [vmem:[#allocation151_spill] sm:$0xff] }
 0x638   :  { %3860 = vmatpush.bf16.msra.mxu0 %v11243_v12  ;;  %3886 = vmatpush.bf16.msra.mxu2 %v11244_v34 }
 0x639   :  { %3776 = vmatmul.bf16.vlgmr.msra.gmra.mxu1 %v9993_v32  ;;  %3802 = vmatmul.bf16.vlgmr.msra.gmra.mxu3 %v9993_v32  ;;  %v5551_v36 = vunpack.c.l.b16 %v9993_v32 }
 0x63a   :  { %3872 = vmatpush.bf16.msra.mxu1 %v11245_v5  ;;  %3898 = vmatpush.bf16.msra.mxu3 %v11246_v61 }
 0x63b   :  { %v5585_v1 = vrot.slane %v5551_v36, 3  ;;  %v5841_v55 = vrot.slane %v5551_v36, 4  ;;  %v11836_v36 = vld [vmem:[#allocation160_spill] sm:$0xff] }
 0x63c   :  { %3861 = vmatpush.bf16.msra.mxu0 %v11247_v47  ;;  %3887 = vmatpush.bf16.msra.mxu2 %v11248_v56 }
 0x63d   :  { %v10014_v44 = vsel %vm5569_vm5, %v5585_v1, %v9776_v25  ;;  %v10018_v21 = vsel %vm5569_vm5, %v5841_v55, %v9780_v45  ;;  %v11818_v25 = vld [vmem:[#allocation136_spill] sm:$0xff]  ;;  %v11819_v45 = vld [vmem:[#allocation138_spill] sm:$0xff]  ;;  %v11838_v55 = vld [vmem:[#allocation155_spill] sm:$0xff] }
 0x63e   :  { %3873 = vmatpush.bf16.msra.mxu1 %v11249_v43  ;;  %3899 = vmatpush.bf16.msra.mxu3 %v11250_v57  ;;  %v11837_v1 = vld [vmem:[#allocation162_spill] sm:$0xff] }
 0x640   :  { %3862 = vmatpush.bf16.msra.mxu0 %v11251_v58  ;;  %3888 = vmatpush.bf16.msra.mxu2 %v11252_v28 }
 0x642   :  { %3874 = vmatpush.bf16.msra.mxu1 %v11253_v38  ;;  %3900 = vmatpush.bf16.msra.mxu3 %v11254_v27 }
 0x643   :  { %3815 = vmatmul.bf16.vlgmr.msrb.gmra.mxu0 %v9986_v20  ;;  %3841 = vmatmul.bf16.vlgmr.msrb.gmra.mxu2 %v9986_v20 }
 0x644   :  { %3863 = vmatpush.bf16.msra.mxu0 %v11255_v54  ;;  %3889 = vmatpush.bf16.msra.mxu2 %v11256_v23 }
 0x646   :  { %3875 = vmatpush.bf16.msra.mxu1 %v11257_v52  ;;  %3901 = vmatpush.bf16.msra.mxu3 %v11258_v2 }
 0x648   :  { %3864 = vmatpush.bf16.msra.mxu0 %v11259_v60  ;;  %3890 = vmatpush.bf16.msra.mxu2 %v11260_v9 }
 0x649   :  { %3828 = vmatmul.bf16.vlgmr.msrb.gmra.mxu1 %v9993_v32  ;;  %3854 = vmatmul.bf16.vlgmr.msrb.gmra.mxu3 %v9993_v32 }
 0x64a   :  { %3876 = vmatpush.bf16.msra.mxu1 %v11358_v3  ;;  %3902 = vmatpush.bf16.msra.mxu3 %v11359_v59 }
 0x64c   :  { %3865 = vmatpush.bf16.msra.mxu0 %v11360_v22  ;;  %3891 = vmatpush.bf16.msra.mxu2 %v11361_v39 }
 0x64e   :  { %3877 = vmatpush.bf16.msra.mxu1 %v11362_v0  ;;  %3903 = vmatpush.bf16.msra.mxu3 %v11363_v11 }
 0x650   :  { %3866 = vmatpush.bf16.msra.mxu0 %v11364_v17  ;;  %3892 = vmatpush.bf16.msra.mxu2 %v11365_v49 }
 0x652   :  { %3878 = vmatpush.bf16.msra.mxu1 %v11368_v48  ;;  %3904 = vmatpush.bf16.msra.mxu3 %v11472_v15 }
 0x653   :  { %3867 = vmatmul.bf16.vlgmr.msra.gmra.mxu0 %v9986_v20  ;;  %3893 = vmatmul.bf16.vlgmr.msra.gmra.mxu2 %v9986_v20 }
 0x654   :  { %3911 = vmatpush.bf16.msrb.mxu0 %v11366_v42  ;;  %3937 = vmatpush.bf16.msrb.mxu2 %v11367_v50 }
 0x656   :  { %3879 = vmatpush.bf16.msra.mxu1 %v11820_v35  ;;  %3905 = vmatpush.bf16.msra.mxu3 %v11821_v13 }
 0x658   :  { %3912 = vmatpush.bf16.msrb.mxu0 %v11818_v25  ;;  %3938 = vmatpush.bf16.msrb.mxu2 %v11819_v45  ;;  %v11923_v45 = vld [vmem:[#allocation203_spill] sm:$0xff] }
 0x659   :  { %3880 = vmatmul.bf16.vlgmr.msra.gmra.mxu1 %v9993_v32  ;;  %3906 = vmatmul.bf16.vlgmr.msra.gmra.mxu3 %v9993_v32 }
 0x65a   :  { %3924 = vmatpush.bf16.msrb.mxu1 %v11822_v6  ;;  %3950 = vmatpush.bf16.msrb.mxu3 %v11823_v16 }
 0x65c   :  { %3913 = vmatpush.bf16.msrb.mxu0 %v11824_v8  ;;  %3939 = vmatpush.bf16.msrb.mxu2 %v11825_v26 }
 0x65e   :  { %3925 = vmatpush.bf16.msrb.mxu1 %v11826_v7  ;;  %3951 = vmatpush.bf16.msrb.mxu3 %v11827_v24 }
 0x660   :  { %3914 = vmatpush.bf16.msrb.mxu0 %v11828_v51  ;;  %3940 = vmatpush.bf16.msrb.mxu2 %v11829_v33 }
 0x662   :  { %3926 = vmatpush.bf16.msrb.mxu1 %v11830_v10  ;;  %3952 = vmatpush.bf16.msrb.mxu3 %v11831_v53  ;;  %v11842_v53 = vld [vmem:[#allocation161_spill] sm:$0xff] }
 0x664   :  { %3915 = vmatpush.bf16.msrb.mxu0 %v11832_v19  ;;  %3941 = vmatpush.bf16.msrb.mxu2 %v11833_v46  ;;  %v11843_v19 = vld [vmem:[#allocation163_spill] sm:$0xff]  ;;  %v11844_v46 = vld [vmem:[#allocation172_spill] sm:$0xff] }
 0x666   :  { %3927 = vmatpush.bf16.msrb.mxu1 %v11834_v62  ;;  %3953 = vmatpush.bf16.msrb.mxu3 %v11835_v63  ;;  %v11845_v62 = vld [vmem:[#allocation174_spill] sm:$0xff] }
 0x667   :  { %v11846_v63 = vld [vmem:[#allocation14_spill] sm:$0xff] }
 0x668   :  { %3916 = vmatpush.bf16.msrb.mxu0 %v11836_v36  ;;  %3942 = vmatpush.bf16.msrb.mxu2 %v11837_v1  ;;  %v11847_v36 = vld [vmem:[#allocation16_spill] sm:$0xff]  ;;  %v11848_v1 = vld [vmem:[#allocation167_spill] sm:$0xff] }
 0x66a   :  { %3928 = vmatpush.bf16.msrb.mxu1 %v11838_v55  ;;  %3954 = vmatpush.bf16.msrb.mxu3 %v11839_v14  ;;  %v11849_v55 = vld [vmem:[#allocation171_spill] sm:$0xff] }
 0x66c   :  { %3917 = vmatpush.bf16.msrb.mxu0 %v11840_v40  ;;  %3943 = vmatpush.bf16.msrb.mxu2 %v11841_v4  ;;  %v11850_v4 = vld [vmem:[#allocation18_spill] sm:$0xff] }
 0x66e   :  { %3929 = vmatpush.bf16.msrb.mxu1 %v11842_v53  ;;  %3955 = vmatpush.bf16.msrb.mxu3 %v11843_v19  ;;  %v11851_v53 = vld [vmem:[#allocation20_spill] sm:$0xff]  ;;  %v11852_v19 = vld [vmem:[#allocation173_spill] sm:$0xff] }
 0x670   :  { %3918 = vmatpush.bf16.msrb.mxu0 %v11844_v46  ;;  %3944 = vmatpush.bf16.msrb.mxu2 %v11845_v62  ;;  %v11853_v46 = vld [vmem:[#allocation175_spill] sm:$0xff] }
 0x671   :  { %v11854_v62 = vld [vmem:[#allocation15_spill] sm:$0xff] }
 0x672   :  { %3930 = vmatpush.bf16.msrb.mxu1 %v11848_v1  ;;  %3956 = vmatpush.bf16.msrb.mxu3 %v11849_v55  ;;  %v11857_v55 = vld [vmem:[#allocation24_spill] sm:$0xff] }
 0x673   :  { %3919 = vmatmul.bf16.vlgmr.msrb.gmra.mxu0 %v9986_v20  ;;  %3945 = vmatmul.bf16.vlgmr.msrb.gmra.mxu2 %v9986_v20  ;;  %v11858_v20 = vld [vmem:[#allocation19_spill] sm:$0xff]  ;;  %v11865_v1 = vld [vmem:[#allocation32_spill] sm:$0xff] }
 0x674   :  { %4113 = vmatpush.bf16.msra.mxu0 %v11846_v63  ;;  %4139 = vmatpush.bf16.msra.mxu2 %v11847_v36  ;;  %v11855_v63 = vld [vmem:[#allocation17_spill] sm:$0xff]  ;;  %v11856_v36 = vld [vmem:[#allocation22_spill] sm:$0xff] }
 0x676   :  { %3931 = vmatpush.bf16.msrb.mxu1 %v11852_v19  ;;  %3957 = vmatpush.bf16.msrb.mxu3 %v11853_v46  ;;  %v11861_v19 = vld [vmem:[#allocation28_spill] sm:$0xff]  ;;  %v11862_v46 = vld [vmem:[#allocation23_spill] sm:$0xff] }
 0x678   :  { %4114 = vmatpush.bf16.msra.mxu0 %v11850_v4  ;;  %4140 = vmatpush.bf16.msra.mxu2 %v11851_v53  ;;  %v11859_v4 = vld [vmem:[#allocation21_spill] sm:$0xff]  ;;  %v11860_v53 = vld [vmem:[#allocation26_spill] sm:$0xff] }
 0x679   :  { %3932 = vmatmul.bf16.vlgmr.msrb.gmra.mxu1 %v9993_v32  ;;  %3958 = vmatmul.bf16.vlgmr.msrb.gmra.mxu3 %v9993_v32  ;;  %v11866_v32 = vld [vmem:[#allocation27_spill] sm:$0xff] }
 0x67a   :  { %4126 = vmatpush.bf16.msra.mxu1 %v11854_v62  ;;  %4152 = vmatpush.bf16.msra.mxu3 %v11855_v63  ;;  %v11863_v62 = vld [vmem:[#allocation25_spill] sm:$0xff]  ;;  %v11864_v63 = vld [vmem:[#allocation30_spill] sm:$0xff] }
 0x67c   :  { %4115 = vmatpush.bf16.msra.mxu0 %v11856_v36  ;;  %4141 = vmatpush.bf16.msra.mxu2 %v11857_v55  ;;  %v11867_v36 = vld [vmem:[#allocation29_spill] sm:$0xff]  ;;  %v11868_v55 = vld [vmem:[#allocation34_spill] sm:$0xff] }
 0x67e   :  { %4127 = vmatpush.bf16.msra.mxu1 %v11858_v20  ;;  %4153 = vmatpush.bf16.msra.mxu3 %v11859_v4  ;;  %v11869_v20 = vld [vmem:[#allocation36_spill] sm:$0xff]  ;;  %v11870_v4 = vld [vmem:[#allocation31_spill] sm:$0xff] }
 0x680   :  { %4116 = vmatpush.bf16.msra.mxu0 %v11860_v53  ;;  %4142 = vmatpush.bf16.msra.mxu2 %v11861_v19  ;;  %v11871_v53 = vld [vmem:[#allocation33_spill] sm:$0xff]  ;;  %v11872_v19 = vld [vmem:[#allocation38_spill] sm:$0xff] }
 0x682   :  { %4128 = vmatpush.bf16.msra.mxu1 %v11862_v46  ;;  %4154 = vmatpush.bf16.msra.mxu3 %v11863_v62  ;;  %v11873_v46 = vld [vmem:[#allocation40_spill] sm:$0xff]  ;;  %v11874_v62 = vld [vmem:[#allocation35_spill] sm:$0xff] }
 0x684   :  { %4117 = vmatpush.bf16.msra.mxu0 %v11864_v63  ;;  %4143 = vmatpush.bf16.msra.mxu2 %v11865_v1  ;;  %v11875_v63 = vld [vmem:[#allocation37_spill] sm:$0xff]  ;;  %v11876_v1 = vld [vmem:[#allocation42_spill] sm:$0xff] }
 0x686   :  { %4129 = vmatpush.bf16.msra.mxu1 %v11866_v32  ;;  %4155 = vmatpush.bf16.msra.mxu3 %v11867_v36  ;;  %v11877_v32 = vld [vmem:[#allocation44_spill] sm:$0xff]  ;;  %v11878_v36 = vld [vmem:[#allocation46_spill] sm:$0xff] }
 0x688   :  { %4118 = vmatpush.bf16.msra.mxu0 %v11868_v55  ;;  %4144 = vmatpush.bf16.msra.mxu2 %v11869_v20  ;;  %v11879_v55 = vld [vmem:[#allocation48_spill] sm:$0xff]  ;;  %v11880_v20 = vld [vmem:[#allocation39_spill] sm:$0xff] }
 0x68a   :  { %4130 = vmatpush.bf16.msra.mxu1 %v11870_v4  ;;  %4156 = vmatpush.bf16.msra.mxu3 %v11871_v53  ;;  %v11881_v4 = vld [vmem:[#allocation41_spill] sm:$0xff]  ;;  %v11882_v53 = vld [vmem:[#allocation50_spill] sm:$0xff] }
 0x68c   :  { %4119 = vmatpush.bf16.msra.mxu0 %v11872_v19  ;;  %4145 = vmatpush.bf16.msra.mxu2 %v11873_v46  ;;  %v11883_v19 = vld [vmem:[#allocation52_spill] sm:$0xff]  ;;  %v11884_v46 = vld [vmem:[#allocation43_spill] sm:$0xff] }
 0x68e   :  { %4131 = vmatpush.bf16.msra.mxu1 %v11874_v62  ;;  %4157 = vmatpush.bf16.msra.mxu3 %v11875_v63  ;;  %v11885_v62 = vld [vmem:[#allocation45_spill] sm:$0xff]  ;;  %v11886_v63 = vld [vmem:[#allocation47_spill] sm:$0xff] }
 0x690   :  { %4120 = vmatpush.bf16.msra.mxu0 %v11876_v1  ;;  %4146 = vmatpush.bf16.msra.mxu2 %v11877_v32  ;;  %v11887_v1 = vld [vmem:[#allocation49_spill] sm:$0xff]  ;;  %v11888_v32 = vld [vmem:[#allocation54_spill] sm:$0xff] }
 0x692   :  { %4132 = vmatpush.bf16.msra.mxu1 %v11880_v20  ;;  %4158 = vmatpush.bf16.msra.mxu3 %v11881_v4  ;;  %v11891_v20 = vld [vmem:[#allocation53_spill] sm:$0xff]  ;;  %v11892_v4 = vld [vmem:[#allocation58_spill] sm:$0xff] }
 0x694   :  { %4165 = vmatpush.bf16.msrb.mxu0 %v11878_v36  ;;  %4191 = vmatpush.bf16.msrb.mxu2 %v11879_v55  ;;  %v11889_v36 = vld [vmem:[#allocation56_spill] sm:$0xff]  ;;  %v11890_v55 = vld [vmem:[#allocation51_spill] sm:$0xff] }
 0x696   :  { %4133 = vmatpush.bf16.msra.mxu1 %v11884_v46  ;;  %4159 = vmatpush.bf16.msra.mxu3 %v11885_v62  ;;  %v11895_v46 = vld [vmem:[#allocation57_spill] sm:$0xff]  ;;  %v11896_v62 = vld [vmem:[#allocation62_spill] sm:$0xff] }
 0x698   :  { %4166 = vmatpush.bf16.msrb.mxu0 %v11882_v53  ;;  %4192 = vmatpush.bf16.msrb.mxu2 %v11883_v19  ;;  %v11893_v53 = vld [vmem:[#allocation60_spill] sm:$0xff]  ;;  %v11894_v19 = vld [vmem:[#allocation55_spill] sm:$0xff] }
 0x69a   :  { %4178 = vmatpush.bf16.msrb.mxu1 %v11886_v63  ;;  %4204 = vmatpush.bf16.msrb.mxu3 %v11887_v1  ;;  %v11897_v63 = vld [vmem:[#allocation64_spill] sm:$0xff]  ;;  %v11898_v1 = vld [vmem:[#allocation59_spill] sm:$0xff] }
 0x69c   :  { %4167 = vmatpush.bf16.msrb.mxu0 %v11888_v32  ;;  %4193 = vmatpush.bf16.msrb.mxu2 %v11889_v36  ;;  %v11899_v32 = vld [vmem:[#allocation61_spill] sm:$0xff]  ;;  %v11900_v36 = vld [vmem:[#allocation66_spill] sm:$0xff] }
 0x69e   :  { %4179 = vmatpush.bf16.msrb.mxu1 %v11890_v55  ;;  %4205 = vmatpush.bf16.msrb.mxu3 %v11891_v20  ;;  %v11901_v55 = vld [vmem:[#allocation68_spill] sm:$0xff]  ;;  %v11902_v20 = vld [vmem:[#allocation63_spill] sm:$0xff] }
 0x6a0   :  { %4168 = vmatpush.bf16.msrb.mxu0 %v11892_v4  ;;  %4194 = vmatpush.bf16.msrb.mxu2 %v11893_v53  ;;  %v11903_v4 = vld [vmem:[#allocation65_spill] sm:$0xff]  ;;  %v11904_v53 = vld [vmem:[#allocation70_spill] sm:$0xff] }
 0x6a2   :  { %4180 = vmatpush.bf16.msrb.mxu1 %v11894_v19  ;;  %4206 = vmatpush.bf16.msrb.mxu3 %v11895_v46  ;;  %v11905_v19 = vld [vmem:[#allocation72_spill] sm:$0xff]  ;;  %v11906_v46 = vld [vmem:[#allocation67_spill] sm:$0xff] }
 0x6a4   :  { %4169 = vmatpush.bf16.msrb.mxu0 %v11896_v62  ;;  %4195 = vmatpush.bf16.msrb.mxu2 %v11897_v63  ;;  %v11907_v62 = vld [vmem:[#allocation69_spill] sm:$0xff]  ;;  %v11908_v63 = vld [vmem:[#allocation74_spill] sm:$0xff] }
 0x6a6   :  { %4181 = vmatpush.bf16.msrb.mxu1 %v11898_v1  ;;  %4207 = vmatpush.bf16.msrb.mxu3 %v11899_v32  ;;  %v11909_v1 = vld [vmem:[#allocation76_spill] sm:$0xff]  ;;  %v11910_v32 = vld [vmem:[#allocation71_spill] sm:$0xff] }
 0x6a8   :  { %4170 = vmatpush.bf16.msrb.mxu0 %v11900_v36  ;;  %4196 = vmatpush.bf16.msrb.mxu2 %v11901_v55  ;;  %v11911_v36 = vld [vmem:[#allocation73_spill] sm:$0xff]  ;;  %v11912_v55 = vld [vmem:[#allocation75_spill] sm:$0xff] }
 0x6aa   :  { %4182 = vmatpush.bf16.msrb.mxu1 %v11902_v20  ;;  %4208 = vmatpush.bf16.msrb.mxu3 %v11903_v4  ;;  %v11913_v20 = vld [vmem:[#allocation77_spill] sm:$0xff] }
 0x6ac   :  { %4171 = vmatpush.bf16.msrb.mxu0 %v11904_v53  ;;  %4197 = vmatpush.bf16.msrb.mxu2 %v11905_v19 }
 0x6ae   :  { %4183 = vmatpush.bf16.msrb.mxu1 %v11906_v46  ;;  %4209 = vmatpush.bf16.msrb.mxu3 %v11907_v62  ;;  %v11914_v46 = vld [vmem:[#allocation157_spill] sm:$0xff] }
 0x6b0   :  { %4172 = vmatpush.bf16.msrb.mxu0 %v11908_v63  ;;  %4198 = vmatpush.bf16.msrb.mxu2 %v11909_v1  ;;  %v3764_v4 = vpop.f32.mrf.mxu0 }
 0x6b2   :  { %4184 = vmatpush.bf16.msrb.mxu1 %v11910_v32  ;;  %4210 = vmatpush.bf16.msrb.mxu3 %v11911_v36  ;;  %v11915_v32 = vld [vmem:[#allocation159_spill] sm:$0xff] }
 0x6b6   :  { %4185 = vmatpush.bf16.msrb.mxu1 %v11912_v55  ;;  %4211 = vmatpush.bf16.msrb.mxu3 %v11913_v20  ;;  %v3777_v53 = vpop.f32.mrf.mxu1  ;;  %v3790_v40 = vpop.f32.mrf.mxu2 }
 0x6b7   :  { %v3778_v19 = vadd.f32 %v3777_v53, %v3764_v4 }
 0x6b8   :  { %v3766_v14 = vpop.f32.mrf.mxu0 }
 0x6b9   :  { %v3963_v10 = vadd.f32 %v3778_v19, %v11914_v46 }
 0x6bb   :  { %v6734_v62 = vmul.f32 -1.442695, %v3963_v10  ;;  %v11916_v10 = vld [vmem:[#allocation165_spill] sm:$0xff] }
 0x6bc   :  { %v3803_v33 = vpop.f32.mrf.mxu3 }
 0x6bd   :  { %7799 = vpow2.f32 %v6734_v62  ;;  %v3804_v63 = vadd.f32 %v3803_v33, %v3790_v40 }
 0x6be   :  { %v3779_v1 = vpop.f32.mrf.mxu1  ;;  %v3792_v51 = vpop.f32.mrf.mxu2 }
 0x6bf   :  { %v3964_v24 = vadd.f32 %v3804_v63, %v11915_v32 }
 0x6c0   :  { %v3816_v36 = vpop.f32.mrf.mxu0 }
 0x6c1   :  { %v6735_v7 = vmul.f32 -1.442695, %v3964_v24 }
 0x6c3   :  { %v7800_v55 = vpop.eup %7799  ;;  %7801 = vpow2.f32 %v6735_v7 }
 0x6c4   :  { %v3977_v20 = vadd.f32 1.0, %v7800_v55  ;;  %v3805_v26 = vpop.f32.mrf.mxu3 }
 0x6c5   :  { %v11917_v26 = vld [vmem:[#allocation169_spill] sm:$0xff] }
 0x6c6   :  { %v3829_v8 = vpop.f32.mrf.mxu1  ;;  %v3842_v16 = vpop.f32.mrf.mxu2  ;;  %7803 = vrcp.f32 %v3977_v20  ;;  %v3988_v13 = vand.u32 2147483647, %v3977_v20  ;;  %vm3984_vm7 = vweird.f32 %v3977_v20 }
 0x6c7   :  { %v3830_v14 = vadd.f32 %v3829_v8, %v3816_v36 }
 0x6c8   :  { %v3818_v4 = vpop.f32.mrf.mxu0  ;;  %vm10172_vm9 = vcmp.eq.f32.partialorder %v3988_v13, 8.507059e+37 }
 0x6c9   :  { %v7802_v53 = vpop.eup %7801  ;;  %v3965_v19 = vadd.f32 %v3830_v14, %v11916_v10 }
 0x6ca   :  { %v10155_v46 = vadd.f32 1.0, %v7802_v53 }
 0x6cb   :  { %v6736_v40 = vmul.f32 -1.442695, %v3965_v19 }
 0x6cc   :  { %7805 = vrcp.f32 %v10155_v46  ;;  %v3855_v51 = vpop.f32.mrf.mxu3  ;;  %v7804_v33 = vpop.eup %7803  ;;  %vm3999_vm11 = vweird.f32 %v10155_v46  ;;  %v4003_v13 = vand.u32 2147483647, %v10155_v46 }
 0x6cd   :  { %7807 = vpow2.f32 %v6736_v40  ;;  %v3856_v24 = vadd.f32 %v3855_v51, %v3842_v16  ;;  %v3980_v1 = vmul.f32 %v7804_v33, %v3977_v20  ;;  %vm3985_vm6 = vweird.f32 %v7804_v33 }
 0x6ce   :  { %v3831_v7 = vpop.f32.mrf.mxu1  ;;  %v3844_v62 = vpop.f32.mrf.mxu2  ;;  %vm10168_vm8 = vmor %vm3984_vm7, %vm3985_vm6  ;;  %vm4004_vm1 = vcmp.eq.f32.partialorder %v4003_v13, 8.507059e+37 }
 0x6cf   :  { %v3966_v63 = vadd.f32 %v3856_v24, %v11917_v26  ;;  %v3981_v14 = vsub.f32 1.0, %v3980_v1 }
 0x6d0   :  { %v3868_v32 = vpop.f32.mrf.mxu0 }
 0x6d1   :  { %v6737_v8 = vmul.f32 -1.442695, %v3966_v63  ;;  %v3982_v51 = vmul.f32 %v7804_v33, %v3981_v14  ;;  %v11918_v63 = vld [vmem:[#allocation202_spill] sm:$0xff] }
 0x6d2   :  { %v10159_v36 = vpop.eup %7805 }
 0x6d3   :  { %v7808_v55 = vpop.eup %7807  ;;  %7809 = vpow2.f32 %v6737_v8  ;;  %v3995_v10 = vmul.f32 %v10159_v36, %v10155_v46  ;;  %v3990_v8 = vand.u32 2147483648, %v3977_v20  ;;  %vm4000_vm10 = vweird.f32 %v10159_v36 }
 0x6d4   :  { %v4015_v4 = vadd.f32 1.0, %v7808_v55  ;;  %v3857_v53 = vpop.f32.mrf.mxu3  ;;  %v3983_v55 = vadd.f32 %v7804_v33, %v3982_v51  ;;  %vm10189_vm13 = vmor %vm3999_vm11, %vm4000_vm10 }
 0x6d5   :  { %v3996_v62 = vsub.f32 1.0, %v3995_v10 }
 0x6d6   :  { %7811 = vrcp.f32 %v4015_v4  ;;  %v3894_v19 = vpop.f32.mrf.mxu2  ;;  %v3881_v16 = vpop.f32.mrf.mxu1  ;;  %v4026_v20 = vand.u32 2147483647, %v4015_v4  ;;  %vm4022_vm12 = vweird.f32 %v4015_v4 }
 0x6d7   :  { %v3882_v40 = vadd.f32 %v3881_v16, %v3868_v32  ;;  %v3997_v32 = vmul.f32 %v10159_v36, %v3996_v62 }
 0x6d8   :  { %v3870_v7 = vpop.f32.mrf.mxu0  ;;  %vm4027_vm0 = vcmp.eq.f32.partialorder %v4026_v20, 8.507059e+37 }
 0x6d9   :  { %v7810_v24 = vpop.eup %7809  ;;  %v3967_v6 = vadd.f32 %v3882_v40, %v11918_v63  ;;  %v4028_v63 = vand.u32 2147483648, %v4015_v4 }
 0x6da   :  { %v10163_v26 = vadd.f32 1.0, %v7810_v24  ;;  %v3991_v24 = vor.u32 1.1754944e-38, %v3990_v8  ;;  %v4005_v8 = vand.u32 2147483648, %v10155_v46 }
 0x6dc   :  { %v7812_v1 = vpop.eup %7811  ;;  %7813 = vrcp.f32 %v10163_v26  ;;  %v3907_v35 = vpop.f32.mrf.mxu3  ;;  %v4043_v40 = vand.u32 2147483648, %v10163_v26  ;;  %vm4037_vm3 = vweird.f32 %v10163_v26 }
 0x6dd   :  { %v4018_v53 = vmul.f32 %v7812_v1, %v4015_v4  ;;  %7815 = vtanh.f32 %v3967_v6  ;;  %v3908_v14 = vadd.f32 %v3907_v35, %v3894_v19  ;;  %v3987_v6 = vsel %vm10168_vm8, %v7804_v33, %v3983_v55 }
 0x6de   :  { %v3896_v16 = vpop.f32.mrf.mxu2  ;;  %v3883_v51 = vpop.f32.mrf.mxu1  ;;  %vm4023_vm15 = vweird.f32 %v7812_v1  ;;  %v3998_v19 = vadd.f32 %v10159_v36, %v3997_v32 }
 0x6df   :  { %v4019_v10 = vsub.f32 1.0, %v4018_v53  ;;  %v3968_v62 = vadd.f32 %v3908_v14, %v11923_v45  ;;  %v3992_v45 = vsel %vm10172_vm9, %v3991_v24, %v3987_v6  ;;  %vm4024_vm14 = vmor %vm4022_vm12, %vm4023_vm15  ;;  %v4029_v14 = vor.u32 1.1754944e-38, %v4028_v63 }
 0x6e0   :  { %v4002_v4 = vsel %vm10189_vm13, %v10159_v36, %v3998_v19  ;;  %v4006_v6 = vor.u32 1.1754944e-38, %v4005_v8  ;;  %v4041_v63 = vand.u32 2147483647, %v10163_v26  ;;  %v4044_v19 = vor.u32 1.1754944e-38, %v4043_v40 }
 0x6e1   :  { %v4020_v35 = vmul.f32 %v7812_v1, %v4019_v10  ;;  %7817 = vtanh.f32 %v3968_v62  ;;  %vm5572_vm13 = vcmask 1046534  }
 0x6e2   :  { %v7814_v53 = vpop.eup %7813  ;;  %vm4042_vm5 = vcmp.eq.f32.partialorder %v4041_v63, 8.507059e+37 }
 0x6e3   :  { %v7816_v16 = vpop.eup %7815  ;;  %v4033_v33 = vmul.f32 %v7814_v53, %v10163_v26  ;;  %v4021_v55 = vadd.f32 %v7812_v1, %v4020_v35  ;;  %vm4038_vm2 = vweird.f32 %v7814_v53 }
 0x6e4   :  { %v4089_v10 = vmul.f32 %v7816_v16, %v3992_v45  ;;  %v3909_v51 = vpop.f32.mrf.mxu3  ;;  %vm4039_vm4 = vmor %vm4037_vm3, %vm4038_vm2 }
 0x6e5   :  { %v4034_v7 = vsub.f32 1.0, %v4033_v33  ;;  %v4025_v46 = vsel %vm4024_vm14, %v7812_v1, %v4021_v55  ;;  %v4007_v33 = vsel %vm4004_vm1, %v4006_v6, %v4002_v4  ;;  %v11926_v4 = vld [vmem:[#allocation204_spill] sm:$0xff] }
 0x6e6   :  { %v4030_v24 = vsel %vm4027_vm0, %v4029_v14, %v4025_v46 }
 0x6e7   :  { %v4035_v62 = vmul.f32 %v7814_v53, %v4034_v7  ;;  %v4087_v35 = vmul.f32 %v4030_v24, %v9975_v41  ;;  %v7818_v16 = vpop.eup %7817 }
 0x6e8   :  { %v4090_v36 = vmul.f32 %v7818_v16, %v4007_v33 }
 0x6e9   :  { %v10200_v1 = vadd.f32 %v4089_v10, %v4087_v35  ;;  %v4036_v20 = vadd.f32 %v7814_v53, %v4035_v62 }
 0x6eb   :  { %v4040_v45 = vsel %vm4039_vm4, %v7814_v53, %v4036_v20  ;;  %v11927_v53 = vld [vmem:[#allocation206_spill] sm:$0xff] }
 0x6ec   :  { %v4045_v13 = vsel %vm4042_vm5, %v4044_v19, %v4040_v45 }
 0x6ed   :  { %v4088_v8 = vmul.f32 %v4045_v13, %v9978_v29 }
 0x6ef   :  { %v10203_v32 = vadd.f32 %v4090_v36, %v4088_v8 }
 0x6f0   :  { %v3920_v55 = vpop.f32.mrf.mxu0 }
 0x6f6   :  { %v3933_v41 = vpop.f32.mrf.mxu1  ;;  %v3946_v14 = vpop.f32.mrf.mxu2 }
 0x6f7   :  { %v3934_v7 = vadd.f32 %v3933_v41, %v3920_v55 }
 0x6f8   :  { %v3922_v46 = vpop.f32.mrf.mxu0 }
 0x6f9   :  { %v3969_v26 = vadd.f32 %v3934_v7, %v11926_v4 }
 0x6fb   :  { %v6738_v10 = vmul.f32 -1.442695, %v3969_v26 }
 0x6fc   :  { %v3959_v51 = vpop.f32.mrf.mxu3 }
 0x6fd   :  { %7819 = vpow2.f32 %v6738_v10  ;;  %v3960_v24 = vadd.f32 %v3959_v51, %v3946_v14 }
 0x6fe   :  { %v3935_v6 = vpop.f32.mrf.mxu1  ;;  %v3948_v40 = vpop.f32.mrf.mxu2 }
 0x6ff   :  { %v3970_v62 = vadd.f32 %v3960_v24, %v11927_v53 }
 0x701   :  { %v6739_v35 = vmul.f32 -1.442695, %v3970_v62 }
 0x703   :  { %v7820_v63 = vpop.eup %7819  ;;  %7821 = vpow2.f32 %v6739_v35 }
 0x704   :  { %v4055_v29 = vadd.f32 1.0, %v7820_v63  ;;  %v3961_v16 = vpop.f32.mrf.mxu3 }
 0x706   :  { %7823 = vrcp.f32 %v4055_v29  ;;  %v4068_v13 = vand.u32 2147483648, %v4055_v29  ;;  %v4066_v55 = vand.u32 2147483647, %v4055_v29  ;;  %vm4062_vm7 = vweird.f32 %v4055_v29 }
 0x708   :  { %v4069_v46 = vor.u32 1.1754944e-38, %v4068_v13  ;;  %vm4067_vm9 = vcmp.eq.f32.partialorder %v4066_v55, 8.507059e+37 }
 0x709   :  { %v7822_v33 = vpop.eup %7821 }
 0x70a   :  { %v4056_v20 = vadd.f32 1.0, %v7822_v33 }
 0x70c   :  { %v7824_v36 = vpop.eup %7823  ;;  %7825 = vrcp.f32 %v4056_v20  ;;  %v4083_v24 = vand.u32 2147483648, %v4056_v20  ;;  %v4081_v53 = vand.u32 2147483647, %v4056_v20  ;;  %vm4077_vm15 = vweird.f32 %v4056_v20 }
 0x70d   :  { %v4058_v19 = vmul.f32 %v7824_v36, %v4055_v29  ;;  %7827 = vtanh.f32 %v10200_v1  ;;  %vm4063_vm6 = vweird.f32 %v7824_v36 }
 0x70e   :  { %vm4064_vm8 = vmor %vm4062_vm7, %vm4063_vm6  ;;  %7829 = vtanh.f32 %v10203_v32  ;;  %v4084_v63 = vor.u32 1.1754944e-38, %v4083_v24  ;;  %vm4082_vm12 = vcmp.eq.f32.partialorder %v4081_v53, 8.507059e+37  ;;  %v7118_v24 = vld [vmem:[#allocation9 + $0x2e8] sm:$0xf0]  ;;  %v11955_v53 = vld [vmem:[#allocation167_spill] sm:$0xff] }
 0x70f   :  { %v4059_v45 = vsub.f32 1.0, %v4058_v19 }
 0x711   :  { %v4060_v8 = vmul.f32 %v7824_v36, %v4059_v45 }
 0x712   :  { %v7826_v41 = vpop.eup %7825 }
 0x713   :  { %v4061_v14 = vadd.f32 %v7824_v36, %v4060_v8  ;;  %v4073_v7 = vmul.f32 %v7826_v41, %v4056_v20  ;;  %v7828_v10 = vpop.eup %7827  ;;  %vm4078_vm10 = vweird.f32 %v7826_v41 }
 0x714   :  { %vm4079_vm11 = vmor %vm4077_vm15, %vm4078_vm10  ;;  %v7830_v33 = vpop.eup %7829 }
 0x715   :  { %v4065_v4 = vsel %vm4064_vm8, %v7824_v36, %v4061_v14  ;;  %v4074_v26 = vsub.f32 1.0, %v4073_v7  ;;  %v6900_v14 = vld [vmem:[#allocation9 + $0x120] sm:$0xf]  ;;  %v7507_v7 = vld [vmem:[#allocation9 + $0x134] sm:$0xf0] }
 0x716   :  { %v4070_v51 = vsel %vm4067_vm9, %v4069_v46, %v4065_v4  ;;  %v7116_v46 = vld [vmem:[#allocation9 + $0x2d0] sm:$0xf]  ;;  %v11953_v4 = vld [vmem:[#allocation172_spill] sm:$0xff] }
 0x717   :  { %v4095_v6 = vmul.f32 %v7828_v10, %v4070_v51  ;;  %v4075_v40 = vmul.f32 %v7826_v41, %v4074_v26  ;;  %v11954_v26 = vld [vmem:[#allocation174_spill] sm:$0xff]  ;;  %v7561_v10 = vld [vmem:[#allocation9 + $0x2e4] sm:$0xf0] }
 0x718   :  { %v7558_v51 = vld [vmem:[#allocation9 + $0x2d4] sm:$0xf] }
 0x719   :  { %v10209_v62 = vpack.c.bf16 %v4095_v6, %v4095_v6  ;;  %v4076_v35 = vadd.f32 %v7826_v41, %v4075_v40  ;;  %v6901_v40 = vor.u32 %v7507_v7, %v6900_v14  ;;  %v7534_v14 = vld [vmem:[#allocation9 + $0x214] sm:$0xf]  ;;  %v7022_v7 = vld [vmem:[#allocation9 + $0x228] sm:$0xf0] }
 0x71b   :  { %v4080_v29 = vsel %vm4079_vm11, %v7826_v41, %v4076_v35  ;;  %4121 = vmatmul.bf16.vlgmr.msra.gmra.mxu0 %v10209_v62  ;;  %4147 = vmatmul.bf16.vlgmr.msra.gmra.mxu2 %v10209_v62  ;;  %v5552_v16 = vunpack.c.l.b16 %v10209_v62  ;;  %v6902_v41 = vld [vmem:[#allocation9 + $0x138] sm:$0xf0] }
 0x71c   :  { %v4085_v36 = vsel %vm4082_vm12, %v4084_v63, %v4080_v29  ;;  %4217 = vmatpush.bf16.msra.mxu0 %v11241_v18  ;;  %4243 = vmatpush.bf16.msra.mxu2 %v11242_v37  ;;  %v11956_v35 = vld [vmem:[#allocation171_spill] sm:$0xff]  ;;  %v7498_v63 = vld [vmem:[#allocation9 + $0xf4] sm:$0xf]  ;;  %v6878_v29 = vld [vmem:[#allocation9 + $0x108] sm:$0xf0] }
 0x71d   :  { %v4096_v19 = vmul.f32 %v7830_v33, %v4085_v36  ;;  %v5571_v45 = vrot.slane %v5552_v16, 2  ;;  %v5829_v20 = vrot.slane %v5552_v16, 3  ;;  %v7117_v16 = vor.u32 %v7561_v10, %v7116_v46  ;;  %v6876_v36 = vld [vmem:[#allocation9 + $0xf0] sm:$0xf]  ;;  %v6782_v10 = vld [vmem:[#allocation9 + $0x48] sm:$0xf0] }
 0x71e   :  { %v7121_v33 = vor.u32 %v7558_v51, %v7118_v24  ;;  %v7025_v24 = vor.u32 %v7534_v14, %v7022_v7  ;;  %v6750_v14 = vld [vmem:[%s10709_s6 + $0x8] sm:$0xf0] }
 0x71f   :  { %v10216_v13 = vpack.c.bf16 %v4096_v19, %v4096_v19  ;;  %v10220_v8 = vsel %vm5572_vm13, %v5571_v45, %v9997_v31  ;;  %v10224_v55 = vsel %vm5572_vm13, %v5829_v20, %v10001_v30  ;;  %v7501_v19 = vld [vmem:[#allocation9 + $0x104] sm:$0xf0]  ;;  %v7092_v45 = vld [vmem:[#allocation9 + $0x2a0] sm:$0xf]  ;;  %v7555_v20 = vld [vmem:[#allocation9 + $0x2b4] sm:$0xf0] }
 0x720   :  { %4218 = vmatpush.bf16.msra.mxu0 %v11243_v12  ;;  %4244 = vmatpush.bf16.msra.mxu2 %v11244_v34 }
 0x721   :  { %4134 = vmatmul.bf16.vlgmr.msra.gmra.mxu1 %v10216_v13  ;;  %4160 = vmatmul.bf16.vlgmr.msra.gmra.mxu3 %v10216_v13  ;;  %v5553_v18 = vunpack.c.l.b16 %v10216_v13 }
 0x722   :  { %4230 = vmatpush.bf16.msra.mxu1 %v11245_v5  ;;  %4256 = vmatpush.bf16.msra.mxu3 %v11246_v61  ;;  %v11928_v5 = vld [vmem:[#allocation138_spill] sm:$0xff]  ;;  %v11929_v61 = vld [vmem:[#allocation125_spill] sm:$0xff] }
 0x723   :  { %v5587_v37 = vrot.slane %v5553_v18, 2  ;;  %v5843_v31 = vrot.slane %v5553_v18, 3  ;;  %v7552_v18 = vld [vmem:[#allocation9 + $0x2a4] sm:$0xf] }
 0x724   :  { %4219 = vmatpush.bf16.msra.mxu0 %v11247_v47  ;;  %4245 = vmatpush.bf16.msra.mxu2 %v11248_v56  ;;  %v11930_v47 = vld [vmem:[#allocation128_spill] sm:$0xff]  ;;  %v11931_v56 = vld [vmem:[#allocation131_spill] sm:$0xff] }
 0x725   :  { %v10237_v12 = vsel %vm5572_vm13, %v5587_v37, %v10014_v44  ;;  %v10241_v34 = vsel %vm5572_vm13, %v5843_v31, %v10018_v21  ;;  %v7504_v44 = vld [vmem:[#allocation9 + $0x124] sm:$0xf]  ;;  %v11951_v21 = vld [vmem:[#allocation161_spill] sm:$0xff]  ;;  %v7094_v37 = vld [vmem:[#allocation9 + $0x2b8] sm:$0xf0] }
 0x726   :  { %4231 = vmatpush.bf16.msra.mxu1 %v11249_v43  ;;  %4257 = vmatpush.bf16.msra.mxu3 %v11250_v57  ;;  %v11932_v43 = vld [vmem:[#allocation134_spill] sm:$0xff]  ;;  %v11933_v57 = vld [vmem:[#allocation140_spill] sm:$0xff]  ;;  %v6905_v6 = vor.u32 %v7504_v44, %v6902_v41  ;;  %v11957_v31 = vld [vmem:[#allocation173_spill] sm:$0xff] }
 0x727   :  { %v6804_v44 = vld [vmem:[#allocation9 + $0x60] sm:$0xf]  ;;  %v7537_v41 = vld [vmem:[#allocation9 + $0x224] sm:$0xf0] }
 0x728   :  { %4220 = vmatpush.bf16.msra.mxu0 %v11251_v58  ;;  %4246 = vmatpush.bf16.msra.mxu2 %v11252_v28  ;;  %v11934_v58 = vld [vmem:[#allocation144_spill] sm:$0xff]  ;;  %v11935_v28 = vld [vmem:[#allocation137_spill] sm:$0xff] }
 0x72a   :  { %4232 = vmatpush.bf16.msra.mxu1 %v11253_v38  ;;  %4258 = vmatpush.bf16.msra.mxu3 %v11254_v27  ;;  %v11936_v38 = vld [vmem:[#allocation139_spill] sm:$0xff]  ;;  %v11937_v27 = vld [vmem:[#allocation148_spill] sm:$0xff] }
 0x72b   :  { %4173 = vmatmul.bf16.vlgmr.msrb.gmra.mxu0 %v10209_v62  ;;  %4199 = vmatmul.bf16.vlgmr.msrb.gmra.mxu2 %v10209_v62 }
 0x72c   :  { %4221 = vmatpush.bf16.msra.mxu0 %v11255_v54  ;;  %4247 = vmatpush.bf16.msra.mxu2 %v11256_v23  ;;  %v11938_v54 = vld [vmem:[#allocation150_spill] sm:$0xff]  ;;  %v11939_v23 = vld [vmem:[#allocation143_spill] sm:$0xff] }
 0x72e   :  { %4233 = vmatpush.bf16.msra.mxu1 %v11257_v52  ;;  %4259 = vmatpush.bf16.msra.mxu3 %v11258_v2  ;;  %v11940_v52 = vld [vmem:[#allocation147_spill] sm:$0xff]  ;;  %v11941_v2 = vld [vmem:[#allocation153_spill] sm:$0xff] }
 0x730   :  { %4222 = vmatpush.bf16.msra.mxu0 %v11259_v60  ;;  %4248 = vmatpush.bf16.msra.mxu2 %v11260_v9  ;;  %v11942_v60 = vld [vmem:[#allocation156_spill] sm:$0xff]  ;;  %v11943_v9 = vld [vmem:[#allocation149_spill] sm:$0xff] }
 0x731   :  { %4186 = vmatmul.bf16.vlgmr.msrb.gmra.mxu1 %v10216_v13  ;;  %4212 = vmatmul.bf16.vlgmr.msrb.gmra.mxu3 %v10216_v13 }
 0x732   :  { %4234 = vmatpush.bf16.msra.mxu1 %v11358_v3  ;;  %4260 = vmatpush.bf16.msra.mxu3 %v11359_v59  ;;  %v11944_v3 = vld [vmem:[#allocation151_spill] sm:$0xff]  ;;  %v11945_v59 = vld [vmem:[#allocation160_spill] sm:$0xff] }
 0x734   :  { %4223 = vmatpush.bf16.msra.mxu0 %v11360_v22  ;;  %4249 = vmatpush.bf16.msra.mxu2 %v11361_v39  ;;  %v11946_v22 = vld [vmem:[#allocation162_spill] sm:$0xff] }
 0x735   :  { %v7510_v39 = vld [vmem:[#allocation9 + $0x154] sm:$0xf] }
 0x736   :  { %4235 = vmatpush.bf16.msra.mxu1 %v11362_v0  ;;  %4261 = vmatpush.bf16.msra.mxu3 %v11363_v11  ;;  %v11947_v0 = vld [vmem:[#allocation155_spill] sm:$0xff]  ;;  %v11948_v11 = vld [vmem:[#allocation158_spill] sm:$0xff] }
 0x738   :  { %4224 = vmatpush.bf16.msra.mxu0 %v11364_v17  ;;  %4250 = vmatpush.bf16.msra.mxu2 %v11365_v49  ;;  %v6926_v17 = vld [vmem:[#allocation9 + $0x168] sm:$0xf0]  ;;  %v6924_v49 = vld [vmem:[#allocation9 + $0x150] sm:$0xf] }
 0x73a   :  { %4236 = vmatpush.bf16.msra.mxu1 %v11368_v48  ;;  %4262 = vmatpush.bf16.msra.mxu3 %v11472_v15  ;;  %v11950_v48 = vld [vmem:[#allocation168_spill] sm:$0xff]  ;;  %v6929_v15 = vor.u32 %v7510_v39, %v6926_v17  ;;  %v7489_v39 = vld [vmem:[#allocation9 + $0xa4] sm:$0xf0] }
 0x73b   :  { %4225 = vmatmul.bf16.vlgmr.msra.gmra.mxu0 %v10209_v62  ;;  %4251 = vmatmul.bf16.vlgmr.msra.gmra.mxu2 %v10209_v62  ;;  %v7540_v17 = vld [vmem:[#allocation9 + $0x244] sm:$0xf] }
 0x73c   :  { %4269 = vmatpush.bf16.msrb.mxu0 %v11366_v42  ;;  %4295 = vmatpush.bf16.msrb.mxu2 %v11367_v50  ;;  %v7513_v42 = vld [vmem:[#allocation9 + $0x164] sm:$0xf0]  ;;  %v11949_v50 = vld [vmem:[#allocation164_spill] sm:$0xff] }
 0x73d   :  { %v6925_v30 = vor.u32 %v7513_v42, %v6924_v49  ;;  %v7046_v49 = vld [vmem:[#allocation9 + $0x258] sm:$0xf0] }
 0x73e   :  { %4237 = vmatpush.bf16.msra.mxu1 %v11929_v61  ;;  %4263 = vmatpush.bf16.msra.mxu3 %v11930_v47  ;;  %v6881_v61 = vor.u32 %v7498_v63, %v6878_v29  ;;  %v6877_v47 = vor.u32 %v7501_v19, %v6876_v36  ;;  %v7528_v63 = vld [vmem:[#allocation9 + $0x1e4] sm:$0xf]  ;;  %v6998_v29 = vld [vmem:[#allocation9 + $0x1f8] sm:$0xf0] }
 0x73f   :  { %v7468_v36 = vld [vmem:[#allocation9 + $0x4] sm:$0xf]  ;;  %v6758_v19 = vld [vmem:[#allocation9 + $0x18] sm:$0xf0] }
 0x740   :  { %4270 = vmatpush.bf16.msrb.mxu0 %v11818_v25  ;;  %4296 = vmatpush.bf16.msrb.mxu2 %v11928_v5  ;;  %v11952_v25 = vld [vmem:[#allocation163_spill] sm:$0xff] }
 0x741   :  { %4238 = vmatmul.bf16.vlgmr.msra.gmra.mxu1 %v10216_v13  ;;  %4264 = vmatmul.bf16.vlgmr.msra.gmra.mxu3 %v10216_v13  ;;  %v11958_v5 = vld [vmem:[#allocation175_spill] sm:$0xff] }
 0x742   :  { %4282 = vmatpush.bf16.msrb.mxu1 %v11931_v56  ;;  %4308 = vmatpush.bf16.msrb.mxu3 %v11932_v43  ;;  %v7492_v56 = vld [vmem:[#allocation9 + $0xc4] sm:$0xf]  ;;  %v6854_v43 = vld [vmem:[#allocation9 + $0xd8] sm:$0xf0] }
 0x744   :  { %4271 = vmatpush.bf16.msrb.mxu0 %v11933_v57  ;;  %4297 = vmatpush.bf16.msrb.mxu2 %v11934_v58  ;;  %v7097_v57 = vor.u32 %v7552_v18, %v7094_v37  ;;  %v6852_v58 = vld [vmem:[#allocation9 + $0xc0] sm:$0xf]  ;;  %v7001_v18 = vor.u32 %v7528_v63, %v6998_v29  ;;  %v6934_v37 = vld [vmem:[#allocation9 + $0x170] sm:$0xf0]  ;;  %v7493_v63 = vld [vmem:[#allocation9 + $0xcc] sm:$0xf] }
 0x745   :  { %v6862_v29 = vld [vmem:[#allocation9 + $0xe0] sm:$0xf0] }
 0x746   :  { %4283 = vmatpush.bf16.msrb.mxu1 %v11935_v28  ;;  %4309 = vmatpush.bf16.msrb.mxu3 %v11936_v38  ;;  %v7495_v28 = vld [vmem:[#allocation9 + $0xd4] sm:$0xf0]  ;;  %v7068_v38 = vld [vmem:[#allocation9 + $0x270] sm:$0xf] }
 0x748   :  { %4272 = vmatpush.bf16.msrb.mxu0 %v11937_v27  ;;  %4298 = vmatpush.bf16.msrb.mxu2 %v11938_v54  ;;  %v7549_v27 = vld [vmem:[#allocation9 + $0x284] sm:$0xf0]  ;;  %v7546_v54 = vld [vmem:[#allocation9 + $0x274] sm:$0xf] }
 0x74a   :  { %4284 = vmatpush.bf16.msrb.mxu1 %v11939_v23  ;;  %4310 = vmatpush.bf16.msrb.mxu3 %v11940_v52  ;;  %v7070_v23 = vld [vmem:[#allocation9 + $0x288] sm:$0xf0]  ;;  %v6857_v52 = vor.u32 %v7492_v56, %v6854_v43  ;;  %v7522_v56 = vld [vmem:[#allocation9 + $0x1b4] sm:$0xf] }
 0x74b   :  { %v6974_v43 = vld [vmem:[#allocation9 + $0x1c8] sm:$0xf0] }
 0x74c   :  { %4273 = vmatpush.bf16.msrb.mxu0 %v11941_v2  ;;  %4299 = vmatpush.bf16.msrb.mxu2 %v11942_v60  ;;  %v6853_v2 = vor.u32 %v7495_v28, %v6852_v58  ;;  %v7486_v60 = vld [vmem:[#allocation9 + $0x94] sm:$0xf]  ;;  %v6761_v58 = vor.u32 %v7468_v36, %v6758_v19  ;;  %v6860_v36 = vld [vmem:[#allocation9 + $0xc8] sm:$0xf]  ;;  %v7496_v19 = vld [vmem:[#allocation9 + $0xdc] sm:$0xf0] }
 0x74e   :  { %4285 = vmatpush.bf16.msrb.mxu1 %v11943_v9  ;;  %4311 = vmatpush.bf16.msrb.mxu3 %v11944_v3  ;;  %v6830_v9 = vld [vmem:[#allocation9 + $0xa8] sm:$0xf0]  ;;  %v7069_v3 = vor.u32 %v7549_v27, %v7068_v38  ;;  %v6748_v38 = vld [vmem:[%s10709_s6] sm:$0xf]  ;;  %v7467_v27 = vld [vmem:[%s10709_s6 + $0x4] sm:$0xf0] }
 0x74f   :  { %v6833_v42 = vor.u32 %v7486_v60, %v6830_v9  ;;  %v6948_v60 = vld [vmem:[#allocation9 + $0x180] sm:$0xf]  ;;  %v6977_v9 = vor.u32 %v7522_v56, %v6974_v43 }
 0x750   :  { %4274 = vmatpush.bf16.msrb.mxu0 %v11945_v59  ;;  %4300 = vmatpush.bf16.msrb.mxu2 %v11946_v22  ;;  %v7073_v59 = vor.u32 %v7546_v54, %v7070_v23  ;;  %v6828_v22 = vld [vmem:[#allocation9 + $0x90] sm:$0xf] }
 0x752   :  { %4286 = vmatpush.bf16.msrb.mxu1 %v11947_v0  ;;  %4312 = vmatpush.bf16.msrb.mxu3 %v11948_v11  ;;  %v7044_v0 = vld [vmem:[#allocation9 + $0x240] sm:$0xf]  ;;  %v7543_v11 = vld [vmem:[#allocation9 + $0x254] sm:$0xf0] }
 0x754   :  { %4275 = vmatpush.bf16.msrb.mxu0 %v11949_v50  ;;  %4301 = vmatpush.bf16.msrb.mxu2 %v11950_v48  ;;  %v7480_v50 = vld [vmem:[#allocation9 + $0x64] sm:$0xf]  ;;  %v6806_v48 = vld [vmem:[#allocation9 + $0x78] sm:$0xf0] }
 0x755   :  { %v6809_v46 = vor.u32 %v7480_v50, %v6806_v48  ;;  %v7126_v50 = vld [vmem:[#allocation9 + $0x2f0] sm:$0xf0] }
 0x756   :  { %4287 = vmatpush.bf16.msrb.mxu1 %v11951_v21  ;;  %4313 = vmatpush.bf16.msrb.mxu3 %v11952_v25  ;;  %v7483_v21 = vld [vmem:[#allocation9 + $0x74] sm:$0xf0]  ;;  %v7020_v25 = vld [vmem:[#allocation9 + $0x210] sm:$0xf] }
 0x757   :  { %v7021_v51 = vor.u32 %v7537_v41, %v7020_v25  ;;  %v6886_v25 = vld [vmem:[#allocation9 + $0x110] sm:$0xf0]  ;;  %v7466_v41 = vld [vmem:[%s10709_s6 + $0x4] sm:$0xf] }
 0x758   :  { %4276 = vmatpush.bf16.msrb.mxu0 %v11953_v4  ;;  %4302 = vmatpush.bf16.msrb.mxu2 %v11954_v26  ;;  %v6805_v4 = vor.u32 %v7483_v21, %v6804_v44  ;;  %v7474_v26 = vld [vmem:[#allocation9 + $0x34] sm:$0xf] }
 0x75a   :  { %4288 = vmatpush.bf16.msrb.mxu1 %v11955_v53  ;;  %4314 = vmatpush.bf16.msrb.mxu3 %v11956_v35  ;;  %v6996_v53 = vld [vmem:[#allocation9 + $0x1e0] sm:$0xf]  ;;  %v7531_v35 = vld [vmem:[#allocation9 + $0x1f4] sm:$0xf0] }
 0x75b   :  { %4277 = vmatmul.bf16.vlgmr.msrb.gmra.mxu0 %v10209_v62  ;;  %4303 = vmatmul.bf16.vlgmr.msrb.gmra.mxu2 %v10209_v62  ;;  %v7093_v62 = vor.u32 %v7555_v20, %v7092_v45  ;;  %v7511_v45 = vld [vmem:[#allocation9 + $0x15c] sm:$0xf]  ;;  %v6997_v20 = vor.u32 %v7531_v35, %v6996_v53  ;;  %v10327_v53 = vor.u32 %v7466_v41, %v6750_v14  ;;  %v7529_v41 = vld [vmem:[#allocation9 + $0x1ec] sm:$0xf]  ;;  %v7006_v14 = vld [vmem:[#allocation9 + $0x200] sm:$0xf0] }
 0x75c   :  { %5092 = vmatpush.bf16.msra.mxu2 %v6929_v15  ;;  %5064 = vmatpush.bf16.msra.mxu0 %v6925_v30  ;;  %v7045_v15 = vor.u32 %v7543_v11, %v7044_v0  ;;  %v7049_v30 = vor.u32 %v7540_v17, %v7046_v49  ;;  %v6937_v54 = vor.u32 %v7511_v45, %v6934_v37  ;;  %v6908_v0 = vld [vmem:[#allocation9 + $0x128] sm:$0xf]  ;;  %v7508_v11 = vld [vmem:[#allocation9 + $0x13c] sm:$0xf0]  ;;  %v7124_v17 = vld [vmem:[#allocation9 + $0x2d8] sm:$0xf] }
 0x75d   :  { %v10317_v49 = vor.u32 %v7467_v27, %v6748_v38  ;;  %v6909_v21 = vor.u32 %v7508_v11, %v6908_v0  ;;  %v7076_v45 = vld [vmem:[#allocation9 + $0x278] sm:$0xf]  ;;  %v7078_v37 = vld [vmem:[#allocation9 + $0x290] sm:$0xf0]  ;;  %v7541_v38 = vld [vmem:[#allocation9 + $0x24c] sm:$0xf] }
 0x75e   :  { %4289 = vmatpush.bf16.msrb.mxu1 %v11957_v31  ;;  %4315 = vmatpush.bf16.msrb.mxu3 %v11958_v5  ;;  %v6756_v31 = vld [vmem:[#allocation9] sm:$0xf]  ;;  %v7471_v5 = vld [vmem:[#allocation9 + $0x14] sm:$0xf0]  ;;  %v7054_v27 = vld [vmem:[#allocation9 + $0x260] sm:$0xf0] }
 0x75f   :  { %v6757_v28 = vor.u32 %v7471_v5, %v6756_v31  ;;  %v6865_v31 = vor.u32 %v7493_v63, %v6862_v29  ;;  %v6861_v5 = vor.u32 %v7496_v19, %v6860_v36  ;;  %v7535_v0 = vld [vmem:[#allocation9 + $0x21c] sm:$0xf]  ;;  %v7030_v11 = vld [vmem:[#allocation9 + $0x230] sm:$0xf0] }
 0x760   :  { %5093 = vmatpush.bf16.msra.mxu2 %v6905_v6  ;;  %5065 = vmatpush.bf16.msra.mxu0 %v6901_v40  ;;  %v6780_v6 = vld [vmem:[#allocation9 + $0x30] sm:$0xf]  ;;  %v7477_v40 = vld [vmem:[#allocation9 + $0x44] sm:$0xf0]  ;;  %v7523_v63 = vld [vmem:[#allocation9 + $0x1bc] sm:$0xf] }
 0x761   :  { %4290 = vmatmul.bf16.vlgmr.msrb.gmra.mxu1 %v10216_v13  ;;  %4316 = vmatmul.bf16.vlgmr.msrb.gmra.mxu3 %v10216_v13  ;;  %v6829_v13 = vor.u32 %v7489_v39, %v6828_v22  ;;  %v7516_v22 = vld [vmem:[#allocation9 + $0x184] sm:$0xf]  ;;  %v6950_v39 = vld [vmem:[#allocation9 + $0x198] sm:$0xf0]  ;;  %v6982_v29 = vld [vmem:[#allocation9 + $0x1d0] sm:$0xf0] }
 0x762   :  { %5078 = vmatpush.bf16.msra.mxu1 %v7117_v16  ;;  %5106 = vmatpush.bf16.msra.mxu3 %v7121_v33  ;;  %v6785_v16 = vor.u32 %v7474_v26, %v6782_v10  ;;  %v6781_v33 = vor.u32 %v7477_v40, %v6780_v6  ;;  %v6953_v44 = vor.u32 %v7516_v22, %v6950_v39  ;;  %v7502_v26 = vld [vmem:[#allocation9 + $0x10c] sm:$0xf0]  ;;  %v7100_v10 = vld [vmem:[#allocation9 + $0x2a8] sm:$0xf]  ;;  %v7102_v6 = vld [vmem:[#allocation9 + $0x2c0] sm:$0xf0] }
 0x763   :  { %v7028_v22 = vld [vmem:[#allocation9 + $0x218] sm:$0xf]  ;;  %v7538_v39 = vld [vmem:[#allocation9 + $0x22c] sm:$0xf0]  ;;  %v6985_v19 = vor.u32 %v7523_v63, %v6982_v29 }
 0x764   :  { %5094 = vmatpush.bf16.msra.mxu2 %v6881_v61  ;;  %5066 = vmatpush.bf16.msra.mxu0 %v6877_v47  ;;  %v6972_v61 = vld [vmem:[#allocation9 + $0x1b0] sm:$0xf]  ;;  %v7525_v47 = vld [vmem:[#allocation9 + $0x1c4] sm:$0xf0] }
 0x765   :  { %v6973_v23 = vor.u32 %v7525_v47, %v6972_v61  ;;  %v7487_v61 = vld [vmem:[#allocation9 + $0x9c] sm:$0xf]  ;;  %v6838_v47 = vld [vmem:[#allocation9 + $0xb0] sm:$0xf0] }
 0x766   :  { %5079 = vmatpush.bf16.msra.mxu1 %v7093_v62  ;;  %5107 = vmatpush.bf16.msra.mxu3 %v7097_v57  ;;  %v6932_v62 = vld [vmem:[#allocation9 + $0x158] sm:$0xf]  ;;  %v7514_v57 = vld [vmem:[#allocation9 + $0x16c] sm:$0xf0] }
 0x768   :  { %5095 = vmatpush.bf16.msra.mxu2 %v6857_v52  ;;  %5067 = vmatpush.bf16.msra.mxu0 %v6853_v2  ;;  %v7505_v52 = vld [vmem:[#allocation9 + $0x12c] sm:$0xf]  ;;  %v6910_v2 = vld [vmem:[#allocation9 + $0x140] sm:$0xf0] }
 0x769   :  { %v6913_v48 = vor.u32 %v7505_v52, %v6910_v2  ;;  %v7481_v52 = vld [vmem:[#allocation9 + $0x6c] sm:$0xf]  ;;  %v6814_v2 = vld [vmem:[#allocation9 + $0x80] sm:$0xf0] }
 0x76a   :  { %5080 = vmatpush.bf16.msra.mxu1 %v7069_v3  ;;  %5108 = vmatpush.bf16.msra.mxu3 %v7073_v59  ;;  %v6933_v3 = vor.u32 %v7514_v57, %v6932_v62  ;;  %v7519_v59 = vld [vmem:[#allocation9 + $0x194] sm:$0xf0]  ;;  %v7490_v57 = vld [vmem:[#allocation9 + $0xac] sm:$0xf0] }
 0x76b   :  { %v6836_v62 = vld [vmem:[#allocation9 + $0x98] sm:$0xf] }
 0x76c   :  { %5096 = vmatpush.bf16.msra.mxu2 %v6833_v42  ;;  %5068 = vmatpush.bf16.msra.mxu0 %v6829_v13  ;;  %v7562_v42 = vld [vmem:[#allocation9 + $0x2ec] sm:$0xf0]  ;;  %v7559_v13 = vld [vmem:[#allocation9 + $0x2dc] sm:$0xf] }
 0x76d   :  { %v7125_v7 = vor.u32 %v7562_v42, %v7124_v17  ;;  %v6817_v17 = vor.u32 %v7481_v52, %v6814_v2  ;;  %v11962_v52 = vld [vmem:[#allocation170_spill] sm:$0xff] }
 0x76e   :  { %5081 = vmatpush.bf16.msra.mxu1 %v7045_v15  ;;  %5109 = vmatpush.bf16.msra.mxu3 %v7049_v30  ;;  %v6949_v15 = vor.u32 %v7519_v59, %v6948_v60  ;;  %v7499_v30 = vld [vmem:[#allocation9 + $0xfc] sm:$0xf]  ;;  %v7484_v59 = vld [vmem:[#allocation9 + $0x7c] sm:$0xf0] }
 0x76f   :  { %v6889_v40 = vor.u32 %v7499_v30, %v6886_v25  ;;  %v6788_v30 = vld [vmem:[#allocation9 + $0x38] sm:$0xf]  ;;  %v7532_v25 = vld [vmem:[#allocation9 + $0x1fc] sm:$0xf0] }
 0x770   :  { %5097 = vmatpush.bf16.msra.mxu2 %v6809_v46  ;;  %5069 = vmatpush.bf16.msra.mxu0 %v6805_v4  ;;  %v7129_v46 = vor.u32 %v7559_v13, %v7126_v50  ;;  %v6884_v4 = vld [vmem:[#allocation9 + $0xf8] sm:$0xf]  ;;  %v7475_v13 = vld [vmem:[#allocation9 + $0x3c] sm:$0xf]  ;;  %v6790_v50 = vld [vmem:[#allocation9 + $0x50] sm:$0xf0] }
 0x771   :  { %v6885_v35 = vor.u32 %v7502_v26, %v6884_v4  ;;  %v7469_v4 = vld [vmem:[#allocation9 + $0xc] sm:$0xf]  ;;  %v6766_v26 = vld [vmem:[#allocation9 + $0x20] sm:$0xf0] }
 0x772   :  { %5082 = vmatpush.bf16.msra.mxu1 %v7021_v51  ;;  %5110 = vmatpush.bf16.msra.mxu3 %v7025_v24  ;;  %v7556_v51 = vld [vmem:[#allocation9 + $0x2bc] sm:$0xf0]  ;;  %v7553_v24 = vld [vmem:[#allocation9 + $0x2ac] sm:$0xf] }
 0x774   :  { %5098 = vmatpush.bf16.msra.mxu2 %v6785_v16  ;;  %5070 = vmatpush.bf16.msra.mxu0 %v6781_v33  ;;  %v7101_v16 = vor.u32 %v7556_v51, %v7100_v10  ;;  %v7105_v33 = vor.u32 %v7553_v24, %v7102_v6  ;;  %v7009_v51 = vor.u32 %v7529_v41, %v7006_v14  ;;  %v6764_v24 = vld [vmem:[#allocation9 + $0x8] sm:$0xf]  ;;  %v7472_v6 = vld [vmem:[#allocation9 + $0x1c] sm:$0xf0] }
 0x776   :  { %5083 = vmatpush.bf16.msra.mxu1 %v6997_v20  ;;  %5111 = vmatpush.bf16.msra.mxu3 %v7001_v18  ;;  %v7550_v20 = vld [vmem:[#allocation9 + $0x28c] sm:$0xf0]  ;;  %v7547_v18 = vld [vmem:[#allocation9 + $0x27c] sm:$0xf] }
 0x777   :  { %v7077_v56 = vor.u32 %v7550_v20, %v7076_v45  ;;  %v7081_v43 = vor.u32 %v7547_v18, %v7078_v37  ;;  %v6956_v45 = vld [vmem:[#allocation9 + $0x188] sm:$0xf]  ;;  %v7520_v20 = vld [vmem:[#allocation9 + $0x19c] sm:$0xf0]  ;;  %v7517_v18 = vld [vmem:[#allocation9 + $0x18c] sm:$0xf] }
 0x778   :  { %5099 = vmatpush.bf16.msra.mxu2 %v6761_v58  ;;  %5071 = vmatpush.bf16.msra.mxu0 %v6757_v28  ;;  %v7052_v58 = vld [vmem:[#allocation9 + $0x248] sm:$0xf]  ;;  %v7544_v28 = vld [vmem:[#allocation9 + $0x25c] sm:$0xf0]  ;;  %v6958_v37 = vld [vmem:[#allocation9 + $0x1a0] sm:$0xf0] }
 0x779   :  { %v7053_v60 = vor.u32 %v7544_v28, %v7052_v58 }
 0x77a   :  { %5084 = vmatpush.bf16.msra.mxu1 %v6973_v23  ;;  %5112 = vmatpush.bf16.msra.mxu3 %v6977_v9  ;;  %v6837_v23 = vor.u32 %v7490_v57, %v6836_v62  ;;  %v7057_v9 = vor.u32 %v7541_v38, %v7054_v27  ;;  %v11960_v62 = vld [vmem:[#allocation166_spill] sm:$0xff] }
 0x77b   :  { %5100 = vmatmul.bf16.vlgmr.msra.gmra.mxu2 %v10317_v49  ;;  %5072 = vmatmul.bf16.vlgmr.msra.gmra.mxu0 %v10317_v49 }
 0x77c   :  { %5148 = vmatpush.bf16.msrb.mxu2 %v6937_v54  ;;  %5120 = vmatpush.bf16.msrb.mxu0 %v6933_v3  ;;  %v6841_v54 = vor.u32 %v7487_v61, %v6838_v47  ;;  %v6812_v3 = vld [vmem:[#allocation9 + $0x68] sm:$0xf] }
 0x77d   :  { %v6813_v42 = vor.u32 %v7484_v59, %v6812_v3 }
 0x77e   :  { %5085 = vmatpush.bf16.msra.mxu1 %v6949_v15  ;;  %5113 = vmatpush.bf16.msra.mxu3 %v6953_v44  ;;  %v7033_v15 = vor.u32 %v7535_v0, %v7030_v11  ;;  %v7478_v44 = vld [vmem:[#allocation9 + $0x4c] sm:$0xf0] }
 0x780   :  { %5149 = vmatpush.bf16.msrb.mxu2 %v6913_v48  ;;  %5121 = vmatpush.bf16.msrb.mxu0 %v6909_v21  ;;  %v7029_v48 = vor.u32 %v7538_v39, %v7028_v22  ;;  %v7004_v21 = vld [vmem:[#allocation9 + $0x1e8] sm:$0xf] }
 0x781   :  { %5086 = vmatmul.bf16.vlgmr.msra.gmra.mxu1 %v10327_v53  ;;  %5114 = vmatmul.bf16.vlgmr.msra.gmra.mxu3 %v10327_v53  ;;  %v7005_v10 = vor.u32 %v7532_v25, %v7004_v21 }
 0x782   :  { %5134 = vmatpush.bf16.msrb.mxu1 %v7125_v7  ;;  %5162 = vmatpush.bf16.msrb.mxu3 %v7129_v46  ;;  %v6793_v7 = vor.u32 %v7475_v13, %v6790_v50  ;;  %v6789_v46 = vor.u32 %v7478_v44, %v6788_v30  ;;  %v11963_v50 = vld [vmem:[#allocation110_spill] sm:$0xff] }
 0x784   :  { %5150 = vmatpush.bf16.msrb.mxu2 %v6889_v40  ;;  %5122 = vmatpush.bf16.msrb.mxu0 %v6885_v35  ;;  %v6980_v40 = vld [vmem:[#allocation9 + $0x1b8] sm:$0xf]  ;;  %v7526_v35 = vld [vmem:[#allocation9 + $0x1cc] sm:$0xf0] }
 0x785   :  { %v6981_v36 = vor.u32 %v7526_v35, %v6980_v40 }
 0x786   :  { %5135 = vmatpush.bf16.msrb.mxu1 %v7101_v16  ;;  %5163 = vmatpush.bf16.msrb.mxu3 %v7105_v33  ;;  %v6769_v16 = vor.u32 %v7469_v4, %v6766_v26  ;;  %v6765_v33 = vor.u32 %v7472_v6, %v6764_v24  ;;  %v11965_v4 = vld [vmem:[#allocation111_spill] sm:$0xff]  ;;  %v11966_v26 = vld [vmem:[#allocation177_spill] sm:$0xff] }
 0x788   :  { %5151 = vmatpush.bf16.msrb.mxu2 %v6865_v31  ;;  %5123 = vmatpush.bf16.msrb.mxu0 %v6861_v5  ;;  %v6957_v31 = vor.u32 %v7520_v20, %v6956_v45  ;;  %v6961_v5 = vor.u32 %v7517_v18, %v6958_v37 }
 0x78a   :  { %5136 = vmatpush.bf16.msrb.mxu1 %v7077_v56  ;;  %5164 = vmatpush.bf16.msrb.mxu3 %v7081_v43  ;;  %v11959_v43 = vld [vmem:[#allocation96_spill] sm:$0xff] }
 0x78b   :  { %v554_v57 = vadd.f32 %v11960_v62, %v11959_v43 }
 0x78c   :  { %5152 = vmatpush.bf16.msrb.mxu2 %v6841_v54  ;;  %5124 = vmatpush.bf16.msrb.mxu0 %v6837_v23  ;;  %v11961_v23 = vld [vmem:[#allocation102_spill] sm:$0xff] }
 0x78d   :  { %v583_v2 = vadd.f32 %v11962_v52, %v11961_v23 }
 0x78e   :  { %5137 = vmatpush.bf16.msrb.mxu1 %v7053_v60  ;;  %5165 = vmatpush.bf16.msrb.mxu3 %v7057_v9 }
 0x790   :  { %5153 = vmatpush.bf16.msrb.mxu2 %v6817_v17  ;;  %5125 = vmatpush.bf16.msrb.mxu0 %v6813_v42 }
 0x792   :  { %5138 = vmatpush.bf16.msrb.mxu1 %v7029_v48  ;;  %5166 = vmatpush.bf16.msrb.mxu3 %v7033_v15  ;;  %v11964_v48 = vld [vmem:[#allocation176_spill] sm:$0xff] }
 0x793   :  { %v612_v15 = vadd.f32 %v11964_v48, %v11963_v50  ;;  %v7557_v50 = vld [vmem:[#allocation9 + $0x2c4] sm:$0xf0] }
 0x794   :  { %5154 = vmatpush.bf16.msrb.mxu2 %v6793_v7  ;;  %5126 = vmatpush.bf16.msrb.mxu0 %v6789_v46 }
 0x796   :  { %5139 = vmatpush.bf16.msrb.mxu1 %v7005_v10  ;;  %5167 = vmatpush.bf16.msrb.mxu3 %v7009_v51  ;;  %v641_v10 = vadd.f32 %v11966_v26, %v11965_v4 }
 0x798   :  { %5155 = vmatpush.bf16.msrb.mxu2 %v6769_v16  ;;  %5127 = vmatpush.bf16.msrb.mxu0 %v6765_v33  ;;  %v4122_v61 = vpop.f32.mrf.mxu0 }
 0x79a   :  { %5140 = vmatpush.bf16.msrb.mxu1 %v6981_v36  ;;  %5168 = vmatpush.bf16.msrb.mxu3 %v6985_v19 }
 0x79b   :  { %5156 = vmatmul.bf16.vlgmr.msrb.gmra.mxu2 %v10317_v49  ;;  %5128 = vmatmul.bf16.vlgmr.msrb.gmra.mxu0 %v10317_v49 }
 0x79e   :  { %5141 = vmatpush.bf16.msrb.mxu1 %v6957_v31  ;;  %5169 = vmatpush.bf16.msrb.mxu3 %v6961_v5  ;;  %v4135_v47 = vpop.f32.mrf.mxu1  ;;  %v4148_v56 = vpop.f32.mrf.mxu2  ;;  %v11967_v5 = vld [vmem:[#allocation180_spill] sm:$0xff] }
 0x79f   :  { %v4136_v58 = vadd.f32 %v4135_v47, %v4122_v61  ;;  %v11968_v61 = vld [vmem:[#allocation205_spill] sm:$0xff] }
 0x7a0   :  { %v4124_v28 = vpop.f32.mrf.mxu0  ;;  %v670_v47 = vadd.f32 %v11968_v61, %v11967_v5  ;;  %v7500_v5 = vld [vmem:[#allocation9 + $0x104] sm:$0xf] }
 0x7a1   :  { %5142 = vmatmul.bf16.vlgmr.msrb.gmra.mxu1 %v10327_v53  ;;  %5170 = vmatmul.bf16.vlgmr.msrb.gmra.mxu3 %v10327_v53  ;;  %v4321_v38 = vadd.f32 %v4136_v58, %v554_v57 }
 0x7a3   :  { %v6740_v27 = vmul.f32 -1.442695, %v4321_v38  ;;  %v7512_v38 = vld [vmem:[#allocation9 + $0x164] sm:$0xf] }
 0x7a4   :  { %v4161_v54 = vpop.f32.mrf.mxu3 }
 0x7a5   :  { %7831 = vpow2.f32 %v6740_v27  ;;  %v4162_v60 = vadd.f32 %v4161_v54, %v4148_v56  ;;  %v6942_v27 = vld [vmem:[#allocation9 + $0x178] sm:$0xf0] }
 0x7a6   :  { %v4137_v9 = vpop.f32.mrf.mxu1  ;;  %v4150_v3 = vpop.f32.mrf.mxu2 }
 0x7a7   :  { %v4322_v59 = vadd.f32 %v4162_v60, %v583_v2  ;;  %v6945_v2 = vor.u32 %v7512_v38, %v6942_v27  ;;  %v7560_v3 = vld [vmem:[#allocation9 + $0x2e4] sm:$0xf]  ;;  %v6916_v27 = vld [vmem:[#allocation9 + $0x130] sm:$0xf] }
 0x7a8   :  { %v4174_v22 = vpop.f32.mrf.mxu0 }
 0x7a9   :  { %v6741_v39 = vmul.f32 -1.442695, %v4322_v59  ;;  %v7134_v59 = vld [vmem:[#allocation9 + $0x2f8] sm:$0xf0]  ;;  %5204 = vmatpush.bf16.msra.mxu2 %v6945_v2  ;;  %v7530_v2 = vld [vmem:[#allocation9 + $0x1f4] sm:$0xf] }
 0x7ab   :  { %v7832_v0 = vpop.eup %7831  ;;  %7833 = vpow2.f32 %v6741_v39  ;;  %v11969_v39 = vld [vmem:[#allocation182_spill] sm:$0xff] }
 0x7ac   :  { %v10339_v11 = vadd.f32 1.0, %v7832_v0  ;;  %v4163_v17 = vpop.f32.mrf.mxu3  ;;  %v11970_v0 = vld [vmem:[#allocation207_spill] sm:$0xff] }
 0x7ad   :  { %v699_v17 = vadd.f32 %v11970_v0, %v11969_v39 }
 0x7ae   :  { %7835 = vrcp.f32 %v10339_v11  ;;  %v4187_v42 = vpop.f32.mrf.mxu1  ;;  %v4200_v13 = vpop.f32.mrf.mxu2  ;;  %v4346_v62 = vand.u32 2147483647, %v10339_v11  ;;  %v4348_v28 = vand.u32 2147483648, %v10339_v11  ;;  %vm4342_vm0 = vweird.f32 %v10339_v11 }
 0x7af   :  { %v4188_v30 = vadd.f32 %v4187_v42, %v4174_v22 }
 0x7b0   :  { %v4176_v44 = vpop.f32.mrf.mxu0  ;;  %vm10380_vm1 = vcmp.eq.f32.partialorder %v4346_v62, 8.507059e+37  ;;  %v4349_v48 = vor.u32 1.1754944e-38, %v4348_v28  ;;  %v6894_v62 = vld [vmem:[#allocation9 + $0x118] sm:$0xf0] }
 0x7b1   :  { %v7834_v21 = vpop.eup %7833  ;;  %v4323_v25 = vadd.f32 %v4188_v30, %v612_v15  ;;  %v7506_v30 = vld [vmem:[#allocation9 + $0x134] sm:$0xf]  ;;  %v6918_v44 = vld [vmem:[#allocation9 + $0x148] sm:$0xf0]  ;;  %v6897_v38 = vor.u32 %v7500_v5, %v6894_v62 }
 0x7b2   :  { %v10344_v41 = vadd.f32 1.0, %v7834_v21  ;;  %v6921_v4 = vor.u32 %v7506_v30, %v6918_v44  ;;  %v7494_v30 = vld [vmem:[#allocation9 + $0xd4] sm:$0xf]  ;;  %v6870_v44 = vld [vmem:[#allocation9 + $0xe8] sm:$0xf0] }
 0x7b3   :  { %v6742_v14 = vmul.f32 -1.442695, %v4323_v25 }
 0x7b4   :  { %v10346_v7 = vpop.eup %7835  ;;  %7837 = vrcp.f32 %v10344_v41  ;;  %v4213_v46 = vpop.f32.mrf.mxu3  ;;  %v4361_v52 = vand.u32 2147483647, %v10344_v41  ;;  %v4363_v9 = vand.u32 2147483648, %v10344_v41  ;;  %5205 = vmatpush.bf16.msra.mxu2 %v6921_v4  ;;  %vm4357_vm6 = vweird.f32 %v10344_v41 }
 0x7b5   :  { %7839 = vpow2.f32 %v6742_v14  ;;  %v4214_v51 = vadd.f32 %v4213_v46, %v4200_v13  ;;  %v4338_v40 = vmul.f32 %v10346_v7, %v10339_v11  ;;  %vm4343_vm14 = vweird.f32 %v10346_v7 }
 0x7b6   :  { %v4189_v24 = vpop.f32.mrf.mxu1  ;;  %v4202_v6 = vpop.f32.mrf.mxu2  ;;  %vm10387_vm2 = vmor %vm4342_vm0, %vm4343_vm14  ;;  %v7137_v46 = vor.u32 %v7560_v3, %v7134_v59  ;;  %vm10395_vm4 = vcmp.eq.f32.partialorder %v4361_v52, 8.507059e+37  ;;  %v7548_v52 = vld [vmem:[#allocation9 + $0x284] sm:$0xf]  ;;  %v7086_v59 = vld [vmem:[#allocation9 + $0x298] sm:$0xf0] }
 0x7b7   :  { %v4324_v35 = vadd.f32 %v4214_v51, %v641_v10  ;;  %v4339_v36 = vsub.f32 1.0, %v4338_v40  ;;  %v10399_v24 = vor.u32 1.1754944e-38, %v4363_v9  ;;  %v6940_v40 = vld [vmem:[#allocation9 + $0x160] sm:$0xf] }
 0x7b8   :  { %v4226_v63 = vpop.f32.mrf.mxu0  ;;  %5218 = vmatpush.bf16.msra.mxu3 %v7137_v46  ;;  %5206 = vmatpush.bf16.msra.mxu2 %v6897_v38  ;;  %v7542_v46 = vld [vmem:[#allocation9 + $0x254] sm:$0xf] }
 0x7b9   :  { %v6743_v29 = vmul.f32 -1.442695, %v4324_v35  ;;  %v4340_v31 = vmul.f32 %v10346_v7, %v4339_v36  ;;  %v7515_v35 = vld [vmem:[#allocation9 + $0x174] sm:$0xf0] }
 0x7ba   :  { %v10353_v16 = vpop.eup %7837  ;;  %v6941_v36 = vor.u32 %v7515_v35, %v6940_v40 }
 0x7bb   :  { %v7840_v33 = vpop.eup %7839  ;;  %7841 = vpow2.f32 %v6743_v29  ;;  %v4353_v19 = vmul.f32 %v10353_v16, %v10344_v41  ;;  %v4341_v60 = vadd.f32 %v10346_v7, %v4340_v31  ;;  %vm4358_vm3 = vweird.f32 %v10353_v16  ;;  %v7563_v31 = vld [vmem:[#allocation9 + $0x2f4] sm:$0xf0] }
 0x7bc   :  { %v10357_v45 = vadd.f32 1.0, %v7840_v33  ;;  %v4215_v20 = vpop.f32.mrf.mxu3  ;;  %vm10411_vm8 = vmor %vm4357_vm6, %vm4358_vm3  ;;  %5176 = vmatpush.bf16.msra.mxu0 %v6941_v36  ;;  %v7488_v36 = vld [vmem:[#allocation9 + $0xa4] sm:$0xf] }
 0x7bd   :  { %v4354_v56 = vsub.f32 1.0, %v4353_v19  ;;  %v4345_v10 = vsel %vm10387_vm2, %v10346_v7, %v4341_v60  ;;  %v7554_v7 = vld [vmem:[#allocation9 + $0x2b4] sm:$0xf]  ;;  %v7110_v19 = vld [vmem:[#allocation9 + $0x2c8] sm:$0xf0] }
 0x7be   :  { %7843 = vrcp.f32 %v10357_v45  ;;  %v4252_v18 = vpop.f32.mrf.mxu2  ;;  %v4239_v37 = vpop.f32.mrf.mxu1  ;;  %v4386_v21 = vand.u32 2147483648, %v10357_v45  ;;  %vm4380_vm7 = vweird.f32 %v10357_v45 }
 0x7bf   :  { %v4240_v43 = vadd.f32 %v4239_v37, %v4226_v63  ;;  %v4355_v42 = vmul.f32 %v10353_v16, %v4354_v56  ;;  %v4384_v63 = vand.u32 2147483647, %v10357_v45  ;;  %v7132_v37 = vld [vmem:[#allocation9 + $0x2e0] sm:$0xf] }
 0x7c0   :  { %v4228_v57 = vpop.f32.mrf.mxu0 }
 0x7c1   :  { %v7842_v58 = vpop.eup %7841  ;;  %v4325_v23 = vadd.f32 %v4240_v43, %v670_v47  ;;  %v4356_v33 = vadd.f32 %v10353_v16, %v4355_v42  ;;  %v4387_v47 = vor.u32 1.1754944e-38, %v4386_v21  ;;  %v7133_v43 = vor.u32 %v7563_v31, %v7132_v37  ;;  %v7536_v37 = vld [vmem:[#allocation9 + $0x224] sm:$0xf] }
 0x7c2   :  { %v10365_v54 = vadd.f32 1.0, %v7842_v58  ;;  %v4350_v58 = vsel %vm10380_vm1, %v4349_v48, %v4345_v10  ;;  %vm4385_vm10 = vcmp.eq.f32.partialorder %v4384_v63, 8.507059e+37  ;;  %v7089_v42 = vor.u32 %v7548_v52, %v7086_v59  ;;  %v7491_v52 = vld [vmem:[#allocation9 + $0xb4] sm:$0xf0] }
 0x7c3   :  { %v4360_v9 = vsel %vm10411_vm8, %v10353_v16, %v4356_v33  ;;  %5190 = vmatpush.bf16.msra.mxu1 %v7133_v43  ;;  %v7551_v33 = vld [vmem:[#allocation9 + $0x294] sm:$0xf0]  ;;  %vm5351_vm8 = vcmask 1043456  }
 0x7c4   :  { %v10371_v22 = vpop.eup %7843  ;;  %7845 = vrcp.f32 %v10365_v54  ;;  %v4265_v15 = vpop.f32.mrf.mxu3  ;;  %v4401_v0 = vand.u32 2147483648, %v10365_v54  ;;  %vm4395_vm11 = vweird.f32 %v10365_v54  ;;  %v7539_v59 = vld [vmem:[#allocation9 + $0x234] sm:$0xf0] }
 0x7c5   :  { %v4376_v13 = vmul.f32 %v10371_v22, %v10357_v45  ;;  %7847 = vtanh.f32 %v4325_v23  ;;  %v4266_v25 = vadd.f32 %v4265_v15, %v4252_v18  ;;  %vm4381_vm5 = vweird.f32 %v10371_v22  ;;  %v7509_v23 = vld [vmem:[#allocation9 + $0x144] sm:$0xf0] }
 0x7c6   :  { %v4254_v14 = vpop.f32.mrf.mxu2  ;;  %v4241_v6 = vpop.f32.mrf.mxu1  ;;  %v7113_v18 = vor.u32 %v7554_v7, %v7110_v19  ;;  %vm10424_vm9 = vmor %vm4380_vm7, %vm4381_vm5  ;;  %v6917_v3 = vor.u32 %v7509_v23, %v6916_v27  ;;  %v4399_v15 = vand.u32 2147483647, %v10365_v54  ;;  %v6844_v23 = vld [vmem:[#allocation9 + $0xa0] sm:$0xf]  ;;  %vm5575_vm7 = vcmask 1047559  }
 0x7c7   :  { %v4377_v26 = vsub.f32 1.0, %v4376_v13  ;;  %v4326_v29 = vadd.f32 %v4266_v25, %v699_v17  ;;  %v7108_v13 = vld [vmem:[#allocation9 + $0x2b0] sm:$0xf]  ;;  %v6873_v25 = vor.u32 %v7494_v30, %v6870_v44  ;;  %v7503_v14 = vld [vmem:[#allocation9 + $0x114] sm:$0xf0]  ;;  %v11982_v30 = vld [vmem:[#allocation208_spill] sm:$0xff] }
 0x7c8   :  { %5219 = vmatpush.bf16.msra.mxu3 %v7113_v18  ;;  %5177 = vmatpush.bf16.msra.mxu0 %v6917_v3  ;;  %v7109_v16 = vor.u32 %v7557_v50, %v7108_v13  ;;  %v7062_v6 = vld [vmem:[#allocation9 + $0x268] sm:$0xf0]  ;;  %vm4400_vm13 = vcmp.eq.f32.partialorder %v4399_v15, 8.507059e+37  ;;  %v7497_v18 = vld [vmem:[#allocation9 + $0xe4] sm:$0xf0] }
 0x7c9   :  { %v4378_v20 = vmul.f32 %v10371_v22, %v4377_v26  ;;  %7849 = vtanh.f32 %v4326_v29  ;;  %v4365_v26 = vsel %vm10395_vm4, %v10399_v24, %v4360_v9  ;;  %5207 = vmatpush.bf16.msra.mxu2 %v6873_v25  ;;  %v7065_v63 = vor.u32 %v7542_v46, %v7062_v6  ;;  %v7084_v29 = vld [vmem:[#allocation9 + $0x280] sm:$0xf]  ;;  %v6846_v24 = vld [vmem:[#allocation9 + $0xb8] sm:$0xf0]  ;;  %v7014_v9 = vld [vmem:[#allocation9 + $0x208] sm:$0xf0] }
 0x7ca   :  { %v10406_v61 = vpop.eup %7845  ;;  %5191 = vmatpush.bf16.msra.mxu1 %v7109_v16  ;;  %v7085_v51 = vor.u32 %v7551_v33, %v7084_v29  ;;  %v6849_v19 = vor.u32 %v7488_v36, %v6846_v24  ;;  %v7036_v3 = vld [vmem:[#allocation9 + $0x220] sm:$0xf]  ;;  %v6820_v50 = vld [vmem:[#allocation9 + $0x70] sm:$0xf]  ;;  %v7524_v15 = vld [vmem:[#allocation9 + $0x1c4] sm:$0xf] }
 0x7cb   :  { %v7848_v41 = vpop.eup %7847  ;;  %v4391_v57 = vmul.f32 %v10406_v61, %v10365_v54  ;;  %v4379_v28 = vadd.f32 %v10371_v22, %v4378_v20  ;;  %vm4396_vm15 = vweird.f32 %v10406_v61  ;;  %v4402_v54 = vor.u32 1.1754944e-38, %v4401_v0  ;;  %v6868_v20 = vld [vmem:[#allocation9 + $0xd0] sm:$0xf]  ;;  %v7476_v0 = vld [vmem:[#allocation9 + $0x44] sm:$0xf] }
 0x7cc   :  { %v4447_v60 = vmul.f32 %v7848_v41, %v4350_v58  ;;  %v4267_v17 = vpop.f32.mrf.mxu3  ;;  %5220 = vmatpush.bf16.msra.mxu3 %v7089_v42  ;;  %vm4397_vm12 = vmor %vm4395_vm11, %vm4396_vm15  ;;  %v6869_v5 = vor.u32 %v7497_v18, %v6868_v20  ;;  %v7060_v41 = vld [vmem:[#allocation9 + $0x250] sm:$0xf]  ;;  %v7482_v58 = vld [vmem:[#allocation9 + $0x74] sm:$0xf] }
 0x7cd   :  { %v4392_v39 = vsub.f32 1.0, %v4391_v57  ;;  %v4383_v45 = vsel %vm10424_vm9, %v10371_v22, %v4379_v28  ;;  %v6892_v22 = vld [vmem:[#allocation9 + $0x100] sm:$0xf]  ;;  %5208 = vmatpush.bf16.msra.mxu2 %v6849_v19  ;;  %v7545_v57 = vld [vmem:[#allocation9 + $0x264] sm:$0xf0]  ;;  %v11981_v16 = vld [vmem:[#allocation186_spill] sm:$0xff] }
 0x7ce   :  { %v4388_v48 = vsel %vm4385_vm10, %v4387_v47, %v4383_v45  ;;  %v6893_v10 = vor.u32 %v7503_v14, %v6892_v22  ;;  %5192 = vmatpush.bf16.msra.mxu1 %v7085_v51  ;;  %v7038_v47 = vld [vmem:[#allocation9 + $0x238] sm:$0xf0]  ;;  %v7061_v28 = vor.u32 %v7545_v57, %v7060_v41  ;;  %v728_v44 = vadd.f32 %v11982_v30, %v11981_v16  ;;  %v7012_v46 = vld [vmem:[#allocation9 + $0x1f0] sm:$0xf]  ;;  %v7479_v29 = vld [vmem:[#allocation9 + $0x54] sm:$0xf0] }
 0x7cf   :  { %v4393_v21 = vmul.f32 %v10406_v61, %v4392_v39  ;;  %v4445_v11 = vmul.f32 %v4388_v48, %v10200_v1  ;;  %v7850_v4 = vpop.eup %7849  ;;  %v7041_v62 = vor.u32 %v7536_v37, %v7038_v47  ;;  %v7037_v39 = vor.u32 %v7539_v59, %v7036_v3  ;;  %v6798_v45 = vld [vmem:[#allocation9 + $0x58] sm:$0xf0]  ;;  %v7485_v48 = vld [vmem:[#allocation9 + $0x84] sm:$0xf0]  ;;  %v7518_v33 = vld [vmem:[#allocation9 + $0x194] sm:$0xf] }
 0x7d0   :  { %v4448_v1 = vmul.f32 %v7850_v4, %v4365_v26  ;;  %5178 = vmatpush.bf16.msra.mxu0 %v6893_v10  ;;  %5221 = vmatpush.bf16.msra.mxu3 %v7065_v63  ;;  %v6801_v13 = vor.u32 %v7476_v0, %v6798_v45  ;;  %v6990_v25 = vld [vmem:[#allocation9 + $0x1d8] sm:$0xf0]  ;;  %v7533_v4 = vld [vmem:[#allocation9 + $0x204] sm:$0xf0]  ;;  %v7470_v26 = vld [vmem:[#allocation9 + $0x14] sm:$0xf] }
 0x7d1   :  { %v10443_v40 = vadd.f32 %v4447_v60, %v4445_v11  ;;  %v4394_v35 = vadd.f32 %v10406_v61, %v4393_v21  ;;  %v6845_v60 = vor.u32 %v7491_v52, %v6844_v23  ;;  %v6821_v11 = vor.u32 %v7485_v48, %v6820_v50  ;;  %v6796_v63 = vld [vmem:[#allocation9 + $0x40] sm:$0xf]  ;;  %v6966_v51 = vld [vmem:[#allocation9 + $0x1a8] sm:$0xf0]  ;;  %v7527_v20 = vld [vmem:[#allocation9 + $0x1d4] sm:$0xf0] }
 0x7d2   :  { %5193 = vmatpush.bf16.msra.mxu1 %v7061_v28  ;;  %v6993_v14 = vor.u32 %v7524_v15, %v6990_v25  ;;  %v7013_v6 = vor.u32 %v7533_v4, %v7012_v46  ;;  %v6988_v19 = vld [vmem:[#allocation9 + $0x1c0] sm:$0xf]  ;;  %v11983_v18 = vld [vmem:[#allocation187_spill] sm:$0xff]  ;;  %v11984_v37 = vld [vmem:[#allocation209_spill] sm:$0xff]  ;;  %vm5347_vm9 = vcmask 64512  }
 0x7d3   :  { %4460 = vst [vmem:[%s10717_s14] sm:$0xff] %v10443_v40  ;;  %v4398_v7 = vsel %vm4397_vm12, %v10406_v61, %v4394_v35  ;;  %v6822_v61 = vld [vmem:[#allocation9 + $0x88] sm:$0xf0]  ;;  %v6772_v47 = vld [vmem:[#allocation9 + $0x10] sm:$0xf]  ;;  %v6989_v41 = vor.u32 %v7527_v20, %v6988_v19  ;;  %v7521_v28 = vld [vmem:[#allocation9 + $0x1a4] sm:$0xf0] }
 0x7d4   :  { %v4403_v31 = vsel %vm4400_vm13, %v4402_v54, %v4398_v7  ;;  %5179 = vmatpush.bf16.msra.mxu0 %v6869_v5  ;;  %v6825_v27 = vor.u32 %v7482_v58, %v6822_v61  ;;  %5222 = vmatpush.bf16.msra.mxu3 %v7041_v62  ;;  %v6774_v35 = vld [vmem:[#allocation9 + $0x28] sm:$0xf0]  ;;  %v6797_v54 = vor.u32 %v7479_v29, %v6796_v63  ;;  %v6964_v58 = vld [vmem:[#allocation9 + $0x190] sm:$0xf] }
 0x7d5   :  { %v4446_v56 = vmul.f32 %v4403_v31, %v10203_v32  ;;  %v7017_v32 = vor.u32 %v7530_v2, %v7014_v9  ;;  %v6969_v7 = vor.u32 %v7518_v33, %v6966_v51  ;;  %v757_v31 = vadd.f32 %v11984_v37, %v11983_v18 }
 0x7d6   :  { %5209 = vmatpush.bf16.msra.mxu2 %v6825_v27  ;;  %5194 = vmatpush.bf16.msra.mxu1 %v7037_v39  ;;  %v6965_v27 = vor.u32 %v7521_v28, %v6964_v58 }
 0x7d7   :  { %v10454_v38 = vadd.f32 %v4448_v1, %v4446_v56  ;;  %v6777_v1 = vor.u32 %v7470_v26, %v6774_v35  ;;  %v7473_v56 = vld [vmem:[#allocation9 + $0x24] sm:$0xf0] }
 0x7d8   :  { %v4278_v43 = vpop.f32.mrf.mxu0  ;;  %5180 = vmatpush.bf16.msra.mxu0 %v6845_v60  ;;  %5223 = vmatpush.bf16.msra.mxu3 %v7017_v32  ;;  %v6773_v57 = vor.u32 %v7473_v56, %v6772_v47 }
 0x7d9   :  { %4461 = vst [vmem:[%s10717_s14 + $0x8] sm:$0xff] %v10454_v38 }
 0x7da   :  { %5210 = vmatpush.bf16.msra.mxu2 %v6801_v13  ;;  %5195 = vmatpush.bf16.msra.mxu1 %v7013_v6 }
 0x7dc   :  { %5181 = vmatpush.bf16.msra.mxu0 %v6821_v11  ;;  %5224 = vmatpush.bf16.msra.mxu3 %v6993_v14 }
 0x7de   :  { %v4291_v17 = vpop.f32.mrf.mxu1  ;;  %v4304_v42 = vpop.f32.mrf.mxu2  ;;  %5211 = vmatpush.bf16.msra.mxu2 %v6777_v1  ;;  %5196 = vmatpush.bf16.msra.mxu1 %v6989_v41 }
 0x7df   :  { %v4292_v21 = vadd.f32 %v4291_v17, %v4278_v43  ;;  %v10474_v17 = vld [vmem:[%s10711_s8] sm:$0x3f] }
 0x7e0   :  { %v4280_v22 = vpop.f32.mrf.mxu0  ;;  %5182 = vmatpush.bf16.msra.mxu0 %v6797_v54  ;;  %5225 = vmatpush.bf16.msra.mxu3 %v6969_v7  ;;  %v4562_v48 = vperm.slane %v10474_v17, 0  ;;  %v4563_v6 = vperm.slane %v10474_v17, 1  ;;  %v4564_v58 = vperm.slane %v10474_v17, 2 }
 0x7e1   :  { %v4327_v10 = vadd.f32 %v4292_v21, %v728_v44  ;;  %5212 = vmatmul.bf16.vlgmr.msra.gmra.mxu2 %v10317_v49 }
 0x7e2   :  { %5197 = vmatpush.bf16.msra.mxu1 %v6965_v27  ;;  %v4565_v27 = vperm.slane %v10474_v17, 3 }
 0x7e3   :  { %v6744_v36 = vmul.f32 -1.442695, %v4327_v10  ;;  %5226 = vmatmul.bf16.vlgmr.msra.gmra.mxu3 %v10327_v53 }
 0x7e4   :  { %v4317_v24 = vpop.f32.mrf.mxu3  ;;  %5183 = vmatpush.bf16.msra.mxu0 %v6773_v57 }
 0x7e5   :  { %7851 = vpow2.f32 %v6744_v36  ;;  %v4318_v5 = vadd.f32 %v4317_v24, %v4304_v42  ;;  %5198 = vmatmul.bf16.vlgmr.msra.gmra.mxu1 %v10327_v53 }
 0x7e6   :  { %v4293_v43 = vpop.f32.mrf.mxu1  ;;  %v4306_v62 = vpop.f32.mrf.mxu2 }
 0x7e7   :  { %v4328_v61 = vadd.f32 %v4318_v5, %v757_v31  ;;  %5184 = vmatmul.bf16.vlgmr.msra.gmra.mxu0 %v10317_v49 }
 0x7e9   :  { %v6745_v23 = vmul.f32 -1.442695, %v4328_v61 }
 0x7eb   :  { %v7852_v52 = vpop.eup %7851  ;;  %7853 = vpow2.f32 %v6745_v23 }
 0x7ec   :  { %v4413_v2 = vadd.f32 1.0, %v7852_v52  ;;  %v4319_v60 = vpop.f32.mrf.mxu3 }
 0x7ed   :  { %v10509_v60 = vld [vmem:[%s10713_s10 + $0x38] sm:$0xff] }
 0x7ee   :  { %7855 = vrcp.f32 %v4413_v2  ;;  %v4426_v45 = vand.u32 2147483648, %v4413_v2  ;;  %v4424_v42 = vand.u32 2147483647, %v4413_v2  ;;  %vm4420_vm0 = vweird.f32 %v4413_v2 }
 0x7f0   :  { %v4427_v16 = vor.u32 1.1754944e-38, %v4426_v45  ;;  %vm4425_vm2 = vcmp.eq.f32.partialorder %v4424_v42, 8.507059e+37  ;;  %v10527_v42 = vld [vmem:[%s10713_s10 + $0x28] sm:$0xff] }
 0x7f1   :  { %v7854_v9 = vpop.eup %7853 }
 0x7f2   :  { %v4414_v32 = vadd.f32 1.0, %v7854_v9 }
 0x7f4   :  { %v7856_v3 = vpop.eup %7855  ;;  %7857 = vrcp.f32 %v4414_v32  ;;  %v4439_v25 = vand.u32 2147483647, %v4414_v32  ;;  %v4441_v22 = vand.u32 2147483648, %v4414_v32  ;;  %vm4435_vm4 = vweird.f32 %v4414_v32 }
 0x7f5   :  { %v4416_v59 = vmul.f32 %v7856_v3, %v4413_v2  ;;  %7859 = vtanh.f32 %v10443_v40  ;;  %vm4421_vm14 = vweird.f32 %v7856_v3 }
 0x7f6   :  { %vm4422_vm1 = vmor %vm4420_vm0, %vm4421_vm14  ;;  %7861 = vtanh.f32 %v10454_v38  ;;  %v4442_v1 = vor.u32 1.1754944e-38, %v4441_v22  ;;  %vm4440_vm6 = vcmp.eq.f32.partialorder %v4439_v25, 8.507059e+37  ;;  %v10575_v25 = vld [vmem:[%s10713_s10 + $0x8] sm:$0xff] }
 0x7f7   :  { %v4417_v0 = vsub.f32 1.0, %v4416_v59 }
 0x7f8   :  { %v10468_v39 = vpop.f32.mrf.mxu0 }
 0x7f9   :  { %v4418_v49 = vmul.f32 %v7856_v3, %v4417_v0  ;;  %v5074_v52 = vadd.f32 %v10468_v39, %v4562_v48  ;;  %v10521_v0 = vld [vmem:[%s10713_s10 + $0x78] sm:$0xff] }
 0x7fa   :  { %v7858_v53 = vpop.eup %7857 }
 0x7fb   :  { %v4419_v13 = vadd.f32 %v7856_v3, %v4418_v49  ;;  %v4431_v50 = vmul.f32 %v7858_v53, %v4414_v32  ;;  %v7860_v21 = vpop.eup %7859  ;;  %vm4436_vm3 = vweird.f32 %v7858_v53 }
 0x7fc   :  { %vm4437_vm5 = vmor %vm4435_vm4, %vm4436_vm3  ;;  %v7862_v36 = vpop.eup %7861 }
 0x7fd   :  { %v4423_v40 = vsel %vm4422_vm1, %v7856_v3, %v4419_v13  ;;  %v4432_v44 = vsub.f32 1.0, %v4431_v50  ;;  %v10515_v3 = vld [vmem:[%s10713_s10 + $0x30] sm:$0xff]  ;;  %v10539_v50 = vld [vmem:[%s10713_s10 + $0x20] sm:$0xff] }
 0x7fe   :  { %v5087_v15 = vpop.f32.mrf.mxu1  ;;  %v10477_v30 = vpop.f32.mrf.mxu2  ;;  %v4428_v11 = vsel %vm4425_vm2, %v4427_v16, %v4423_v40  ;;  %v10533_v13 = vld [vmem:[%s10713_s10 + $0x70] sm:$0xff]  ;;  %v10551_v16 = vld [vmem:[%s10713_s10 + $0x18] sm:$0xff] }
 0x7ff   :  { %v4433_v46 = vmul.f32 %v7858_v53, %v4432_v44  ;;  %v4453_v26 = vmul.f32 %v7860_v21, %v4428_v11  ;;  %v5102_v39 = vadd.f32 %v10477_v30, %v4563_v6  ;;  %v10557_v30 = vld [vmem:[%s10713_s10 + $0x60] sm:$0xff]  ;;  %v10563_v40 = vld [vmem:[%s10713_s10 + $0x10] sm:$0xff]  ;;  %v10569_v21 = vld [vmem:[%s10713_s10 + $0x58] sm:$0xff] }
 0x800   :  { %v5075_v14 = vpop.f32.mrf.mxu0 }
 0x801   :  { %v5076_v4 = vadd.f32 %v5075_v14, %v4562_v48  ;;  %v4434_v10 = vadd.f32 %v7858_v53, %v4433_v46  ;;  %4458 = vst [vmem:[%s10716_s13] sm:$0xff] %v4453_v26  ;;  %v5398_v35 = vpack.c.bf16 %v4453_v26, %v4453_v26  ;;  %v10581_v14 = vld [vmem:[%s10713_s10 + $0x50] sm:$0xff]  ;;  %v10587_v26 = vld [vmem:[%s10713_s10] sm:$0xff] }
 0x803   :  { %v4438_v63 = vsel %vm4437_vm5, %v7858_v53, %v4434_v10  ;;  %v5554_v33 = vunpack.c.l.b16 %v5398_v35 }
 0x804   :  { %v5115_v38 = vpop.f32.mrf.mxu3  ;;  %v4443_v54 = vsel %vm4440_vm6, %v4442_v1, %v4438_v63  ;;  %v10600_v63 = vld [vmem:[%s10713_s10 + $0x40] sm:$0xff] }
 0x805   :  { %v5574_v19 = vrot.slane %v5554_v33, 1  ;;  %v4454_v20 = vmul.f32 %v7862_v36, %v4443_v54  ;;  %v5831_v18 = vrot.slane %v5554_v33, 2  ;;  %v5116_v53 = vadd.f32 %v5115_v38, %v5102_v39  ;;  %v7573_v39 = vld [vmem:[%s10712_s9 + $0x48] sm:$0xff] }
 0x806   :  { %v5089_v29 = vpop.f32.mrf.mxu1  ;;  %v5103_v51 = vpop.f32.mrf.mxu2  ;;  %v4566_v33 = vperm.slane %v10474_v17, 4  ;;  %v4567_v36 = vperm.slane %v10474_v17, 5  ;;  %v10613_v17 = vld [vmem:[%s10712_s9 + $0x78] sm:$0xff] }
 0x807   :  { %v10484_v24 = vadd.f32 %v5089_v29, %v5076_v4  ;;  %v5104_v7 = vadd.f32 %v5103_v51, %v4563_v6  ;;  %v10487_v37 = vsel %vm5575_vm7, %v5574_v19, %v10220_v8  ;;  %4459 = vst [vmem:[%s10716_s13 + $0x8] sm:$0xff] %v4454_v20  ;;  %v5399_v31 = vpack.c.bf16 %v4454_v20, %v4454_v20  ;;  %v10593_v6 = vld [vmem:[%s10713_s10 + $0x48] sm:$0xff] }
 0x808   :  { %v10493_v5 = vsel %vm5575_vm7, %v5831_v18, %v10224_v55  ;;  %v5314_v48 = vpack.c.bf16 %v5116_v53, %v5116_v53 }
 0x809   :  { %v5555_v47 = vunpack.c.l.b16 %v5399_v31 }
 0x80b   :  { %v5589_v62 = vrot.slane %v5555_v47, 1  ;;  %v5845_v41 = vrot.slane %v5555_v47, 2 }
 0x80c   :  { %v5117_v56 = vpop.f32.mrf.mxu3 }
 0x80d   :  { %v10495_v43 = vadd.f32 %v5117_v56, %v5104_v7  ;;  %v10498_v57 = vsel %vm5575_vm7, %v5589_v62, %v10237_v12  ;;  %v10501_v8 = vsel %vm5575_vm7, %v5845_v41, %v10241_v34  ;;  %v5088_v34 = vadd.f32 %v5087_v15, %v5074_v52  ;;  %v10545_v15 = vld [vmem:[%s10713_s10 + $0x68] sm:$0xff]  ;;  %v10608_v62 = vld [vmem:[%s10712_s9 + $0x38] sm:$0xff]  ;;  %v7568_v52 = vld [vmem:[%s10712_s9 + $0x20] sm:$0xff] }
 0x80f   :  { %v5313_v49 = vpack.c.bf16 %v5088_v34, %v5088_v34  ;;  %v7566_v34 = vld [vmem:[%s10712_s9 + $0x10] sm:$0xff] }
 0x818   :  { %v5129_v28 = vpop.f32.mrf.mxu0 }
 0x819   :  { %v5130_v61 = vadd.f32 %v5129_v28, %v4564_v58 }
 0x81e   :  { %v5143_v55 = vpop.f32.mrf.mxu1  ;;  %v5157_v2 = vpop.f32.mrf.mxu2 }
 0x81f   :  { %v5144_v23 = vadd.f32 %v5143_v55, %v5130_v61  ;;  %v5158_v9 = vadd.f32 %v5157_v2, %v4565_v27  ;;  %v7570_v61 = vld [vmem:[%s10712_s9 + $0x30] sm:$0xff]  ;;  %v7569_v55 = vld [vmem:[%s10712_s9 + $0x28] sm:$0xff]  ;;  %v7576_v2 = vld [vmem:[%s10712_s9 + $0x60] sm:$0xff] }
 0x820   :  { %v5131_v44 = vpop.f32.mrf.mxu0 }
 0x821   :  { %v5315_v12 = vpack.c.bf16 %v5144_v23, %v5144_v23  ;;  %v5132_v22 = vadd.f32 %v5131_v44, %v4564_v58  ;;  %v7577_v23 = vld [vmem:[%s10712_s9 + $0x68] sm:$0xff] }
 0x823   :  { %5326 = vmatpush.bf16.xpose.msrb.mxu0 %v5315_v12  ;;  %v7567_v12 = vld [vmem:[%s10712_s9 + $0x18] sm:$0xff] }
 0x824   :  { %v5171_v32 = vpop.f32.mrf.mxu3 }
 0x825   :  { %v5172_v59 = vadd.f32 %v5171_v32, %v5158_v9  ;;  %v7575_v9 = vld [vmem:[%s10712_s9 + $0x58] sm:$0xff]  ;;  %v7574_v32 = vld [vmem:[%s10712_s9 + $0x50] sm:$0xff] }
 0x826   :  { %v5145_v11 = vpop.f32.mrf.mxu1  ;;  %v5159_v4 = vpop.f32.mrf.mxu2 }
 0x827   :  { %v5316_v45 = vpack.c.bf16 %v5172_v59, %v5172_v59  ;;  %v5146_v46 = vadd.f32 %v5145_v11, %v5132_v22  ;;  %v5160_v1 = vadd.f32 %v5159_v4, %v4565_v27  ;;  %v7578_v27 = vld [vmem:[%s10712_s9 + $0x70] sm:$0xff]  ;;  %v7565_v59 = vld [vmem:[%s10712_s9 + $0x8] sm:$0xff] }
 0x829   :  { %5339 = vmatpush.bf16.xpose.msrb.mxu1 %v5316_v45  ;;  %v5724_v35 = vpack.c.bf16 %v5146_v46, %v5146_v46  ;;  %v7564_v45 = vld [vmem:[%s10712_s9] sm:$0xff] }
 0x82a   :  { %5327 = vmatmul.bf16.vlgmr.msrb.gmra.mxu0 %v5313_v49  ;;  %v7572_v49 = vld [vmem:[%s10712_s9 + $0x40] sm:$0xff] }
 0x82b   :  { %5498 = vmatpush.bf16.msra.mxu0 %v10509_v60 }
 0x82c   :  { %v5173_v10 = vpop.f32.mrf.mxu3 }
 0x82d   :  { %v5174_v38 = vadd.f32 %v5173_v10, %v5160_v1 }
 0x82f   :  { %5499 = vmatpush.bf16.msra.mxu0 %v10515_v3  ;;  %v5725_v29 = vpack.c.bf16 %v5174_v38, %v5174_v38 }
 0x830   :  { %5340 = vmatmul.bf16.vlgmr.msrb.gmra.mxu1 %v5314_v48 }
 0x831   :  { %5511 = vmatpush.bf16.msra.mxu1 %v10521_v0 }
 0x833   :  { %5500 = vmatpush.bf16.msra.mxu0 %v10527_v42 }
 0x835   :  { %5512 = vmatpush.bf16.msra.mxu1 %v10533_v13 }
 0x837   :  { %5501 = vmatpush.bf16.msra.mxu0 %v10539_v50 }
 0x839   :  { %5513 = vmatpush.bf16.msra.mxu1 %v10545_v15 }
 0x83b   :  { %5502 = vmatpush.bf16.msra.mxu0 %v10551_v16 }
 0x83d   :  { %5514 = vmatpush.bf16.msra.mxu1 %v10557_v30 }
 0x83f   :  { %5503 = vmatpush.bf16.msra.mxu0 %v10563_v40 }
 0x841   :  { %5515 = vmatpush.bf16.msra.mxu1 %v10569_v21 }
 0x843   :  { %5504 = vmatpush.bf16.msra.mxu0 %v10575_v25 }
 0x845   :  { %5516 = vmatpush.bf16.msra.mxu1 %v10581_v14 }
 0x847   :  { %5505 = vmatpush.bf16.msra.mxu0 %v10587_v26 }
 0x849   :  { %5517 = vmatpush.bf16.msra.mxu1 %v10593_v6 }
 0x84b   :  { %5735 = vmatpush.bf16.xpose.msrb.mxu0 %v5724_v35 }
 0x84d   :  { %5518 = vmatpush.bf16.msra.mxu1 %v10600_v63 }
 0x851   :  { %5748 = vmatpush.bf16.xpose.msrb.mxu1 %v5725_v29 }
 0x862   :  { %v5199_v20 = vpop.f32.mrf.mxu1 }
 0x864   :  { %v5185_v54 = vpop.f32.mrf.mxu0  ;;  %v5213_v7 = vpop.f32.mrf.mxu2 }
 0x865   :  { %v5186_v51 = vadd.f32 %v5185_v54, %v4566_v33  ;;  %v5214_v19 = vadd.f32 %v5213_v7, %v4567_v36 }
 0x866   :  { %v5227_v31 = vpop.f32.mrf.mxu3 }
 0x867   :  { %v5200_v18 = vadd.f32 %v5199_v20, %v5186_v51  ;;  %v5228_v47 = vadd.f32 %v5227_v31, %v5214_v19  ;;  %v5592_v31 = vpack.c.b16 %v10498_v57, %v10498_v57 }
 0x869   :  { %v5317_v56 = vpack.c.bf16 %v5200_v18, %v5200_v18  ;;  %v5318_v41 = vpack.c.bf16 %v5228_v47, %v5228_v47 }
 0x86a   :  { %v5201_v48 = vpop.f32.mrf.mxu1 }
 0x86b   :  { %v5353_v58 = vsel %vm5351_vm8, %v5317_v56, 0  ;;  %v5356_v28 = vsel %vm5351_vm8, %v5318_v41, 0 }
 0x86c   :  { %5365 = vmatpush.bf16.msrb.mxu2 %v5353_v58  ;;  %5378 = vmatpush.bf16.msrb.mxu3 %v5356_v28  ;;  %v5187_v53 = vpop.f32.mrf.mxu0  ;;  %v5215_v44 = vpop.f32.mrf.mxu2 }
 0x86d   :  { %v5188_v22 = vadd.f32 %v5187_v53, %v4566_v33  ;;  %v5216_v46 = vadd.f32 %v5215_v44, %v4567_v36  ;;  %v5591_v36 = vpack.c.b16 %v10487_v37, %v10487_v37 }
 0x86e   :  { %v5229_v4 = vpop.f32.mrf.mxu3 }
 0x86f   :  { %v5202_v10 = vadd.f32 %v5201_v48, %v5188_v22  ;;  %v5230_v35 = vadd.f32 %v5229_v4, %v5216_v46 }
 0x870   :  { %5691 = vmatpush.bf16.msra.mxu2 %v10608_v62  ;;  %5704 = vmatpush.bf16.msra.mxu3 %v10613_v17 }
 0x871   :  { %v5726_v54 = vpack.c.bf16 %v5202_v10, %v5202_v10  ;;  %v5727_v51 = vpack.c.bf16 %v5230_v35, %v5230_v35 }
 0x873   :  { %v5760_v20 = vsel %vm5351_vm8, %v5726_v54, 0  ;;  %v5763_v18 = vsel %vm5351_vm8, %v5727_v51, 0 }
 0x874   :  { %5692 = vmatpush.bf16.msra.mxu2 %v7570_v61  ;;  %5705 = vmatpush.bf16.msra.mxu3 %v7578_v27 }
 0x878   :  { %5693 = vmatpush.bf16.msra.mxu2 %v7569_v55  ;;  %5706 = vmatpush.bf16.msra.mxu3 %v7577_v23 }
 0x87c   :  { %5694 = vmatpush.bf16.msra.mxu2 %v7568_v52  ;;  %5707 = vmatpush.bf16.msra.mxu3 %v7576_v2 }
 0x880   :  { %5695 = vmatpush.bf16.msra.mxu2 %v7567_v12  ;;  %5708 = vmatpush.bf16.msra.mxu3 %v7575_v9 }
 0x884   :  { %5696 = vmatpush.bf16.msra.mxu2 %v7566_v34  ;;  %5709 = vmatpush.bf16.msra.mxu3 %v7574_v32 }
 0x888   :  { %5697 = vmatpush.bf16.msra.mxu2 %v7565_v59  ;;  %5710 = vmatpush.bf16.msra.mxu3 %v7573_v39 }
 0x88c   :  { %5698 = vmatpush.bf16.msra.mxu2 %v7564_v45  ;;  %5711 = vmatpush.bf16.msra.mxu3 %v7572_v49 }
 0x8a7   :  { %v5328_v11 = vpop.f32.mrf.mxu0 }
 0x8ad   :  { %v5341_v1 = vpop.f32.mrf.mxu1 }
 0x8ae   :  { %v5342_v38 = vadd.f32 %v5341_v1, %v5328_v11 }
 0x8af   :  { %v5330_v29 = vpop.f32.mrf.mxu0 }
 0x8b0   :  { %v5345_v7 = vmul.f32 0.0625, %v5342_v38 }
 0x8b2   :  { %v5346_v19 = vpack.c.bf16 %v5345_v7, %v5345_v7 }
 0x8b4   :  { %7138 = vmatmul.msk.bf16.vlgmr.msrb.gmra.mxu2 %vm5347_vm9, %v5346_v19  ;;  %7139 = vmatmul.msk.bf16.vlgmr.msrb.gmra.mxu3 %vm5347_vm9, %v5346_v19 }
 0x8b5   :  { %5772 = vmatpush.bf16.msrb.mxu2 %v5760_v20  ;;  %5785 = vmatpush.bf16.msrb.mxu3 %v5763_v18  ;;  %v5343_v33 = vpop.f32.mrf.mxu1 }
 0x8c4   :  { %5699 = vmatmul.bf16.vlgmr.msra.gmra.mxu2 %v5591_v36  ;;  %5712 = vmatmul.bf16.vlgmr.msra.gmra.mxu3 %v5592_v31 }
 0x8c5   :  { %5851 = vmatpush.bf16.msra.mxu2 %v10608_v62  ;;  %5864 = vmatpush.bf16.msra.mxu3 %v10613_v17 }
 0x8c9   :  { %5852 = vmatpush.bf16.msra.mxu2 %v7570_v61  ;;  %5865 = vmatpush.bf16.msra.mxu3 %v7578_v27  ;;  %v5847_v27 = vpack.c.b16 %v10493_v5, %v10493_v5 }
 0x8cd   :  { %5853 = vmatpush.bf16.msra.mxu2 %v7569_v55  ;;  %5866 = vmatpush.bf16.msra.mxu3 %v7577_v23  ;;  %v5848_v55 = vpack.c.b16 %v10501_v8, %v10501_v8 }
 0x8d1   :  { %5854 = vmatpush.bf16.msra.mxu2 %v7568_v52  ;;  %5867 = vmatpush.bf16.msra.mxu3 %v7576_v2 }
 0x8d5   :  { %5855 = vmatpush.bf16.msra.mxu2 %v7567_v12  ;;  %5868 = vmatpush.bf16.msra.mxu3 %v7575_v9 }
 0x8d9   :  { %5856 = vmatpush.bf16.msra.mxu2 %v7566_v34  ;;  %5869 = vmatpush.bf16.msra.mxu3 %v7574_v32 }
 0x8dd   :  { %5857 = vmatpush.bf16.msra.mxu2 %v7565_v59  ;;  %5870 = vmatpush.bf16.msra.mxu3 %v7573_v39 }
 0x8e1   :  { %5858 = vmatpush.bf16.msra.mxu2 %v7564_v45  ;;  %5871 = vmatpush.bf16.msra.mxu3 %v7572_v49 }
 0x937   :  { %v5367_v37 = vpop.f32.mrf.mxu2  ;;  %v5380_v57 = vpop.f32.mrf.mxu3 }
 0x938   :  { %v5400_v47 = vpack.c.bf16 %v5367_v37, %v5367_v37  ;;  %v5401_v56 = vpack.c.bf16 %v5380_v57, %v5380_v57 }
 0x93a   :  { %5506 = vmatmul.bf16.vlgmr.msra.gmra.mxu0 %v5400_v47  ;;  %5519 = vmatmul.bf16.vlgmr.msra.gmra.mxu1 %v5401_v56 }
 0x93b   :  { %5793 = vmatpush.bf16.msra.mxu0 %v10509_v60  ;;  %5806 = vmatpush.bf16.msra.mxu1 %v10521_v0  ;;  %v5722_v60 = vpack.c.bf16 %v10484_v24, %v10484_v24  ;;  %v5723_v0 = vpack.c.bf16 %v10495_v43, %v10495_v43 }
 0x93f   :  { %v5369_v62 = vpop.f32.mrf.mxu2  ;;  %v5382_v41 = vpop.f32.mrf.mxu3  ;;  %5794 = vmatpush.bf16.msra.mxu0 %v10515_v3  ;;  %5807 = vmatpush.bf16.msra.mxu1 %v10533_v13 }
 0x943   :  { %5795 = vmatpush.bf16.msra.mxu0 %v10527_v42  ;;  %5808 = vmatpush.bf16.msra.mxu1 %v10545_v15  ;;  %v7606_v15 = vld [vmem:[%s10714_s11] ss:$0 sm:$0xff]  ;;  %s7972_s11 = smov [#allocation10]  }
 0x944   :  { %s5883_s2 = sshll.u32 %s7972_s11, 4  ;;  %s5884_s2 = int_to_ptr.vmem [resolvable:$true] %s5883_s2 }
 0x947   :  { %v5700_v17 = vpop.f32.mrf.mxu2  ;;  %v5713_v58 = vpop.f32.mrf.mxu3  ;;  %5796 = vmatpush.bf16.msra.mxu0 %v10539_v50  ;;  %5809 = vmatpush.bf16.msra.mxu1 %v10557_v30 }
 0x94a   :  { %5736 = vmatmul.bf16.vlgmr.msrb.gmra.mxu0 %v5722_v60  ;;  %5749 = vmatmul.bf16.vlgmr.msrb.gmra.mxu1 %v5723_v0 }
 0x94b   :  { %5797 = vmatpush.bf16.msra.mxu0 %v10551_v16  ;;  %5810 = vmatpush.bf16.msra.mxu1 %v10569_v21 }
 0x94f   :  { %v5702_v3 = vpop.f32.mrf.mxu2  ;;  %v5715_v42 = vpop.f32.mrf.mxu3  ;;  %5798 = vmatpush.bf16.msra.mxu0 %v10563_v40  ;;  %5811 = vmatpush.bf16.msra.mxu1 %v10581_v14 }
 0x953   :  { %5799 = vmatpush.bf16.msra.mxu0 %v10575_v25  ;;  %5812 = vmatpush.bf16.msra.mxu1 %v10593_v6 }
 0x957   :  { %5800 = vmatpush.bf16.msra.mxu0 %v10587_v26  ;;  %5813 = vmatpush.bf16.msra.mxu1 %v10600_v63 }
 0x9b7   :  { %v5507_v24 = vpop.f32.mrf.mxu0  ;;  %v5520_v43 = vpop.f32.mrf.mxu1 }
 0x9b8   :  { %v5521_v13 = vadd.f32 %v5520_v43, %v5507_v24 }
 0x9ba   :  { %v5701_v50 = vadd.f32 %v5700_v17, %v5521_v13 }
 0x9bc   :  { %v5714_v16 = vadd.f32 %v5713_v58, %v5701_v50 }
 0x9be   :  { %v5720_v30 = vadd.f32 %v7606_v15, %v5714_v16 }
 0x9bf   :  { %v5509_v40 = vpop.f32.mrf.mxu0  ;;  %v5522_v21 = vpop.f32.mrf.mxu1 }
 0x9c0   :  { %5721 = vst [vmem:[#allocation10] sm:$0xff] %v5720_v30 }
 0x9c7   :  { %v5737_v25 = vpop.f32.mrf.mxu0  ;;  %v5750_v14 = vpop.f32.mrf.mxu1 }
 0x9c8   :  { %v5751_v6 = vadd.f32 %v5750_v14, %v5737_v25 }
 0x9ca   :  { %v5754_v28 = vmul.f32 0.0625, %v5751_v6 }
 0x9cc   :  { %v5755_v26 = vpack.c.bf16 %v5754_v28, %v5754_v28 }
 0x9ce   :  { %7268 = vmatmul.msk.bf16.vlgmr.msrb.gmra.mxu2 %vm5347_vm9, %v5755_v26  ;;  %7269 = vmatmul.msk.bf16.vlgmr.msrb.gmra.mxu3 %vm5347_vm9, %v5755_v26 }
 0x9cf   :  { %v5739_v63 = vpop.f32.mrf.mxu0  ;;  %v5752_v61 = vpop.f32.mrf.mxu1 }
 0x9de   :  { %5859 = vmatmul.bf16.vlgmr.msra.gmra.mxu2 %v5847_v27  ;;  %5872 = vmatmul.bf16.vlgmr.msra.gmra.mxu3 %v5848_v55 }
 0xa51   :  { %v5774_v23 = vpop.f32.mrf.mxu2  ;;  %v5787_v52 = vpop.f32.mrf.mxu3 }
 0xa52   :  { %v5791_v2 = vpack.c.bf16 %v5774_v23, %v5774_v23  ;;  %v5792_v12 = vpack.c.bf16 %v5787_v52, %v5787_v52 }
 0xa54   :  { %5801 = vmatmul.bf16.vlgmr.msra.gmra.mxu0 %v5791_v2  ;;  %5814 = vmatmul.bf16.vlgmr.msra.gmra.mxu1 %v5792_v12 }
 0xa59   :  { %v5776_v9 = vpop.f32.mrf.mxu2  ;;  %v5789_v34 = vpop.f32.mrf.mxu3 }
 0xa61   :  { %v5860_v32 = vpop.f32.mrf.mxu2  ;;  %v5873_v59 = vpop.f32.mrf.mxu3 }
 0xa69   :  { %v5862_v39 = vpop.f32.mrf.mxu2  ;;  %v5875_v45 = vpop.f32.mrf.mxu3 }
 0xad1   :  { %v5802_v49 = vpop.f32.mrf.mxu0  ;;  %v5815_v53 = vpop.f32.mrf.mxu1 }
 0xad2   :  { %v5816_v5 = vadd.f32 %v5815_v53, %v5802_v49 }
 0xad4   :  { %v5861_v48 = vadd.f32 %v5860_v32, %v5816_v5 }
 0xad6   :  { %v5874_v8 = vadd.f32 %v5873_v59, %v5861_v48 }
 0xad8   :  { %v5877_v44 = vadd.f32 %v7606_v15, %v5874_v8 }
 0xad9   :  { %v5804_v11 = vpop.f32.mrf.mxu0  ;;  %v5817_v22 = vpop.f32.mrf.mxu1 }
 0xada   :  { %5878 = vst [vmem:[#allocation10 + $0x8] sm:$0xff] %v5877_v44 }
 0xadb   :  { %5891 = dma.vmem_to_hbm [thread:$0]  %s5884_s2, 256, %s5886_s29, [#allocation6], %s7973_s30, %s7973_s30, %s7974_s3  }
 0xadc   :  { %7963 = dma.done.wait [#allocation6], 256  }
 0xadd   :  { %7964 = vsyncadd [#allocation6], 4294967040 }
 0xade   :  { %5904 = vsyncpa [#allocation5], 1 }
 0xadf   :  { %5905 = vsyncpa [#allocation8], 1 }
 0xae0   :  { %5906 = vsyncpa [#allocation6], 1 }

</bundles_post_ra>
